<compile_context>
chip_gen: v7x
topology: tpu7x:2x2x1
jax: 0.10.0
libtpu: 0.0.40
codegen_flags: <defaults>
</compile_context>

<pallas_src>
import functools

import jax
import jax.numpy as jnp
from jax.experimental import pallas as pl
from jax.experimental.pallas import tpu as pltpu

_BN_EPS = 1e-5


def _pointnet_kernel(
    # ---- inputs -------------------------------------------------------
    x_ref,                                    # (B, TN, 6) bf16
    # TNet
    tw1, tb1, tw2, tb2, tw3, tb3,
    tfw1, tfb1, tfw2, tfb2, tfw3, tfb3,
    # feature extractor: (conv weight, conv bias, bn gamma, bn beta) x 3
    fw1, fb1, fg1, fbt1,
    fw2, fb2, fg2, fbt2,
    fw3, fb3, fg3, fbt3,
    # classifier head
    cw1, cb1, cw2, cb2, cw3, cb3,
    # ---- output -------------------------------------------------------
    out_ref,                                  # (B, 2) f32
    # ---- scratch ------------------------------------------------------
    tnet_pool,                                # (B, 1024) f32  TNet max-pool accumulator
    dcorr,                                    # (3, B, 64) f32 per-cloud conv1 correction rows
    h3max,                                    # (B, 1024) f32  conv3 pre-act per-cloud max
    h3min,                                    # (B, 1024) f32  conv3 pre-act per-cloud min
    s1, q1,                                   # (1, 64)   BN1 sum/sumsq -> scale/shift
    s2, q2,                                   # (1, 128)  BN2
    s3, q3,                                   # (1, 1024) BN3 (finalized locally in epilogue)
    *,
    num_samples,                              # static: B * N_true (BN population size)
    valid_last,                               # static: valid rows in the last point tile
):
    f32 = jnp.float32
    bf16 = jnp.bfloat16

    phase = pl.program_id(0)
    tile = pl.program_id(1)
    n_tiles = pl.num_programs(1)
    first = tile == 0
    last = tile == n_tiles - 1

    B, TN, _ = x_ref.shape
    M = B * TN
    inv_n = 1.0 / float(num_samples)
    has_tail = valid_last < TN                 # static python bool

    # Row-validity masks (only traced when the wrapper actually padded N).
    if has_tail:
        row_idx = jax.lax.broadcasted_iota(jnp.int32, (B, TN, 1), 1)
        row_limit = jnp.where(last, valid_last, TN)
        valid3 = row_idx < row_limit            # (B, TN, 1) bool
        valid2 = valid3.reshape(M, 1)
    else:
        valid3 = None
        valid2 = None

    def relu(a):
        return jnp.maximum(a, 0.0)

    def mm(a, w_ref, b_ref):
        # bf16 MXU inputs, f32 accumulation; bias stays f32.
        return jnp.dot(a.astype(bf16), w_ref[...], preferred_element_type=f32) + b_ref[...]

    def mask_zero(h2d):
        return h2d if valid2 is None else jnp.where(valid2, h2d, 0.0)

    def mask_for_max(h3d):
        return h3d if valid3 is None else jnp.where(valid3, h3d, -jnp.inf)

    def mask_for_min(h3d):
        return h3d if valid3 is None else jnp.where(valid3, h3d, jnp.inf)

    def conv1_pre():
        # Shared MXU matmul over all 6 channels + cheap per-cloud VPU correction that
        # injects the predicted 3x3 transform on the coordinate channels:
        #   h = x @ fw1 + sum_d coords[...,d] * (T[b] @ fw1[:3] - fw1[:3])[d] + bias
        x = x_ref[...]                                              # (B, TN, 6) bf16
        xf = x.reshape(M, 6)
        h = jnp.dot(xf, fw1[...].astype(bf16), preferred_element_type=f32)   # (M, 64)
        corr = x[:, :, 0:1].astype(f32) * dcorr[0][:, None, :]
        corr = corr + x[:, :, 1:2].astype(f32) * dcorr[1][:, None, :]
        corr = corr + x[:, :, 2:3].astype(f32) * dcorr[2][:, None, :]
        return h + corr.reshape(M, 64) + fb1[...]

    def bn_relu(hpre, scale_ref, shift_ref):
        return relu(hpre * scale_ref[...] + shift_ref[...])

    def accum_stats(hpre, sum_ref, ssq_ref):
        @pl.when(first)
        def _():
            sum_ref[...] = jnp.zeros_like(sum_ref)
            ssq_ref[...] = jnp.zeros_like(ssq_ref)

        hm = mask_zero(hpre)
        sum_ref[...] += jnp.sum(hm, axis=0, keepdims=True)
        ssq_ref[...] += jnp.sum(hm * hm, axis=0, keepdims=True)

    def finalize_stats(sum_ref, ssq_ref, gamma_ref, beta_ref):
        # One-pass (sum, sumsq) -> (scale, shift), stored in place on the last tile.
        @pl.when(last)
        def _():
            mu = sum_ref[...] * inv_n
            var = jnp.maximum(ssq_ref[...] * inv_n - mu * mu, 0.0)   # biased, clamped
            scale = gamma_ref[...] * jax.lax.rsqrt(var + _BN_EPS)
            sum_ref[...] = scale
            ssq_ref[...] = beta_ref[...] - scale * mu

    # ------------ phase 0: TNet stream + pool -> transform -> conv1 correction rows ----
    @pl.when(phase == 0)
    def _phase_tnet():
        @pl.when(first)
        def _():
            tnet_pool[...] = jnp.full_like(tnet_pool, -jnp.inf)
            out_ref[...] = jnp.zeros_like(out_ref)

        xf = x_ref[...].reshape(M, 6)                               # bf16
        th1 = relu(jnp.dot(xf, tw1[...], preferred_element_type=f32) + tb1[...])
        th2 = relu(mm(th1, tw2, tb2))                               # (M, 128)
        th3 = relu(mm(th2, tw3, tb3))                               # (M, 1024)
        th3 = mask_for_max(th3.reshape(B, TN, 1024))
        tnet_pool[...] = jnp.maximum(tnet_pool[...], jnp.max(th3, axis=1))

        @pl.when(last)
        def _():
            pool = tnet_pool[...]                                   # (B, 1024)
            tf1 = relu(mm(pool, tfw1, tfb1))                        # (B, 512)
            tf2 = relu(mm(tf1, tfw2, tfb2))                         # (B, 256)
            t9 = mm(tf2, tfw3, tfb3)                                # (B, 9) row-major (3,3)
            fw1f = fw1[...]                                         # (6, 64) f32
            # dcorr[d, b, :] = sum_c T[b,d,c] * fw1[c,:] - fw1[d,:]   (coords rows only)
            for d in range(3):
                g = t9[:, 3 * d:3 * d + 1] * fw1f[0:1, :]
                g = g + t9[:, 3 * d + 1:3 * d + 2] * fw1f[1:2, :]
                g = g + t9[:, 3 * d + 2:3 * d + 3] * fw1f[2:3, :]
                dcorr[d] = g - fw1f[d:d + 1, :]                     # (B, 64)

    # ------------ phase 1: BN1 statistics ----------------------------------------------
    @pl.when(phase == 1)
    def _phase_bn1():
        accum_stats(conv1_pre(), s1, q1)                            # (M, 64)
        finalize_stats(s1, q1, fg1, fbt1)

    # ------------ phase 2: BN2 statistics ----------------------------------------------
    @pl.when(phase == 2)
    def _phase_bn2():
        h1 = bn_relu(conv1_pre(), s1, q1)                           # (M, 64)
        accum_stats(mm(h1, fw2, fb2), s2, q2)                       # (M, 128)
        finalize_stats(s2, q2, fg2, fbt2)

    # ------------ phase 3: BN3 statistics + fused max-pool + classifier head -----------
    @pl.when(phase == 3)
    def _phase_bn3_head():
        @pl.when(first)
        def _():
            h3max[...] = jnp.full_like(h3max, -jnp.inf)
            h3min[...] = jnp.full_like(h3min, jnp.inf)

        h1 = bn_relu(conv1_pre(), s1, q1)
        h2 = bn_relu(mm(h1, fw2, fb2), s2, q2)                      # (M, 128)
        h3p = mm(h2, fw3, fb3)                                      # (M, 1024) pre-BN3
        accum_stats(h3p, s3, q3)
        h3b = h3p.reshape(B, TN, 1024)
        h3max[...] = jnp.maximum(h3max[...], jnp.max(mask_for_max(h3b), axis=1))
        h3min[...] = jnp.minimum(h3min[...], jnp.min(mask_for_min(h3b), axis=1))

        @pl.when(last)
        def _():
            # Finalize BN3 locally; max-pool commutes through the affine via sign-select
            # (gamma, hence scale, may be negative), then ReLU.
            mu3 = s3[...] * inv_n
            var3 = jnp.maximum(q3[...] * inv_n - mu3 * mu3, 0.0)
            sc3 = fg3[...] * jax.lax.rsqrt(var3 + _BN_EPS)
            sh3 = fbt3[...] - sc3 * mu3
            hsel = jnp.where(sc3 >= 0.0, h3max[...], h3min[...])    # (B, 1024)
            pooled = relu(sc3 * hsel + sh3)                         # (B, 1024)
            g1 = relu(mm(pooled, cw1, cb1))                         # (B, 512)
            g2 = relu(mm(g1, cw2, cb2))                             # (B, 256)
            out_ref[...] = mm(g2, cw3, cb3)                         # (B, 2)


def _const_spec(arr):
    nd = arr.ndim
    return pl.BlockSpec(arr.shape, lambda p, t, _nd=nd: (0,) * _nd)


def _vmem_limit_bytes():
    try:
        cap = int(pltpu.get_tpu_info().vmem_capacity_bytes)
    except Exception:
        cap = 64 * 1024 * 1024        # conservative: v7x physical VMEM per TensorCore
    # ~25% headroom for double buffers / compiler temporaries; never above 96 MiB.
    return min((cap // 4) * 3, 96 * 1024 * 1024)


def _choose_point_tile(n, b, vmem_bytes):
    """Pick the point-tile size TN (and padded N) from the VMEM budget.

    Peak live f32 activations in phase 3 are ~16 KB per (cloud, point) row including
    matmul/temporary copies; ~10 MiB is reserved for the resident (double-buffered)
    bf16 weights, scratch accumulators and the streamed x buffers.  Rows are capped at
    4096 (v5e/v6e with 128 MiB VMEM reach the cap; v7x's 64 MiB lands around ~2K).
    Non-divisible N is handled by zero-padding + in-kernel masking.
    Returns (tile, padded_n)."""
    bytes_per_row = 16 * 1024
    resident = 10 * 1024 * 1024
    avail = max(vmem_bytes - resident, 4 * 1024 * 1024)
    target_rows = int(max(256, min(4096, avail // bytes_per_row)))
    tn_target = max(16, target_rows // max(b, 1))
    if n <= tn_target:
        return n, n                              # single whole-axis tile, no padding
    tn = max(16, (tn_target // 16) * 16)         # multiple of 16 for bf16 sublane packing
    n_pad = ((n + tn - 1) // tn) * tn
    return tn, n_pad


def pointnet_classifier(x, params):
    """PointNetClassifier forward.  x: (B, N, 6) float32 -> logits (B, 2) float32."""
    B, N, C = x.shape
    assert C == 6, x.shape

    (tw1, tb1, tw2, tb2, tw3, tb3,
     tfw1, tfb1, tfw2, tfb2, tfw3, tfb3,
     fw1, fb1, fg1, fbt1,
     fw2, fb2, fg2, fbt2,
     fw3, fb3, fg3, fbt3,
     cw1, cb1, cw2, cb2, cw3, cb3) = params

    f32, bf16 = jnp.float32, jnp.bfloat16

    vmem_limit = _vmem_limit_bytes()
    tn, n_pad = _choose_point_tile(N, B, vmem_limit)
    n_tiles = n_pad // tn
    valid_last = N - (n_tiles - 1) * tn          # valid rows in the last point tile

    # x streams as 6-channel bf16 tiles (12 B/point); no 8-wide f32 copy is materialized.
    xb = x.astype(bf16)
    if n_pad > N:
        xb = jnp.concatenate([xb, jnp.zeros((B, n_pad - N, 6), bf16)], axis=1)

    def _bf(w):  # matmul weights in bf16 (f32 accumulation in-kernel)
        return w.astype(bf16)

    inputs = [
        xb,
        _bf(tw1), tb1.astype(f32), _bf(tw2), tb2.astype(f32), _bf(tw3), tb3.astype(f32),
        _bf(tfw1), tfb1.astype(f32), _bf(tfw2), tfb2.astype(f32), _bf(tfw3), tfb3.astype(f32),
        fw1.astype(f32), fb1.astype(f32), fg1.astype(f32), fbt1.astype(f32),
        _bf(fw2), fb2.astype(f32), fg2.astype(f32), fbt2.astype(f32),
        _bf(fw3), fb3.astype(f32), fg3.astype(f32), fbt3.astype(f32),
        _bf(cw1), cb1.astype(f32), _bf(cw2), cb2.astype(f32), _bf(cw3), cb3.astype(f32),
    ]

    grid = (4, n_tiles)   # (phase, point tile); phases sweep the full point set in order

    in_specs = [pl.BlockSpec((B, tn, 6), lambda p, t: (0, t, 0))]
    in_specs += [_const_spec(a) for a in inputs[1:]]   # weights: resident, fetched once

    kernel = functools.partial(_pointnet_kernel,
                               num_samples=B * N, valid_last=valid_last)

    return pl.pallas_call(
        kernel,
        out_shape=jax.ShapeDtypeStruct((B, 2), f32),
        grid_spec=pltpu.PrefetchScalarGridSpec(
            num_scalar_prefetch=0,
            grid=grid,
            in_specs=in_specs,
            out_specs=pl.BlockSpec((B, 2), lambda p, t: (0, 0)),
            scratch_shapes=[
                pltpu.VMEM((B, 1024), f32),       # TNet max-pool accumulator
                pltpu.VMEM((3, B, 64), f32),      # per-cloud conv1 correction rows
                pltpu.VMEM((B, 1024), f32),       # conv3 pre-act per-cloud max
                pltpu.VMEM((B, 1024), f32),       # conv3 pre-act per-cloud min
                pltpu.VMEM((1, 64), f32), pltpu.VMEM((1, 64), f32),       # BN1 stats
                pltpu.VMEM((1, 128), f32), pltpu.VMEM((1, 128), f32),     # BN2 stats
                pltpu.VMEM((1, 1024), f32), pltpu.VMEM((1, 1024), f32),   # BN3 stats
            ],
        ),
        compiler_params=pltpu.CompilerParams(
            # Both axes carry cross-step state (global max/min pools, BN batch stats),
            # so they must remain sequential.
            dimension_semantics=("arbitrary", "arbitrary"),
            vmem_limit_bytes=vmem_limit,
        ),
    )(*inputs)


def init_params(key):
    keys = iter(jax.random.split(key, 64))

    def dense(cin, cout):
        w = (jax.random.normal(next(keys), (cin, cout)) / jnp.sqrt(cin)).astype(jnp.float32)
        b = (0.02 * jax.random.normal(next(keys), (1, cout))).astype(jnp.float32)
        return [w, b]

    def bn(c):
        g = (1.0 + 0.05 * jax.random.normal(next(keys), (1, c))).astype(jnp.float32)
        b = (0.05 * jax.random.normal(next(keys), (1, c))).astype(jnp.float32)
        return [g, b]

    params = []
    # TNet: conv1/2/3 + fc1/2/3
    params += dense(6, 64) + dense(64, 128) + dense(128, 1024)
    params += dense(1024, 512) + dense(512, 256) + dense(256, 9)
    # feature extractor: (conv, bn) x 3
    params += dense(6, 64) + bn(64)
    params += dense(64, 128) + bn(128)
    params += dense(128, 1024) + bn(1024)
    # classifier head
    params += dense(1024, 512) + dense(512, 256) + dense(256, 2)
    return params


if __name__ == "__main__":
    key = jax.random.PRNGKey(0)
    kx, kp = jax.random.split(key)
    B, N = 2, 16                                 # batch of 2 clouds, 16 points each
    x = jax.random.normal(kx, (B, N, 6), dtype=jnp.float32)
    params = init_params(kp)

    out = pointnet_classifier(x, params)
    out = jax.block_until_ready(out)

    assert out.shape == (B, 2), out.shape
    assert bool(jnp.all(jnp.isfinite(out)))
    print("KERNEL_OK")
</pallas_src>

<mosaic_0001>
module attributes {stable_mosaic.version = 11 : i64} {
  func.func @_pointnet_kernel(%arg0: i32, %arg1: i32, %arg2: memref<2x16x6xbf16, #tpu.memory_space<vmem>>, %arg3: memref<6x64xbf16, #tpu.memory_space<vmem>>, %arg4: memref<1x64xf32, #tpu.memory_space<vmem>>, %arg5: memref<64x128xbf16, #tpu.memory_space<vmem>>, %arg6: memref<1x128xf32, #tpu.memory_space<vmem>>, %arg7: memref<128x1024xbf16, #tpu.memory_space<vmem>>, %arg8: memref<1x1024xf32, #tpu.memory_space<vmem>>, %arg9: memref<1024x512xbf16, #tpu.memory_space<vmem>>, %arg10: memref<1x512xf32, #tpu.memory_space<vmem>>, %arg11: memref<512x256xbf16, #tpu.memory_space<vmem>>, %arg12: memref<1x256xf32, #tpu.memory_space<vmem>>, %arg13: memref<256x9xbf16, #tpu.memory_space<vmem>>, %arg14: memref<1x9xf32, #tpu.memory_space<vmem>>, %arg15: memref<6x64xf32, #tpu.memory_space<vmem>>, %arg16: memref<1x64xf32, #tpu.memory_space<vmem>>, %arg17: memref<1x64xf32, #tpu.memory_space<vmem>>, %arg18: memref<1x64xf32, #tpu.memory_space<vmem>>, %arg19: memref<64x128xbf16, #tpu.memory_space<vmem>>, %arg20: memref<1x128xf32, #tpu.memory_space<vmem>>, %arg21: memref<1x128xf32, #tpu.memory_space<vmem>>, %arg22: memref<1x128xf32, #tpu.memory_space<vmem>>, %arg23: memref<128x1024xbf16, #tpu.memory_space<vmem>>, %arg24: memref<1x1024xf32, #tpu.memory_space<vmem>>, %arg25: memref<1x1024xf32, #tpu.memory_space<vmem>>, %arg26: memref<1x1024xf32, #tpu.memory_space<vmem>>, %arg27: memref<1024x512xbf16, #tpu.memory_space<vmem>>, %arg28: memref<1x512xf32, #tpu.memory_space<vmem>>, %arg29: memref<512x256xbf16, #tpu.memory_space<vmem>>, %arg30: memref<1x256xf32, #tpu.memory_space<vmem>>, %arg31: memref<256x2xbf16, #tpu.memory_space<vmem>>, %arg32: memref<1x2xf32, #tpu.memory_space<vmem>>, %arg33: memref<2x2xf32, #tpu.memory_space<vmem>>, %arg34: memref<2x1024xf32, #tpu.memory_space<vmem>>, %arg35: memref<3x2x64xf32, #tpu.memory_space<vmem>>, %arg36: memref<2x1024xf32, #tpu.memory_space<vmem>>, %arg37: memref<2x1024xf32, #tpu.memory_space<vmem>>, %arg38: memref<1x64xf32, #tpu.memory_space<vmem>>, %arg39: memref<1x64xf32, #tpu.memory_space<vmem>>, %arg40: memref<1x128xf32, #tpu.memory_space<vmem>>, %arg41: memref<1x128xf32, #tpu.memory_space<vmem>>, %arg42: memref<1x1024xf32, #tpu.memory_space<vmem>>, %arg43: memref<1x1024xf32, #tpu.memory_space<vmem>>) attributes {dimension_semantics = [#tpu.dimension_semantics<arbitrary>, #tpu.dimension_semantics<arbitrary>], iteration_bounds = array<i64: 4, 1>, scalar_prefetch = 0 : i64, scratch_operands = 10 : i64, tpu.core_type = #tpu.core_type<tc>, window_params = [{transform_indices = @transform_0, window_bounds = array<i64: 2, 16, 6>}, {pipeline_mode = #tpu.pipeline_mode<synchronous>, transform_indices = @transform_1, window_bounds = array<i64: 6, 64>}, {pipeline_mode = #tpu.pipeline_mode<synchronous>, transform_indices = @transform_2, window_bounds = array<i64: 1, 64>}, {pipeline_mode = #tpu.pipeline_mode<synchronous>, transform_indices = @transform_3, window_bounds = array<i64: 64, 128>}, {pipeline_mode = #tpu.pipeline_mode<synchronous>, transform_indices = @transform_4, window_bounds = array<i64: 1, 128>}, {pipeline_mode = #tpu.pipeline_mode<synchronous>, transform_indices = @transform_5, window_bounds = array<i64: 128, 1024>}, {pipeline_mode = #tpu.pipeline_mode<synchronous>, transform_indices = @transform_6, window_bounds = array<i64: 1, 1024>}, {pipeline_mode = #tpu.pipeline_mode<synchronous>, transform_indices = @transform_7, window_bounds = array<i64: 1024, 512>}, {pipeline_mode = #tpu.pipeline_mode<synchronous>, transform_indices = @transform_8, window_bounds = array<i64: 1, 512>}, {pipeline_mode = #tpu.pipeline_mode<synchronous>, transform_indices = @transform_9, window_bounds = array<i64: 512, 256>}, {pipeline_mode = #tpu.pipeline_mode<synchronous>, transform_indices = @transform_10, window_bounds = array<i64: 1, 256>}, {pipeline_mode = #tpu.pipeline_mode<synchronous>, transform_indices = @transform_11, window_bounds = array<i64: 256, 9>}, {pipeline_mode = #tpu.pipeline_mode<synchronous>, transform_indices = @transform_12, window_bounds = array<i64: 1, 9>}, {pipeline_mode = #tpu.pipeline_mode<synchronous>, transform_indices = @transform_13, window_bounds = array<i64: 6, 64>}, {pipeline_mode = #tpu.pipeline_mode<synchronous>, transform_indices = @transform_14, window_bounds = array<i64: 1, 64>}, {pipeline_mode = #tpu.pipeline_mode<synchronous>, transform_indices = @transform_15, window_bounds = array<i64: 1, 64>}, {pipeline_mode = #tpu.pipeline_mode<synchronous>, transform_indices = @transform_16, window_bounds = array<i64: 1, 64>}, {pipeline_mode = #tpu.pipeline_mode<synchronous>, transform_indices = @transform_17, window_bounds = array<i64: 64, 128>}, {pipeline_mode = #tpu.pipeline_mode<synchronous>, transform_indices = @transform_18, window_bounds = array<i64: 1, 128>}, {pipeline_mode = #tpu.pipeline_mode<synchronous>, transform_indices = @transform_19, window_bounds = array<i64: 1, 128>}, {pipeline_mode = #tpu.pipeline_mode<synchronous>, transform_indices = @transform_20, window_bounds = array<i64: 1, 128>}, {pipeline_mode = #tpu.pipeline_mode<synchronous>, transform_indices = @transform_21, window_bounds = array<i64: 128, 1024>}, {pipeline_mode = #tpu.pipeline_mode<synchronous>, transform_indices = @transform_22, window_bounds = array<i64: 1, 1024>}, {pipeline_mode = #tpu.pipeline_mode<synchronous>, transform_indices = @transform_23, window_bounds = array<i64: 1, 1024>}, {pipeline_mode = #tpu.pipeline_mode<synchronous>, transform_indices = @transform_24, window_bounds = array<i64: 1, 1024>}, {pipeline_mode = #tpu.pipeline_mode<synchronous>, transform_indices = @transform_25, window_bounds = array<i64: 1024, 512>}, {pipeline_mode = #tpu.pipeline_mode<synchronous>, transform_indices = @transform_26, window_bounds = array<i64: 1, 512>}, {pipeline_mode = #tpu.pipeline_mode<synchronous>, transform_indices = @transform_27, window_bounds = array<i64: 512, 256>}, {pipeline_mode = #tpu.pipeline_mode<synchronous>, transform_indices = @transform_28, window_bounds = array<i64: 1, 256>}, {pipeline_mode = #tpu.pipeline_mode<synchronous>, transform_indices = @transform_29, window_bounds = array<i64: 256, 2>}, {pipeline_mode = #tpu.pipeline_mode<synchronous>, transform_indices = @transform_30, window_bounds = array<i64: 1, 2>}, {pipeline_mode = #tpu.pipeline_mode<synchronous>, transform_indices = @transform_31, window_bounds = array<i64: 2, 2>}]} {
    %c0_i32 = arith.constant 0 : i32
    %0 = arith.cmpi eq, %arg1, %c0_i32 : i32
    %c0_i32_0 = arith.constant 0 : i32
    %1 = arith.cmpi eq, %arg1, %c0_i32_0 : i32
    %c0_i32_1 = arith.constant 0 : i32
    %2 = arith.cmpi eq, %arg0, %c0_i32_1 : i32
    %3 = arith.extui %2 : i1 to i32
    %c0_i32_2 = arith.constant 0 : i32
    %4 = arith.cmpi ne, %3, %c0_i32_2 : i32
    scf.if %4 {
      %14 = arith.extui %0 : i1 to i32
      %c0_i32_6 = arith.constant 0 : i32
      %15 = arith.cmpi ne, %14, %c0_i32_6 : i32
      scf.if %15 {
        %cst_32 = arith.constant 0xFF800000 : f32
        %48 = vector.broadcast %cst_32 : f32 to vector<2x1024xf32>
        %c0_33 = arith.constant 0 : index
        %c0_34 = arith.constant 0 : index
        %49 = vector.load %arg34[%c0_33, %c0_34] : memref<2x1024xf32, #tpu.memory_space<vmem>>, vector<2x1024xf32>
        tpu.vector_store %arg34[%c0_33, %c0_34], %48 {strides = array<i32>} : memref<2x1024xf32, #tpu.memory_space<vmem>>, vector<2x1024xf32>,
        %cst_35 = arith.constant 0.000000e+00 : f32
        %50 = vector.broadcast %cst_35 : f32 to vector<2x2xf32>
        %c0_36 = arith.constant 0 : index
        %c0_37 = arith.constant 0 : index
        %51 = vector.load %arg33[%c0_36, %c0_37] : memref<2x2xf32, #tpu.memory_space<vmem>>, vector<2x2xf32>
        tpu.vector_store %arg33[%c0_36, %c0_37], %50 {strides = array<i32>} : memref<2x2xf32, #tpu.memory_space<vmem>>, vector<2x2xf32>,
      } else {
      }
      %c0 = arith.constant 0 : index
      %c0_7 = arith.constant 0 : index
      %c0_8 = arith.constant 0 : index
      %16 = vector.load %arg2[%c0, %c0_7, %c0_8] : memref<2x16x6xbf16, #tpu.memory_space<vmem>>, vector<2x16x6xbf16>
      %17 = vector.shape_cast %16 : vector<2x16x6xbf16> to vector<32x6xbf16>
      %c0_9 = arith.constant 0 : index
      %c0_10 = arith.constant 0 : index
      %18 = vector.load %arg3[%c0_9, %c0_10] : memref<6x64xbf16, #tpu.memory_space<vmem>>, vector<6x64xbf16>
      %cst = arith.constant dense<0.000000e+00> : vector<32x64xf32>
      %19 = tpu.matmul %17, %18, %cst {dimension_numbers = #tpu.dot_dimension_numbers<[1], [0], [0], [1], [0, 0, 1, 1], [], []>} : vector<32x6xbf16>, vector<6x64xbf16>, vector<32x64xf32> -> vector<32x64xf32>
      %c0_11 = arith.constant 0 : index
      %c0_12 = arith.constant 0 : index
      %20 = vector.load %arg4[%c0_11, %c0_12] : memref<1x64xf32, #tpu.memory_space<vmem>>, vector<1x64xf32>
      %21 = vector.broadcast %20 : vector<1x64xf32> to vector<32x64xf32>
      %22 = arith.addf %19, %21 : vector<32x64xf32>
      %cst_13 = arith.constant 0.000000e+00 : f32
      %23 = vector.broadcast %cst_13 : f32 to vector<32x64xf32>
      %24 = arith.maximumf %22, %23 : vector<32x64xf32>
      %25 = arith.truncf %24 : vector<32x64xf32> to vector<32x64xbf16>
      %c0_14 = arith.constant 0 : index
      %c0_15 = arith.constant 0 : index
      %26 = vector.load %arg5[%c0_14, %c0_15] : memref<64x128xbf16, #tpu.memory_space<vmem>>, vector<64x128xbf16>
      %cst_16 = arith.constant dense<0.000000e+00> : vector<32x128xf32>
      %27 = tpu.matmul %25, %26, %cst_16 {dimension_numbers = #tpu.dot_dimension_numbers<[1], [0], [0], [1], [0, 0, 1, 1], [], []>} : vector<32x64xbf16>, vector<64x128xbf16>, vector<32x128xf32> -> vector<32x128xf32>
      %c0_17 = arith.constant 0 : index
      %c0_18 = arith.constant 0 : index
      %28 = vector.load %arg6[%c0_17, %c0_18] : memref<1x128xf32, #tpu.memory_space<vmem>>, vector<1x128xf32>
      %29 = vector.broadcast %28 : vector<1x128xf32> to vector<32x128xf32>
      %30 = arith.addf %27, %29 : vector<32x128xf32>
      %cst_19 = arith.constant 0.000000e+00 : f32
      %31 = vector.broadcast %cst_19 : f32 to vector<32x128xf32>
      %32 = arith.maximumf %30, %31 : vector<32x128xf32>
      %33 = arith.truncf %32 : vector<32x128xf32> to vector<32x128xbf16>
      %c0_20 = arith.constant 0 : index
      %c0_21 = arith.constant 0 : index
      %34 = vector.load %arg7[%c0_20, %c0_21] : memref<128x1024xbf16, #tpu.memory_space<vmem>>, vector<128x1024xbf16>
      %cst_22 = arith.constant dense<0.000000e+00> : vector<32x1024xf32>
      %35 = tpu.matmul %33, %34, %cst_22 {dimension_numbers = #tpu.dot_dimension_numbers<[1], [0], [0], [1], [0, 0, 1, 1], [], []>} : vector<32x128xbf16>, vector<128x1024xbf16>, vector<32x1024xf32> -> vector<32x1024xf32>
      %c0_23 = arith.constant 0 : index
      %c0_24 = arith.constant 0 : index
      %36 = vector.load %arg8[%c0_23, %c0_24] : memref<1x1024xf32, #tpu.memory_space<vmem>>, vector<1x1024xf32>
      %37 = vector.broadcast %36 : vector<1x1024xf32> to vector<32x1024xf32>
      %38 = arith.addf %35, %37 : vector<32x1024xf32>
      %cst_25 = arith.constant 0.000000e+00 : f32
      %39 = vector.broadcast %cst_25 : f32 to vector<32x1024xf32>
      %40 = arith.maximumf %38, %39 : vector<32x1024xf32>
      %41 = vector.shape_cast %40 : vector<32x1024xf32> to vector<2x16x1024xf32>
      %c0_26 = arith.constant 0 : index
      %c0_27 = arith.constant 0 : index
      %42 = vector.load %arg34[%c0_26, %c0_27] : memref<2x1024xf32, #tpu.memory_space<vmem>>, vector<2x1024xf32>
      %cst_28 = arith.constant dense<0xFF800000> : vector<2x1024xf32>
      %43 = vector.multi_reduction <maximumf>, %41, %cst_28 [1] : vector<2x16x1024xf32> to vector<2x1024xf32>
      %44 = arith.maximumf %42, %43 : vector<2x1024xf32>
      %c0_29 = arith.constant 0 : index
      %c0_30 = arith.constant 0 : index
      %45 = vector.load %arg34[%c0_29, %c0_30] : memref<2x1024xf32, #tpu.memory_space<vmem>>, vector<2x1024xf32>
      tpu.vector_store %arg34[%c0_29, %c0_30], %44 {strides = array<i32>} : memref<2x1024xf32, #tpu.memory_space<vmem>>, vector<2x1024xf32>,
      %46 = arith.extui %1 : i1 to i32
      %c0_i32_31 = arith.constant 0 : i32
      %47 = arith.cmpi ne, %46, %c0_i32_31 : i32
      scf.if %47 {
        %c0_32 = arith.constant 0 : index
        %c0_33 = arith.constant 0 : index
        %48 = vector.load %arg34[%c0_32, %c0_33] : memref<2x1024xf32, #tpu.memory_space<vmem>>, vector<2x1024xf32>
        %49 = arith.truncf %48 : vector<2x1024xf32> to vector<2x1024xbf16>
        %c0_34 = arith.constant 0 : index
        %c0_35 = arith.constant 0 : index
        %50 = vector.load %arg9[%c0_34, %c0_35] : memref<1024x512xbf16, #tpu.memory_space<vmem>>, vector<1024x512xbf16>
        %cst_36 = arith.constant dense<0.000000e+00> : vector<2x512xf32>
        %51 = tpu.matmul %49, %50, %cst_36 {dimension_numbers = #tpu.dot_dimension_numbers<[1], [0], [0], [1], [0, 0, 1, 1], [], []>} : vector<2x1024xbf16>, vector<1024x512xbf16>, vector<2x512xf32> -> vector<2x512xf32>
        %c0_37 = arith.constant 0 : index
        %c0_38 = arith.constant 0 : index
        %52 = vector.load %arg10[%c0_37, %c0_38] : memref<1x512xf32, #tpu.memory_space<vmem>>, vector<1x512xf32>
        %53 = vector.broadcast %52 : vector<1x512xf32> to vector<2x512xf32>
        %54 = arith.addf %51, %53 : vector<2x512xf32>
        %cst_39 = arith.constant 0.000000e+00 : f32
        %55 = vector.broadcast %cst_39 : f32 to vector<2x512xf32>
        %56 = arith.maximumf %54, %55 : vector<2x512xf32>
        %57 = arith.truncf %56 : vector<2x512xf32> to vector<2x512xbf16>
        %c0_40 = arith.constant 0 : index
        %c0_41 = arith.constant 0 : index
        %58 = vector.load %arg11[%c0_40, %c0_41] : memref<512x256xbf16, #tpu.memory_space<vmem>>, vector<512x256xbf16>
        %cst_42 = arith.constant dense<0.000000e+00> : vector<2x256xf32>
        %59 = tpu.matmul %57, %58, %cst_42 {dimension_numbers = #tpu.dot_dimension_numbers<[1], [0], [0], [1], [0, 0, 1, 1], [], []>} : vector<2x512xbf16>, vector<512x256xbf16>, vector<2x256xf32> -> vector<2x256xf32>
        %c0_43 = arith.constant 0 : index
        %c0_44 = arith.constant 0 : index
        %60 = vector.load %arg12[%c0_43, %c0_44] : memref<1x256xf32, #tpu.memory_space<vmem>>, vector<1x256xf32>
        %61 = vector.broadcast %60 : vector<1x256xf32> to vector<2x256xf32>
        %62 = arith.addf %59, %61 : vector<2x256xf32>
        %cst_45 = arith.constant 0.000000e+00 : f32
        %63 = vector.broadcast %cst_45 : f32 to vector<2x256xf32>
        %64 = arith.maximumf %62, %63 : vector<2x256xf32>
        %65 = arith.truncf %64 : vector<2x256xf32> to vector<2x256xbf16>
        %c0_46 = arith.constant 0 : index
        %c0_47 = arith.constant 0 : index
        %66 = vector.load %arg13[%c0_46, %c0_47] : memref<256x9xbf16, #tpu.memory_space<vmem>>, vector<256x9xbf16>
        %cst_48 = arith.constant dense<0.000000e+00> : vector<2x9xf32>
        %67 = tpu.matmul %65, %66, %cst_48 {dimension_numbers = #tpu.dot_dimension_numbers<[1], [0], [0], [1], [0, 0, 1, 1], [], []>} : vector<2x256xbf16>, vector<256x9xbf16>, vector<2x9xf32> -> vector<2x9xf32>
        %c0_49 = arith.constant 0 : index
        %c0_50 = arith.constant 0 : index
        %68 = vector.load %arg14[%c0_49, %c0_50] : memref<1x9xf32, #tpu.memory_space<vmem>>, vector<1x9xf32>
        %69 = vector.broadcast %68 : vector<1x9xf32> to vector<2x9xf32>
        %70 = arith.addf %67, %69 : vector<2x9xf32>
        %c0_51 = arith.constant 0 : index
        %c0_52 = arith.constant 0 : index
        %71 = vector.load %arg15[%c0_51, %c0_52] : memref<6x64xf32, #tpu.memory_space<vmem>>, vector<6x64xf32>
        %72 = vector.extract_strided_slice %70 {offsets = [0, 0], sizes = [2, 1], strides = [1, 1]} : vector<2x9xf32> to vector<2x1xf32>
        %73 = vector.extract_strided_slice %71 {offsets = [0, 0], sizes = [1, 64], strides = [1, 1]} : vector<6x64xf32> to vector<1x64xf32>
        %74 = vector.broadcast %72 : vector<2x1xf32> to vector<2x64xf32>
        %75 = vector.broadcast %73 : vector<1x64xf32> to vector<2x64xf32>
        %76 = arith.mulf %74, %75 : vector<2x64xf32>
        %77 = vector.extract_strided_slice %70 {offsets = [0, 1], sizes = [2, 1], strides = [1, 1]} : vector<2x9xf32> to vector<2x1xf32>
        %78 = vector.extract_strided_slice %71 {offsets = [1, 0], sizes = [1, 64], strides = [1, 1]} : vector<6x64xf32> to vector<1x64xf32>
        %79 = vector.broadcast %77 : vector<2x1xf32> to vector<2x64xf32>
        %80 = vector.broadcast %78 : vector<1x64xf32> to vector<2x64xf32>
        %81 = arith.mulf %79, %80 : vector<2x64xf32>
        %82 = arith.addf %76, %81 : vector<2x64xf32>
        %83 = vector.extract_strided_slice %70 {offsets = [0, 2], sizes = [2, 1], strides = [1, 1]} : vector<2x9xf32> to vector<2x1xf32>
        %84 = vector.extract_strided_slice %71 {offsets = [2, 0], sizes = [1, 64], strides = [1, 1]} : vector<6x64xf32> to vector<1x64xf32>
        %85 = vector.broadcast %83 : vector<2x1xf32> to vector<2x64xf32>
        %86 = vector.broadcast %84 : vector<1x64xf32> to vector<2x64xf32>
        %87 = arith.mulf %85, %86 : vector<2x64xf32>
        %88 = arith.addf %82, %87 : vector<2x64xf32>
        %89 = vector.extract_strided_slice %71 {offsets = [0, 0], sizes = [1, 64], strides = [1, 1]} : vector<6x64xf32> to vector<1x64xf32>
        %90 = vector.broadcast %89 : vector<1x64xf32> to vector<2x64xf32>
        %91 = arith.subf %88, %90 : vector<2x64xf32>
        %c0_53 = arith.constant 0 : index
        %c0_54 = arith.constant 0 : index
        %c0_55 = arith.constant 0 : index
        %92 = vector.load %arg35[%c0_53, %c0_54, %c0_55] : memref<3x2x64xf32, #tpu.memory_space<vmem>>, vector<1x2x64xf32>
        %93 = vector.shape_cast %92 : vector<1x2x64xf32> to vector<2x64xf32>
        %94 = vector.shape_cast %91 : vector<2x64xf32> to vector<1x2x64xf32>
        tpu.vector_store %arg35[%c0_53, %c0_54, %c0_55], %94 {strides = array<i32>} : memref<3x2x64xf32, #tpu.memory_space<vmem>>, vector<1x2x64xf32>,
        %95 = vector.extract_strided_slice %70 {offsets = [0, 3], sizes = [2, 1], strides = [1, 1]} : vector<2x9xf32> to vector<2x1xf32>
        %96 = vector.extract_strided_slice %71 {offsets = [0, 0], sizes = [1, 64], strides = [1, 1]} : vector<6x64xf32> to vector<1x64xf32>
        %97 = vector.broadcast %95 : vector<2x1xf32> to vector<2x64xf32>
        %98 = vector.broadcast %96 : vector<1x64xf32> to vector<2x64xf32>
        %99 = arith.mulf %97, %98 : vector<2x64xf32>
        %100 = vector.extract_strided_slice %70 {offsets = [0, 4], sizes = [2, 1], strides = [1, 1]} : vector<2x9xf32> to vector<2x1xf32>
        %101 = vector.extract_strided_slice %71 {offsets = [1, 0], sizes = [1, 64], strides = [1, 1]} : vector<6x64xf32> to vector<1x64xf32>
        %102 = vector.broadcast %100 : vector<2x1xf32> to vector<2x64xf32>
        %103 = vector.broadcast %101 : vector<1x64xf32> to vector<2x64xf32>
        %104 = arith.mulf %102, %103 : vector<2x64xf32>
        %105 = arith.addf %99, %104 : vector<2x64xf32>
        %106 = vector.extract_strided_slice %70 {offsets = [0, 5], sizes = [2, 1], strides = [1, 1]} : vector<2x9xf32> to vector<2x1xf32>
        %107 = vector.extract_strided_slice %71 {offsets = [2, 0], sizes = [1, 64], strides = [1, 1]} : vector<6x64xf32> to vector<1x64xf32>
        %108 = vector.broadcast %106 : vector<2x1xf32> to vector<2x64xf32>
        %109 = vector.broadcast %107 : vector<1x64xf32> to vector<2x64xf32>
        %110 = arith.mulf %108, %109 : vector<2x64xf32>
        %111 = arith.addf %105, %110 : vector<2x64xf32>
        %112 = vector.extract_strided_slice %71 {offsets = [1, 0], sizes = [1, 64], strides = [1, 1]} : vector<6x64xf32> to vector<1x64xf32>
        %113 = vector.broadcast %112 : vector<1x64xf32> to vector<2x64xf32>
        %114 = arith.subf %111, %113 : vector<2x64xf32>
        %c1 = arith.constant 1 : index
        %c0_56 = arith.constant 0 : index
        %c0_57 = arith.constant 0 : index
        %115 = vector.load %arg35[%c1, %c0_56, %c0_57] : memref<3x2x64xf32, #tpu.memory_space<vmem>>, vector<1x2x64xf32>
        %116 = vector.shape_cast %115 : vector<1x2x64xf32> to vector<2x64xf32>
        %117 = vector.shape_cast %114 : vector<2x64xf32> to vector<1x2x64xf32>
        tpu.vector_store %arg35[%c1, %c0_56, %c0_57], %117 {strides = array<i32>} : memref<3x2x64xf32, #tpu.memory_space<vmem>>, vector<1x2x64xf32>,
        %118 = vector.extract_strided_slice %70 {offsets = [0, 6], sizes = [2, 1], strides = [1, 1]} : vector<2x9xf32> to vector<2x1xf32>
        %119 = vector.extract_strided_slice %71 {offsets = [0, 0], sizes = [1, 64], strides = [1, 1]} : vector<6x64xf32> to vector<1x64xf32>
        %120 = vector.broadcast %118 : vector<2x1xf32> to vector<2x64xf32>
        %121 = vector.broadcast %119 : vector<1x64xf32> to vector<2x64xf32>
        %122 = arith.mulf %120, %121 : vector<2x64xf32>
        %123 = vector.extract_strided_slice %70 {offsets = [0, 7], sizes = [2, 1], strides = [1, 1]} : vector<2x9xf32> to vector<2x1xf32>
        %124 = vector.extract_strided_slice %71 {offsets = [1, 0], sizes = [1, 64], strides = [1, 1]} : vector<6x64xf32> to vector<1x64xf32>
        %125 = vector.broadcast %123 : vector<2x1xf32> to vector<2x64xf32>
        %126 = vector.broadcast %124 : vector<1x64xf32> to vector<2x64xf32>
        %127 = arith.mulf %125, %126 : vector<2x64xf32>
        %128 = arith.addf %122, %127 : vector<2x64xf32>
        %129 = vector.extract_strided_slice %70 {offsets = [0, 8], sizes = [2, 1], strides = [1, 1]} : vector<2x9xf32> to vector<2x1xf32>
        %130 = vector.extract_strided_slice %71 {offsets = [2, 0], sizes = [1, 64], strides = [1, 1]} : vector<6x64xf32> to vector<1x64xf32>
        %131 = vector.broadcast %129 : vector<2x1xf32> to vector<2x64xf32>
        %132 = vector.broadcast %130 : vector<1x64xf32> to vector<2x64xf32>
        %133 = arith.mulf %131, %132 : vector<2x64xf32>
        %134 = arith.addf %128, %133 : vector<2x64xf32>
        %135 = vector.extract_strided_slice %71 {offsets = [2, 0], sizes = [1, 64], strides = [1, 1]} : vector<6x64xf32> to vector<1x64xf32>
        %136 = vector.broadcast %135 : vector<1x64xf32> to vector<2x64xf32>
        %137 = arith.subf %134, %136 : vector<2x64xf32>
        %c2 = arith.constant 2 : index
        %c0_58 = arith.constant 0 : index
        %c0_59 = arith.constant 0 : index
        %138 = vector.load %arg35[%c2, %c0_58, %c0_59] : memref<3x2x64xf32, #tpu.memory_space<vmem>>, vector<1x2x64xf32>
        %139 = vector.shape_cast %138 : vector<1x2x64xf32> to vector<2x64xf32>
        %140 = vector.shape_cast %137 : vector<2x64xf32> to vector<1x2x64xf32>
        tpu.vector_store %arg35[%c2, %c0_58, %c0_59], %140 {strides = array<i32>} : memref<3x2x64xf32, #tpu.memory_space<vmem>>, vector<1x2x64xf32>,
      } else {
      }
    } else {
    }
    %c1_i32 = arith.constant 1 : i32
    %5 = arith.cmpi eq, %arg0, %c1_i32 : i32
    %6 = arith.extui %5 : i1 to i32
    %c0_i32_3 = arith.constant 0 : i32
    %7 = arith.cmpi ne, %6, %c0_i32_3 : i32
    scf.if %7 {
      %c0 = arith.constant 0 : index
      %c0_6 = arith.constant 0 : index
      %c0_7 = arith.constant 0 : index
      %14 = vector.load %arg2[%c0, %c0_6, %c0_7] : memref<2x16x6xbf16, #tpu.memory_space<vmem>>, vector<2x16x6xbf16>
      %15 = vector.shape_cast %14 : vector<2x16x6xbf16> to vector<32x6xbf16>
      %c0_8 = arith.constant 0 : index
      %c0_9 = arith.constant 0 : index
      %16 = vector.load %arg15[%c0_8, %c0_9] : memref<6x64xf32, #tpu.memory_space<vmem>>, vector<6x64xf32>
      %17 = arith.truncf %16 : vector<6x64xf32> to vector<6x64xbf16>
      %cst = arith.constant dense<0.000000e+00> : vector<32x64xf32>
      %18 = tpu.matmul %15, %17, %cst {dimension_numbers = #tpu.dot_dimension_numbers<[1], [0], [0], [1], [0, 0, 1, 1], [], []>} : vector<32x6xbf16>, vector<6x64xbf16>, vector<32x64xf32> -> vector<32x64xf32>
      %19 = vector.extract_strided_slice %14 {offsets = [0, 0, 0], sizes = [2, 16, 1], strides = [1, 1, 1]} : vector<2x16x6xbf16> to vector<2x16x1xbf16>
      %20 = arith.extf %19 : vector<2x16x1xbf16> to vector<2x16x1xf32>
      %c0_10 = arith.constant 0 : index
      %c0_11 = arith.constant 0 : index
      %c0_12 = arith.constant 0 : index
      %21 = vector.load %arg35[%c0_10, %c0_11, %c0_12] : memref<3x2x64xf32, #tpu.memory_space<vmem>>, vector<1x2x64xf32>
      %22 = vector.shape_cast %21 : vector<1x2x64xf32> to vector<2x64xf32>
      %23 = vector.shape_cast %22 : vector<2x64xf32> to vector<2x1x64xf32>
      %24 = vector.broadcast %20 : vector<2x16x1xf32> to vector<2x16x64xf32>
      %25 = vector.broadcast %23 : vector<2x1x64xf32> to vector<2x16x64xf32>
      %26 = arith.mulf %24, %25 : vector<2x16x64xf32>
      %27 = vector.extract_strided_slice %14 {offsets = [0, 0, 1], sizes = [2, 16, 1], strides = [1, 1, 1]} : vector<2x16x6xbf16> to vector<2x16x1xbf16>
      %28 = arith.extf %27 : vector<2x16x1xbf16> to vector<2x16x1xf32>
      %c1 = arith.constant 1 : index
      %c0_13 = arith.constant 0 : index
      %c0_14 = arith.constant 0 : index
      %29 = vector.load %arg35[%c1, %c0_13, %c0_14] : memref<3x2x64xf32, #tpu.memory_space<vmem>>, vector<1x2x64xf32>
      %30 = vector.shape_cast %29 : vector<1x2x64xf32> to vector<2x64xf32>
      %31 = vector.shape_cast %30 : vector<2x64xf32> to vector<2x1x64xf32>
      %32 = vector.broadcast %28 : vector<2x16x1xf32> to vector<2x16x64xf32>
      %33 = vector.broadcast %31 : vector<2x1x64xf32> to vector<2x16x64xf32>
      %34 = arith.mulf %32, %33 : vector<2x16x64xf32>
      %35 = arith.addf %26, %34 : vector<2x16x64xf32>
      %36 = vector.extract_strided_slice %14 {offsets = [0, 0, 2], sizes = [2, 16, 1], strides = [1, 1, 1]} : vector<2x16x6xbf16> to vector<2x16x1xbf16>
      %37 = arith.extf %36 : vector<2x16x1xbf16> to vector<2x16x1xf32>
      %c2 = arith.constant 2 : index
      %c0_15 = arith.constant 0 : index
      %c0_16 = arith.constant 0 : index
      %38 = vector.load %arg35[%c2, %c0_15, %c0_16] : memref<3x2x64xf32, #tpu.memory_space<vmem>>, vector<1x2x64xf32>
      %39 = vector.shape_cast %38 : vector<1x2x64xf32> to vector<2x64xf32>
      %40 = vector.shape_cast %39 : vector<2x64xf32> to vector<2x1x64xf32>
      %41 = vector.broadcast %37 : vector<2x16x1xf32> to vector<2x16x64xf32>
      %42 = vector.broadcast %40 : vector<2x1x64xf32> to vector<2x16x64xf32>
      %43 = arith.mulf %41, %42 : vector<2x16x64xf32>
      %44 = arith.addf %35, %43 : vector<2x16x64xf32>
      %45 = vector.shape_cast %44 : vector<2x16x64xf32> to vector<32x64xf32>
      %46 = arith.addf %18, %45 : vector<32x64xf32>
      %c0_17 = arith.constant 0 : index
      %c0_18 = arith.constant 0 : index
      %47 = vector.load %arg16[%c0_17, %c0_18] : memref<1x64xf32, #tpu.memory_space<vmem>>, vector<1x64xf32>
      %48 = vector.broadcast %47 : vector<1x64xf32> to vector<32x64xf32>
      %49 = arith.addf %46, %48 : vector<32x64xf32>
      %50 = arith.extui %0 : i1 to i32
      %c0_i32_19 = arith.constant 0 : i32
      %51 = arith.cmpi ne, %50, %c0_i32_19 : i32
      scf.if %51 {
        %cst_31 = arith.constant 0.000000e+00 : f32
        %65 = vector.broadcast %cst_31 : f32 to vector<1x64xf32>
        %c0_32 = arith.constant 0 : index
        %c0_33 = arith.constant 0 : index
        %66 = vector.load %arg38[%c0_32, %c0_33] : memref<1x64xf32, #tpu.memory_space<vmem>>, vector<1x64xf32>
        tpu.vector_store %arg38[%c0_32, %c0_33], %65 {strides = array<i32>} : memref<1x64xf32, #tpu.memory_space<vmem>>, vector<1x64xf32>,
        %cst_34 = arith.constant 0.000000e+00 : f32
        %67 = vector.broadcast %cst_34 : f32 to vector<1x64xf32>
        %c0_35 = arith.constant 0 : index
        %c0_36 = arith.constant 0 : index
        %68 = vector.load %arg39[%c0_35, %c0_36] : memref<1x64xf32, #tpu.memory_space<vmem>>, vector<1x64xf32>
        tpu.vector_store %arg39[%c0_35, %c0_36], %67 {strides = array<i32>} : memref<1x64xf32, #tpu.memory_space<vmem>>, vector<1x64xf32>,
      } else {
      }
      %c0_20 = arith.constant 0 : index
      %c0_21 = arith.constant 0 : index
      %52 = vector.load %arg38[%c0_20, %c0_21] : memref<1x64xf32, #tpu.memory_space<vmem>>, vector<1x64xf32>
      %cst_22 = arith.constant dense<0.000000e+00> : vector<64xf32>
      %53 = vector.multi_reduction <add>, %49, %cst_22 [0] : vector<32x64xf32> to vector<64xf32>
      %54 = vector.shape_cast %53 : vector<64xf32> to vector<1x64xf32>
      %55 = arith.addf %52, %54 : vector<1x64xf32>
      %c0_23 = arith.constant 0 : index
      %c0_24 = arith.constant 0 : index
      %56 = vector.load %arg38[%c0_23, %c0_24] : memref<1x64xf32, #tpu.memory_space<vmem>>, vector<1x64xf32>
      tpu.vector_store %arg38[%c0_23, %c0_24], %55 {strides = array<i32>} : memref<1x64xf32, #tpu.memory_space<vmem>>, vector<1x64xf32>,
      %c0_25 = arith.constant 0 : index
      %c0_26 = arith.constant 0 : index
      %57 = vector.load %arg39[%c0_25, %c0_26] : memref<1x64xf32, #tpu.memory_space<vmem>>, vector<1x64xf32>
      %58 = arith.mulf %49, %49 : vector<32x64xf32>
      %cst_27 = arith.constant dense<0.000000e+00> : vector<64xf32>
      %59 = vector.multi_reduction <add>, %58, %cst_27 [0] : vector<32x64xf32> to vector<64xf32>
      %60 = vector.shape_cast %59 : vector<64xf32> to vector<1x64xf32>
      %61 = arith.addf %57, %60 : vector<1x64xf32>
      %c0_28 = arith.constant 0 : index
      %c0_29 = arith.constant 0 : index
      %62 = vector.load %arg39[%c0_28, %c0_29] : memref<1x64xf32, #tpu.memory_space<vmem>>, vector<1x64xf32>
      tpu.vector_store %arg39[%c0_28, %c0_29], %61 {strides = array<i32>} : memref<1x64xf32, #tpu.memory_space<vmem>>, vector<1x64xf32>,
      %63 = arith.extui %1 : i1 to i32
      %c0_i32_30 = arith.constant 0 : i32
      %64 = arith.cmpi ne, %63, %c0_i32_30 : i32
      scf.if %64 {
        %c0_31 = arith.constant 0 : index
        %c0_32 = arith.constant 0 : index
        %65 = vector.load %arg38[%c0_31, %c0_32] : memref<1x64xf32, #tpu.memory_space<vmem>>, vector<1x64xf32>
        %cst_33 = arith.constant 3.125000e-02 : f32
        %66 = vector.broadcast %cst_33 : f32 to vector<1x64xf32>
        %67 = arith.mulf %65, %66 : vector<1x64xf32>
        %c0_34 = arith.constant 0 : index
        %c0_35 = arith.constant 0 : index
        %68 = vector.load %arg39[%c0_34, %c0_35] : memref<1x64xf32, #tpu.memory_space<vmem>>, vector<1x64xf32>
        %cst_36 = arith.constant 3.125000e-02 : f32
        %69 = vector.broadcast %cst_36 : f32 to vector<1x64xf32>
        %70 = arith.mulf %68, %69 : vector<1x64xf32>
        %71 = arith.mulf %67, %67 : vector<1x64xf32>
        %72 = arith.subf %70, %71 : vector<1x64xf32>
        %cst_37 = arith.constant 0.000000e+00 : f32
        %73 = vector.broadcast %cst_37 : f32 to vector<1x64xf32>
        %74 = arith.maximumf %72, %73 : vector<1x64xf32>
        %c0_38 = arith.constant 0 : index
        %c0_39 = arith.constant 0 : index
        %75 = vector.load %arg17[%c0_38, %c0_39] : memref<1x64xf32, #tpu.memory_space<vmem>>, vector<1x64xf32>
        %cst_40 = arith.constant 9.99999974E-6 : f32
        %76 = vector.broadcast %cst_40 : f32 to vector<1x64xf32>
        %77 = arith.addf %74, %76 : vector<1x64xf32>
        %78 = math.rsqrt %77 : vector<1x64xf32>
        %79 = arith.mulf %75, %78 : vector<1x64xf32>
        %c0_41 = arith.constant 0 : index
        %c0_42 = arith.constant 0 : index
        %80 = vector.load %arg38[%c0_41, %c0_42] : memref<1x64xf32, #tpu.memory_space<vmem>>, vector<1x64xf32>
        tpu.vector_store %arg38[%c0_41, %c0_42], %79 {strides = array<i32>} : memref<1x64xf32, #tpu.memory_space<vmem>>, vector<1x64xf32>,
        %c0_43 = arith.constant 0 : index
        %c0_44 = arith.constant 0 : index
        %81 = vector.load %arg18[%c0_43, %c0_44] : memref<1x64xf32, #tpu.memory_space<vmem>>, vector<1x64xf32>
        %82 = arith.mulf %79, %67 : vector<1x64xf32>
        %83 = arith.subf %81, %82 : vector<1x64xf32>
        %c0_45 = arith.constant 0 : index
        %c0_46 = arith.constant 0 : index
        %84 = vector.load %arg39[%c0_45, %c0_46] : memref<1x64xf32, #tpu.memory_space<vmem>>, vector<1x64xf32>
        tpu.vector_store %arg39[%c0_45, %c0_46], %83 {strides = array<i32>} : memref<1x64xf32, #tpu.memory_space<vmem>>, vector<1x64xf32>,
      } else {
      }
    } else {
    }
    %c2_i32 = arith.constant 2 : i32
    %8 = arith.cmpi eq, %arg0, %c2_i32 : i32
    %9 = arith.extui %8 : i1 to i32
    %c0_i32_4 = arith.constant 0 : i32
    %10 = arith.cmpi ne, %9, %c0_i32_4 : i32
    scf.if %10 {
      %c0 = arith.constant 0 : index
      %c0_6 = arith.constant 0 : index
      %c0_7 = arith.constant 0 : index
      %14 = vector.load %arg2[%c0, %c0_6, %c0_7] : memref<2x16x6xbf16, #tpu.memory_space<vmem>>, vector<2x16x6xbf16>
      %15 = vector.shape_cast %14 : vector<2x16x6xbf16> to vector<32x6xbf16>
      %c0_8 = arith.constant 0 : index
      %c0_9 = arith.constant 0 : index
      %16 = vector.load %arg15[%c0_8, %c0_9] : memref<6x64xf32, #tpu.memory_space<vmem>>, vector<6x64xf32>
      %17 = arith.truncf %16 : vector<6x64xf32> to vector<6x64xbf16>
      %cst = arith.constant dense<0.000000e+00> : vector<32x64xf32>
      %18 = tpu.matmul %15, %17, %cst {dimension_numbers = #tpu.dot_dimension_numbers<[1], [0], [0], [1], [0, 0, 1, 1], [], []>} : vector<32x6xbf16>, vector<6x64xbf16>, vector<32x64xf32> -> vector<32x64xf32>
      %19 = vector.extract_strided_slice %14 {offsets = [0, 0, 0], sizes = [2, 16, 1], strides = [1, 1, 1]} : vector<2x16x6xbf16> to vector<2x16x1xbf16>
      %20 = arith.extf %19 : vector<2x16x1xbf16> to vector<2x16x1xf32>
      %c0_10 = arith.constant 0 : index
      %c0_11 = arith.constant 0 : index
      %c0_12 = arith.constant 0 : index
      %21 = vector.load %arg35[%c0_10, %c0_11, %c0_12] : memref<3x2x64xf32, #tpu.memory_space<vmem>>, vector<1x2x64xf32>
      %22 = vector.shape_cast %21 : vector<1x2x64xf32> to vector<2x64xf32>
      %23 = vector.shape_cast %22 : vector<2x64xf32> to vector<2x1x64xf32>
      %24 = vector.broadcast %20 : vector<2x16x1xf32> to vector<2x16x64xf32>
      %25 = vector.broadcast %23 : vector<2x1x64xf32> to vector<2x16x64xf32>
      %26 = arith.mulf %24, %25 : vector<2x16x64xf32>
      %27 = vector.extract_strided_slice %14 {offsets = [0, 0, 1], sizes = [2, 16, 1], strides = [1, 1, 1]} : vector<2x16x6xbf16> to vector<2x16x1xbf16>
      %28 = arith.extf %27 : vector<2x16x1xbf16> to vector<2x16x1xf32>
      %c1 = arith.constant 1 : index
      %c0_13 = arith.constant 0 : index
      %c0_14 = arith.constant 0 : index
      %29 = vector.load %arg35[%c1, %c0_13, %c0_14] : memref<3x2x64xf32, #tpu.memory_space<vmem>>, vector<1x2x64xf32>
      %30 = vector.shape_cast %29 : vector<1x2x64xf32> to vector<2x64xf32>
      %31 = vector.shape_cast %30 : vector<2x64xf32> to vector<2x1x64xf32>
      %32 = vector.broadcast %28 : vector<2x16x1xf32> to vector<2x16x64xf32>
      %33 = vector.broadcast %31 : vector<2x1x64xf32> to vector<2x16x64xf32>
      %34 = arith.mulf %32, %33 : vector<2x16x64xf32>
      %35 = arith.addf %26, %34 : vector<2x16x64xf32>
      %36 = vector.extract_strided_slice %14 {offsets = [0, 0, 2], sizes = [2, 16, 1], strides = [1, 1, 1]} : vector<2x16x6xbf16> to vector<2x16x1xbf16>
      %37 = arith.extf %36 : vector<2x16x1xbf16> to vector<2x16x1xf32>
      %c2 = arith.constant 2 : index
      %c0_15 = arith.constant 0 : index
      %c0_16 = arith.constant 0 : index
      %38 = vector.load %arg35[%c2, %c0_15, %c0_16] : memref<3x2x64xf32, #tpu.memory_space<vmem>>, vector<1x2x64xf32>
      %39 = vector.shape_cast %38 : vector<1x2x64xf32> to vector<2x64xf32>
      %40 = vector.shape_cast %39 : vector<2x64xf32> to vector<2x1x64xf32>
      %41 = vector.broadcast %37 : vector<2x16x1xf32> to vector<2x16x64xf32>
      %42 = vector.broadcast %40 : vector<2x1x64xf32> to vector<2x16x64xf32>
      %43 = arith.mulf %41, %42 : vector<2x16x64xf32>
      %44 = arith.addf %35, %43 : vector<2x16x64xf32>
      %45 = vector.shape_cast %44 : vector<2x16x64xf32> to vector<32x64xf32>
      %46 = arith.addf %18, %45 : vector<32x64xf32>
      %c0_17 = arith.constant 0 : index
      %c0_18 = arith.constant 0 : index
      %47 = vector.load %arg16[%c0_17, %c0_18] : memref<1x64xf32, #tpu.memory_space<vmem>>, vector<1x64xf32>
      %48 = vector.broadcast %47 : vector<1x64xf32> to vector<32x64xf32>
      %49 = arith.addf %46, %48 : vector<32x64xf32>
      %c0_19 = arith.constant 0 : index
      %c0_20 = arith.constant 0 : index
      %50 = vector.load %arg38[%c0_19, %c0_20] : memref<1x64xf32, #tpu.memory_space<vmem>>, vector<1x64xf32>
      %51 = vector.broadcast %50 : vector<1x64xf32> to vector<32x64xf32>
      %52 = arith.mulf %49, %51 : vector<32x64xf32>
      %c0_21 = arith.constant 0 : index
      %c0_22 = arith.constant 0 : index
      %53 = vector.load %arg39[%c0_21, %c0_22] : memref<1x64xf32, #tpu.memory_space<vmem>>, vector<1x64xf32>
      %54 = vector.broadcast %53 : vector<1x64xf32> to vector<32x64xf32>
      %55 = arith.addf %52, %54 : vector<32x64xf32>
      %cst_23 = arith.constant 0.000000e+00 : f32
      %56 = vector.broadcast %cst_23 : f32 to vector<32x64xf32>
      %57 = arith.maximumf %55, %56 : vector<32x64xf32>
      %58 = arith.truncf %57 : vector<32x64xf32> to vector<32x64xbf16>
      %c0_24 = arith.constant 0 : index
      %c0_25 = arith.constant 0 : index
      %59 = vector.load %arg19[%c0_24, %c0_25] : memref<64x128xbf16, #tpu.memory_space<vmem>>, vector<64x128xbf16>
      %cst_26 = arith.constant dense<0.000000e+00> : vector<32x128xf32>
      %60 = tpu.matmul %58, %59, %cst_26 {dimension_numbers = #tpu.dot_dimension_numbers<[1], [0], [0], [1], [0, 0, 1, 1], [], []>} : vector<32x64xbf16>, vector<64x128xbf16>, vector<32x128xf32> -> vector<32x128xf32>
      %c0_27 = arith.constant 0 : index
      %c0_28 = arith.constant 0 : index
      %61 = vector.load %arg20[%c0_27, %c0_28] : memref<1x128xf32, #tpu.memory_space<vmem>>, vector<1x128xf32>
      %62 = vector.broadcast %61 : vector<1x128xf32> to vector<32x128xf32>
      %63 = arith.addf %60, %62 : vector<32x128xf32>
      %64 = arith.extui %0 : i1 to i32
      %c0_i32_29 = arith.constant 0 : i32
      %65 = arith.cmpi ne, %64, %c0_i32_29 : i32
      scf.if %65 {
        %cst_41 = arith.constant 0.000000e+00 : f32
        %79 = vector.broadcast %cst_41 : f32 to vector<1x128xf32>
        %c0_42 = arith.constant 0 : index
        %c0_43 = arith.constant 0 : index
        %80 = vector.load %arg40[%c0_42, %c0_43] : memref<1x128xf32, #tpu.memory_space<vmem>>, vector<1x128xf32>
        tpu.vector_store %arg40[%c0_42, %c0_43], %79 {strides = array<i32>} : memref<1x128xf32, #tpu.memory_space<vmem>>, vector<1x128xf32>,
        %cst_44 = arith.constant 0.000000e+00 : f32
        %81 = vector.broadcast %cst_44 : f32 to vector<1x128xf32>
        %c0_45 = arith.constant 0 : index
        %c0_46 = arith.constant 0 : index
        %82 = vector.load %arg41[%c0_45, %c0_46] : memref<1x128xf32, #tpu.memory_space<vmem>>, vector<1x128xf32>
        tpu.vector_store %arg41[%c0_45, %c0_46], %81 {strides = array<i32>} : memref<1x128xf32, #tpu.memory_space<vmem>>, vector<1x128xf32>,
      } else {
      }
      %c0_30 = arith.constant 0 : index
      %c0_31 = arith.constant 0 : index
      %66 = vector.load %arg40[%c0_30, %c0_31] : memref<1x128xf32, #tpu.memory_space<vmem>>, vector<1x128xf32>
      %cst_32 = arith.constant dense<0.000000e+00> : vector<128xf32>
      %67 = vector.multi_reduction <add>, %63, %cst_32 [0] : vector<32x128xf32> to vector<128xf32>
      %68 = vector.shape_cast %67 : vector<128xf32> to vector<1x128xf32>
      %69 = arith.addf %66, %68 : vector<1x128xf32>
      %c0_33 = arith.constant 0 : index
      %c0_34 = arith.constant 0 : index
      %70 = vector.load %arg40[%c0_33, %c0_34] : memref<1x128xf32, #tpu.memory_space<vmem>>, vector<1x128xf32>
      tpu.vector_store %arg40[%c0_33, %c0_34], %69 {strides = array<i32>} : memref<1x128xf32, #tpu.memory_space<vmem>>, vector<1x128xf32>,
      %c0_35 = arith.constant 0 : index
      %c0_36 = arith.constant 0 : index
      %71 = vector.load %arg41[%c0_35, %c0_36] : memref<1x128xf32, #tpu.memory_space<vmem>>, vector<1x128xf32>
      %72 = arith.mulf %63, %63 : vector<32x128xf32>
      %cst_37 = arith.constant dense<0.000000e+00> : vector<128xf32>
      %73 = vector.multi_reduction <add>, %72, %cst_37 [0] : vector<32x128xf32> to vector<128xf32>
      %74 = vector.shape_cast %73 : vector<128xf32> to vector<1x128xf32>
      %75 = arith.addf %71, %74 : vector<1x128xf32>
      %c0_38 = arith.constant 0 : index
      %c0_39 = arith.constant 0 : index
      %76 = vector.load %arg41[%c0_38, %c0_39] : memref<1x128xf32, #tpu.memory_space<vmem>>, vector<1x128xf32>
      tpu.vector_store %arg41[%c0_38, %c0_39], %75 {strides = array<i32>} : memref<1x128xf32, #tpu.memory_space<vmem>>, vector<1x128xf32>,
      %77 = arith.extui %1 : i1 to i32
      %c0_i32_40 = arith.constant 0 : i32
      %78 = arith.cmpi ne, %77, %c0_i32_40 : i32
      scf.if %78 {
        %c0_41 = arith.constant 0 : index
        %c0_42 = arith.constant 0 : index
        %79 = vector.load %arg40[%c0_41, %c0_42] : memref<1x128xf32, #tpu.memory_space<vmem>>, vector<1x128xf32>
        %cst_43 = arith.constant 3.125000e-02 : f32
        %80 = vector.broadcast %cst_43 : f32 to vector<1x128xf32>
        %81 = arith.mulf %79, %80 : vector<1x128xf32>
        %c0_44 = arith.constant 0 : index
        %c0_45 = arith.constant 0 : index
        %82 = vector.load %arg41[%c0_44, %c0_45] : memref<1x128xf32, #tpu.memory_space<vmem>>, vector<1x128xf32>
        %cst_46 = arith.constant 3.125000e-02 : f32
        %83 = vector.broadcast %cst_46 : f32 to vector<1x128xf32>
        %84 = arith.mulf %82, %83 : vector<1x128xf32>
        %85 = arith.mulf %81, %81 : vector<1x128xf32>
        %86 = arith.subf %84, %85 : vector<1x128xf32>
        %cst_47 = arith.constant 0.000000e+00 : f32
        %87 = vector.broadcast %cst_47 : f32 to vector<1x128xf32>
        %88 = arith.maximumf %86, %87 : vector<1x128xf32>
        %c0_48 = arith.constant 0 : index
        %c0_49 = arith.constant 0 : index
        %89 = vector.load %arg21[%c0_48, %c0_49] : memref<1x128xf32, #tpu.memory_space<vmem>>, vector<1x128xf32>
        %cst_50 = arith.constant 9.99999974E-6 : f32
        %90 = vector.broadcast %cst_50 : f32 to vector<1x128xf32>
        %91 = arith.addf %88, %90 : vector<1x128xf32>
        %92 = math.rsqrt %91 : vector<1x128xf32>
        %93 = arith.mulf %89, %92 : vector<1x128xf32>
        %c0_51 = arith.constant 0 : index
        %c0_52 = arith.constant 0 : index
        %94 = vector.load %arg40[%c0_51, %c0_52] : memref<1x128xf32, #tpu.memory_space<vmem>>, vector<1x128xf32>
        tpu.vector_store %arg40[%c0_51, %c0_52], %93 {strides = array<i32>} : memref<1x128xf32, #tpu.memory_space<vmem>>, vector<1x128xf32>,
        %c0_53 = arith.constant 0 : index
        %c0_54 = arith.constant 0 : index
        %95 = vector.load %arg22[%c0_53, %c0_54] : memref<1x128xf32, #tpu.memory_space<vmem>>, vector<1x128xf32>
        %96 = arith.mulf %93, %81 : vector<1x128xf32>
        %97 = arith.subf %95, %96 : vector<1x128xf32>
        %c0_55 = arith.constant 0 : index
        %c0_56 = arith.constant 0 : index
        %98 = vector.load %arg41[%c0_55, %c0_56] : memref<1x128xf32, #tpu.memory_space<vmem>>, vector<1x128xf32>
        tpu.vector_store %arg41[%c0_55, %c0_56], %97 {strides = array<i32>} : memref<1x128xf32, #tpu.memory_space<vmem>>, vector<1x128xf32>,
      } else {
      }
    } else {
    }
    %c3_i32 = arith.constant 3 : i32
    %11 = arith.cmpi eq, %arg0, %c3_i32 : i32
    %12 = arith.extui %11 : i1 to i32
    %c0_i32_5 = arith.constant 0 : i32
    %13 = arith.cmpi ne, %12, %c0_i32_5 : i32
    scf.if %13 {
      %14 = arith.extui %0 : i1 to i32
      %c0_i32_6 = arith.constant 0 : i32
      %15 = arith.cmpi ne, %14, %c0_i32_6 : i32
      scf.if %15 {
        %cst_62 = arith.constant 0xFF800000 : f32
        %104 = vector.broadcast %cst_62 : f32 to vector<2x1024xf32>
        %c0_63 = arith.constant 0 : index
        %c0_64 = arith.constant 0 : index
        %105 = vector.load %arg36[%c0_63, %c0_64] : memref<2x1024xf32, #tpu.memory_space<vmem>>, vector<2x1024xf32>
        tpu.vector_store %arg36[%c0_63, %c0_64], %104 {strides = array<i32>} : memref<2x1024xf32, #tpu.memory_space<vmem>>, vector<2x1024xf32>,
        %cst_65 = arith.constant 0x7F800000 : f32
        %106 = vector.broadcast %cst_65 : f32 to vector<2x1024xf32>
        %c0_66 = arith.constant 0 : index
        %c0_67 = arith.constant 0 : index
        %107 = vector.load %arg37[%c0_66, %c0_67] : memref<2x1024xf32, #tpu.memory_space<vmem>>, vector<2x1024xf32>
        tpu.vector_store %arg37[%c0_66, %c0_67], %106 {strides = array<i32>} : memref<2x1024xf32, #tpu.memory_space<vmem>>, vector<2x1024xf32>,
      } else {
      }
      %c0 = arith.constant 0 : index
      %c0_7 = arith.constant 0 : index
      %c0_8 = arith.constant 0 : index
      %16 = vector.load %arg2[%c0, %c0_7, %c0_8] : memref<2x16x6xbf16, #tpu.memory_space<vmem>>, vector<2x16x6xbf16>
      %17 = vector.shape_cast %16 : vector<2x16x6xbf16> to vector<32x6xbf16>
      %c0_9 = arith.constant 0 : index
      %c0_10 = arith.constant 0 : index
      %18 = vector.load %arg15[%c0_9, %c0_10] : memref<6x64xf32, #tpu.memory_space<vmem>>, vector<6x64xf32>
      %19 = arith.truncf %18 : vector<6x64xf32> to vector<6x64xbf16>
      %cst = arith.constant dense<0.000000e+00> : vector<32x64xf32>
      %20 = tpu.matmul %17, %19, %cst {dimension_numbers = #tpu.dot_dimension_numbers<[1], [0], [0], [1], [0, 0, 1, 1], [], []>} : vector<32x6xbf16>, vector<6x64xbf16>, vector<32x64xf32> -> vector<32x64xf32>
      %21 = vector.extract_strided_slice %16 {offsets = [0, 0, 0], sizes = [2, 16, 1], strides = [1, 1, 1]} : vector<2x16x6xbf16> to vector<2x16x1xbf16>
      %22 = arith.extf %21 : vector<2x16x1xbf16> to vector<2x16x1xf32>
      %c0_11 = arith.constant 0 : index
      %c0_12 = arith.constant 0 : index
      %c0_13 = arith.constant 0 : index
      %23 = vector.load %arg35[%c0_11, %c0_12, %c0_13] : memref<3x2x64xf32, #tpu.memory_space<vmem>>, vector<1x2x64xf32>
      %24 = vector.shape_cast %23 : vector<1x2x64xf32> to vector<2x64xf32>
      %25 = vector.shape_cast %24 : vector<2x64xf32> to vector<2x1x64xf32>
      %26 = vector.broadcast %22 : vector<2x16x1xf32> to vector<2x16x64xf32>
      %27 = vector.broadcast %25 : vector<2x1x64xf32> to vector<2x16x64xf32>
      %28 = arith.mulf %26, %27 : vector<2x16x64xf32>
      %29 = vector.extract_strided_slice %16 {offsets = [0, 0, 1], sizes = [2, 16, 1], strides = [1, 1, 1]} : vector<2x16x6xbf16> to vector<2x16x1xbf16>
      %30 = arith.extf %29 : vector<2x16x1xbf16> to vector<2x16x1xf32>
      %c1 = arith.constant 1 : index
      %c0_14 = arith.constant 0 : index
      %c0_15 = arith.constant 0 : index
      %31 = vector.load %arg35[%c1, %c0_14, %c0_15] : memref<3x2x64xf32, #tpu.memory_space<vmem>>, vector<1x2x64xf32>
      %32 = vector.shape_cast %31 : vector<1x2x64xf32> to vector<2x64xf32>
      %33 = vector.shape_cast %32 : vector<2x64xf32> to vector<2x1x64xf32>
      %34 = vector.broadcast %30 : vector<2x16x1xf32> to vector<2x16x64xf32>
      %35 = vector.broadcast %33 : vector<2x1x64xf32> to vector<2x16x64xf32>
      %36 = arith.mulf %34, %35 : vector<2x16x64xf32>
      %37 = arith.addf %28, %36 : vector<2x16x64xf32>
      %38 = vector.extract_strided_slice %16 {offsets = [0, 0, 2], sizes = [2, 16, 1], strides = [1, 1, 1]} : vector<2x16x6xbf16> to vector<2x16x1xbf16>
      %39 = arith.extf %38 : vector<2x16x1xbf16> to vector<2x16x1xf32>
      %c2 = arith.constant 2 : index
      %c0_16 = arith.constant 0 : index
      %c0_17 = arith.constant 0 : index
      %40 = vector.load %arg35[%c2, %c0_16, %c0_17] : memref<3x2x64xf32, #tpu.memory_space<vmem>>, vector<1x2x64xf32>
      %41 = vector.shape_cast %40 : vector<1x2x64xf32> to vector<2x64xf32>
      %42 = vector.shape_cast %41 : vector<2x64xf32> to vector<2x1x64xf32>
      %43 = vector.broadcast %39 : vector<2x16x1xf32> to vector<2x16x64xf32>
      %44 = vector.broadcast %42 : vector<2x1x64xf32> to vector<2x16x64xf32>
      %45 = arith.mulf %43, %44 : vector<2x16x64xf32>
      %46 = arith.addf %37, %45 : vector<2x16x64xf32>
      %47 = vector.shape_cast %46 : vector<2x16x64xf32> to vector<32x64xf32>
      %48 = arith.addf %20, %47 : vector<32x64xf32>
      %c0_18 = arith.constant 0 : index
      %c0_19 = arith.constant 0 : index
      %49 = vector.load %arg16[%c0_18, %c0_19] : memref<1x64xf32, #tpu.memory_space<vmem>>, vector<1x64xf32>
      %50 = vector.broadcast %49 : vector<1x64xf32> to vector<32x64xf32>
      %51 = arith.addf %48, %50 : vector<32x64xf32>
      %c0_20 = arith.constant 0 : index
      %c0_21 = arith.constant 0 : index
      %52 = vector.load %arg38[%c0_20, %c0_21] : memref<1x64xf32, #tpu.memory_space<vmem>>, vector<1x64xf32>
      %53 = vector.broadcast %52 : vector<1x64xf32> to vector<32x64xf32>
      %54 = arith.mulf %51, %53 : vector<32x64xf32>
      %c0_22 = arith.constant 0 : index
      %c0_23 = arith.constant 0 : index
      %55 = vector.load %arg39[%c0_22, %c0_23] : memref<1x64xf32, #tpu.memory_space<vmem>>, vector<1x64xf32>
      %56 = vector.broadcast %55 : vector<1x64xf32> to vector<32x64xf32>
      %57 = arith.addf %54, %56 : vector<32x64xf32>
      %cst_24 = arith.constant 0.000000e+00 : f32
      %58 = vector.broadcast %cst_24 : f32 to vector<32x64xf32>
      %59 = arith.maximumf %57, %58 : vector<32x64xf32>
      %60 = arith.truncf %59 : vector<32x64xf32> to vector<32x64xbf16>
      %c0_25 = arith.constant 0 : index
      %c0_26 = arith.constant 0 : index
      %61 = vector.load %arg19[%c0_25, %c0_26] : memref<64x128xbf16, #tpu.memory_space<vmem>>, vector<64x128xbf16>
      %cst_27 = arith.constant dense<0.000000e+00> : vector<32x128xf32>
      %62 = tpu.matmul %60, %61, %cst_27 {dimension_numbers = #tpu.dot_dimension_numbers<[1], [0], [0], [1], [0, 0, 1, 1], [], []>} : vector<32x64xbf16>, vector<64x128xbf16>, vector<32x128xf32> -> vector<32x128xf32>
      %c0_28 = arith.constant 0 : index
      %c0_29 = arith.constant 0 : index
      %63 = vector.load %arg20[%c0_28, %c0_29] : memref<1x128xf32, #tpu.memory_space<vmem>>, vector<1x128xf32>
      %64 = vector.broadcast %63 : vector<1x128xf32> to vector<32x128xf32>
      %65 = arith.addf %62, %64 : vector<32x128xf32>
      %c0_30 = arith.constant 0 : index
      %c0_31 = arith.constant 0 : index
      %66 = vector.load %arg40[%c0_30, %c0_31] : memref<1x128xf32, #tpu.memory_space<vmem>>, vector<1x128xf32>
      %67 = vector.broadcast %66 : vector<1x128xf32> to vector<32x128xf32>
      %68 = arith.mulf %65, %67 : vector<32x128xf32>
      %c0_32 = arith.constant 0 : index
      %c0_33 = arith.constant 0 : index
      %69 = vector.load %arg41[%c0_32, %c0_33] : memref<1x128xf32, #tpu.memory_space<vmem>>, vector<1x128xf32>
      %70 = vector.broadcast %69 : vector<1x128xf32> to vector<32x128xf32>
      %71 = arith.addf %68, %70 : vector<32x128xf32>
      %cst_34 = arith.constant 0.000000e+00 : f32
      %72 = vector.broadcast %cst_34 : f32 to vector<32x128xf32>
      %73 = arith.maximumf %71, %72 : vector<32x128xf32>
      %74 = arith.truncf %73 : vector<32x128xf32> to vector<32x128xbf16>
      %c0_35 = arith.constant 0 : index
      %c0_36 = arith.constant 0 : index
      %75 = vector.load %arg23[%c0_35, %c0_36] : memref<128x1024xbf16, #tpu.memory_space<vmem>>, vector<128x1024xbf16>
      %cst_37 = arith.constant dense<0.000000e+00> : vector<32x1024xf32>
      %76 = tpu.matmul %74, %75, %cst_37 {dimension_numbers = #tpu.dot_dimension_numbers<[1], [0], [0], [1], [0, 0, 1, 1], [], []>} : vector<32x128xbf16>, vector<128x1024xbf16>, vector<32x1024xf32> -> vector<32x1024xf32>
      %c0_38 = arith.constant 0 : index
      %c0_39 = arith.constant 0 : index
      %77 = vector.load %arg24[%c0_38, %c0_39] : memref<1x1024xf32, #tpu.memory_space<vmem>>, vector<1x1024xf32>
      %78 = vector.broadcast %77 : vector<1x1024xf32> to vector<32x1024xf32>
      %79 = arith.addf %76, %78 : vector<32x1024xf32>
      %80 = arith.extui %0 : i1 to i32
      %c0_i32_40 = arith.constant 0 : i32
      %81 = arith.cmpi ne, %80, %c0_i32_40 : i32
      scf.if %81 {
        %cst_62 = arith.constant 0.000000e+00 : f32
        %104 = vector.broadcast %cst_62 : f32 to vector<1x1024xf32>
        %c0_63 = arith.constant 0 : index
        %c0_64 = arith.constant 0 : index
        %105 = vector.load %arg42[%c0_63, %c0_64] : memref<1x1024xf32, #tpu.memory_space<vmem>>, vector<1x1024xf32>
        tpu.vector_store %arg42[%c0_63, %c0_64], %104 {strides = array<i32>} : memref<1x1024xf32, #tpu.memory_space<vmem>>, vector<1x1024xf32>,
        %cst_65 = arith.constant 0.000000e+00 : f32
        %106 = vector.broadcast %cst_65 : f32 to vector<1x1024xf32>
        %c0_66 = arith.constant 0 : index
        %c0_67 = arith.constant 0 : index
        %107 = vector.load %arg43[%c0_66, %c0_67] : memref<1x1024xf32, #tpu.memory_space<vmem>>, vector<1x1024xf32>
        tpu.vector_store %arg43[%c0_66, %c0_67], %106 {strides = array<i32>} : memref<1x1024xf32, #tpu.memory_space<vmem>>, vector<1x1024xf32>,
      } else {
      }
      %c0_41 = arith.constant 0 : index
      %c0_42 = arith.constant 0 : index
      %82 = vector.load %arg42[%c0_41, %c0_42] : memref<1x1024xf32, #tpu.memory_space<vmem>>, vector<1x1024xf32>
      %cst_43 = arith.constant dense<0.000000e+00> : vector<1024xf32>
      %83 = vector.multi_reduction <add>, %79, %cst_43 [0] : vector<32x1024xf32> to vector<1024xf32>
      %84 = vector.shape_cast %83 : vector<1024xf32> to vector<1x1024xf32>
      %85 = arith.addf %82, %84 : vector<1x1024xf32>
      %c0_44 = arith.constant 0 : index
      %c0_45 = arith.constant 0 : index
      %86 = vector.load %arg42[%c0_44, %c0_45] : memref<1x1024xf32, #tpu.memory_space<vmem>>, vector<1x1024xf32>
      tpu.vector_store %arg42[%c0_44, %c0_45], %85 {strides = array<i32>} : memref<1x1024xf32, #tpu.memory_space<vmem>>, vector<1x1024xf32>,
      %c0_46 = arith.constant 0 : index
      %c0_47 = arith.constant 0 : index
      %87 = vector.load %arg43[%c0_46, %c0_47] : memref<1x1024xf32, #tpu.memory_space<vmem>>, vector<1x1024xf32>
      %88 = arith.mulf %79, %79 : vector<32x1024xf32>
      %cst_48 = arith.constant dense<0.000000e+00> : vector<1024xf32>
      %89 = vector.multi_reduction <add>, %88, %cst_48 [0] : vector<32x1024xf32> to vector<1024xf32>
      %90 = vector.shape_cast %89 : vector<1024xf32> to vector<1x1024xf32>
      %91 = arith.addf %87, %90 : vector<1x1024xf32>
      %c0_49 = arith.constant 0 : index
      %c0_50 = arith.constant 0 : index
      %92 = vector.load %arg43[%c0_49, %c0_50] : memref<1x1024xf32, #tpu.memory_space<vmem>>, vector<1x1024xf32>
      tpu.vector_store %arg43[%c0_49, %c0_50], %91 {strides = array<i32>} : memref<1x1024xf32, #tpu.memory_space<vmem>>, vector<1x1024xf32>,
      %93 = vector.shape_cast %79 : vector<32x1024xf32> to vector<2x16x1024xf32>
      %c0_51 = arith.constant 0 : index
      %c0_52 = arith.constant 0 : index
      %94 = vector.load %arg36[%c0_51, %c0_52] : memref<2x1024xf32, #tpu.memory_space<vmem>>, vector<2x1024xf32>
      %cst_53 = arith.constant dense<0xFF800000> : vector<2x1024xf32>
      %95 = vector.multi_reduction <maximumf>, %93, %cst_53 [1] : vector<2x16x1024xf32> to vector<2x1024xf32>
      %96 = arith.maximumf %94, %95 : vector<2x1024xf32>
      %c0_54 = arith.constant 0 : index
      %c0_55 = arith.constant 0 : index
      %97 = vector.load %arg36[%c0_54, %c0_55] : memref<2x1024xf32, #tpu.memory_space<vmem>>, vector<2x1024xf32>
      tpu.vector_store %arg36[%c0_54, %c0_55], %96 {strides = array<i32>} : memref<2x1024xf32, #tpu.memory_space<vmem>>, vector<2x1024xf32>,
      %c0_56 = arith.constant 0 : index
      %c0_57 = arith.constant 0 : index
      %98 = vector.load %arg37[%c0_56, %c0_57] : memref<2x1024xf32, #tpu.memory_space<vmem>>, vector<2x1024xf32>
      %cst_58 = arith.constant dense<0x7F800000> : vector<2x1024xf32>
      %99 = vector.multi_reduction <minimumf>, %93, %cst_58 [1] : vector<2x16x1024xf32> to vector<2x1024xf32>
      %100 = arith.minimumf %98, %99 : vector<2x1024xf32>
      %c0_59 = arith.constant 0 : index
      %c0_60 = arith.constant 0 : index
      %101 = vector.load %arg37[%c0_59, %c0_60] : memref<2x1024xf32, #tpu.memory_space<vmem>>, vector<2x1024xf32>
      tpu.vector_store %arg37[%c0_59, %c0_60], %100 {strides = array<i32>} : memref<2x1024xf32, #tpu.memory_space<vmem>>, vector<2x1024xf32>,
      %102 = arith.extui %1 : i1 to i32
      %c0_i32_61 = arith.constant 0 : i32
      %103 = arith.cmpi ne, %102, %c0_i32_61 : i32
      scf.if %103 {
        %c0_62 = arith.constant 0 : index
        %c0_63 = arith.constant 0 : index
        %104 = vector.load %arg42[%c0_62, %c0_63] : memref<1x1024xf32, #tpu.memory_space<vmem>>, vector<1x1024xf32>
        %cst_64 = arith.constant 3.125000e-02 : f32
        %105 = vector.broadcast %cst_64 : f32 to vector<1x1024xf32>
        %106 = arith.mulf %104, %105 : vector<1x1024xf32>
        %c0_65 = arith.constant 0 : index
        %c0_66 = arith.constant 0 : index
        %107 = vector.load %arg43[%c0_65, %c0_66] : memref<1x1024xf32, #tpu.memory_space<vmem>>, vector<1x1024xf32>
        %cst_67 = arith.constant 3.125000e-02 : f32
        %108 = vector.broadcast %cst_67 : f32 to vector<1x1024xf32>
        %109 = arith.mulf %107, %108 : vector<1x1024xf32>
        %110 = arith.mulf %106, %106 : vector<1x1024xf32>
        %111 = arith.subf %109, %110 : vector<1x1024xf32>
        %cst_68 = arith.constant 0.000000e+00 : f32
        %112 = vector.broadcast %cst_68 : f32 to vector<1x1024xf32>
        %113 = arith.maximumf %111, %112 : vector<1x1024xf32>
        %c0_69 = arith.constant 0 : index
        %c0_70 = arith.constant 0 : index
        %114 = vector.load %arg25[%c0_69, %c0_70] : memref<1x1024xf32, #tpu.memory_space<vmem>>, vector<1x1024xf32>
        %cst_71 = arith.constant 9.99999974E-6 : f32
        %115 = vector.broadcast %cst_71 : f32 to vector<1x1024xf32>
        %116 = arith.addf %113, %115 : vector<1x1024xf32>
        %117 = math.rsqrt %116 : vector<1x1024xf32>
        %118 = arith.mulf %114, %117 : vector<1x1024xf32>
        %c0_72 = arith.constant 0 : index
        %c0_73 = arith.constant 0 : index
        %119 = vector.load %arg26[%c0_72, %c0_73] : memref<1x1024xf32, #tpu.memory_space<vmem>>, vector<1x1024xf32>
        %120 = arith.mulf %118, %106 : vector<1x1024xf32>
        %121 = arith.subf %119, %120 : vector<1x1024xf32>
        %cst_74 = arith.constant 0.000000e+00 : f32
        %122 = vector.broadcast %cst_74 : f32 to vector<1x1024xf32>
        %123 = arith.cmpf oge, %118, %122 : vector<1x1024xf32>
        %c0_75 = arith.constant 0 : index
        %c0_76 = arith.constant 0 : index
        %124 = vector.load %arg36[%c0_75, %c0_76] : memref<2x1024xf32, #tpu.memory_space<vmem>>, vector<2x1024xf32>
        %c0_77 = arith.constant 0 : index
        %c0_78 = arith.constant 0 : index
        %125 = vector.load %arg37[%c0_77, %c0_78] : memref<2x1024xf32, #tpu.memory_space<vmem>>, vector<2x1024xf32>
        %126 = vector.shape_cast %123 : vector<1x1024xi1> to vector<1x1024xi1>
        %127 = vector.broadcast %126 : vector<1x1024xi1> to vector<2x1024xi1>
        %128 = arith.select %127, %124, %125 : vector<2x1024xi1>, vector<2x1024xf32>
        %129 = vector.broadcast %118 : vector<1x1024xf32> to vector<2x1024xf32>
        %130 = arith.mulf %129, %128 : vector<2x1024xf32>
        %131 = vector.broadcast %121 : vector<1x1024xf32> to vector<2x1024xf32>
        %132 = arith.addf %130, %131 : vector<2x1024xf32>
        %cst_79 = arith.constant 0.000000e+00 : f32
        %133 = vector.broadcast %cst_79 : f32 to vector<2x1024xf32>
        %134 = arith.maximumf %132, %133 : vector<2x1024xf32>
        %135 = arith.truncf %134 : vector<2x1024xf32> to vector<2x1024xbf16>
        %c0_80 = arith.constant 0 : index
        %c0_81 = arith.constant 0 : index
        %136 = vector.load %arg27[%c0_80, %c0_81] : memref<1024x512xbf16, #tpu.memory_space<vmem>>, vector<1024x512xbf16>
        %cst_82 = arith.constant dense<0.000000e+00> : vector<2x512xf32>
        %137 = tpu.matmul %135, %136, %cst_82 {dimension_numbers = #tpu.dot_dimension_numbers<[1], [0], [0], [1], [0, 0, 1, 1], [], []>} : vector<2x1024xbf16>, vector<1024x512xbf16>, vector<2x512xf32> -> vector<2x512xf32>
        %c0_83 = arith.constant 0 : index
        %c0_84 = arith.constant 0 : index
        %138 = vector.load %arg28[%c0_83, %c0_84] : memref<1x512xf32, #tpu.memory_space<vmem>>, vector<1x512xf32>
        %139 = vector.broadcast %138 : vector<1x512xf32> to vector<2x512xf32>
        %140 = arith.addf %137, %139 : vector<2x512xf32>
        %cst_85 = arith.constant 0.000000e+00 : f32
        %141 = vector.broadcast %cst_85 : f32 to vector<2x512xf32>
        %142 = arith.maximumf %140, %141 : vector<2x512xf32>
        %143 = arith.truncf %142 : vector<2x512xf32> to vector<2x512xbf16>
        %c0_86 = arith.constant 0 : index
        %c0_87 = arith.constant 0 : index
        %144 = vector.load %arg29[%c0_86, %c0_87] : memref<512x256xbf16, #tpu.memory_space<vmem>>, vector<512x256xbf16>
        %cst_88 = arith.constant dense<0.000000e+00> : vector<2x256xf32>
        %145 = tpu.matmul %143, %144, %cst_88 {dimension_numbers = #tpu.dot_dimension_numbers<[1], [0], [0], [1], [0, 0, 1, 1], [], []>} : vector<2x512xbf16>, vector<512x256xbf16>, vector<2x256xf32> -> vector<2x256xf32>
        %c0_89 = arith.constant 0 : index
        %c0_90 = arith.constant 0 : index
        %146 = vector.load %arg30[%c0_89, %c0_90] : memref<1x256xf32, #tpu.memory_space<vmem>>, vector<1x256xf32>
        %147 = vector.broadcast %146 : vector<1x256xf32> to vector<2x256xf32>
        %148 = arith.addf %145, %147 : vector<2x256xf32>
        %cst_91 = arith.constant 0.000000e+00 : f32
        %149 = vector.broadcast %cst_91 : f32 to vector<2x256xf32>
        %150 = arith.maximumf %148, %149 : vector<2x256xf32>
        %151 = arith.truncf %150 : vector<2x256xf32> to vector<2x256xbf16>
        %c0_92 = arith.constant 0 : index
        %c0_93 = arith.constant 0 : index
        %152 = vector.load %arg31[%c0_92, %c0_93] : memref<256x2xbf16, #tpu.memory_space<vmem>>, vector<256x2xbf16>
        %cst_94 = arith.constant dense<0.000000e+00> : vector<2x2xf32>
        %153 = tpu.matmul %151, %152, %cst_94 {dimension_numbers = #tpu.dot_dimension_numbers<[1], [0], [0], [1], [0, 0, 1, 1], [], []>} : vector<2x256xbf16>, vector<256x2xbf16>, vector<2x2xf32> -> vector<2x2xf32>
        %c0_95 = arith.constant 0 : index
        %c0_96 = arith.constant 0 : index
        %154 = vector.load %arg32[%c0_95, %c0_96] : memref<1x2xf32, #tpu.memory_space<vmem>>, vector<1x2xf32>
        %155 = vector.broadcast %154 : vector<1x2xf32> to vector<2x2xf32>
        %156 = arith.addf %153, %155 : vector<2x2xf32>
        %c0_97 = arith.constant 0 : index
        %c0_98 = arith.constant 0 : index
        %157 = vector.load %arg33[%c0_97, %c0_98] : memref<2x2xf32, #tpu.memory_space<vmem>>, vector<2x2xf32>
        tpu.vector_store %arg33[%c0_97, %c0_98], %156 {strides = array<i32>} : memref<2x2xf32, #tpu.memory_space<vmem>>, vector<2x2xf32>,
      } else {
      }
    } else {
    }
    return
  }
  func.func @transform_0(%arg0: i32, %arg1: i32) -> (i32, i32, i32) {
    %c0_i32 = arith.constant 0 : i32
    %c0_i32_0 = arith.constant 0 : i32
    %c0_i32_1 = arith.constant 0 : i32
    return %c0_i32, %arg1, %c0_i32_0 : i32, i32, i32
  }
  func.func @transform_1(%arg0: i32, %arg1: i32) -> (i32, i32) {
    %c0_i32 = arith.constant 0 : i32
    %c0_i32_0 = arith.constant 0 : i32
    %c0_i32_1 = arith.constant 0 : i32
    return %c0_i32, %c0_i32_0 : i32, i32
  }
  func.func @transform_2(%arg0: i32, %arg1: i32) -> (i32, i32) {
    %c0_i32 = arith.constant 0 : i32
    %c0_i32_0 = arith.constant 0 : i32
    %c0_i32_1 = arith.constant 0 : i32
    return %c0_i32, %c0_i32_0 : i32, i32
  }
  func.func @transform_3(%arg0: i32, %arg1: i32) -> (i32, i32) {
    %c0_i32 = arith.constant 0 : i32
    %c0_i32_0 = arith.constant 0 : i32
    %c0_i32_1 = arith.constant 0 : i32
    return %c0_i32, %c0_i32_0 : i32, i32
  }
  func.func @transform_4(%arg0: i32, %arg1: i32) -> (i32, i32) {
    %c0_i32 = arith.constant 0 : i32
    %c0_i32_0 = arith.constant 0 : i32
    %c0_i32_1 = arith.constant 0 : i32
    return %c0_i32, %c0_i32_0 : i32, i32
  }
  func.func @transform_5(%arg0: i32, %arg1: i32) -> (i32, i32) {
    %c0_i32 = arith.constant 0 : i32
    %c0_i32_0 = arith.constant 0 : i32
    %c0_i32_1 = arith.constant 0 : i32
    return %c0_i32, %c0_i32_0 : i32, i32
  }
  func.func @transform_6(%arg0: i32, %arg1: i32) -> (i32, i32) {
    %c0_i32 = arith.constant 0 : i32
    %c0_i32_0 = arith.constant 0 : i32
    %c0_i32_1 = arith.constant 0 : i32
    return %c0_i32, %c0_i32_0 : i32, i32
  }
  func.func @transform_7(%arg0: i32, %arg1: i32) -> (i32, i32) {
    %c0_i32 = arith.constant 0 : i32
    %c0_i32_0 = arith.constant 0 : i32
    %c0_i32_1 = arith.constant 0 : i32
    return %c0_i32, %c0_i32_0 : i32, i32
  }
  func.func @transform_8(%arg0: i32, %arg1: i32) -> (i32, i32) {
    %c0_i32 = arith.constant 0 : i32
    %c0_i32_0 = arith.constant 0 : i32
    %c0_i32_1 = arith.constant 0 : i32
    return %c0_i32, %c0_i32_0 : i32, i32
  }
  func.func @transform_9(%arg0: i32, %arg1: i32) -> (i32, i32) {
    %c0_i32 = arith.constant 0 : i32
    %c0_i32_0 = arith.constant 0 : i32
    %c0_i32_1 = arith.constant 0 : i32
    return %c0_i32, %c0_i32_0 : i32, i32
  }
  func.func @transform_10(%arg0: i32, %arg1: i32) -> (i32, i32) {
    %c0_i32 = arith.constant 0 : i32
    %c0_i32_0 = arith.constant 0 : i32
    %c0_i32_1 = arith.constant 0 : i32
    return %c0_i32, %c0_i32_0 : i32, i32
  }
  func.func @transform_11(%arg0: i32, %arg1: i32) -> (i32, i32) {
    %c0_i32 = arith.constant 0 : i32
    %c0_i32_0 = arith.constant 0 : i32
    %c0_i32_1 = arith.constant 0 : i32
    return %c0_i32, %c0_i32_0 : i32, i32
  }
  func.func @transform_12(%arg0: i32, %arg1: i32) -> (i32, i32) {
    %c0_i32 = arith.constant 0 : i32
    %c0_i32_0 = arith.constant 0 : i32
    %c0_i32_1 = arith.constant 0 : i32
    return %c0_i32, %c0_i32_0 : i32, i32
  }
  func.func @transform_13(%arg0: i32, %arg1: i32) -> (i32, i32) {
    %c0_i32 = arith.constant 0 : i32
    %c0_i32_0 = arith.constant 0 : i32
    %c0_i32_1 = arith.constant 0 : i32
    return %c0_i32, %c0_i32_0 : i32, i32
  }
  func.func @transform_14(%arg0: i32, %arg1: i32) -> (i32, i32) {
    %c0_i32 = arith.constant 0 : i32
    %c0_i32_0 = arith.constant 0 : i32
    %c0_i32_1 = arith.constant 0 : i32
    return %c0_i32, %c0_i32_0 : i32, i32
  }
  func.func @transform_15(%arg0: i32, %arg1: i32) -> (i32, i32) {
    %c0_i32 = arith.constant 0 : i32
    %c0_i32_0 = arith.constant 0 : i32
    %c0_i32_1 = arith.constant 0 : i32
    return %c0_i32, %c0_i32_0 : i32, i32
  }
  func.func @transform_16(%arg0: i32, %arg1: i32) -> (i32, i32) {
    %c0_i32 = arith.constant 0 : i32
    %c0_i32_0 = arith.constant 0 : i32
    %c0_i32_1 = arith.constant 0 : i32
    return %c0_i32, %c0_i32_0 : i32, i32
  }
  func.func @transform_17(%arg0: i32, %arg1: i32) -> (i32, i32) {
    %c0_i32 = arith.constant 0 : i32
    %c0_i32_0 = arith.constant 0 : i32
    %c0_i32_1 = arith.constant 0 : i32
    return %c0_i32, %c0_i32_0 : i32, i32
  }
  func.func @transform_18(%arg0: i32, %arg1: i32) -> (i32, i32) {
    %c0_i32 = arith.constant 0 : i32
    %c0_i32_0 = arith.constant 0 : i32
    %c0_i32_1 = arith.constant 0 : i32
    return %c0_i32, %c0_i32_0 : i32, i32
  }
  func.func @transform_19(%arg0: i32, %arg1: i32) -> (i32, i32) {
    %c0_i32 = arith.constant 0 : i32
    %c0_i32_0 = arith.constant 0 : i32
    %c0_i32_1 = arith.constant 0 : i32
    return %c0_i32, %c0_i32_0 : i32, i32
  }
  func.func @transform_20(%arg0: i32, %arg1: i32) -> (i32, i32) {
    %c0_i32 = arith.constant 0 : i32
    %c0_i32_0 = arith.constant 0 : i32
    %c0_i32_1 = arith.constant 0 : i32
    return %c0_i32, %c0_i32_0 : i32, i32
  }
  func.func @transform_21(%arg0: i32, %arg1: i32) -> (i32, i32) {
    %c0_i32 = arith.constant 0 : i32
    %c0_i32_0 = arith.constant 0 : i32
    %c0_i32_1 = arith.constant 0 : i32
    return %c0_i32, %c0_i32_0 : i32, i32
  }
  func.func @transform_22(%arg0: i32, %arg1: i32) -> (i32, i32) {
    %c0_i32 = arith.constant 0 : i32
    %c0_i32_0 = arith.constant 0 : i32
    %c0_i32_1 = arith.constant 0 : i32
    return %c0_i32, %c0_i32_0 : i32, i32
  }
  func.func @transform_23(%arg0: i32, %arg1: i32) -> (i32, i32) {
    %c0_i32 = arith.constant 0 : i32
    %c0_i32_0 = arith.constant 0 : i32
    %c0_i32_1 = arith.constant 0 : i32
    return %c0_i32, %c0_i32_0 : i32, i32
  }
  func.func @transform_24(%arg0: i32, %arg1: i32) -> (i32, i32) {
    %c0_i32 = arith.constant 0 : i32
    %c0_i32_0 = arith.constant 0 : i32
    %c0_i32_1 = arith.constant 0 : i32
    return %c0_i32, %c0_i32_0 : i32, i32
  }
  func.func @transform_25(%arg0: i32, %arg1: i32) -> (i32, i32) {
    %c0_i32 = arith.constant 0 : i32
    %c0_i32_0 = arith.constant 0 : i32
    %c0_i32_1 = arith.constant 0 : i32
    return %c0_i32, %c0_i32_0 : i32, i32
  }
  func.func @transform_26(%arg0: i32, %arg1: i32) -> (i32, i32) {
    %c0_i32 = arith.constant 0 : i32
    %c0_i32_0 = arith.constant 0 : i32
    %c0_i32_1 = arith.constant 0 : i32
    return %c0_i32, %c0_i32_0 : i32, i32
  }
  func.func @transform_27(%arg0: i32, %arg1: i32) -> (i32, i32) {
    %c0_i32 = arith.constant 0 : i32
    %c0_i32_0 = arith.constant 0 : i32
    %c0_i32_1 = arith.constant 0 : i32
    return %c0_i32, %c0_i32_0 : i32, i32
  }
  func.func @transform_28(%arg0: i32, %arg1: i32) -> (i32, i32) {
    %c0_i32 = arith.constant 0 : i32
    %c0_i32_0 = arith.constant 0 : i32
    %c0_i32_1 = arith.constant 0 : i32
    return %c0_i32, %c0_i32_0 : i32, i32
  }
  func.func @transform_29(%arg0: i32, %arg1: i32) -> (i32, i32) {
    %c0_i32 = arith.constant 0 : i32
    %c0_i32_0 = arith.constant 0 : i32
    %c0_i32_1 = arith.constant 0 : i32
    return %c0_i32, %c0_i32_0 : i32, i32
  }
  func.func @transform_30(%arg0: i32, %arg1: i32) -> (i32, i32) {
    %c0_i32 = arith.constant 0 : i32
    %c0_i32_0 = arith.constant 0 : i32
    %c0_i32_1 = arith.constant 0 : i32
    return %c0_i32, %c0_i32_0 : i32, i32
  }
  func.func @transform_31(%arg0: i32, %arg1: i32) -> (i32, i32) {
    %c0_i32 = arith.constant 0 : i32
    %c0_i32_0 = arith.constant 0 : i32
    %c0_i32_1 = arith.constant 0 : i32
    return %c0_i32, %c0_i32_0 : i32, i32
  }
}

</mosaic_0001>

<bundles_post_ra>
// kernel: tpu_custom_call.1
= control target key start
LH: loop header
LB: loop body
LE: loop exit
PB: predicated region body
PF: predicated region fallthrough
CT: control target
= control target key end

     0   :  { %s13009_s6 = smov 1   ;;  %s13010_s10 = smov 2   ;;  %s14342_s0 = inlined_call_operand.smem [shape: u32[32], index: -1, kind: input, shape index: {}] }
   0x1   :  { %s13087_s5 = sld [smem:[%s14342_s0]]   ;;  %s13011_s14 = smov 3  }
   0x2   :  { %s13092_s9 = sld [smem:[%s14342_s0 + %s13009_s6]]   ;;  %s13012_s18 = smov 4  }
   0x3   :  { %s13097_s13 = sld [smem:[%s14342_s0 + %s13010_s10]]   ;;  %s13013_s22 = smov 5  }
   0x4   :  { %s13102_s17 = sld [smem:[%s14342_s0 + %s13011_s14]]   ;;  %s13014_s26 = smov 6  }
   0x5   :  { %s13107_s21 = sld [smem:[%s14342_s0 + %s13012_s18]]   ;;  %s13015_s30 = smov 7  }
   0x6   :  { %s13112_s25 = sld [smem:[%s14342_s0 + %s13013_s22]]   ;;  %s13016_s4 = smov 8  }
   0x7   :  { %s13117_s29 = sld [smem:[%s14342_s0 + %s13014_s26]]   ;;  %s13017_s10 = smov 9  }
   0x8   :  { %s13122_s3 = sld [smem:[%s14342_s0 + %s13015_s30]]   ;;  %s13018_s15 = smov 10  }
   0x9   :  { %s13127_s8 = sld [smem:[%s14342_s0 + %s13016_s4]]   ;;  %s13019_s20 = smov 11  }
   0xa   :  { %s13132_s14 = sld [smem:[%s14342_s0 + %s13017_s10]]   ;;  %s13020_s26 = smov 12  }
   0xb   :  { %s13137_s19 = sld [smem:[%s14342_s0 + %s13018_s15]]   ;;  %s13021_s1 = smov 13  }
   0xc   :  { %s13142_s24 = sld [smem:[%s14342_s0 + %s13019_s20]]   ;;  %s13022_s7 = smov 14  }
   0xd   :  { %s13147_s30 = sld [smem:[%s14342_s0 + %s13020_s26]]   ;;  %s13023_s15 = smov 15  }
   0xe   :  { %14375 = sst [smem:[#allocation29_spill]] %s13122_s3  ;;  %s13024_s22 = smov 16  }
   0xf   :  { %s13152_s6 = sld [smem:[%s14342_s0 + %s13021_s1]]   ;;  %s13025_s28 = smov 17  }
  0x10   :  { %s13157_s12 = sld [smem:[%s14342_s0 + %s13022_s7]]   ;;  %s13026_s7 = smov 18  }
  0x11   :  { %14376 = sst [smem:[#allocation30_spill]] %s13137_s19 }
  0x12   :  { %s13162_s20 = sld [smem:[%s14342_s0 + %s13023_s15]]   ;;  %s13027_s15 = smov 19  }
  0x13   :  { %14377 = sst [smem:[#allocation31_spill]] %s13147_s30 }
  0x14   :  { %s13167_s27 = sld [smem:[%s14342_s0 + %s13024_s22]]   ;;  %s13028_s22 = smov 20  }
  0x15   :  { %14378 = sst [smem:[#allocation32_spill]] %s13152_s6 }
  0x16   :  { %14379 = sst [smem:[#allocation33_spill]] %s13157_s12 }
  0x17   :  { %s13172_s4 = sld [smem:[%s14342_s0 + %s13025_s28]]   ;;  %s13029_s28 = smov 21  }
  0x18   :  { %14380 = sst [smem:[#allocation34_spill]] %s13162_s20 }
  0x19   :  { %s13177_s12 = sld [smem:[%s14342_s0 + %s13026_s7]]   ;;  %s13030_s7 = smov 22  }
  0x1a   :  { %14381 = sst [smem:[#allocation35_spill]] %s13167_s27 }
  0x1b   :  { %s13182_s20 = sld [smem:[%s14342_s0 + %s13027_s15]]   ;;  %s13031_s15 = smov 23  }
  0x1c   :  { %s13187_s27 = sld [smem:[%s14342_s0 + %s13028_s22]]   ;;  %s13032_s22 = smov 24  }
  0x1d   :  { %14382 = sst [smem:[#allocation36_spill]] %s13172_s4 }
  0x1e   :  { %s13192_s4 = sld [smem:[%s14342_s0 + %s13029_s28]]   ;;  %s13033_s28 = smov 25  }
  0x1f   :  { %14383 = sst [smem:[#allocation37_spill]] %s13177_s12 }
  0x20   :  { %s13197_s12 = sld [smem:[%s14342_s0 + %s13030_s7]]   ;;  %s13034_s7 = smov 26  }
  0x21   :  { %14384 = sst [smem:[#allocation38_spill]] %s13182_s20 }
  0x22   :  { %14385 = sst [smem:[#allocation39_spill]] %s13187_s27 }
  0x23   :  { %s13202_s20 = sld [smem:[%s14342_s0 + %s13031_s15]]   ;;  %s13035_s15 = smov 27  }
  0x24   :  { %s13207_s27 = sld [smem:[%s14342_s0 + %s13032_s22]]   ;;  %s13036_s22 = smov 28  }
  0x25   :  { %s13212_s6 = sld [smem:[%s14342_s0 + %s13033_s28]]   ;;  %s13037_s28 = smov 29  }
  0x26   :  { %14386 = sst [smem:[#allocation40_spill]] %s13197_s12 }
  0x27   :  { %s13217_s12 = sld [smem:[%s14342_s0 + %s13034_s7]]   ;;  %s13038_s7 = smov 30  }
  0x28   :  { %s13232_s30 = sld [smem:[%s14342_s0 + %s13037_s28]]  }
  0x29   :  { %14387 = sst [smem:[#allocation41_spill]] %s13202_s20 }
  0x2a   :  { %14388 = sst [smem:[#allocation42_spill]] %s13207_s27 }
  0x2b   :  { %s13222_s20 = sld [smem:[%s14342_s0 + %s13035_s15]]   ;;  %s13039_s15 = smov 31  }
  0x2c   :  { %s13227_s27 = sld [smem:[%s14342_s0 + %s13036_s22]]  }
  0x2d   :  { %14389 = sst [smem:[#allocation43_spill]] %s13217_s12 }
  0x2e   :  { %s13237_s12 = sld [smem:[%s14342_s0 + %s13038_s7]]  }
  0x2f   :  { %s13242_s19 = sld [smem:[%s14342_s0 + %s13039_s15]]  }
  0x34   :  { %14390 = sst [smem:[#allocation44_spill]] %s13237_s12 }
  0x35   :  { %14391 = sst [smem:[#allocation45_spill]] %s13242_s19 }
  0x36   :  { %68 = vsyncpa [#allocation13], 0 }
  0x37   :  { %69 = vsyncpa [#allocation16], 0 }
  0x38   :  { %70 = vsyncpa [#allocation19], 0 }
  0x39   :  { %71 = vsyncpa [#allocation22], 0 }
  0x3a   :  { %72 = vsyncpa [#allocation14], 0  ;;  %s13244_s22 = smov 0   ;;  %s13246_s23 = smov 0  }
  0x3b   :  { %s13248_s26 = smov 0  }
  0x3c LB: > { %s14392_s3 = sld [smem:[#allocation29_spill]]  ;;  %14393 = sst [smem:[#allocation46_spill]] %s13007_s26  ;;  %s12999_s22 = sphi %s13244_s22, %s14467_s22   ;;  %s13007_s26 = sphi %s13248_s26, %s78_s26   ;;  %s13003_s23 = sphi %s13246_s23, %s14468_s23  }
  0x3d   : > { %s13040_s0 = smov [#allocation15]   ;;  %s14348_s1 = sadd.s32 4294967295, %s13007_s26  }
  0x3e   : > { %s821_s28 = sshll.u32 %s13040_s0, 4  ;;  %p10393_p0 = scmp.ge.s32.totalorder %s13007_s26, 1  ;;  %s13268_s28 = int_to_ptr.vmem [resolvable:$true] %s821_s28 }
  0x3f   : > { %p772_p1 = scmp.lt.s32.totalorder %s13007_s26, 5  ;;  %p13264_p2 = scmp.eq.s32.totalorder %s14348_s1, 0 }
  0x40   : > { %s13041_s11 = smov [#allocation18]  }
  0x41   : > { %s14394_s2 = scalar_select %p13264_p2, 1, 0 }
  0x42   : > { %p13270_p3 = pnand %p10393_p0, %p772_p1  ;;  %s883_s15 = sshll.u32 %s13041_s11, 4  ;;  %s13282_s15 = int_to_ptr.vmem [resolvable:$true] %s883_s15 }
  0x43   : > { %s12771_s16 = scalar_lea.hbm %s14392_s3, 32768 }
  0x44   : > { %s14395_s7 = scalar_select %p13270_p3, 1, 0 }
  0x45   : > { %p11508_p4 = pneg %p13270_p3  ;;  %p12772_p6 = scmp.ne.s32.totalorder %s14392_s3, %s12771_s16 }
  0x46   : > { %p12778_p10 = scmp.lt.u32.totalorder %s12771_s16, %s14392_s3 }
  0x47   : > { %p13278_p5 = pnand %p13264_p2, %p11508_p4 }
  0x49   : > { %p13288_p7 = pneg %p13278_p5 }
  0x4b   : > { %p12774_p8 = pnand %p13288_p7, %p12772_p6 }
  0x4d   : > { %p12775_p9 = pneg %p12774_p8 }
  0x4f   : > { %p12780_p11 = pnand %p12778_p10, %p12775_p9 }
  0x51   : > { %12783 = shalt.err (!%p12780_p11)
}
  0x52   : > { %s12784_s0 = scalar_lea.vmem %s13268_s28, 32768  ;;  %p12792_p1 = scmp.lt.s32.totalorder %s13268_s28, %s13268_s28 }
  0x53   : > { %p12785_p12 = scmp.ne.s32.totalorder %s13268_s28, %s12784_s0  ;;  %p12793_p4 = scmp.lt.s32.totalorder %s12784_s0, %s12784_s0 }
  0x55   : > { %p12787_p13 = pnand %p12785_p12, %p13288_p7  ;;  %p12794_p2 = por %p12793_p4, %p12792_p1 }
  0x57   : > { %p12788_p0 = pneg %p12787_p13 }
  0x59   : > { %p12795_p3 = pnand %p12794_p2, %p12788_p0 }
  0x5b   : > { %12798 = shalt.err (!%p12795_p3)
}
  0x5c   : > { %s14349_s11 = smov 256   ;;  %s14350_s16 = smov 16  }
  0x5d   : > { %11514 = dma.hbm_to_vmem [thread:$0]  (!%p13278_p5), %s14392_s3, 32768, %s13268_s28, [#allocation16], %s14349_s11, %s14349_s11, %s14350_s16  }
  0x5e   : > { %s12799_s1 = scalar_lea.hbm %s13192_s4, 8192 }
  0x5f   : > { %p12800_p6 = scmp.ne.s32.totalorder %s13192_s4, %s12799_s1  ;;  %p12806_p3 = scmp.lt.u32.totalorder %s12799_s1, %s13192_s4 }
  0x61   : > { %p12802_p8 = pnand %p12800_p6, %p13288_p7 }
  0x63   : > { %p12803_p2 = pneg %p12802_p8 }
  0x65   : > { %p12808_p9 = pnand %p12806_p3, %p12803_p2 }
  0x67   : > { %12811 = shalt.err (!%p12808_p9)
}
  0x68   : > { %s12812_s0 = scalar_lea.vmem %s13282_s15, 8192  ;;  %p12820_p13 = scmp.lt.s32.totalorder %s13282_s15, %s13282_s15 }
  0x69   : > { %p12813_p10 = scmp.ne.s32.totalorder %s13282_s15, %s12812_s0  ;;  %p12821_p0 = scmp.lt.s32.totalorder %s12812_s0, %s12812_s0 }
  0x6b   : > { %p12815_p11 = pnand %p12813_p10, %p13288_p7  ;;  %p12822_p1 = por %p12821_p0, %p12820_p13 }
  0x6d   : > { %p12816_p12 = pneg %p12815_p11 }
  0x6f   : > { %p12823_p4 = pnand %p12822_p1, %p12816_p12 }
  0x71   : > { %12826 = shalt.err (!%p12823_p4)
}
  0x72   : > { %s13044_s28 = smov 512   ;;  %s13045_s1 = smov 32  }
  0x73   : > { %11520 = dma.hbm_to_vmem [thread:$0]  (!%p13278_p5), %s13192_s4, 8192, %s13282_s15, [#allocation19], %s13044_s28, %s13044_s28, %s13045_s1  }
  0x74   : > { %s90_s11 = sadd.s32 1, %s13003_s23  ;;  %s13046_s0 = smov [#allocation12]  }
  0x75   : > { %p92_p6 = scmp.ge.s32.totalorder %s90_s11, 4  ;;  %s805_s16 = sshll.u32 %s13046_s0, 4  ;;  %s806_s16 = int_to_ptr.vmem [resolvable:$true] %s805_s16 }
  0x76   : > { %s13047_s3 = smov [#allocation17]   ;;  %s12827_s26 = scalar_lea.hbm %s13112_s25, 8192 }
  0x77   : > { %s14470_s11 = smov (%p92_p6, %s90_s11), 0  ;;  %s837_s19 = sshll.u32 %s13047_s3, 4  ;;  %s838_s19 = int_to_ptr.vmem [resolvable:$true] %s837_s19 }
  0x78   : > { %p12828_p8 = scmp.ne.s32.totalorder %s13112_s25, %s12827_s26  ;;  %p12834_p9 = scmp.lt.u32.totalorder %s12827_s26, %s13112_s25 }
  0x7a   : > { %p12830_p2 = pnand %p12828_p8, %p13288_p7 }
  0x7c   : > { %p12831_p3 = pneg %p12830_p2 }
  0x7e   : > { %p12836_p10 = pnand %p12834_p9, %p12831_p3 }
  0x80   : > { %12839 = shalt.err (!%p12836_p10)
}
  0x81   : > { %s12840_s12 = scalar_lea.vmem %s806_s16, 8192  ;;  %p12848_p0 = scmp.lt.s32.totalorder %s806_s16, %s806_s16 }
  0x82   : > { %p12841_p11 = scmp.ne.s32.totalorder %s806_s16, %s12840_s12  ;;  %p12849_p1 = scmp.lt.s32.totalorder %s12840_s12, %s12840_s12 }
  0x84   : > { %p12843_p12 = pnand %p12841_p11, %p13288_p7  ;;  %p12850_p4 = por %p12849_p1, %p12848_p0 }
  0x86   : > { %p12844_p13 = pneg %p12843_p12 }
  0x88   : > { %p12851_p6 = pnand %p12850_p4, %p12844_p13 }
  0x8a   : > { %12854 = shalt.err (!%p12851_p6)
}
  0x8b   : > { %11511 = dma.hbm_to_vmem [thread:$0]  (!%p13278_p5), %s13112_s25, 8192, %s806_s16, [#allocation13], %s13044_s28, %s13044_s28, %s13045_s1  }
  0x8c   : > { %s12855_s3 = scalar_lea.hbm %s13132_s14, 8192 }
  0x8d   : > { %p12856_p8 = scmp.ne.s32.totalorder %s13132_s14, %s12855_s3  ;;  %p12862_p9 = scmp.lt.u32.totalorder %s12855_s3, %s13132_s14 }
  0x8f   : > { %p12858_p2 = pnand %p12856_p8, %p13288_p7 }
  0x91   : > { %p12859_p3 = pneg %p12858_p2 }
  0x93   : > { %p12864_p10 = pnand %p12862_p9, %p12859_p3 }
  0x95   : > { %12867 = shalt.err (!%p12864_p10)
}
  0x96   : > { %s12868_s12 = scalar_lea.vmem %s838_s19, 8192  ;;  %p12876_p0 = scmp.lt.s32.totalorder %s838_s19, %s838_s19 }
  0x97   : > { %p12869_p11 = scmp.ne.s32.totalorder %s838_s19, %s12868_s12  ;;  %p12877_p1 = scmp.lt.s32.totalorder %s12868_s12, %s12868_s12 }
  0x99   : > { %p12871_p12 = pnand %p12869_p11, %p13288_p7  ;;  %p12878_p4 = por %p12877_p1, %p12876_p0 }
  0x9b   : > { %p12872_p13 = pneg %p12871_p12 }
  0x9d   : > { %p12879_p6 = pnand %p12878_p4, %p12872_p13 }
  0x9f   : > { %12882 = shalt.err (!%p12879_p6)
}
  0xa0   : > { %s13048_s26 = smov 128   ;;  %s13049_s15 = smov 8  }
  0xa1   : > { %11517 = dma.hbm_to_vmem [thread:$0]  (!%p13278_p5), %s13132_s14, 8192, %s838_s19, [#allocation16], %s13048_s26, %s13048_s26, %s13049_s15  }
  0xa2   : > { %s13050_s16 = smov [#allocation20]   ;;  %s13051_s1 = smov [#allocation21]  }
  0xa3   : > { %s905_s28 = sshll.u32 %s13050_s16, 4  ;;  %s921_s0 = sshll.u32 %s13051_s1, 4  ;;  %s906_s28 = int_to_ptr.vmem [resolvable:$true] %s905_s28  ;;  %s922_s0 = int_to_ptr.vmem [resolvable:$true] %s921_s0 }
  0xa4   : > { %s12883_s3 = scalar_lea.hbm %s13212_s6, 32768 }
  0xa5   : > { %p12884_p8 = scmp.ne.s32.totalorder %s13212_s6, %s12883_s3  ;;  %p12890_p9 = scmp.lt.u32.totalorder %s12883_s3, %s13212_s6 }
  0xa7   : > { %p12886_p2 = pnand %p12884_p8, %p13288_p7 }
  0xa9   : > { %p12887_p3 = pneg %p12886_p2 }
  0xab   : > { %p12892_p10 = pnand %p12890_p9, %p12887_p3 }
  0xad   : > { %12895 = shalt.err (!%p12892_p10)
}
  0xae   : > { %s12896_s12 = scalar_lea.vmem %s906_s28, 32768  ;;  %p12904_p0 = scmp.lt.s32.totalorder %s906_s28, %s906_s28 }
  0xaf   : > { %p12897_p11 = scmp.ne.s32.totalorder %s906_s28, %s12896_s12  ;;  %p12905_p1 = scmp.lt.s32.totalorder %s12896_s12, %s12896_s12 }
  0xb1   : > { %p12899_p12 = pnand %p12897_p11, %p13288_p7  ;;  %p12906_p4 = por %p12905_p1, %p12904_p0 }
  0xb3   : > { %p12900_p13 = pneg %p12899_p12 }
  0xb5   : > { %p12907_p6 = pnand %p12906_p4, %p12900_p13 }
  0xb7   : > { %12910 = shalt.err (!%p12907_p6)
}
  0xb8   : > { %s14398_s19 = smov 16   ;;  %s14399_s16 = smov 256  }
  0xb9   : > { %11523 = dma.hbm_to_vmem [thread:$0]  (!%p13278_p5), %s13212_s6, 32768, %s906_s28, [#allocation19], %s14399_s16, %s14399_s16, %s14398_s19  }
  0xba   : > { %s12911_s1 = scalar_lea.hbm %s13222_s20, 8192 }
  0xbb   : > { %p12912_p8 = scmp.ne.s32.totalorder %s13222_s20, %s12911_s1  ;;  %p12918_p9 = scmp.lt.u32.totalorder %s12911_s1, %s13222_s20 }
  0xbd   : > { %p12914_p2 = pnand %p12912_p8, %p13288_p7 }
  0xbf   : > { %p12915_p3 = pneg %p12914_p2 }
  0xc1   : > { %p12920_p10 = pnand %p12918_p9, %p12915_p3 }
  0xc3   : > { %12923 = shalt.err (!%p12920_p10)
}
  0xc4   : > { %s12924_s3 = scalar_lea.vmem %s922_s0, 8192  ;;  %p12932_p0 = scmp.lt.s32.totalorder %s922_s0, %s922_s0 }
  0xc5   : > { %p12925_p11 = scmp.ne.s32.totalorder %s922_s0, %s12924_s3  ;;  %p12933_p1 = scmp.lt.s32.totalorder %s12924_s3, %s12924_s3 }
  0xc7   : > { %p12927_p12 = pnand %p12925_p11, %p13288_p7  ;;  %p12934_p4 = por %p12933_p1, %p12932_p0 }
  0xc9   : > { %p12928_p13 = pneg %p12927_p12 }
  0xcb   : > { %p12935_p6 = pnand %p12934_p4, %p12928_p13 }
  0xcd   : > { %12938 = shalt.err (!%p12935_p6)
}
  0xce   : > { %11526 = dma.hbm_to_vmem [thread:$0]  (!%p13278_p5), %s13222_s20, 8192, %s922_s0, [#allocation22], %s13048_s26, %s13048_s26, %s13049_s15  }
  0xcf   : > { %p14400_p8 = scmp.ne.s32.totalorder %s14395_s7, 0 }
  0xd0   : > { %p14401_p2 = scmp.ne.s32.totalorder (!%p14400_p8), %s14394_s2, 0 }
  0xd1   : > { %946 = sbr.rel (%p14400_p8) target bundleno = 4643 (0x1223), region = 144 }
  0xd8   : > { %12978 = dma.done.wait (%p14401_p2), [#allocation13], 8192  }
  0xd9   : > { %12980 = vsyncadd (%p14401_p2), [#allocation13], 4294959104 }
  0xda   : > { %12982 = dma.done.wait (%p14401_p2), [#allocation16], 40960  }
  0xdb   : > { %12984 = vsyncadd (%p14401_p2), [#allocation16], 4294926336 }
  0xdc   : > { %12986 = dma.done.wait (%p14401_p2), [#allocation19], 40960  }
  0xdd   : > { %12988 = vsyncadd (%p14401_p2), [#allocation19], 4294926336 }
  0xde   : > { %12990 = dma.done.wait (%p14401_p2), [#allocation22], 8192  }
  0xdf   : > { %12992 = vsyncadd (%p14401_p2), [#allocation22], 4294959104  ;;  %p10408_p5 = scmp.ne.s32.totalorder %s12999_s22, 0 }
  0xe0   : > { %vm1058_vm0 = vcmask (!%p10408_p5), 9216   ;;  %v1064_v0 = vld [vmem:[%s13092_s9] sm:$0x7] (!%p10408_p5)  ;;  %vm1089_vm1 = vcmask (!%p10408_p5), 1042432   ;;  %v13052_v2 = vmov (!%p10408_p5), 0.0   ;;  %vm1082_vm2 = vcmask (!%p10408_p5), 48128  }
  0xe1   : > { %1052 = sbr.rel (%p10408_p5) target bundleno = 2032 (0x7f0), region = 172  ;;  %v11644_v1 = vld [vmem:[%s13087_s5] sm:$0xff] (!%p10408_p5)   ;;  %1059 = vst.msk [vmem:[#allocation23] sm:$0x3] (!%p10408_p5), %vm1058_vm0, %v13052_v2  ;;  %11476 = vmatprep.subr.msk.bf16.mxu1 (!%p10408_p5), %vm1089_vm1, %v1064_v0  ;;  %v1091_v3 = vsel (!%p10408_p5), %vm1089_vm1, %v1064_v0, 0  ;;  %v11645_v4 = vld [vmem:[%s13087_s5 + $0x8] sm:$0xff] (!%p10408_p5)  }
  0xe2   : > { %11349 = vmatpush3.bf16.msra.mxu1 (!%p10408_p5), %v1091_v3  ;;  %11350 = vmatprep.mubr.msk.bf16.mxu1 (!%p10408_p5), %vm1082_vm2, %v11644_v1  ;;  %v11646_v5 = vld [vmem:[%s13102_s17] sm:$0xff] (!%p10408_p5)   ;;  %v11647_v6 = vld [vmem:[%s13102_s17 + $0x8] sm:$0xff] (!%p10408_p5)   ;;  %v11648_v7 = vld [vmem:[%s13102_s17 + $0x10] sm:$0xff] (!%p10408_p5)   ;;  %vm1187_vm3 = vcmask (!%p10408_p5), 523264   ;;  %vm2122_vm4 = vcmask (!%p10408_p5), 1041409   ;;  %vm2124_vm5 = vcmask (!%p10408_p5), 1043459  }
  0xe3   : > { %11354 = vmatprep.subr.bf16.mxu1 (!%p10408_p5), %v11646_v5  ;;  %v11649_v8 = vld [vmem:[%s13102_s17 + $0x18] sm:$0xff] (!%p10408_p5)   ;;  %v1251_v13 = vld [vmem:[#allocation12 + $0x10] sm:$0xff] (!%p10408_p5)  ;;  %v10409_v37 = vld [vmem:[%s13097_s13] ss:$0 sm:$0xff] (!%p10408_p5)  ;;  %vm2126_vm6 = vcmask (!%p10408_p5), 1045509   ;;  %vm2128_vm7 = vcmask (!%p10408_p5), 1047559  }
  0xe4   : > { %v13407_v9 = vld [vmem:[#allocation12] sm:$0xff] (!%p10408_p5)  ;;  %v1255_v14 = vld [vmem:[#allocation12 + $0x30] sm:$0xff] (!%p10408_p5)  ;;  %s14402_s2 = sld [smem:[#allocation30_spill]] (!%p10408_p5)  ;;  %s14403_s7 = sld [smem:[#allocation31_spill]] (!%p10408_p5)  ;;  %vm4783_vm8 = vcmask (!%p10408_p5), 517120  }
  0xe5   : > { %11351 = vmatmul.mubr.msk.bf16.vlgmr.msra.gmra.mrb[0].mxu1 (!%p10408_p5), %vm1082_vm2, %v11645_v4  ;;  %v13409_v10 = vld [vmem:[#allocation12 + $0x20] sm:$0xff] (!%p10408_p5)  ;;  %v10426_v15 = vcombine.high (!%p10408_p5), %v1251_v13, %v1255_v14  ;;  %v10425_v16 = vcombine.low (!%p10408_p5), %v1251_v13, %v1255_v14  ;;  %v1259_v17 = vld [vmem:[#allocation12 + $0x50] sm:$0xff] (!%p10408_p5)  ;;  %s14404_s10 = sld [smem:[#allocation32_spill]] (!%p10408_p5) }
  0xe6   : > { %11355 = vmatpush3.bf16.msra.mxu1 (!%p10408_p5), %v11646_v5  ;;  %v10421_v11 = vcombine.low (!%p10408_p5), %v13407_v9, %v13409_v10  ;;  %v10422_v12 = vcombine.high (!%p10408_p5), %v13407_v9, %v13409_v10  ;;  %v1263_v18 = vld [vmem:[#allocation12 + $0x70] sm:$0xff] (!%p10408_p5)  ;;  %v1257_v50 = vld [vmem:[#allocation12 + $0x40] sm:$0xff] (!%p10408_p5) }
  0xe7   : > { %11356 = vmatprep.subr.bf16.mxu1 (!%p10408_p5), %v11647_v6  ;;  %1781 = vmatprep.subr.bf16.mxu0 (!%p10408_p5), %v10426_v15  ;;  %v10434_v19 = vcombine.high (!%p10408_p5), %v1259_v17, %v1263_v18  ;;  %v10433_v20 = vcombine.low (!%p10408_p5), %v1259_v17, %v1263_v18  ;;  %v1267_v21 = vld [vmem:[#allocation12 + $0x90] sm:$0xff] (!%p10408_p5)  ;;  %v1261_v51 = vld [vmem:[#allocation12 + $0x60] sm:$0xff] (!%p10408_p5) }
  0xe8   : > { %1782 = vmatpush1.bf16.msra.mxu0 %v10425_v16  ;;  %v1271_v22 = vld [vmem:[#allocation12 + $0xb0] sm:$0xff]  ;;  %v10430_v54 = vcombine.high %v1257_v50, %v1261_v51  ;;  %v1265_v55 = vld [vmem:[#allocation12 + $0x80] sm:$0xff]  ;;  %v10429_v57 = vcombine.low %v1257_v50, %v1261_v51  ;;  %v1274_v51 = vld [vmem:[#allocation12 + $0xc8] sm:$0xff] }
  0xe9   : > { %1783 = vmatprep.subr.bf16.mxu0 %v10434_v19  ;;  %v10442_v23 = vcombine.high %v1267_v21, %v1271_v22  ;;  %v10441_v24 = vcombine.low %v1267_v21, %v1271_v22  ;;  %v1275_v25 = vld [vmem:[#allocation12 + $0xd0] sm:$0xff]  ;;  %v1269_v56 = vld [vmem:[#allocation12 + $0xa0] sm:$0xff] }
  0xea   : > { %11357 = vmatpush3.bf16.msra.mxu1 %v11647_v6  ;;  %v1279_v26 = vld [vmem:[#allocation12 + $0xf0] sm:$0xff]  ;;  %v10438_v58 = vcombine.high %v1265_v55, %v1269_v56  ;;  %v1273_v59 = vld [vmem:[#allocation12 + $0xc0] sm:$0xff]  ;;  %v10437_v61 = vcombine.low %v1265_v55, %v1269_v56  ;;  %v1282_v55 = vld [vmem:[#allocation12 + $0x108] sm:$0xff] }
  0xeb   : > { %11358 = vmatprep.subr.bf16.mxu1 %v11648_v7  ;;  %v10450_v27 = vcombine.high %v1275_v25, %v1279_v26  ;;  %v10449_v28 = vcombine.low %v1275_v25, %v1279_v26  ;;  %v1283_v29 = vld [vmem:[#allocation12 + $0x110] sm:$0xff]  ;;  %v1277_v60 = vld [vmem:[#allocation12 + $0xe0] sm:$0xff]  ;;  %v1254_v25 = vld [vmem:[#allocation12 + $0x28] sm:$0xff] }
  0xec   : > { %1784 = vmatpush1.bf16.msra.mxu0 %v10433_v20  ;;  %v1287_v30 = vld [vmem:[#allocation12 + $0x130] sm:$0xff]  ;;  %v10446_v62 = vcombine.high %v1273_v59, %v1277_v60  ;;  %v1281_v63 = vld [vmem:[#allocation12 + $0x100] sm:$0xff]  ;;  %v10445_v1 = vcombine.low %v1273_v59, %v1277_v60  ;;  %v1286_v56 = vld [vmem:[#allocation12 + $0x128] sm:$0xff] }
  0xed   : > { %1785 = vmatprep.subr.bf16.mxu0 %v10442_v23  ;;  %v10458_v31 = vcombine.high %v1283_v29, %v1287_v30  ;;  %v10457_v32 = vcombine.low %v1283_v29, %v1287_v30  ;;  %v1291_v33 = vld [vmem:[#allocation12 + $0x150] sm:$0xff]  ;;  %v1285_v0 = vld [vmem:[#allocation12 + $0x120] sm:$0xff]  ;;  %v1290_v59 = vld [vmem:[#allocation12 + $0x148] sm:$0xff] }
  0xee   : > { %11359 = vmatpush3.bf16.msra.mxu1 %v11648_v7  ;;  %v1295_v34 = vld [vmem:[#allocation12 + $0x170] sm:$0xff]  ;;  %v10454_v2 = vcombine.high %v1281_v63, %v1285_v0  ;;  %v1289_v3 = vld [vmem:[#allocation12 + $0x140] sm:$0xff]  ;;  %v10453_v5 = vcombine.low %v1281_v63, %v1285_v0  ;;  %v1294_v60 = vld [vmem:[#allocation12 + $0x168] sm:$0xff] }
  0xef   : > { %11360 = vmatprep.subr.bf16.mxu1 %v11649_v8  ;;  %v10466_v35 = vcombine.high %v1291_v33, %v1295_v34  ;;  %v10465_v36 = vcombine.low %v1291_v33, %v1295_v34  ;;  %v1293_v4 = vld [vmem:[#allocation12 + $0x160] sm:$0xff]  ;;  %v1307_v19 = vld [vmem:[#allocation12 + $0x1d0] sm:$0xff]  ;;  %v1298_v63 = vld [vmem:[#allocation12 + $0x188] sm:$0xff] }
  0xf0   : > { %1786 = vmatpush1.bf16.msra.mxu0 %v10441_v24  ;;  %v10462_v6 = vcombine.high %v1289_v3, %v1293_v4  ;;  %v10461_v7 = vcombine.low %v1289_v3, %v1293_v4  ;;  %v1301_v9 = vld [vmem:[#allocation12 + $0x1a0] sm:$0xff]  ;;  %v1311_v20 = vld [vmem:[#allocation12 + $0x1f0] sm:$0xff]  ;;  %v1250_v24 = vld [vmem:[#allocation12 + $0x8] sm:$0xff] }
  0xf1   : > { %1787 = vmatprep.subr.bf16.mxu0 %v10450_v27  ;;  %v1305_v16 = vld [vmem:[#allocation12 + $0x1c0] sm:$0xff]  ;;  %v10482_v22 = vcombine.high %v1307_v19, %v1311_v20  ;;  %v10481_v23 = vcombine.low %v1307_v19, %v1311_v20  ;;  %v10424_v26 = vcombine.high %v1250_v24, %v1254_v25  ;;  %v10423_v27 = vcombine.low %v1250_v24, %v1254_v25  ;;  %v1302_v0 = vld [vmem:[#allocation12 + $0x1a8] sm:$0xff]  ;;  %v1276_v19 = vld [vmem:[#allocation12 + $0xd8] sm:$0xff] }
  0xf2   : > { %11361 = vmatpush3.bf16.msra.mxu1 %v11649_v8  ;;  %v1297_v8 = vld [vmem:[#allocation12 + $0x180] sm:$0xff]  ;;  %v1306_v3 = vld [vmem:[#allocation12 + $0x1c8] sm:$0xff]  ;;  %v1280_v20 = vld [vmem:[#allocation12 + $0xf8] sm:$0xff] }
  0xf3   : > { %1675 = vmatprep.subr.bf16.mxu1 %v10422_v12  ;;  %v10470_v10 = vcombine.high %v1297_v8, %v1301_v9  ;;  %v1303_v12 = vld [vmem:[#allocation12 + $0x1b0] sm:$0xff]  ;;  %v10469_v13 = vcombine.low %v1297_v8, %v1301_v9  ;;  %v1309_v17 = vld [vmem:[#allocation12 + $0x1e0] sm:$0xff]  ;;  %v1310_v4 = vld [vmem:[#allocation12 + $0x1e8] sm:$0xff]  ;;  %v10451_v25 = vcombine.low %v1276_v19, %v1280_v20 }
  0xf4   : > { %1788 = vmatpush1.bf16.msra.mxu0 %v10449_v28  ;;  %v10478_v18 = vcombine.high %v1305_v16, %v1309_v17  ;;  %v10477_v21 = vcombine.low %v1305_v16, %v1309_v17  ;;  %v13053_v28 = vmov 0   ;;  %v10414_v29 = vld [vmem:[%s13107_s21] ss:$0 sm:$0xff]  ;;  %v1256_v8 = vld [vmem:[#allocation12 + $0x38] sm:$0xff]  ;;  %v10479_v9 = vcombine.low %v1306_v3, %v1310_v4 }
  0xf5   : > { %1789 = vmatprep.subr.bf16.mxu0 %v10458_v31  ;;  %1813 = vmatprep.mubr.bf16.mxu0 %v13053_v28  ;;  %v1272_v16 = vld [vmem:[#allocation12 + $0xb8] sm:$0xff] }
  0xf6   : > { %11635 = vset.pattern.permute.xlu0 %v13053_v28  ;;  %v1288_v24 = vld [vmem:[#allocation12 + $0x138] sm:$0xff] }
  0xf8   : > { %1790 = vmatpush1.bf16.msra.mxu0 %v10457_v32 }
  0xf9   : > { %1791 = vmatprep.subr.bf16.mxu0 %v10466_v35 }
  0xfc   : > { %1792 = vmatpush1.bf16.msra.mxu0 %v10465_v36 }
 0x1b8   : > { %v11352_v38 = vpop.f32.mrb[0].mxu1 }
 0x1b9   : > { %v1136_v39 = vadd.f32 %v11352_v38, %v10409_v37  ;;  %v1127_v40 = vpop.f32.mrb[1].mxu1 }
 0x1ba   : > { %v1128_v41 = vadd.f32 %v10409_v37, %v1127_v40  ;;  %v11353_v42 = vpop.f32.mrb[2].mxu1  ;;  %v1258_v40 = vld [vmem:[#allocation12 + $0x48] sm:$0xff] }
 0x1bb   : > { %v1139_v43 = vadd.f32 %v11353_v42, %v10409_v37  ;;  %v1130_v44 = vpop.f32.mrb[3].mxu1  ;;  %v1144_v46 = vmax.f32 %v1136_v39, 0.0 }
 0x1bc   : > { %v1131_v45 = vadd.f32 %v10409_v37, %v1130_v44  ;;  %v1142_v48 = vmax.f32 %v1128_v41, 0.0  ;;  %v1262_v41 = vld [vmem:[#allocation12 + $0x68] sm:$0xff] }
 0x1bd   : > { %v1145_v47 = vmax.f32 %v1139_v43, 0.0 }
 0x1be   : > { %v1143_v49 = vmax.f32 %v1131_v45, 0.0 }
 0x1bf   : > { %v1147_v52 = vpack.c.bf16 %v1145_v47, %v1144_v46  ;;  %v10432_v46 = vcombine.high %v1258_v40, %v1262_v41  ;;  %v1266_v47 = vld [vmem:[#allocation12 + $0x88] sm:$0xff] }
 0x1c0   : > { %v1146_v53 = vpack.c.bf16 %v1143_v49, %v1142_v48  ;;  %v1270_v48 = vld [vmem:[#allocation12 + $0xa8] sm:$0xff]  ;;  %v10431_v49 = vcombine.low %v1258_v40, %v1262_v41  ;;  %v11652_v41 = vld [vmem:[#allocation15 + $0x4] ss:$16 sps:$4 sm:$0xff]  }
 0x1c1   : > { %v10440_v50 = vcombine.high %v1266_v47, %v1270_v48 }
 0x1c2   : > { %11362 = vmatprep.mubr.msk.bf16.mxu1 %vm1187_vm3, %v1146_v53  ;;  %v10439_v53 = vcombine.low %v1266_v47, %v1270_v48  ;;  %v11658_v47 = vld [vmem:[#allocation15 + $0x24] ss:$16 sps:$4 sm:$0xff]   ;;  %v11661_v48 = vld [vmem:[#allocation15 + $0x2c] ss:$16 sps:$4 sm:$0xff]  }
 0x1c3   : > { %11363 = vmatmul.mubr.msk.bf16.vlgmr.msra.gmra.mrb[4].mxu1 %vm1187_vm3, %v1147_v52  ;;  %v1278_v52 = vld [vmem:[#allocation12 + $0xe8] sm:$0xff] }
 0x1c4   : > { %1676 = vmatpush1.bf16.msra.mxu1 %v10421_v11  ;;  %v1299_v11 = vld [vmem:[#allocation12 + $0x190] sm:$0xff]  ;;  %1707 = vmatprep.mubr.bf16.mxu1 %v13053_v28 }
 0x1c5   : > { %1677 = vmatprep.subr.bf16.mxu1 %v10430_v54  ;;  %v10474_v14 = vcombine.high %v1299_v11, %v1303_v12  ;;  %v10473_v15 = vcombine.low %v1299_v11, %v1303_v12  ;;  %v10448_v54 = vcombine.high %v1274_v51, %v1278_v52  ;;  %v1260_v11 = vld [vmem:[#allocation12 + $0x58] sm:$0xff] }
 0x1c6   : > { %v1264_v12 = vld [vmem:[#allocation12 + $0x78] sm:$0xff] }
 0x1c7   : > { %1793 = vmatprep.subr.bf16.mxu0 %v10474_v14  ;;  %v10436_v14 = vcombine.high %v1260_v11, %v1264_v12  ;;  %v10435_v17 = vcombine.low %v1260_v11, %v1264_v12  ;;  %v11701_v11 = vld [vmem:[#allocation15 + $0x108] ss:$16 sps:$4 sm:$0xff]   ;;  %v11706_v12 = vld [vmem:[#allocation15 + $0x124] ss:$16 sps:$4 sm:$0xff]  }
 0x1c8   : > { %1678 = vmatpush1.bf16.msra.mxu1 %v10429_v57  ;;  %1794 = vmatpush1.bf16.msra.mxu0 %v10473_v15  ;;  %v10447_v57 = vcombine.low %v1274_v51, %v1278_v52  ;;  %v1268_v15 = vld [vmem:[#allocation12 + $0x98] sm:$0xff]  ;;  %v11662_v51 = vld [vmem:[#allocation15 + $0x40] ss:$16 sps:$4 sm:$0xff]   ;;  %v11670_v52 = vld [vmem:[#allocation15 + $0x64] ss:$16 sps:$4 sm:$0xff]  }
 0x1c9   : > { %1679 = vmatprep.subr.bf16.mxu1 %v10438_v58  ;;  %1795 = vmatprep.subr.bf16.mxu0 %v10482_v22  ;;  %v10456_v58 = vcombine.high %v1282_v55, %v1286_v56  ;;  %v10452_v22 = vcombine.high %v1276_v19, %v1280_v20  ;;  %v11713_v19 = vld [vmem:[#allocation15 + $0x148] ss:$16 sps:$4 sm:$0xff]   ;;  %v11718_v20 = vld [vmem:[#allocation15 + $0x164] ss:$16 sps:$4 sm:$0xff]  }
 0x1cc   : > { %1680 = vmatpush1.bf16.msra.mxu1 %v10437_v61  ;;  %1796 = vmatpush1.bf16.msra.mxu0 %v10481_v23  ;;  %v10455_v61 = vcombine.low %v1282_v55, %v1286_v56  ;;  %v1284_v23 = vld [vmem:[#allocation12 + $0x118] sm:$0xff]  ;;  %v11676_v56 = vld [vmem:[#allocation15 + $0x84] ss:$16 sps:$4 sm:$0xff]  }
 0x1cd   : > { %1681 = vmatprep.subr.bf16.mxu1 %v10446_v62  ;;  %v10464_v62 = vcombine.high %v1290_v59, %v1294_v60  ;;  %3758 = vmatprep.subr.bf16.mxu0 %v11652_v41  ;;  %v11671_v55 = vld [vmem:[#allocation15 + $0x68] ss:$16 sps:$4 sm:$0xff]   ;;  %v11748_v41 = vld [vmem:[#allocation15 + $0x204] ss:$16 sps:$4 sm:$0xff]  }
 0x1d0   : > { %1682 = vmatpush1.bf16.msra.mxu1 %v10445_v1  ;;  %v10463_v1 = vcombine.low %v1290_v59, %v1294_v60  ;;  %v11677_v59 = vld [vmem:[#allocation15 + $0x88] ss:$16 sps:$4 sm:$0xff]   ;;  %v11682_v60 = vld [vmem:[#allocation15 + $0xa4] ss:$16 sps:$4 sm:$0xff]  }
 0x1d1   : > { %1683 = vmatprep.subr.bf16.mxu1 %v10454_v2  ;;  %v10472_v2 = vcombine.high %v1298_v63, %v1302_v0 }
 0x1d4   : > { %1684 = vmatpush1.bf16.msra.mxu1 %v10453_v5  ;;  %v10471_v5 = vcombine.low %v1298_v63, %v1302_v0  ;;  %v11683_v63 = vld [vmem:[#allocation15 + $0xa8] ss:$16 sps:$4 sm:$0xff]   ;;  %v11688_v0 = vld [vmem:[#allocation15 + $0xc4] ss:$16 sps:$4 sm:$0xff]  }
 0x1d5   : > { %1685 = vmatprep.subr.bf16.mxu1 %v10462_v6  ;;  %v10480_v6 = vcombine.high %v1306_v3, %v1310_v4  ;;  %v11689_v3 = vld [vmem:[#allocation15 + $0xc8] ss:$16 sps:$4 sm:$0xff]   ;;  %v11694_v4 = vld [vmem:[#allocation15 + $0xe4] ss:$16 sps:$4 sm:$0xff]  }
 0x1d8   : > { %1686 = vmatpush1.bf16.msra.mxu1 %v10461_v7  ;;  %v1252_v7 = vld [vmem:[#allocation12 + $0x18] sm:$0xff] }
 0x1d9   : > { %1687 = vmatprep.subr.bf16.mxu1 %v10470_v10  ;;  %v10428_v10 = vcombine.high %v1252_v7, %v1256_v8 }
 0x1dc   : > { %1688 = vmatpush1.bf16.msra.mxu1 %v10469_v13  ;;  %v10427_v13 = vcombine.low %v1252_v7, %v1256_v8  ;;  %v11695_v7 = vld [vmem:[#allocation15 + $0xe8] ss:$16 sps:$4 sm:$0xff]   ;;  %v11700_v8 = vld [vmem:[#allocation15 + $0x104] ss:$16 sps:$4 sm:$0xff]  }
 0x1dd   : > { %1689 = vmatprep.subr.bf16.mxu1 %v10478_v18  ;;  %v10444_v18 = vcombine.high %v1268_v15, %v1272_v16 }
 0x1e0   : > { %1690 = vmatpush1.bf16.msra.mxu1 %v10477_v21  ;;  %v10443_v21 = vcombine.low %v1268_v15, %v1272_v16  ;;  %v11707_v15 = vld [vmem:[#allocation15 + $0x128] ss:$16 sps:$4 sm:$0xff]   ;;  %v11712_v16 = vld [vmem:[#allocation15 + $0x144] ss:$16 sps:$4 sm:$0xff]  }
 0x1e1   : > { %1728 = vmatprep.subr.bf16.mxu1 %v10424_v26  ;;  %v10460_v26 = vcombine.high %v1284_v23, %v1288_v24 }
 0x296   : > { %v11364_v30 = vpop.f32.mrb[4].mxu1 }
 0x297   : > { %v1237_v31 = vadd.f32 %v11364_v30, %v10414_v29  ;;  %v1228_v32 = vpop.f32.mrb[5].mxu1  ;;  %v10459_v30 = vcombine.low %v1284_v23, %v1288_v24  ;;  %v11719_v23 = vld [vmem:[#allocation15 + $0x168] ss:$16 sps:$4 sm:$0xff]   ;;  %v11724_v24 = vld [vmem:[#allocation15 + $0x184] ss:$16 sps:$4 sm:$0xff]  }
 0x298   : > { %v1229_v33 = vadd.f32 %v10414_v29, %v1228_v32  ;;  %v11365_v34 = vpop.f32.mrb[6].mxu1  ;;  %v1300_v32 = vld [vmem:[#allocation12 + $0x198] sm:$0xff] }
 0x299   : > { %v1240_v35 = vadd.f32 %v11365_v34, %v10414_v29  ;;  %v1231_v36 = vpop.f32.mrb[7].mxu1  ;;  %v1245_v38 = vmax.f32 %v1237_v31, 0.0 }
 0x29a   : > { %v1232_v37 = vadd.f32 %v10414_v29, %v1231_v36  ;;  %v1243_v42 = vmax.f32 %v1229_v33, 0.0  ;;  %v1296_v29 = vld [vmem:[#allocation12 + $0x178] sm:$0xff] }
 0x29b   : > { %v1246_v39 = vmax.f32 %v1240_v35, 0.0  ;;  %v1304_v33 = vld [vmem:[#allocation12 + $0x1b8] sm:$0xff] }
 0x29c   : > { %v1244_v43 = vmax.f32 %v1232_v37, 0.0  ;;  %v10476_v35 = vcombine.high %v1300_v32, %v1304_v33  ;;  %v1308_v36 = vld [vmem:[#allocation12 + $0x1d8] sm:$0xff] }
 0x29d   : > { %v13420_v44 = vpack.c.bf16 %v1246_v39, %v1245_v38  ;;  %v1312_v37 = vld [vmem:[#allocation12 + $0x1f8] sm:$0xff]  ;;  %v10475_v38 = vcombine.low %v1300_v32, %v1304_v33  ;;  %v11736_v33 = vld [vmem:[#allocation15 + $0x1c4] ss:$16 sps:$4 sm:$0xff]  }
 0x29e   : > { %v13422_v45 = vpack.c.bf16 %v1244_v43, %v1243_v42  ;;  %v10484_v39 = vcombine.high %v1308_v36, %v1312_v37  ;;  %v10483_v40 = vcombine.low %v1308_v36, %v1312_v37  ;;  %v11655_v42 = vld [vmem:[#allocation15 + $0xc] ss:$16 sps:$4 sm:$0xff]   ;;  %v11650_v43 = vld [vmem:[#allocation15] ss:$16 sps:$4 sm:$0xff]   ;;  %v11731_v32 = vld [vmem:[#allocation15 + $0x1a8] ss:$16 sps:$4 sm:$0xff]  }
 0x29f   : > { %v11737_v36 = vld [vmem:[#allocation15 + $0x1c8] ss:$16 sps:$4 sm:$0xff]   ;;  %v11742_v37 = vld [vmem:[#allocation15 + $0x1e4] ss:$16 sps:$4 sm:$0xff]  }
 0x2a0   : > { %1708 = vmatmul.mubr.bf16.vlgmr.msra.gmra.mrb[8].mxu1 %v13422_v45  ;;  %1814 = vmatmul.mubr.bf16.vlgmr.msra.gmra.mrb[0].mxu0 %v13422_v45 }
 0x2a1   : > { %1729 = vmatpush1.bf16.msra.mxu1 %v10423_v27  ;;  %1717 = vmatprep.mubr.bf16.mxu1 %v13053_v28  ;;  %v1292_v27 = vld [vmem:[#allocation12 + $0x158] sm:$0xff] }
 0x2a2   : > { %1730 = vmatprep.subr.bf16.mxu1 %v10432_v46  ;;  %1823 = vmatprep.mubr.bf16.mxu0 %v13053_v28  ;;  %v10468_v31 = vcombine.high %v1292_v27, %v1296_v29  ;;  %v10467_v34 = vcombine.low %v1292_v27, %v1296_v29  ;;  %v11653_v46 = vld [vmem:[#allocation15 + $0x8] ss:$16 sps:$4 sm:$0xff]   ;;  %v11730_v29 = vld [vmem:[#allocation15 + $0x1a4] ss:$16 sps:$4 sm:$0xff]  }
 0x2a3   : > { %3759 = vmatpush1.bf16.msra.mxu0 %v11650_v43  ;;  %v11725_v27 = vld [vmem:[#allocation15 + $0x188] ss:$16 sps:$4 sm:$0xff]   ;;  %v1315_v43 = vlaneseq }
 0x2a4   : > { %3760 = vmatprep.subr.bf16.mxu0 %v11658_v47 }
 0x2a5   : > { %1731 = vmatpush1.bf16.msra.mxu1 %v10431_v49  ;;  %v11656_v49 = vld [vmem:[#allocation15 + $0x20] ss:$16 sps:$4 sm:$0xff]  }
 0x2a6   : > { %1732 = vmatprep.subr.bf16.mxu1 %v10440_v50  ;;  %v11659_v50 = vld [vmem:[#allocation15 + $0x28] ss:$16 sps:$4 sm:$0xff]  }
 0x2a7   : > { %3761 = vmatpush1.bf16.msra.mxu0 %v11656_v49  ;;  %v13445_v49 = vld [vmem:[%s13117_s29] sm:$0xff] }
 0x2a8   : > { %1718 = vmatmul.mubr.bf16.gmra.mrb[12].mxu1 %v13420_v44  ;;  %1824 = vmatmul.mubr.bf16.gmra.mrb[4].mxu0 %v13420_v44 }
 0x2a9   : > { %1733 = vmatpush1.bf16.msra.mxu1 %v10439_v53  ;;  %1760 = vmatprep.mubr.bf16.mxu1 %v13053_v28  ;;  %v11673_v53 = vld [vmem:[#allocation15 + $0x6c] ss:$16 sps:$4 sm:$0xff]  }
 0x2aa   : > { %1734 = vmatprep.subr.bf16.mxu1 %v10448_v54  ;;  %v11668_v54 = vld [vmem:[#allocation15 + $0x60] ss:$16 sps:$4 sm:$0xff]  }
 0x2ad   : > { %1735 = vmatpush1.bf16.msra.mxu1 %v10447_v57  ;;  %v11679_v57 = vld [vmem:[#allocation15 + $0x8c] ss:$16 sps:$4 sm:$0xff]  }
 0x2ae   : > { %1736 = vmatprep.subr.bf16.mxu1 %v10456_v58  ;;  %v11674_v58 = vld [vmem:[#allocation15 + $0x80] ss:$16 sps:$4 sm:$0xff]  }
 0x2b1   : > { %1737 = vmatpush1.bf16.msra.mxu1 %v10455_v61  ;;  %v11685_v61 = vld [vmem:[#allocation15 + $0xac] ss:$16 sps:$4 sm:$0xff]  }
 0x2b2   : > { %1738 = vmatprep.subr.bf16.mxu1 %v10464_v62  ;;  %v11680_v62 = vld [vmem:[#allocation15 + $0xa0] ss:$16 sps:$4 sm:$0xff]  }
 0x2b5   : > { %1739 = vmatpush1.bf16.msra.mxu1 %v10463_v1  ;;  %v11691_v1 = vld [vmem:[#allocation15 + $0xcc] ss:$16 sps:$4 sm:$0xff]  }
 0x2b6   : > { %1740 = vmatprep.subr.bf16.mxu1 %v10472_v2  ;;  %v11686_v2 = vld [vmem:[#allocation15 + $0xc0] ss:$16 sps:$4 sm:$0xff]  }
 0x2b9   : > { %1741 = vmatpush1.bf16.msra.mxu1 %v10471_v5  ;;  %v11697_v5 = vld [vmem:[#allocation15 + $0xec] ss:$16 sps:$4 sm:$0xff]  }
 0x2ba   : > { %1742 = vmatprep.subr.bf16.mxu1 %v10480_v6  ;;  %v11692_v6 = vld [vmem:[#allocation15 + $0xe0] ss:$16 sps:$4 sm:$0xff]  }
 0x2bd   : > { %1743 = vmatpush1.bf16.msra.mxu1 %v10479_v9  ;;  %v11703_v9 = vld [vmem:[#allocation15 + $0x10c] ss:$16 sps:$4 sm:$0xff]  }
 0x2be   : > { %1834 = vmatprep.subr.bf16.mxu1 %v10428_v10  ;;  %v11698_v10 = vld [vmem:[#allocation15 + $0x100] ss:$16 sps:$4 sm:$0xff]  }
 0x2c0   : > { %1761 = vmatmul.mubr.bf16.vlgmr.msra.gmra.mrb[16].mxu1 %v13422_v45 }
 0x2c1   : > { %1835 = vmatpush1.bf16.msra.mxu1 %v10427_v13  ;;  %1770 = vmatprep.mubr.bf16.mxu1 %v13053_v28  ;;  %v11709_v13 = vld [vmem:[#allocation15 + $0x12c] ss:$16 sps:$4 sm:$0xff]  }
 0x2c2   : > { %1836 = vmatprep.subr.bf16.mxu1 %v10436_v14  ;;  %v11704_v14 = vld [vmem:[#allocation15 + $0x120] ss:$16 sps:$4 sm:$0xff]  }
 0x2c5   : > { %1837 = vmatpush1.bf16.msra.mxu1 %v10435_v17  ;;  %v11715_v17 = vld [vmem:[#allocation15 + $0x14c] ss:$16 sps:$4 sm:$0xff]  }
 0x2c6   : > { %1838 = vmatprep.subr.bf16.mxu1 %v10444_v18  ;;  %v11710_v18 = vld [vmem:[#allocation15 + $0x140] ss:$16 sps:$4 sm:$0xff]  }
 0x2c8   : > { %1771 = vmatmul.mubr.bf16.gmra.mrb[20].mxu1 %v13420_v44 }
 0x2c9   : > { %1839 = vmatpush1.bf16.msra.mxu1 %v10443_v21  ;;  %1866 = vmatprep.mubr.bf16.mxu1 %v13053_v28  ;;  %v11721_v21 = vld [vmem:[#allocation15 + $0x16c] ss:$16 sps:$4 sm:$0xff]  }
 0x2ca   : > { %1840 = vmatprep.subr.bf16.mxu1 %v10452_v22  ;;  %v11716_v22 = vld [vmem:[#allocation15 + $0x160] ss:$16 sps:$4 sm:$0xff]  }
 0x2cd   : > { %1841 = vmatpush1.bf16.msra.mxu1 %v10451_v25  ;;  %v11727_v25 = vld [vmem:[#allocation15 + $0x18c] ss:$16 sps:$4 sm:$0xff]  }
 0x2ce   : > { %1842 = vmatprep.subr.bf16.mxu1 %v10460_v26  ;;  %v11722_v26 = vld [vmem:[#allocation15 + $0x180] ss:$16 sps:$4 sm:$0xff]  }
 0x2d1   : > { %1843 = vmatpush1.bf16.msra.mxu1 %v10459_v30  ;;  %v11733_v30 = vld [vmem:[#allocation15 + $0x1ac] ss:$16 sps:$4 sm:$0xff]  }
 0x2d2   : > { %1844 = vmatprep.subr.bf16.mxu1 %v10468_v31  ;;  %v11728_v31 = vld [vmem:[#allocation15 + $0x1a0] ss:$16 sps:$4 sm:$0xff]  }
 0x2d5   : > { %1845 = vmatpush1.bf16.msra.mxu1 %v10467_v34  ;;  %v11739_v34 = vld [vmem:[#allocation15 + $0x1cc] ss:$16 sps:$4 sm:$0xff]  }
 0x2d6   : > { %1846 = vmatprep.subr.bf16.mxu1 %v10476_v35  ;;  %v11734_v35 = vld [vmem:[#allocation15 + $0x1c0] ss:$16 sps:$4 sm:$0xff]  }
 0x2d9   : > { %1847 = vmatpush1.bf16.msra.mxu1 %v10475_v38  ;;  %v11745_v38 = vld [vmem:[#allocation15 + $0x1ec] ss:$16 sps:$4 sm:$0xff]  }
 0x2da   : > { %1848 = vmatprep.subr.bf16.mxu1 %v10484_v39  ;;  %v11740_v39 = vld [vmem:[#allocation15 + $0x1e0] ss:$16 sps:$4 sm:$0xff]  }
 0x2dd   : > { %1849 = vmatpush1.bf16.msra.mxu1 %v10483_v40  ;;  %v11743_v40 = vld [vmem:[#allocation15 + $0x1e8] ss:$16 sps:$4 sm:$0xff]  }
 0x2de   : > { %3922 = vmatprep.subr.bf16.mxu1 %v11655_v42  ;;  %v11751_v42 = vld [vmem:[#allocation15 + $0x20c] ss:$16 sps:$4 sm:$0xff]  }
 0x2e0   : > { %1867 = vmatmul.mubr.bf16.vlgmr.msra.gmra.mrb[24].mxu1 %v13422_v45  ;;  %v11664_v45 = vld [vmem:[#allocation15 + $0x44] ss:$16 sps:$4 sm:$0xff]  }
 0x2e1   : > { %1876 = vmatprep.mubr.bf16.mxu1 %v13053_v28  ;;  %3923 = vmatpush1.bf16.msra.mxu1 %v11653_v46  ;;  %v11667_v28 = vld [vmem:[#allocation15 + $0x4c] ss:$16 sps:$4 sm:$0xff]   ;;  %v13438_v46 = vshrl.u32 %v1315_v43, 7 }
 0x2e2   : > { %3924 = vmatprep.subr.bf16.mxu1 %v11661_v48  ;;  %3762 = vmatprep.subr.bf16.mxu0 %v11664_v45 }
 0x2e3   : > { %3763 = vmatpush1.bf16.msra.mxu0 %v11662_v51  ;;  %v13441_v47 = vsub.s32 0, %v13438_v46  ;;  %v1333_v48 = vsub.s32 4, %v13438_v46  ;;  %v1337_v45 = vsub.s32 5, %v13438_v46 }
 0x2e4   : > { %3764 = vmatprep.subr.bf16.mxu0 %v11670_v52 }
 0x2e5   : > { %3925 = vmatpush1.bf16.msra.mxu1 %v11659_v50  ;;  %v13448_v50 = vsub.s32 1, %v13438_v46  ;;  %v1334_v51 = vrot.slane %v13445_v49, %v1333_v48  ;;  %v1338_v52 = vrot.slane %v13445_v49, %v1337_v45 }
 0x2e6   : > { %3926 = vmatprep.subr.bf16.mxu1 %v11667_v28  ;;  %v1318_v28 = vrot.slane %v13445_v49, %v13441_v47 }
 0x2e7   : > { %3765 = vmatpush1.bf16.msra.mxu0 %v11668_v54 }
 0x2e8   : > { %1877 = vmatmul.mubr.bf16.gmra.mrb[28].mxu1 %v13420_v44  ;;  %v11665_v44 = vld [vmem:[#allocation15 + $0x48] ss:$16 sps:$4 sm:$0xff]   ;;  %3766 = vmatprep.subr.bf16.mxu0 %v11676_v56 }
 0x2e9   : > { %3927 = vmatpush1.bf16.msra.mxu1 %v11665_v44  ;;  %v1322_v44 = vrot.slane %v13445_v49, %v13448_v50 }
 0x2ea   : > { %3928 = vmatprep.subr.bf16.mxu1 %v11673_v53 }
 0x2eb   : > { %3767 = vmatpush1.bf16.msra.mxu0 %v11674_v58 }
 0x2ec   : > { %3768 = vmatprep.subr.bf16.mxu0 %v11682_v60 }
 0x2ed   : > { %3929 = vmatpush1.bf16.msra.mxu1 %v11671_v55 }
 0x2ee   : > { %3930 = vmatprep.subr.bf16.mxu1 %v11679_v57 }
 0x2ef   : > { %3769 = vmatpush1.bf16.msra.mxu0 %v11680_v62 }
 0x2f0   : > { %3770 = vmatprep.subr.bf16.mxu0 %v11688_v0 }
 0x2f1   : > { %3931 = vmatpush1.bf16.msra.mxu1 %v11677_v59 }
 0x2f2   : > { %3932 = vmatprep.subr.bf16.mxu1 %v11685_v61 }
 0x2f3   : > { %3771 = vmatpush1.bf16.msra.mxu0 %v11686_v2 }
 0x2f4   : > { %3772 = vmatprep.subr.bf16.mxu0 %v11694_v4 }
 0x2f5   : > { %3933 = vmatpush1.bf16.msra.mxu1 %v11683_v63 }
 0x2f6   : > { %3934 = vmatprep.subr.bf16.mxu1 %v11691_v1 }
 0x2f7   : > { %3773 = vmatpush1.bf16.msra.mxu0 %v11692_v6 }
 0x2f8   : > { %3774 = vmatprep.subr.bf16.mxu0 %v11700_v8 }
 0x2f9   : > { %3935 = vmatpush1.bf16.msra.mxu1 %v11689_v3 }
 0x2fa   : > { %3936 = vmatprep.subr.bf16.mxu1 %v11697_v5 }
 0x2fb   : > { %3775 = vmatpush1.bf16.msra.mxu0 %v11698_v10 }
 0x2fc   : > { %3776 = vmatprep.subr.bf16.mxu0 %v11706_v12 }
 0x2fd   : > { %3937 = vmatpush1.bf16.msra.mxu1 %v11695_v7 }
 0x2fe   : > { %3938 = vmatprep.subr.bf16.mxu1 %v11703_v9 }
 0x2ff   : > { %3777 = vmatpush1.bf16.msra.mxu0 %v11704_v14 }
 0x300   : > { %3778 = vmatprep.subr.bf16.mxu0 %v11712_v16 }
 0x301   : > { %3939 = vmatpush1.bf16.msra.mxu1 %v11701_v11 }
 0x302   : > { %3940 = vmatprep.subr.bf16.mxu1 %v11709_v13 }
 0x303   : > { %3779 = vmatpush1.bf16.msra.mxu0 %v11710_v18 }
 0x304   : > { %3780 = vmatprep.subr.bf16.mxu0 %v11718_v20 }
 0x305   : > { %3941 = vmatpush1.bf16.msra.mxu1 %v11707_v15 }
 0x306   : > { %3942 = vmatprep.subr.bf16.mxu1 %v11715_v17 }
 0x307   : > { %3781 = vmatpush1.bf16.msra.mxu0 %v11716_v22 }
 0x308   : > { %3782 = vmatprep.subr.bf16.mxu0 %v11724_v24 }
 0x309   : > { %3943 = vmatpush1.bf16.msra.mxu1 %v11713_v19 }
 0x30a   : > { %3944 = vmatprep.subr.bf16.mxu1 %v11721_v21 }
 0x30b   : > { %3783 = vmatpush1.bf16.msra.mxu0 %v11722_v26 }
 0x30c   : > { %3784 = vmatprep.subr.bf16.mxu0 %v11730_v29 }
 0x30d   : > { %3945 = vmatpush1.bf16.msra.mxu1 %v11719_v23 }
 0x30e   : > { %3946 = vmatprep.subr.bf16.mxu1 %v11727_v25 }
 0x30f   : > { %3785 = vmatpush1.bf16.msra.mxu0 %v11728_v31 }
 0x310   : > { %3786 = vmatprep.subr.bf16.mxu0 %v11736_v33 }
 0x311   : > { %3947 = vmatpush1.bf16.msra.mxu1 %v11725_v27 }
 0x312   : > { %3948 = vmatprep.subr.bf16.mxu1 %v11733_v30 }
 0x313   : > { %3787 = vmatpush1.bf16.msra.mxu0 %v11734_v35 }
 0x314   : > { %3788 = vmatprep.subr.bf16.mxu0 %v11742_v37 }
 0x315   : > { %3949 = vmatpush1.bf16.msra.mxu1 %v11731_v32 }
 0x316   : > { %3950 = vmatprep.subr.bf16.mxu1 %v11739_v34 }
 0x317   : > { %3789 = vmatpush1.bf16.msra.mxu0 %v11740_v39 }
 0x318   : > { %3799 = vmatprep.subr.bf16.mxu0 %v11748_v41 }
 0x319   : > { %3951 = vmatpush1.bf16.msra.mxu1 %v11737_v36 }
 0x31a   : > { %3952 = vmatprep.subr.bf16.mxu1 %v11745_v38 }
 0x31d   : > { %3953 = vmatpush1.bf16.msra.mxu1 %v11743_v40 }
 0x31e   : > { %3963 = vmatprep.subr.bf16.mxu1 %v11751_v42 }
 0x373   : > { %v1709_v53 = vpop.f32.mrb[8].mxu1  ;;  %v1815_v54 = vpop.f32.mrb[0].mxu0 }
 0x374   : > { %v1710_v55 = vadd.f32 %v1709_v53, %v1318_v28  ;;  %v1816_v56 = vadd.f32 %v1815_v54, %v1334_v51  ;;  %v1711_v57 = vpop.f32.mrb[9].mxu1  ;;  %v1817_v58 = vpop.f32.mrb[1].mxu0 }
 0x375   : > { %v1712_v59 = vadd.f32 %v1711_v57, %v1322_v44  ;;  %v1818_v60 = vadd.f32 %v1817_v58, %v1338_v52  ;;  %v1713_v61 = vpop.f32.mrb[10].mxu1  ;;  %v1819_v62 = vpop.f32.mrb[2].mxu0 }
 0x376   : > { %v1714_v63 = vadd.f32 %v1713_v61, %v1318_v28  ;;  %v1820_v0 = vadd.f32 %v1819_v62, %v1334_v51  ;;  %v1715_v1 = vpop.f32.mrb[11].mxu1  ;;  %v1821_v2 = vpop.f32.mrb[3].mxu0  ;;  %v1887_v5 = vmax.f32 %v1710_v55, 0.0  ;;  %v1891_v6 = vmax.f32 %v1816_v56, 0.0 }
 0x377   : > { %v1716_v3 = vadd.f32 %v1715_v1, %v1322_v44  ;;  %v1822_v4 = vadd.f32 %v1821_v2, %v1338_v52  ;;  %v1888_v9 = vmax.f32 %v1712_v59, 0.0  ;;  %v1892_v10 = vmax.f32 %v1818_v60, 0.0 }
 0x378   : > { %v1895_v7 = vmax.f32 %v1714_v63, 0.0  ;;  %v1899_v8 = vmax.f32 %v1820_v0, 0.0 }
 0x379   : > { %v1896_v11 = vmax.f32 %v1716_v3, 0.0  ;;  %v1900_v12 = vmax.f32 %v1822_v4, 0.0 }
 0x37a   : > { %v1921_v13 = vmax.f32 %v1887_v5, %v1895_v7  ;;  %v1949_v14 = vmax.f32 %v1891_v6, %v1899_v8 }
 0x37b   : > { %v1928_v15 = vmax.f32 %v1888_v9, %v1896_v11  ;;  %v1956_v16 = vmax.f32 %v1892_v10, %v1900_v12  ;;  %v1719_v17 = vpop.f32.mrb[12].mxu1  ;;  %v1825_v18 = vpop.f32.mrb[4].mxu0 }
 0x37c   : > { %v1922_v19 = vrot.slane %v1921_v13, 4  ;;  %v1950_v20 = vrot.slane %v1949_v14, 4  ;;  %v1720_v21 = vadd.f32 %v1719_v17, %v1318_v28  ;;  %v1826_v22 = vadd.f32 %v1825_v18, %v1334_v51  ;;  %v1721_v23 = vpop.f32.mrb[13].mxu1  ;;  %v1827_v24 = vpop.f32.mrb[5].mxu0 }
 0x37d   : > { %v1929_v25 = vrot.slane %v1928_v15, 4  ;;  %v1957_v26 = vrot.slane %v1956_v16, 4  ;;  %v1722_v27 = vadd.f32 %v1721_v23, %v1322_v44  ;;  %v1828_v29 = vadd.f32 %v1827_v24, %v1338_v52  ;;  %v1723_v30 = vpop.f32.mrb[14].mxu1  ;;  %v1829_v31 = vpop.f32.mrb[6].mxu0 }
 0x37e   : > { %v1923_v32 = vmax.f32 %v1921_v13, %v1922_v19  ;;  %v1951_v33 = vmax.f32 %v1949_v14, %v1950_v20  ;;  %v1903_v34 = vmax.f32 %v1720_v21, 0.0  ;;  %v1907_v35 = vmax.f32 %v1826_v22, 0.0  ;;  %v1725_v36 = vpop.f32.mrb[15].mxu1  ;;  %v1831_v37 = vpop.f32.mrb[7].mxu0 }
 0x37f   : > { %v1930_v38 = vmax.f32 %v1928_v15, %v1929_v25  ;;  %v1958_v39 = vmax.f32 %v1956_v16, %v1957_v26  ;;  %v1904_v40 = vmax.f32 %v1722_v27, 0.0  ;;  %v1908_v41 = vmax.f32 %v1828_v29, 0.0 }
 0x380   : > { %v1924_v42 = vrot.slane %v1923_v32, 2  ;;  %v1952_v43 = vrot.slane %v1951_v33, 2  ;;  %v1724_v48 = vadd.f32 %v1723_v30, %v1318_v28  ;;  %v1830_v45 = vadd.f32 %v1829_v31, %v1334_v51 }
 0x381   : > { %v1931_v53 = vrot.slane %v1930_v38, 2  ;;  %v1959_v54 = vrot.slane %v1958_v39, 2  ;;  %v1726_v55 = vadd.f32 %v1725_v36, %v1322_v44  ;;  %v1832_v56 = vadd.f32 %v1831_v37, %v1338_v52 }
 0x382   : > { %v1925_v57 = vmax.f32 %v1923_v32, %v1924_v42  ;;  %v1953_v58 = vmax.f32 %v1951_v33, %v1952_v43  ;;  %v1911_v59 = vmax.f32 %v1724_v48, 0.0  ;;  %v1915_v60 = vmax.f32 %v1830_v45, 0.0 }
 0x383   : > { %v1932_v61 = vmax.f32 %v1930_v38, %v1931_v53  ;;  %v1960_v62 = vmax.f32 %v1958_v39, %v1959_v54  ;;  %v1912_v63 = vmax.f32 %v1726_v55, 0.0  ;;  %v1916_v0 = vmax.f32 %v1832_v56, 0.0 }
 0x384   : > { %v1926_v1 = vrot.slane %v1925_v57, 1  ;;  %v1954_v2 = vrot.slane %v1953_v58, 1  ;;  %v1977_v3 = vmax.f32 %v1903_v34, %v1911_v59  ;;  %v2005_v4 = vmax.f32 %v1907_v35, %v1915_v60 }
 0x385   : > { %v1933_v5 = vrot.slane %v1932_v61, 1  ;;  %v1961_v6 = vrot.slane %v1960_v62, 1  ;;  %v1984_v28 = vmax.f32 %v1904_v40, %v1912_v63  ;;  %v2012_v51 = vmax.f32 %v1908_v41, %v1916_v0 }
 0x386   : > { %v13457_v7 = vmax.f32 %v1925_v57, %v1926_v1  ;;  %v13459_v44 = vmax.f32 %v1953_v58, %v1954_v2  ;;  %v1978_v52 = vrot.slane %v1977_v3, 4  ;;  %v2006_v8 = vrot.slane %v2005_v4, 4 }
 0x387   : > { %v13461_v9 = vmax.f32 %v1932_v61, %v1933_v5  ;;  %v13463_v10 = vmax.f32 %v1960_v62, %v1961_v6  ;;  %v1985_v11 = vrot.slane %v1984_v28, 4  ;;  %v2013_v12 = vrot.slane %v2012_v51, 4 }
 0x388   : > { %v1979_v13 = vmax.f32 %v1977_v3, %v1978_v52  ;;  %v2007_v14 = vmax.f32 %v2005_v4, %v2006_v8  ;;  %v13470_v25 = vsub.s32 2, %v13438_v46  ;;  %v1329_v29 = vsub.s32 3, %v13438_v46 }
 0x389   : > { %v2049_v15 = vcombine.low %v13457_v7, %v13461_v9  ;;  %v2066_v16 = vcombine.low %v13459_v44, %v13463_v10  ;;  %v1986_v17 = vmax.f32 %v1984_v28, %v1985_v11  ;;  %v2014_v18 = vmax.f32 %v2012_v51, %v2013_v12  ;;  %v11770_v44 = vld [vmem:[#allocation15 + $0x280] ss:$16 sps:$4 sm:$0xff]   ;;  %v11773_v10 = vld [vmem:[#allocation15 + $0x288] ss:$16 sps:$4 sm:$0xff]  }
 0x38a   : > { %v1980_v19 = vrot.slane %v1979_v13, 2  ;;  %v2008_v20 = vrot.slane %v2007_v14, 2  ;;  %v1326_v36 = vrot.slane %v13445_v49, %v13470_v25  ;;  %v1330_v39 = vrot.slane %v13445_v49, %v1329_v29 }
 0x38b   : > { %v1987_v21 = vrot.slane %v1986_v17, 2  ;;  %v2015_v22 = vrot.slane %v2014_v18, 2  ;;  %v13054_v52 = vmov 1983009808  }
 0x38c   : > { %v1981_v23 = vmax.f32 %v1979_v13, %v1980_v19  ;;  %v2009_v24 = vmax.f32 %v2007_v14, %v2008_v20  ;;  %v2052_v8 = vunpack.c.l.s4 %v13054_v52 }
 0x38d   : > { %v1988_v26 = vmax.f32 %v1986_v17, %v1987_v21  ;;  %v2016_v27 = vmax.f32 %v2014_v18, %v2015_v22 }
 0x38e   : > { %v1982_v30 = vrot.slane %v1981_v23, 1  ;;  %v2010_v31 = vrot.slane %v2009_v24, 1 }
 0x38f   : > { %v1989_v32 = vrot.slane %v1988_v26, 1  ;;  %v2017_v33 = vrot.slane %v2016_v27, 1 }
 0x390   : > { %v13473_v34 = vmax.f32 %v1981_v23, %v1982_v30  ;;  %v13475_v35 = vmax.f32 %v2009_v24, %v2010_v31  ;;  %v2053_v23 = vunpack.c.0.s8 %v2052_v8 }
 0x391   : > { %v13479_v37 = vmax.f32 %v1988_v26, %v1989_v32  ;;  %v13481_v38 = vmax.f32 %v2016_v27, %v2017_v33 }
 0x393   : > { %v2083_v40 = vcombine.low %v13473_v34, %v13479_v37  ;;  %v2100_v41 = vcombine.low %v13475_v35, %v13481_v38  ;;  %v1762_v42 = vpop.f32.mrb[16].mxu1  ;;  %v11790_v35 = vld [vmem:[#allocation15 + $0x2e4] ss:$16 sps:$4 sm:$0xff]   ;;  %v11793_v38 = vld [vmem:[#allocation15 + $0x2ec] ss:$16 sps:$4 sm:$0xff]  }
 0x394   : > { %v1763_v43 = vadd.f32 %v1762_v42, %v1326_v36  ;;  %v1764_v48 = vpop.f32.mrb[17].mxu1  ;;  %v13491_v42 = vsub.s32 %v2053_v23, %v13438_v46 }
 0x395   : > { %v1765_v45 = vadd.f32 %v1764_v48, %v1330_v39  ;;  %v1766_v53 = vpop.f32.mrb[18].mxu1 }
 0x396   : > { %v1767_v54 = vadd.f32 %v1766_v53, %v1326_v36  ;;  %v1768_v55 = vpop.f32.mrb[19].mxu1  ;;  %v1889_v57 = vmax.f32 %v1763_v43, 0.0  ;;  %v2091_v7 = vrot.slane %v2083_v40, %v13491_v42 }
 0x397   : > { %v1769_v56 = vadd.f32 %v1768_v55, %v1330_v39  ;;  %v1890_v59 = vmax.f32 %v1765_v45, 0.0  ;;  %v2057_v55 = vrot.slane %v2049_v15, %v13491_v42 }
 0x398   : > { %v1897_v58 = vmax.f32 %v1767_v54, 0.0 }
 0x399   : > { %v1898_v60 = vmax.f32 %v1769_v56, 0.0 }
 0x39a   : > { %v1935_v61 = vmax.f32 %v1889_v57, %v1897_v58 }
 0x39b   : > { %v1942_v62 = vmax.f32 %v1890_v59, %v1898_v60  ;;  %v1772_v63 = vpop.f32.mrb[20].mxu1  ;;  %v1341_v59 = vsub.s32 6, %v13438_v46 }
 0x39c   : > { %v1936_v0 = vrot.slane %v1935_v61, 4  ;;  %v1773_v1 = vadd.f32 %v1772_v63, %v1326_v36  ;;  %v1774_v2 = vpop.f32.mrb[21].mxu1 }
 0x39d   : > { %v1943_v3 = vrot.slane %v1942_v62, 4  ;;  %v1775_v4 = vadd.f32 %v1774_v2, %v1330_v39  ;;  %v1776_v5 = vpop.f32.mrb[22].mxu1 }
 0x39e   : > { %v1937_v6 = vmax.f32 %v1935_v61, %v1936_v0  ;;  %v1777_v28 = vadd.f32 %v1776_v5, %v1326_v36  ;;  %v1778_v51 = vpop.f32.mrb[23].mxu1  ;;  %v1905_v14 = vmax.f32 %v1773_v1, 0.0  ;;  %v1342_v1 = vrot.slane %v13445_v49, %v1341_v59 }
 0x39f   : > { %v1944_v11 = vmax.f32 %v1942_v62, %v1943_v3  ;;  %v1779_v12 = vadd.f32 %v1778_v51, %v1330_v39  ;;  %v1906_v19 = vmax.f32 %v1775_v4, 0.0  ;;  %v1345_v62 = vsub.s32 7, %v13438_v46 }
 0x3a0   : > { %v1938_v13 = vrot.slane %v1937_v6, 2  ;;  %v1913_v17 = vmax.f32 %v1777_v28, 0.0 }
 0x3a1   : > { %v1945_v18 = vrot.slane %v1944_v11, 2  ;;  %v1914_v20 = vmax.f32 %v1779_v12, 0.0  ;;  %v1346_v3 = vrot.slane %v13445_v49, %v1345_v62  ;;  %v11749_v62 = vld [vmem:[#allocation15 + $0x208] ss:$16 sps:$4 sm:$0xff]  }
 0x3a2   : > { %v1939_v21 = vmax.f32 %v1937_v6, %v1938_v13  ;;  %v1991_v22 = vmax.f32 %v1905_v14, %v1913_v17 }
 0x3a3   : > { %v1946_v24 = vmax.f32 %v1944_v11, %v1945_v18  ;;  %v1998_v26 = vmax.f32 %v1906_v19, %v1914_v20 }
 0x3a4   : > { %v1940_v27 = vrot.slane %v1939_v21, 1  ;;  %v1992_v30 = vrot.slane %v1991_v22, 4 }
 0x3a5   : > { %v1947_v31 = vrot.slane %v1946_v24, 1  ;;  %v1999_v32 = vrot.slane %v1998_v26, 4 }
 0x3a6   : > { %v1941_v33 = vmax.f32 %v1939_v21, %v1940_v27  ;;  %v1993_v36 = vmax.f32 %v1991_v22, %v1992_v30 }
 0x3a7   : > { %v1948_v39 = vmax.f32 %v1946_v24, %v1947_v31  ;;  %v2000_v43 = vmax.f32 %v1998_v26, %v1999_v32 }
 0x3a8   : > { %v1994_v48 = vrot.slane %v1993_v36, 2 }
 0x3a9   : > { %v2050_v45 = vcombine.low %v1941_v33, %v1948_v39  ;;  %v2001_v53 = vrot.slane %v2000_v43, 2 }
 0x3aa   : > { %v1995_v54 = vmax.f32 %v1993_v36, %v1994_v48 }
 0x3ab   : > { %v2064_v56 = vrot.slane %v2050_v45, %v13491_v42  ;;  %v2002_v57 = vmax.f32 %v2000_v43, %v2001_v53 }
 0x3ac   : > { %v1996_v58 = vrot.slane %v1995_v54, 1 }
 0x3ad   : > { %v2065_v60 = vcombine.low %v2057_v55, %v2064_v56  ;;  %v2003_v61 = vrot.slane %v2002_v57, 1  ;;  %v11746_v56 = vld [vmem:[#allocation15 + $0x200] ss:$16 sps:$4 sm:$0xff]  }
 0x3ae   : > { %v1997_v63 = vmax.f32 %v1995_v54, %v1996_v58 }
 0x3af   : > { %v2004_v0 = vmax.f32 %v2002_v57, %v2003_v61 }
 0x3b1   : > { %v2084_v2 = vcombine.low %v1997_v63, %v2004_v0 }
 0x3b3   : > { %v2098_v9 = vrot.slane %v2084_v2, %v13491_v42  ;;  %v1868_v15 = vpop.f32.mrb[24].mxu1 }
 0x3b4   : > { %v1869_v4 = vadd.f32 %v1868_v15, %v1342_v1  ;;  %v1870_v5 = vpop.f32.mrb[25].mxu1  ;;  %v11757_v15 = vld [vmem:[#allocation15 + $0x22c] ss:$16 sps:$4 sm:$0xff]  }
 0x3b5   : > { %v2099_v6 = vcombine.low %v2091_v7, %v2098_v9  ;;  %v1871_v28 = vadd.f32 %v1870_v5, %v1346_v3  ;;  %v1872_v51 = vpop.f32.mrb[26].mxu1  ;;  %v11754_v9 = vld [vmem:[#allocation15 + $0x224] ss:$16 sps:$4 sm:$0xff]  }
 0x3b6   : > { %v1873_v52 = vadd.f32 %v1872_v51, %v1342_v1  ;;  %v1874_v8 = vpop.f32.mrb[27].mxu1  ;;  %v1893_v49 = vmax.f32 %v1869_v4, 0.0 }
 0x3b7   : > { %v1875_v11 = vadd.f32 %v1874_v8, %v1346_v3  ;;  %v2121_v12 = vrot.slane %v2099_v6, 7  ;;  %v1894_v14 = vmax.f32 %v1871_v28, 0.0  ;;  %v11755_v8 = vld [vmem:[#allocation15 + $0x228] ss:$16 sps:$4 sm:$0xff]  }
 0x3b8   : > { %v1901_v13 = vmax.f32 %v1873_v52, 0.0  ;;  %v11752_v52 = vld [vmem:[#allocation15 + $0x220] ss:$16 sps:$4 sm:$0xff]  }
 0x3b9   : > { %v1902_v34 = vmax.f32 %v1875_v11, 0.0  ;;  %v2123_v37 = vsel %vm2122_vm4, %v2121_v12, %v2065_v60 }
 0x3ba   : > { %v1963_v40 = vmax.f32 %v1893_v49, %v1901_v13  ;;  %v2125_v17 = vsel %vm2124_vm5, %v2121_v12, %v2123_v37  ;;  %v11760_v49 = vld [vmem:[#allocation15 + $0x244] ss:$16 sps:$4 sm:$0xff]   ;;  %v11763_v13 = vld [vmem:[#allocation15 + $0x24c] ss:$16 sps:$4 sm:$0xff]  }
 0x3bb   : > { %v1970_v18 = vmax.f32 %v1894_v14, %v1902_v34  ;;  %v1878_v19 = vpop.f32.mrb[28].mxu1  ;;  %v2127_v20 = vsel %vm2126_vm6, %v2121_v12, %v2125_v17 }
 0x3bc   : > { %v1964_v21 = vrot.slane %v1963_v40, 4  ;;  %v1879_v22 = vadd.f32 %v1878_v19, %v1342_v1  ;;  %v1880_v23 = vpop.f32.mrb[29].mxu1  ;;  %v2129_v24 = vsel %vm2128_vm7, %v2121_v12, %v2127_v20  ;;  %v11761_v19 = vld [vmem:[#allocation15 + $0x248] ss:$16 sps:$4 sm:$0xff]  }
 0x3bd   : > { %v1971_v26 = vrot.slane %v1970_v18, 4  ;;  %v1881_v27 = vadd.f32 %v1880_v23, %v1346_v3  ;;  %v1882_v30 = vpop.f32.mrb[30].mxu1  ;;  %v2157_v31 = vrot.slane %v2129_v24, %v13491_v42  ;;  %v2150_v32 = vcombine.high %v2129_v24, %v2129_v24 }
 0x3be   : > { %v1965_v33 = vmax.f32 %v1963_v40, %v1964_v21  ;;  %v1883_v36 = vadd.f32 %v1882_v30, %v1342_v1  ;;  %v1884_v39 = vpop.f32.mrb[31].mxu1  ;;  %v1909_v54 = vmax.f32 %v1879_v22, 0.0  ;;  %v11766_v21 = vld [vmem:[#allocation15 + $0x264] ss:$16 sps:$4 sm:$0xff]   ;;  %v11769_v22 = vld [vmem:[#allocation15 + $0x26c] ss:$16 sps:$4 sm:$0xff]   ;;  %v2074_v23 = vrot.slane %v2066_v16, %v13491_v42 }
 0x3bf   : > { %v1972_v43 = vmax.f32 %v1970_v18, %v1971_v26  ;;  %v1885_v48 = vadd.f32 %v1884_v39, %v1346_v3  ;;  %v2165_v45 = vcombine.high %v2157_v31, %v2157_v31  ;;  %v13513_v57 = vrot.slane %v2150_v32, %v13491_v42  ;;  %v11758_v18 = vld [vmem:[#allocation15 + $0x240] ss:$16 sps:$4 sm:$0xff]   ;;  %v11772_v39 = vld [vmem:[#allocation15 + $0x284] ss:$16 sps:$4 sm:$0xff]  }
 0x3c0   : > { %v1966_v53 = vrot.slane %v1965_v33, 2  ;;  %v1917_v55 = vmax.f32 %v1883_v36, 0.0  ;;  %v1910_v59 = vmax.f32 %v1881_v27, 0.0  ;;  %v2192_v2 = vpack.c.bf16 %v2157_v31, %v2157_v31  ;;  %v11764_v32 = vld [vmem:[#allocation15 + $0x260] ss:$16 sps:$4 sm:$0xff]  }
 0x3c1   : > { %v1973_v58 = vrot.slane %v1972_v43, 2  ;;  %v1918_v60 = vmax.f32 %v1885_v48, 0.0  ;;  %v2193_v61 = vpack.c.bf16 %v2165_v45, %v2165_v45  ;;  %v2166_v1 = vcombine.high %v13513_v57, %v13513_v57  ;;  %v11778_v16 = vld [vmem:[#allocation15 + $0x2a4] ss:$16 sps:$4 sm:$0xff]  }
 0x3c2   : > { %v1967_v63 = vmax.f32 %v1965_v33, %v1966_v53  ;;  %v2019_v0 = vmax.f32 %v1909_v54, %v1917_v55  ;;  %v11767_v33 = vld [vmem:[#allocation15 + $0x268] ss:$16 sps:$4 sm:$0xff]   ;;  %v11781_v53 = vld [vmem:[#allocation15 + $0x2ac] ss:$16 sps:$4 sm:$0xff]   ;;  %v2108_v54 = vrot.slane %v2100_v41, %v13491_v42 }
 0x3c3   : > { %v1974_v3 = vmax.f32 %v1972_v43, %v1973_v58  ;;  %v2026_v7 = vmax.f32 %v1910_v59, %v1918_v60  ;;  %3790 = vmatprep.mubr.bf16.mxu0 %v2193_v61  ;;  %3954 = vmatprep.mubr.bf16.mxu1 %v2193_v61  ;;  %v2195_v6 = vpack.c.bf16 %v2166_v1, %v2166_v1  ;;  %v11775_v43 = vld [vmem:[#allocation15 + $0x28c] ss:$16 sps:$4 sm:$0xff]   ;;  %v11776_v58 = vld [vmem:[#allocation15 + $0x2a0] ss:$16 sps:$4 sm:$0xff]   ;;  %v11779_v59 = vld [vmem:[#allocation15 + $0x2a8] ss:$16 sps:$4 sm:$0xff]  }
 0x3c4   : > { %v1968_v4 = vrot.slane %v1967_v63, 1  ;;  %v2020_v5 = vrot.slane %v2019_v0, 4  ;;  %3791 = vmatmul.mubr.bf16.vlgmr.msra.gmra.mrb[8].mxu0 %v2192_v2  ;;  %3955 = vmatmul.mubr.bf16.vlgmr.msra.gmra.mrb[32].mxu1 %v2192_v2  ;;  %v11784_v60 = vld [vmem:[#allocation15 + $0x2c4] ss:$16 sps:$4 sm:$0xff]   ;;  %v11787_v61 = vld [vmem:[#allocation15 + $0x2cc] ss:$16 sps:$4 sm:$0xff]  }
 0x3c5   : > { %v1975_v28 = vrot.slane %v1974_v3, 1  ;;  %v2027_v51 = vrot.slane %v2026_v7, 4  ;;  %3800 = vmatpush1.bf16.msra.mxu0 %v11746_v56  ;;  %3964 = vmatpush1.bf16.msra.mxu1 %v11749_v62 }
 0x3c6   : > { %v1969_v11 = vmax.f32 %v1967_v63, %v1968_v4  ;;  %v2021_v12 = vmax.f32 %v2019_v0, %v2020_v5  ;;  %3831 = vmatprep.mubr.bf16.mxu0 %v2195_v6  ;;  %3995 = vmatprep.mubr.bf16.mxu1 %v2195_v6  ;;  %v11782_v63 = vld [vmem:[#allocation15 + $0x2c0] ss:$16 sps:$4 sm:$0xff]   ;;  %v11785_v0 = vld [vmem:[#allocation15 + $0x2c8] ss:$16 sps:$4 sm:$0xff]   ;;  %v11799_v4 = vld [vmem:[#allocation15 + $0x30c] ss:$16 sps:$4 sm:$0xff]  }
 0x3c7   : > { %v1976_v14 = vmax.f32 %v1974_v3, %v1975_v28  ;;  %v2028_v34 = vmax.f32 %v2026_v7, %v2027_v51  ;;  %3801 = vmatprep.subr.bf16.mxu0 %v11754_v9  ;;  %3965 = vmatprep.subr.bf16.mxu1 %v11757_v15  ;;  %v11788_v7 = vld [vmem:[#allocation15 + $0x2e0] ss:$16 sps:$4 sm:$0xff]   ;;  %v11791_v9 = vld [vmem:[#allocation15 + $0x2e8] ss:$16 sps:$4 sm:$0xff]   ;;  %v11796_v15 = vld [vmem:[#allocation15 + $0x304] ss:$16 sps:$4 sm:$0xff]  }
 0x3c8   : > { %v2022_v37 = vrot.slane %v2021_v12, 2  ;;  %v11794_v5 = vld [vmem:[#allocation15 + $0x300] ss:$16 sps:$4 sm:$0xff]   ;;  %v11797_v6 = vld [vmem:[#allocation15 + $0x308] ss:$16 sps:$4 sm:$0xff]  }
 0x3c9   : > { %v2067_v40 = vcombine.low %v1969_v11, %v1976_v14  ;;  %v2029_v17 = vrot.slane %v2028_v34, 2  ;;  %3802 = vmatpush1.bf16.msra.mxu0 %v11752_v52  ;;  %3966 = vmatpush1.bf16.msra.mxu1 %v11755_v8  ;;  %v11802_v28 = vld [vmem:[#allocation15 + $0x324] ss:$16 sps:$4 sm:$0xff]   ;;  %v11805_v51 = vld [vmem:[#allocation15 + $0x32c] ss:$16 sps:$4 sm:$0xff]  }
 0x3ca   : > { %v2023_v20 = vmax.f32 %v2021_v12, %v2022_v37  ;;  %3803 = vmatprep.subr.bf16.mxu0 %v11760_v49  ;;  %3967 = vmatprep.subr.bf16.mxu1 %v11763_v13  ;;  %v11800_v52 = vld [vmem:[#allocation15 + $0x320] ss:$16 sps:$4 sm:$0xff]   ;;  %v11803_v8 = vld [vmem:[#allocation15 + $0x328] ss:$16 sps:$4 sm:$0xff]   ;;  %v11808_v11 = vld [vmem:[#allocation15 + $0x344] ss:$16 sps:$4 sm:$0xff]  }
 0x3cb   : > { %v2081_v24 = vrot.slane %v2067_v40, %v13491_v42  ;;  %v2030_v26 = vmax.f32 %v2028_v34, %v2029_v17  ;;  %v11811_v12 = vld [vmem:[#allocation15 + $0x34c] ss:$16 sps:$4 sm:$0xff]   ;;  %v11806_v49 = vld [vmem:[#allocation15 + $0x340] ss:$16 sps:$4 sm:$0xff]   ;;  %v11809_v13 = vld [vmem:[#allocation15 + $0x348] ss:$16 sps:$4 sm:$0xff]  }
 0x3cc   : > { %v2024_v27 = vrot.slane %v2023_v20, 1  ;;  %v11814_v14 = vld [vmem:[#allocation15 + $0x364] ss:$16 sps:$4 sm:$0xff]   ;;  %v11817_v34 = vld [vmem:[#allocation15 + $0x36c] ss:$16 sps:$4 sm:$0xff]  }
 0x3cd   : > { %v2082_v30 = vcombine.low %v2074_v23, %v2081_v24  ;;  %v2031_v31 = vrot.slane %v2030_v26, 1  ;;  %3804 = vmatpush1.bf16.msra.mxu0 %v11758_v18  ;;  %3968 = vmatpush1.bf16.msra.mxu1 %v11761_v19  ;;  %v11812_v37 = vld [vmem:[#allocation15 + $0x360] ss:$16 sps:$4 sm:$0xff]   ;;  %v11815_v40 = vld [vmem:[#allocation15 + $0x368] ss:$16 sps:$4 sm:$0xff]  }
 0x3ce   : > { %v2025_v36 = vmax.f32 %v2023_v20, %v2024_v27  ;;  %3805 = vmatprep.subr.bf16.mxu0 %v11766_v21  ;;  %3969 = vmatprep.subr.bf16.mxu1 %v11769_v22  ;;  %v11820_v17 = vld [vmem:[#allocation15 + $0x384] ss:$16 sps:$4 sm:$0xff]   ;;  %v11823_v18 = vld [vmem:[#allocation15 + $0x38c] ss:$16 sps:$4 sm:$0xff]   ;;  %v11818_v19 = vld [vmem:[#allocation15 + $0x380] ss:$16 sps:$4 sm:$0xff]  }
 0x3cf   : > { %v2032_v48 = vmax.f32 %v2030_v26, %v2031_v31  ;;  %v11821_v20 = vld [vmem:[#allocation15 + $0x388] ss:$16 sps:$4 sm:$0xff]   ;;  %v11826_v21 = vld [vmem:[#allocation15 + $0x3a4] ss:$16 sps:$4 sm:$0xff]   ;;  %v11829_v22 = vld [vmem:[#allocation15 + $0x3ac] ss:$16 sps:$4 sm:$0xff]  }
 0x3d0   : > { %v11824_v23 = vld [vmem:[#allocation15 + $0x3a0] ss:$16 sps:$4 sm:$0xff]   ;;  %v11827_v24 = vld [vmem:[#allocation15 + $0x3a8] ss:$16 sps:$4 sm:$0xff]   ;;  %v11832_v26 = vld [vmem:[#allocation15 + $0x3c4] ss:$16 sps:$4 sm:$0xff]  }
 0x3d1   : > { %v2101_v45 = vcombine.low %v2025_v36, %v2032_v48  ;;  %3806 = vmatpush1.bf16.msra.mxu0 %v11764_v32  ;;  %3970 = vmatpush1.bf16.msra.mxu1 %v11767_v33  ;;  %v11835_v27 = vld [vmem:[#allocation15 + $0x3cc] ss:$16 sps:$4 sm:$0xff]   ;;  %v11833_v31 = vld [vmem:[#allocation15 + $0x3c8] ss:$16 sps:$4 sm:$0xff]   ;;  %v11838_v32 = vld [vmem:[#allocation15 + $0x3e4] ss:$16 sps:$4 sm:$0xff]  }
 0x3d2   : > { %3807 = vmatprep.subr.bf16.mxu0 %v11772_v39  ;;  %3971 = vmatprep.subr.bf16.mxu1 %v11775_v43  ;;  %v11841_v33 = vld [vmem:[#allocation15 + $0x3ec] ss:$16 sps:$4 sm:$0xff]   ;;  %v11836_v39 = vld [vmem:[#allocation15 + $0x3e0] ss:$16 sps:$4 sm:$0xff]   ;;  %v11839_v43 = vld [vmem:[#allocation15 + $0x3e8] ss:$16 sps:$4 sm:$0xff]  }
 0x3d3   : > { %v2115_v55 = vrot.slane %v2101_v45, %v13491_v42  ;;  %v11844_v48 = vld [vmem:[#allocation15 + $0x404] ss:$16 sps:$4 sm:$0xff]   ;;  %v11847_v45 = vld [vmem:[#allocation15 + $0x40c] ss:$16 sps:$4 sm:$0xff]  }
 0x3d5   : > { %v2116_v56 = vcombine.low %v2108_v54, %v2115_v55  ;;  %3808 = vmatpush1.bf16.msra.mxu0 %v11770_v44  ;;  %3972 = vmatpush1.bf16.msra.mxu1 %v11773_v10  ;;  %v11842_v10 = vld [vmem:[#allocation15 + $0x400] ss:$16 sps:$4 sm:$0xff]   ;;  %v11850_v55 = vld [vmem:[#allocation15 + $0x424] ss:$16 sps:$4 sm:$0xff]  }
 0x3d6   : > { %3809 = vmatprep.subr.bf16.mxu0 %v11778_v16  ;;  %3973 = vmatprep.subr.bf16.mxu1 %v11781_v53  ;;  %v2194_v16 = vpack.c.bf16 %v13513_v57, %v13513_v57  ;;  %v11845_v53 = vld [vmem:[#allocation15 + $0x408] ss:$16 sps:$4 sm:$0xff]   ;;  %v11854_v57 = vld [vmem:[#allocation15 + $0x440] ss:$16 sps:$4 sm:$0xff]  }
 0x3d7   : > { %v2132_v62 = vrot.slane %v2116_v56, 7  ;;  %v11853_v56 = vld [vmem:[#allocation15 + $0x42c] ss:$16 sps:$4 sm:$0xff]  }
 0x3d9   : > { %3810 = vmatpush1.bf16.msra.mxu0 %v11776_v58  ;;  %3974 = vmatpush1.bf16.msra.mxu1 %v11779_v59  ;;  %v2133_v2 = vsel %vm2122_vm4, %v2132_v62, %v2082_v30  ;;  %v11830_v30 = vld [vmem:[#allocation15 + $0x3c0] ss:$16 sps:$4 sm:$0xff]   ;;  %v11851_v59 = vld [vmem:[#allocation15 + $0x428] ss:$16 sps:$4 sm:$0xff]  }
 0x3da   : > { %3811 = vmatprep.subr.bf16.mxu0 %v11784_v60  ;;  %3975 = vmatprep.subr.bf16.mxu1 %v11787_v61  ;;  %v2134_v41 = vsel %vm2124_vm5, %v2132_v62, %v2133_v2  ;;  %v11848_v58 = vld [vmem:[#allocation15 + $0x420] ss:$16 sps:$4 sm:$0xff]   ;;  %v11856_v60 = vld [vmem:[#allocation15 + $0x444] ss:$16 sps:$4 sm:$0xff]   ;;  %v11859_v61 = vld [vmem:[#allocation15 + $0x44c] ss:$16 sps:$4 sm:$0xff]  }
 0x3db   : > { %v2135_v1 = vsel %vm2126_vm6, %v2132_v62, %v2134_v41  ;;  %v11860_v2 = vld [vmem:[#allocation15 + $0x460] ss:$16 sps:$4 sm:$0xff]   ;;  %v11871_v41 = vld [vmem:[#allocation15 + $0x48c] ss:$16 sps:$4 sm:$0xff]  }
 0x3dc   : > { %v13531_v3 = vsel %vm2128_vm7, %v2132_v62, %v2135_v1  ;;  %v11857_v62 = vld [vmem:[#allocation15 + $0x448] ss:$16 sps:$4 sm:$0xff]   ;;  %v11866_v1 = vld [vmem:[#allocation15 + $0x480] ss:$16 sps:$4 sm:$0xff]  }
 0x3dd   : > { %3812 = vmatpush1.bf16.msra.mxu0 %v11782_v63  ;;  %3976 = vmatpush1.bf16.msra.mxu1 %v11785_v0  ;;  %v13535_v36 = vrot.slane %v13531_v3, %v13491_v42  ;;  %v11862_v63 = vld [vmem:[#allocation15 + $0x464] ss:$16 sps:$4 sm:$0xff]   ;;  %v11865_v0 = vld [vmem:[#allocation15 + $0x46c] ss:$16 sps:$4 sm:$0xff]  }
 0x3de   : > { %3813 = vmatprep.subr.bf16.mxu0 %v11790_v35  ;;  %3977 = vmatprep.subr.bf16.mxu1 %v11793_v38  ;;  %v11863_v35 = vld [vmem:[#allocation15 + $0x468] ss:$16 sps:$4 sm:$0xff]   ;;  %v11868_v38 = vld [vmem:[#allocation15 + $0x484] ss:$16 sps:$4 sm:$0xff]  }
 0x3df   : > { %v2182_v44 = vcombine.high %v13535_v36, %v13535_v36 }
 0x3e1   : > { %3814 = vmatpush1.bf16.msra.mxu0 %v11788_v7  ;;  %3978 = vmatpush1.bf16.msra.mxu1 %v11791_v9  ;;  %v2197_v54 = vpack.c.bf16 %v2182_v44, %v2182_v44  ;;  %v11869_v7 = vld [vmem:[#allocation15 + $0x488] ss:$16 sps:$4 sm:$0xff]   ;;  %v11874_v9 = vld [vmem:[#allocation15 + $0x4a4] ss:$16 sps:$4 sm:$0xff]  }
 0x3e2   : > { %3815 = vmatprep.subr.bf16.mxu0 %v11796_v15  ;;  %3979 = vmatprep.subr.bf16.mxu1 %v11799_v4  ;;  %v11877_v15 = vld [vmem:[#allocation15 + $0x4ac] ss:$16 sps:$4 sm:$0xff]   ;;  %v11872_v4 = vld [vmem:[#allocation15 + $0x4a0] ss:$16 sps:$4 sm:$0xff]   ;;  %v11923_v44 = vld [vmem:[#allocation15 + $0x5a8] ss:$16 sps:$4 sm:$0xff]  }
 0x3e5   : > { %3816 = vmatpush1.bf16.msra.mxu0 %v11794_v5  ;;  %3980 = vmatpush1.bf16.msra.mxu1 %v11797_v6  ;;  %v11875_v5 = vld [vmem:[#allocation15 + $0x4a8] ss:$16 sps:$4 sm:$0xff]   ;;  %v11880_v6 = vld [vmem:[#allocation15 + $0x4c4] ss:$16 sps:$4 sm:$0xff]  }
 0x3e6   : > { %3817 = vmatprep.subr.bf16.mxu0 %v11802_v28  ;;  %3981 = vmatprep.subr.bf16.mxu1 %v11805_v51  ;;  %v11883_v28 = vld [vmem:[#allocation15 + $0x4cc] ss:$16 sps:$4 sm:$0xff]   ;;  %v11878_v51 = vld [vmem:[#allocation15 + $0x4c0] ss:$16 sps:$4 sm:$0xff]  }
 0x3e9   : > { %3818 = vmatpush1.bf16.msra.mxu0 %v11800_v52  ;;  %3982 = vmatpush1.bf16.msra.mxu1 %v11803_v8  ;;  %v11881_v52 = vld [vmem:[#allocation15 + $0x4c8] ss:$16 sps:$4 sm:$0xff]   ;;  %v11886_v8 = vld [vmem:[#allocation15 + $0x4e4] ss:$16 sps:$4 sm:$0xff]  }
 0x3ea   : > { %3819 = vmatprep.subr.bf16.mxu0 %v11808_v11  ;;  %3983 = vmatprep.subr.bf16.mxu1 %v11811_v12  ;;  %v11889_v11 = vld [vmem:[#allocation15 + $0x4ec] ss:$16 sps:$4 sm:$0xff]   ;;  %v11884_v12 = vld [vmem:[#allocation15 + $0x4e0] ss:$16 sps:$4 sm:$0xff]  }
 0x3ed   : > { %3820 = vmatpush1.bf16.msra.mxu0 %v11806_v49  ;;  %3984 = vmatpush1.bf16.msra.mxu1 %v11809_v13  ;;  %v11887_v49 = vld [vmem:[#allocation15 + $0x4e8] ss:$16 sps:$4 sm:$0xff]   ;;  %v11892_v13 = vld [vmem:[#allocation15 + $0x504] ss:$16 sps:$4 sm:$0xff]  }
 0x3ee   : > { %3821 = vmatprep.subr.bf16.mxu0 %v11814_v14  ;;  %3985 = vmatprep.subr.bf16.mxu1 %v11817_v34  ;;  %v11895_v14 = vld [vmem:[#allocation15 + $0x50c] ss:$16 sps:$4 sm:$0xff]   ;;  %v11890_v34 = vld [vmem:[#allocation15 + $0x500] ss:$16 sps:$4 sm:$0xff]  }
 0x3f1   : > { %3822 = vmatpush1.bf16.msra.mxu0 %v11812_v37  ;;  %3986 = vmatpush1.bf16.msra.mxu1 %v11815_v40  ;;  %v11893_v37 = vld [vmem:[#allocation15 + $0x508] ss:$16 sps:$4 sm:$0xff]   ;;  %v11898_v40 = vld [vmem:[#allocation15 + $0x524] ss:$16 sps:$4 sm:$0xff]  }
 0x3f2   : > { %3823 = vmatprep.subr.bf16.mxu0 %v11820_v17  ;;  %3987 = vmatprep.subr.bf16.mxu1 %v11823_v18  ;;  %v11901_v17 = vld [vmem:[#allocation15 + $0x52c] ss:$16 sps:$4 sm:$0xff]   ;;  %v11896_v18 = vld [vmem:[#allocation15 + $0x520] ss:$16 sps:$4 sm:$0xff]  }
 0x3f5   : > { %3824 = vmatpush1.bf16.msra.mxu0 %v11818_v19  ;;  %3988 = vmatpush1.bf16.msra.mxu1 %v11821_v20  ;;  %v11899_v19 = vld [vmem:[#allocation15 + $0x528] ss:$16 sps:$4 sm:$0xff]   ;;  %v11904_v20 = vld [vmem:[#allocation15 + $0x544] ss:$16 sps:$4 sm:$0xff]  }
 0x3f6   : > { %3825 = vmatprep.subr.bf16.mxu0 %v11826_v21  ;;  %3989 = vmatprep.subr.bf16.mxu1 %v11829_v22  ;;  %v11907_v21 = vld [vmem:[#allocation15 + $0x54c] ss:$16 sps:$4 sm:$0xff]   ;;  %v11902_v22 = vld [vmem:[#allocation15 + $0x540] ss:$16 sps:$4 sm:$0xff]  }
 0x3f9   : > { %3826 = vmatpush1.bf16.msra.mxu0 %v11824_v23  ;;  %3990 = vmatpush1.bf16.msra.mxu1 %v11827_v24  ;;  %v11905_v23 = vld [vmem:[#allocation15 + $0x548] ss:$16 sps:$4 sm:$0xff]   ;;  %v11910_v24 = vld [vmem:[#allocation15 + $0x564] ss:$16 sps:$4 sm:$0xff]  }
 0x3fa   : > { %3827 = vmatprep.subr.bf16.mxu0 %v11832_v26  ;;  %3991 = vmatprep.subr.bf16.mxu1 %v11835_v27  ;;  %v11913_v26 = vld [vmem:[#allocation15 + $0x56c] ss:$16 sps:$4 sm:$0xff]   ;;  %v11908_v27 = vld [vmem:[#allocation15 + $0x560] ss:$16 sps:$4 sm:$0xff]  }
 0x3fd   : > { %3828 = vmatpush1.bf16.msra.mxu0 %v11830_v30  ;;  %3992 = vmatpush1.bf16.msra.mxu1 %v11833_v31  ;;  %v11911_v30 = vld [vmem:[#allocation15 + $0x568] ss:$16 sps:$4 sm:$0xff]   ;;  %v11916_v31 = vld [vmem:[#allocation15 + $0x584] ss:$16 sps:$4 sm:$0xff]  }
 0x3fe   : > { %3829 = vmatprep.subr.bf16.mxu0 %v11838_v32  ;;  %3993 = vmatprep.subr.bf16.mxu1 %v11841_v33  ;;  %v11919_v32 = vld [vmem:[#allocation15 + $0x58c] ss:$16 sps:$4 sm:$0xff]   ;;  %v11914_v33 = vld [vmem:[#allocation15 + $0x580] ss:$16 sps:$4 sm:$0xff]  }
 0x401   : > { %3830 = vmatpush1.bf16.msra.mxu0 %v11836_v39  ;;  %3994 = vmatpush1.bf16.msra.mxu1 %v11839_v43  ;;  %v11917_v39 = vld [vmem:[#allocation15 + $0x588] ss:$16 sps:$4 sm:$0xff]   ;;  %v11922_v43 = vld [vmem:[#allocation15 + $0x5a4] ss:$16 sps:$4 sm:$0xff]  }
 0x402   : > { %3840 = vmatprep.subr.bf16.mxu0 %v11844_v48  ;;  %4004 = vmatprep.subr.bf16.mxu1 %v11847_v45  ;;  %v11925_v48 = vld [vmem:[#allocation15 + $0x5ac] ss:$16 sps:$4 sm:$0xff]   ;;  %v11920_v45 = vld [vmem:[#allocation15 + $0x5a0] ss:$16 sps:$4 sm:$0xff]  }
 0x404   : > { %3832 = vmatmul.mubr.bf16.vlgmr.msra.gmra.mrb[8].mxu0 %v2194_v16  ;;  %3996 = vmatmul.mubr.bf16.vlgmr.msra.gmra.mrb[32].mxu1 %v2194_v16  ;;  %v11931_v16 = vld [vmem:[#allocation15 + $0x5cc] ss:$16 sps:$4 sm:$0xff]  }
 0x405   : > { %3841 = vmatpush1.bf16.msra.mxu0 %v11842_v10  ;;  %3872 = vmatprep.mubr.bf16.mxu0 %v2197_v54  ;;  %v11928_v10 = vld [vmem:[#allocation15 + $0x5c4] ss:$16 sps:$4 sm:$0xff]  }
 0x406   : > { %4005 = vmatpush1.bf16.msra.mxu1 %v11845_v53  ;;  %4036 = vmatprep.mubr.bf16.mxu1 %v2197_v54  ;;  %v2167_v53 = vcombine.high %v13531_v3, %v13531_v3  ;;  %v11926_v54 = vld [vmem:[#allocation15 + $0x5c0] ss:$16 sps:$4 sm:$0xff]  }
 0x407   : > { %3842 = vmatprep.subr.bf16.mxu0 %v11850_v55  ;;  %4006 = vmatprep.subr.bf16.mxu1 %v11853_v56  ;;  %v11929_v55 = vld [vmem:[#allocation15 + $0x5c8] ss:$16 sps:$4 sm:$0xff]   ;;  %v11934_v56 = vld [vmem:[#allocation15 + $0x5e4] ss:$16 sps:$4 sm:$0xff]  }
 0x409   : > { %3843 = vmatpush1.bf16.msra.mxu0 %v11848_v58  ;;  %v11937_v58 = vld [vmem:[#allocation15 + $0x5ec] ss:$16 sps:$4 sm:$0xff]  }
 0x40a   : > { %4007 = vmatpush1.bf16.msra.mxu1 %v11851_v59  ;;  %3844 = vmatprep.subr.bf16.mxu0 %v11856_v60  ;;  %v13544_v59 = vrot.slane %v2167_v53, %v13491_v42  ;;  %v11932_v60 = vld [vmem:[#allocation15 + $0x5e0] ss:$16 sps:$4 sm:$0xff]   ;;  %v11941_v42 = vld [vmem:[#allocation15 + $0x608] ss:$16 sps:$4 sm:$0xff]   ;;  %v12012_v53 = vld [vmem:[#allocation15 + $0x784] ss:$16 sps:$4 sm:$0xff]  }
 0x40b   : > { %4008 = vmatprep.subr.bf16.mxu1 %v11859_v61  ;;  %v11935_v61 = vld [vmem:[#allocation15 + $0x5e8] ss:$16 sps:$4 sm:$0xff]  }
 0x40c   : > { %v2183_v3 = vcombine.high %v13544_v59, %v13544_v59 }
 0x40d   : > { %3845 = vmatpush1.bf16.msra.mxu0 %v11854_v57  ;;  %v11940_v57 = vld [vmem:[#allocation15 + $0x604] ss:$16 sps:$4 sm:$0xff]  }
 0x40e   : > { %4009 = vmatpush1.bf16.msra.mxu1 %v11857_v62  ;;  %3846 = vmatprep.subr.bf16.mxu0 %v11862_v63  ;;  %v11943_v62 = vld [vmem:[#allocation15 + $0x60c] ss:$16 sps:$4 sm:$0xff]   ;;  %v11938_v63 = vld [vmem:[#allocation15 + $0x600] ss:$16 sps:$4 sm:$0xff]  }
 0x40f   : > { %4010 = vmatprep.subr.bf16.mxu1 %v11865_v0  ;;  %v2196_v0 = vpack.c.bf16 %v13535_v36, %v13535_v36  ;;  %v11950_v36 = vld [vmem:[#allocation15 + $0x640] ss:$16 sps:$4 sm:$0xff]  }
 0x411   : > { %3847 = vmatpush1.bf16.msra.mxu0 %v11860_v2  ;;  %v11946_v2 = vld [vmem:[#allocation15 + $0x624] ss:$16 sps:$4 sm:$0xff]  }
 0x412   : > { %4011 = vmatpush1.bf16.msra.mxu1 %v11863_v35  ;;  %3848 = vmatprep.subr.bf16.mxu0 %v11868_v38  ;;  %v2199_v35 = vpack.c.bf16 %v2183_v3, %v2183_v3  ;;  %v11949_v38 = vld [vmem:[#allocation15 + $0x62c] ss:$16 sps:$4 sm:$0xff]  }
 0x413   : > { %4012 = vmatprep.subr.bf16.mxu1 %v11871_v41  ;;  %v11944_v41 = vld [vmem:[#allocation15 + $0x620] ss:$16 sps:$4 sm:$0xff]   ;;  %v12027_v3 = vld [vmem:[#allocation15 + $0x7cc] ss:$16 sps:$4 sm:$0xff]  }
 0x415   : > { %3849 = vmatpush1.bf16.msra.mxu0 %v11866_v1  ;;  %v11947_v1 = vld [vmem:[#allocation15 + $0x628] ss:$16 sps:$4 sm:$0xff]  }
 0x416   : > { %4013 = vmatpush1.bf16.msra.mxu1 %v11869_v7  ;;  %3850 = vmatprep.subr.bf16.mxu0 %v11874_v9  ;;  %v11952_v7 = vld [vmem:[#allocation15 + $0x644] ss:$16 sps:$4 sm:$0xff]   ;;  %v11955_v9 = vld [vmem:[#allocation15 + $0x64c] ss:$16 sps:$4 sm:$0xff]  }
 0x417   : > { %4014 = vmatprep.subr.bf16.mxu1 %v11877_v15  ;;  %v11953_v15 = vld [vmem:[#allocation15 + $0x648] ss:$16 sps:$4 sm:$0xff]  }
 0x419   : > { %3851 = vmatpush1.bf16.msra.mxu0 %v11872_v4  ;;  %v11958_v4 = vld [vmem:[#allocation15 + $0x664] ss:$16 sps:$4 sm:$0xff]  }
 0x41a   : > { %4015 = vmatpush1.bf16.msra.mxu1 %v11875_v5  ;;  %3852 = vmatprep.subr.bf16.mxu0 %v11880_v6  ;;  %v11961_v5 = vld [vmem:[#allocation15 + $0x66c] ss:$16 sps:$4 sm:$0xff]   ;;  %v11956_v6 = vld [vmem:[#allocation15 + $0x660] ss:$16 sps:$4 sm:$0xff]  }
 0x41b   : > { %4016 = vmatprep.subr.bf16.mxu1 %v11883_v28  ;;  %v11959_v28 = vld [vmem:[#allocation15 + $0x668] ss:$16 sps:$4 sm:$0xff]  }
 0x41d   : > { %3853 = vmatpush1.bf16.msra.mxu0 %v11878_v51  ;;  %v11964_v51 = vld [vmem:[#allocation15 + $0x684] ss:$16 sps:$4 sm:$0xff]  }
 0x41e   : > { %4017 = vmatpush1.bf16.msra.mxu1 %v11881_v52  ;;  %3854 = vmatprep.subr.bf16.mxu0 %v11886_v8  ;;  %v11967_v52 = vld [vmem:[#allocation15 + $0x68c] ss:$16 sps:$4 sm:$0xff]   ;;  %v11962_v8 = vld [vmem:[#allocation15 + $0x680] ss:$16 sps:$4 sm:$0xff]  }
 0x41f   : > { %4018 = vmatprep.subr.bf16.mxu1 %v11889_v11  ;;  %v11965_v11 = vld [vmem:[#allocation15 + $0x688] ss:$16 sps:$4 sm:$0xff]  }
 0x421   : > { %3855 = vmatpush1.bf16.msra.mxu0 %v11884_v12  ;;  %v11970_v12 = vld [vmem:[#allocation15 + $0x6a4] ss:$16 sps:$4 sm:$0xff]  }
 0x422   : > { %4019 = vmatpush1.bf16.msra.mxu1 %v11887_v49  ;;  %3856 = vmatprep.subr.bf16.mxu0 %v11892_v13  ;;  %v11973_v49 = vld [vmem:[#allocation15 + $0x6ac] ss:$16 sps:$4 sm:$0xff]   ;;  %v11968_v13 = vld [vmem:[#allocation15 + $0x6a0] ss:$16 sps:$4 sm:$0xff]  }
 0x423   : > { %4020 = vmatprep.subr.bf16.mxu1 %v11895_v14  ;;  %v11971_v14 = vld [vmem:[#allocation15 + $0x6a8] ss:$16 sps:$4 sm:$0xff]  }
 0x425   : > { %3857 = vmatpush1.bf16.msra.mxu0 %v11890_v34  ;;  %v11976_v34 = vld [vmem:[#allocation15 + $0x6c4] ss:$16 sps:$4 sm:$0xff]  }
 0x426   : > { %4021 = vmatpush1.bf16.msra.mxu1 %v11893_v37  ;;  %3858 = vmatprep.subr.bf16.mxu0 %v11898_v40  ;;  %v11979_v37 = vld [vmem:[#allocation15 + $0x6cc] ss:$16 sps:$4 sm:$0xff]   ;;  %v11974_v40 = vld [vmem:[#allocation15 + $0x6c0] ss:$16 sps:$4 sm:$0xff]  }
 0x427   : > { %4022 = vmatprep.subr.bf16.mxu1 %v11901_v17  ;;  %v11977_v17 = vld [vmem:[#allocation15 + $0x6c8] ss:$16 sps:$4 sm:$0xff]  }
 0x429   : > { %3859 = vmatpush1.bf16.msra.mxu0 %v11896_v18  ;;  %v11982_v18 = vld [vmem:[#allocation15 + $0x6e4] ss:$16 sps:$4 sm:$0xff]  }
 0x42a   : > { %4023 = vmatpush1.bf16.msra.mxu1 %v11899_v19  ;;  %3860 = vmatprep.subr.bf16.mxu0 %v11904_v20  ;;  %v11985_v19 = vld [vmem:[#allocation15 + $0x6ec] ss:$16 sps:$4 sm:$0xff]   ;;  %v11980_v20 = vld [vmem:[#allocation15 + $0x6e0] ss:$16 sps:$4 sm:$0xff]  }
 0x42b   : > { %4024 = vmatprep.subr.bf16.mxu1 %v11907_v21  ;;  %v11983_v21 = vld [vmem:[#allocation15 + $0x6e8] ss:$16 sps:$4 sm:$0xff]  }
 0x42d   : > { %3861 = vmatpush1.bf16.msra.mxu0 %v11902_v22  ;;  %v11988_v22 = vld [vmem:[#allocation15 + $0x704] ss:$16 sps:$4 sm:$0xff]  }
 0x42e   : > { %4025 = vmatpush1.bf16.msra.mxu1 %v11905_v23  ;;  %3862 = vmatprep.subr.bf16.mxu0 %v11910_v24  ;;  %v11991_v23 = vld [vmem:[#allocation15 + $0x70c] ss:$16 sps:$4 sm:$0xff]   ;;  %v11986_v24 = vld [vmem:[#allocation15 + $0x700] ss:$16 sps:$4 sm:$0xff]  }
 0x42f   : > { %4026 = vmatprep.subr.bf16.mxu1 %v11913_v26  ;;  %v11989_v26 = vld [vmem:[#allocation15 + $0x708] ss:$16 sps:$4 sm:$0xff]  }
 0x431   : > { %3863 = vmatpush1.bf16.msra.mxu0 %v11908_v27  ;;  %v11994_v27 = vld [vmem:[#allocation15 + $0x724] ss:$16 sps:$4 sm:$0xff]  }
 0x432   : > { %4027 = vmatpush1.bf16.msra.mxu1 %v11911_v30  ;;  %3864 = vmatprep.subr.bf16.mxu0 %v11916_v31  ;;  %v11997_v30 = vld [vmem:[#allocation15 + $0x72c] ss:$16 sps:$4 sm:$0xff]   ;;  %v11992_v31 = vld [vmem:[#allocation15 + $0x720] ss:$16 sps:$4 sm:$0xff]  }
 0x433   : > { %4028 = vmatprep.subr.bf16.mxu1 %v11919_v32  ;;  %v11995_v32 = vld [vmem:[#allocation15 + $0x728] ss:$16 sps:$4 sm:$0xff]  }
 0x435   : > { %3865 = vmatpush1.bf16.msra.mxu0 %v11914_v33  ;;  %v12000_v33 = vld [vmem:[#allocation15 + $0x744] ss:$16 sps:$4 sm:$0xff]  }
 0x436   : > { %4029 = vmatpush1.bf16.msra.mxu1 %v11917_v39  ;;  %3866 = vmatprep.subr.bf16.mxu0 %v11922_v43  ;;  %v12003_v39 = vld [vmem:[#allocation15 + $0x74c] ss:$16 sps:$4 sm:$0xff]   ;;  %v11998_v43 = vld [vmem:[#allocation15 + $0x740] ss:$16 sps:$4 sm:$0xff]  }
 0x437   : > { %4030 = vmatprep.subr.bf16.mxu1 %v11925_v48  ;;  %v12001_v48 = vld [vmem:[#allocation15 + $0x748] ss:$16 sps:$4 sm:$0xff]  }
 0x439   : > { %3867 = vmatpush1.bf16.msra.mxu0 %v11920_v45  ;;  %v12006_v45 = vld [vmem:[#allocation15 + $0x764] ss:$16 sps:$4 sm:$0xff]  }
 0x43a   : > { %4031 = vmatpush1.bf16.msra.mxu1 %v11923_v44  ;;  %3868 = vmatprep.subr.bf16.mxu0 %v11928_v10  ;;  %v12009_v44 = vld [vmem:[#allocation15 + $0x76c] ss:$16 sps:$4 sm:$0xff]   ;;  %v12004_v10 = vld [vmem:[#allocation15 + $0x760] ss:$16 sps:$4 sm:$0xff]  }
 0x43b   : > { %4032 = vmatprep.subr.bf16.mxu1 %v11931_v16  ;;  %v12007_v16 = vld [vmem:[#allocation15 + $0x768] ss:$16 sps:$4 sm:$0xff]  }
 0x43d   : > { %3869 = vmatpush1.bf16.msra.mxu0 %v11926_v54  ;;  %v12015_v54 = vld [vmem:[#allocation15 + $0x78c] ss:$16 sps:$4 sm:$0xff]  }
 0x43e   : > { %4033 = vmatpush1.bf16.msra.mxu1 %v11929_v55  ;;  %3870 = vmatprep.subr.bf16.mxu0 %v11934_v56  ;;  %v12010_v55 = vld [vmem:[#allocation15 + $0x780] ss:$16 sps:$4 sm:$0xff]   ;;  %v12013_v56 = vld [vmem:[#allocation15 + $0x788] ss:$16 sps:$4 sm:$0xff]  }
 0x43f   : > { %4034 = vmatprep.subr.bf16.mxu1 %v11937_v58  ;;  %v12018_v58 = vld [vmem:[#allocation15 + $0x7a4] ss:$16 sps:$4 sm:$0xff]  }
 0x441   : > { %3871 = vmatpush1.bf16.msra.mxu0 %v11932_v60  ;;  %v12021_v60 = vld [vmem:[#allocation15 + $0x7ac] ss:$16 sps:$4 sm:$0xff]  }
 0x442   : > { %4035 = vmatpush1.bf16.msra.mxu1 %v11935_v61  ;;  %3881 = vmatprep.subr.bf16.mxu0 %v11940_v57  ;;  %v12016_v61 = vld [vmem:[#allocation15 + $0x7a0] ss:$16 sps:$4 sm:$0xff]   ;;  %v12019_v57 = vld [vmem:[#allocation15 + $0x7a8] ss:$16 sps:$4 sm:$0xff]  }
 0x443   : > { %4045 = vmatprep.subr.bf16.mxu1 %v11943_v62  ;;  %v12024_v62 = vld [vmem:[#allocation15 + $0x7c4] ss:$16 sps:$4 sm:$0xff]  }
 0x444   : > { %3873 = vmatmul.mubr.bf16.vlgmr.msra.gmra.mrb[8].mxu0 %v2196_v0 }
 0x445   : > { %4037 = vmatmul.mubr.bf16.vlgmr.msra.gmra.mrb[32].mxu1 %v2196_v0  ;;  %3882 = vmatpush1.bf16.msra.mxu0 %v11938_v63  ;;  %v12022_v63 = vld [vmem:[#allocation15 + $0x7c0] ss:$16 sps:$4 sm:$0xff]   ;;  %v12025_v0 = vld [vmem:[#allocation15 + $0x7c8] ss:$16 sps:$4 sm:$0xff]  }
 0x446   : > { %3913 = vmatprep.mubr.bf16.mxu0 %v2199_v35  ;;  %4046 = vmatpush1.bf16.msra.mxu1 %v11941_v42  ;;  %v12030_v42 = vld [vmem:[#allocation15 + $0x7e4] ss:$16 sps:$4 sm:$0xff]  }
 0x447   : > { %4077 = vmatprep.mubr.bf16.mxu1 %v2199_v35  ;;  %3883 = vmatprep.subr.bf16.mxu0 %v11946_v2  ;;  %v12033_v2 = vld [vmem:[#allocation15 + $0x7ec] ss:$16 sps:$4 sm:$0xff]   ;;  %v12028_v35 = vld [vmem:[#allocation15 + $0x7e0] ss:$16 sps:$4 sm:$0xff]  }
 0x448   : > { %4047 = vmatprep.subr.bf16.mxu1 %v11949_v38  ;;  %v12031_v38 = vld [vmem:[#allocation15 + $0x7e8] ss:$16 sps:$4 sm:$0xff]  }
 0x449   : > { %3884 = vmatpush1.bf16.msra.mxu0 %v11944_v41  ;;  %v12036_v41 = vld [vmem:[#allocation17 + $0x4] ss:$8 sps:$4 sm:$0xff]  }
 0x44a   : > { %4048 = vmatpush1.bf16.msra.mxu1 %v11947_v1  ;;  %3885 = vmatprep.subr.bf16.mxu0 %v11952_v7  ;;  %v12034_v1 = vld [vmem:[#allocation17] ss:$8 sps:$4 sm:$0xff]   ;;  %v2198_v7 = vpack.c.bf16 %v13544_v59, %v13544_v59  ;;  %v12051_v59 = vld [vmem:[#allocation17 + $0x54] ss:$8 sps:$4 sm:$0xff]  }
 0x44b   : > { %4049 = vmatprep.subr.bf16.mxu1 %v11955_v9  ;;  %v12039_v9 = vld [vmem:[#allocation17 + $0x14] ss:$8 sps:$4 sm:$0xff]  }
 0x44d   : > { %3886 = vmatpush1.bf16.msra.mxu0 %v11950_v36  ;;  %v12037_v36 = vld [vmem:[#allocation17 + $0x10] ss:$8 sps:$4 sm:$0xff]  }
 0x44e   : > { %4050 = vmatpush1.bf16.msra.mxu1 %v11953_v15  ;;  %3887 = vmatprep.subr.bf16.mxu0 %v11958_v4  ;;  %v12042_v15 = vld [vmem:[#allocation17 + $0x24] ss:$8 sps:$4 sm:$0xff]   ;;  %v12040_v4 = vld [vmem:[#allocation17 + $0x20] ss:$8 sps:$4 sm:$0xff]  }
 0x44f   : > { %4051 = vmatprep.subr.bf16.mxu1 %v11961_v5  ;;  %v12045_v5 = vld [vmem:[#allocation17 + $0x34] ss:$8 sps:$4 sm:$0xff]  }
 0x451   : > { %3888 = vmatpush1.bf16.msra.mxu0 %v11956_v6  ;;  %v12043_v6 = vld [vmem:[#allocation17 + $0x30] ss:$8 sps:$4 sm:$0xff]  }
 0x452   : > { %4052 = vmatpush1.bf16.msra.mxu1 %v11959_v28  ;;  %3889 = vmatprep.subr.bf16.mxu0 %v11964_v51  ;;  %v12048_v28 = vld [vmem:[#allocation17 + $0x44] ss:$8 sps:$4 sm:$0xff]   ;;  %v12046_v51 = vld [vmem:[#allocation17 + $0x40] ss:$8 sps:$4 sm:$0xff]  }
 0x453   : > { %4053 = vmatprep.subr.bf16.mxu1 %v11967_v52  ;;  %v12049_v52 = vld [vmem:[#allocation17 + $0x50] ss:$8 sps:$4 sm:$0xff]  }
 0x455   : > { %3890 = vmatpush1.bf16.msra.mxu0 %v11962_v8  ;;  %v12054_v8 = vld [vmem:[#allocation17 + $0x64] ss:$8 sps:$4 sm:$0xff]  }
 0x456   : > { %4054 = vmatpush1.bf16.msra.mxu1 %v11965_v11  ;;  %3891 = vmatprep.subr.bf16.mxu0 %v11970_v12  ;;  %v12052_v11 = vld [vmem:[#allocation17 + $0x60] ss:$8 sps:$4 sm:$0xff]   ;;  %v12057_v12 = vld [vmem:[#allocation17 + $0x74] ss:$8 sps:$4 sm:$0xff]  }
 0x457   : > { %4055 = vmatprep.subr.bf16.mxu1 %v11973_v49  ;;  %v12055_v49 = vld [vmem:[#allocation17 + $0x70] ss:$8 sps:$4 sm:$0xff]  }
 0x459   : > { %3892 = vmatpush1.bf16.msra.mxu0 %v11968_v13  ;;  %v12060_v13 = vld [vmem:[#allocation17 + $0x84] ss:$8 sps:$4 sm:$0xff]  }
 0x45a   : > { %4056 = vmatpush1.bf16.msra.mxu1 %v11971_v14  ;;  %3893 = vmatprep.subr.bf16.mxu0 %v11976_v34  ;;  %v12058_v14 = vld [vmem:[#allocation17 + $0x80] ss:$8 sps:$4 sm:$0xff]   ;;  %v12063_v34 = vld [vmem:[#allocation17 + $0x94] ss:$8 sps:$4 sm:$0xff]  }
 0x45b   : > { %4057 = vmatprep.subr.bf16.mxu1 %v11979_v37  ;;  %v12061_v37 = vld [vmem:[#allocation17 + $0x90] ss:$8 sps:$4 sm:$0xff]  }
 0x45d   : > { %3894 = vmatpush1.bf16.msra.mxu0 %v11974_v40  ;;  %v12066_v40 = vld [vmem:[#allocation17 + $0xa4] ss:$8 sps:$4 sm:$0xff]  }
 0x45e   : > { %4058 = vmatpush1.bf16.msra.mxu1 %v11977_v17  ;;  %3895 = vmatprep.subr.bf16.mxu0 %v11982_v18  ;;  %v12064_v17 = vld [vmem:[#allocation17 + $0xa0] ss:$8 sps:$4 sm:$0xff]   ;;  %v12069_v18 = vld [vmem:[#allocation17 + $0xb4] ss:$8 sps:$4 sm:$0xff]  }
 0x45f   : > { %4059 = vmatprep.subr.bf16.mxu1 %v11985_v19  ;;  %v12067_v19 = vld [vmem:[#allocation17 + $0xb0] ss:$8 sps:$4 sm:$0xff]  }
 0x461   : > { %3896 = vmatpush1.bf16.msra.mxu0 %v11980_v20  ;;  %v12072_v20 = vld [vmem:[#allocation17 + $0xc4] ss:$8 sps:$4 sm:$0xff]  }
 0x462   : > { %4060 = vmatpush1.bf16.msra.mxu1 %v11983_v21  ;;  %3897 = vmatprep.subr.bf16.mxu0 %v11988_v22  ;;  %v12070_v21 = vld [vmem:[#allocation17 + $0xc0] ss:$8 sps:$4 sm:$0xff]   ;;  %v12075_v22 = vld [vmem:[#allocation17 + $0xd4] ss:$8 sps:$4 sm:$0xff]  }
 0x463   : > { %4061 = vmatprep.subr.bf16.mxu1 %v11991_v23  ;;  %v12073_v23 = vld [vmem:[#allocation17 + $0xd0] ss:$8 sps:$4 sm:$0xff]  }
 0x465   : > { %3898 = vmatpush1.bf16.msra.mxu0 %v11986_v24  ;;  %v12078_v24 = vld [vmem:[#allocation17 + $0xe4] ss:$8 sps:$4 sm:$0xff]  }
 0x466   : > { %4062 = vmatpush1.bf16.msra.mxu1 %v11989_v26  ;;  %3899 = vmatprep.subr.bf16.mxu0 %v11994_v27  ;;  %v12076_v26 = vld [vmem:[#allocation17 + $0xe0] ss:$8 sps:$4 sm:$0xff]   ;;  %v12081_v27 = vld [vmem:[#allocation17 + $0xf4] ss:$8 sps:$4 sm:$0xff]  }
 0x467   : > { %4063 = vmatprep.subr.bf16.mxu1 %v11997_v30  ;;  %v12079_v30 = vld [vmem:[#allocation17 + $0xf0] ss:$8 sps:$4 sm:$0xff]  }
 0x469   : > { %3900 = vmatpush1.bf16.msra.mxu0 %v11992_v31  ;;  %v12084_v31 = vld [vmem:[#allocation17 + $0x104] ss:$8 sps:$4 sm:$0xff]  }
 0x46a   : > { %4064 = vmatpush1.bf16.msra.mxu1 %v11995_v32  ;;  %3901 = vmatprep.subr.bf16.mxu0 %v12000_v33  ;;  %v12130_v32 = vld [vmem:[%s13142_s24 + $0x40] sm:$0xff]  }
 0x46b   : > { %4065 = vmatprep.subr.bf16.mxu1 %v12003_v39  ;;  %v12131_v33 = vld [vmem:[%s13142_s24] sm:$0xff]   ;;  %v12132_v39 = vld [vmem:[%s13142_s24 + $0x48] sm:$0xff]  }
 0x46d   : > { %3902 = vmatpush1.bf16.msra.mxu0 %v11998_v43  ;;  %v12133_v43 = vld [vmem:[%s13142_s24 + $0x8] sm:$0xff]  }
 0x46e   : > { %4066 = vmatpush1.bf16.msra.mxu1 %v12001_v48  ;;  %3903 = vmatprep.subr.bf16.mxu0 %v12006_v45  ;;  %v12134_v48 = vld [vmem:[%s13142_s24 + $0x50] sm:$0xff]  }
 0x46f   : > { %4067 = vmatprep.subr.bf16.mxu1 %v12009_v44  ;;  %v12135_v45 = vld [vmem:[%s13142_s24 + $0x10] sm:$0xff]   ;;  %v12136_v44 = vld [vmem:[%s13142_s24 + $0x58] sm:$0xff]  }
 0x471   : > { %3904 = vmatpush1.bf16.msra.mxu0 %v12004_v10  ;;  %v12137_v10 = vld [vmem:[%s13142_s24 + $0x18] sm:$0xff]  }
 0x472   : > { %4068 = vmatpush1.bf16.msra.mxu1 %v12007_v16  ;;  %3905 = vmatprep.subr.bf16.mxu0 %v12012_v53  ;;  %v12138_v16 = vld [vmem:[%s13142_s24 + $0x60] sm:$0xff]  }
 0x473   : > { %4069 = vmatprep.subr.bf16.mxu1 %v12015_v54  ;;  %v12139_v53 = vld [vmem:[%s13142_s24 + $0x20] sm:$0xff]   ;;  %v12140_v54 = vld [vmem:[%s13142_s24 + $0x68] sm:$0xff]  }
 0x475   : > { %3906 = vmatpush1.bf16.msra.mxu0 %v12010_v55  ;;  %v12141_v55 = vld [vmem:[%s13142_s24 + $0x28] sm:$0xff]  }
 0x476   : > { %4070 = vmatpush1.bf16.msra.mxu1 %v12013_v56  ;;  %3907 = vmatprep.subr.bf16.mxu0 %v12018_v58  ;;  %v13565_v56 = vld [vmem:[%s13127_s8] sm:$0xf] }
 0x477   : > { %4071 = vmatprep.subr.bf16.mxu1 %v12021_v60  ;;  %v2461_v58 = vrot.slane %v13565_v56, %v13441_v47  ;;  %v2465_v60 = vrot.slane %v13565_v56, %v13448_v50 }
 0x479   : > { %3908 = vmatpush1.bf16.msra.mxu0 %v12016_v61  ;;  %v2473_v61 = vrot.slane %v13565_v56, %v1329_v29 }
 0x47a   : > { %4072 = vmatpush1.bf16.msra.mxu1 %v12019_v57  ;;  %3909 = vmatprep.subr.bf16.mxu0 %v12024_v62 }
 0x47b   : > { %4073 = vmatprep.subr.bf16.mxu1 %v12027_v3 }
 0x47d   : > { %3910 = vmatpush1.bf16.msra.mxu0 %v12022_v63 }
 0x47e   : > { %4074 = vmatpush1.bf16.msra.mxu1 %v12025_v0  ;;  %3911 = vmatprep.subr.bf16.mxu0 %v12030_v42 }
 0x47f   : > { %4075 = vmatprep.subr.bf16.mxu1 %v12033_v2 }
 0x481   : > { %3912 = vmatpush1.bf16.msra.mxu0 %v12028_v35 }
 0x482   : > { %4076 = vmatpush1.bf16.msra.mxu1 %v12031_v38  ;;  %4490 = vmatprep.subr.bf16.mxu0 %v12036_v41 }
 0x483   : > { %11283 = vmatprep.subr.bf16.mxu1 %v12130_v32  ;;  %v12126_v32 = vld [vmem:[#allocation17 + $0x1e4] ss:$8 sps:$4 sm:$0xff]  }
 0x484   : > { %3914 = vmatmul.mubr.bf16.vlgmr.msra.gmra.mrb[8].mxu0 %v2198_v7 }
 0x485   : > { %4078 = vmatmul.mubr.bf16.vlgmr.msra.gmra.mrb[32].mxu1 %v2198_v7  ;;  %4491 = vmatpush1.bf16.msra.mxu0 %v12034_v1 }
 0x486   : > { %4492 = vmatprep.subr.bf16.mxu0 %v12039_v9  ;;  %11284 = vmatpush3.bf16.msra.mxu1 %v12131_v33  ;;  %v12124_v33 = vld [vmem:[#allocation17 + $0x1e0] ss:$8 sps:$4 sm:$0xff]  }
 0x487   : > { %11285 = vmatprep.subr.bf16.mxu1 %v12132_v39 }
 0x489   : > { %4493 = vmatpush1.bf16.msra.mxu0 %v12037_v36 }
 0x48a   : > { %4494 = vmatprep.subr.bf16.mxu0 %v12042_v15  ;;  %11286 = vmatpush3.bf16.msra.mxu1 %v12133_v43  ;;  %v12129_v43 = vld [vmem:[#allocation17 + $0x1f4] ss:$8 sps:$4 sm:$0xff]  }
 0x48b   : > { %11287 = vmatprep.subr.bf16.mxu1 %v12134_v48  ;;  %v12127_v48 = vld [vmem:[#allocation17 + $0x1f0] ss:$8 sps:$4 sm:$0xff]  }
 0x48d   : > { %4495 = vmatpush1.bf16.msra.mxu0 %v12040_v4  ;;  %v12082_v4 = vld [vmem:[#allocation17 + $0x100] ss:$8 sps:$4 sm:$0xff]  }
 0x48e   : > { %4496 = vmatprep.subr.bf16.mxu0 %v12045_v5  ;;  %11288 = vmatpush3.bf16.msra.mxu1 %v12135_v45  ;;  %v12087_v5 = vld [vmem:[#allocation17 + $0x114] ss:$8 sps:$4 sm:$0xff]  }
 0x48f   : > { %11289 = vmatprep.subr.bf16.mxu1 %v12136_v44 }
 0x491   : > { %4497 = vmatpush1.bf16.msra.mxu0 %v12043_v6  ;;  %v12085_v6 = vld [vmem:[#allocation17 + $0x110] ss:$8 sps:$4 sm:$0xff]  }
 0x492   : > { %4498 = vmatprep.subr.bf16.mxu0 %v12048_v28  ;;  %11290 = vmatpush3.bf16.msra.mxu1 %v12137_v10  ;;  %v12090_v28 = vld [vmem:[#allocation17 + $0x124] ss:$8 sps:$4 sm:$0xff]   ;;  %v12142_v10 = vld [vmem:[%s13142_s24 + $0x70] sm:$0xff]  }
 0x493   : > { %11291 = vmatprep.subr.bf16.mxu1 %v12138_v16  ;;  %v12143_v16 = vld [vmem:[%s13142_s24 + $0x30] sm:$0xff]  }
 0x495   : > { %4499 = vmatpush1.bf16.msra.mxu0 %v12046_v51  ;;  %v12088_v51 = vld [vmem:[#allocation17 + $0x120] ss:$8 sps:$4 sm:$0xff]  }
 0x496   : > { %4500 = vmatprep.subr.bf16.mxu0 %v12051_v59  ;;  %11292 = vmatpush3.bf16.msra.mxu1 %v12139_v53  ;;  %v12093_v59 = vld [vmem:[#allocation17 + $0x134] ss:$8 sps:$4 sm:$0xff]  }
 0x497   : > { %11293 = vmatprep.subr.bf16.mxu1 %v12140_v54  ;;  %v12144_v53 = vld [vmem:[%s13142_s24 + $0x78] sm:$0xff]  }
 0x498   : > { %v12145_v54 = vld [vmem:[%s13142_s24 + $0x38] sm:$0xff]  }
 0x499   : > { %4501 = vmatpush1.bf16.msra.mxu0 %v12049_v52  ;;  %v12091_v52 = vld [vmem:[#allocation17 + $0x130] ss:$8 sps:$4 sm:$0xff]  }
 0x49a   : > { %4502 = vmatprep.subr.bf16.mxu0 %v12054_v8  ;;  %11294 = vmatpush3.bf16.msra.mxu1 %v12141_v55  ;;  %v12096_v8 = vld [vmem:[#allocation17 + $0x144] ss:$8 sps:$4 sm:$0xff]  }
 0x49b   : > { %11295 = vmatprep.subr.bf16.mxu1 %v12142_v10  ;;  %v4158_v55 = vld [vmem:[%s14402_s2] sm:$0x3] }
 0x49d   : > { %4503 = vmatpush1.bf16.msra.mxu0 %v12052_v11  ;;  %v12094_v11 = vld [vmem:[#allocation17 + $0x140] ss:$8 sps:$4 sm:$0xff]  }
 0x49e   : > { %4504 = vmatprep.subr.bf16.mxu0 %v12057_v12  ;;  %v12099_v12 = vld [vmem:[#allocation17 + $0x154] ss:$8 sps:$4 sm:$0xff]   ;;  %11296 = vmatpush3.bf16.msra.mxu1 %v12143_v16 }
 0x49f   : > { %11297 = vmatprep.subr.bf16.mxu1 %v12144_v53 }
 0x4a1   : > { %4505 = vmatpush1.bf16.msra.mxu0 %v12055_v49  ;;  %v12097_v49 = vld [vmem:[#allocation17 + $0x150] ss:$8 sps:$4 sm:$0xff]  }
 0x4a2   : > { %4506 = vmatprep.subr.bf16.mxu0 %v12060_v13  ;;  %v12102_v13 = vld [vmem:[#allocation17 + $0x164] ss:$8 sps:$4 sm:$0xff]   ;;  %11298 = vmatpush3.bf16.msra.mxu1 %v12145_v54 }
 0x4a5   : > { %4507 = vmatpush1.bf16.msra.mxu0 %v12058_v14  ;;  %v12100_v14 = vld [vmem:[#allocation17 + $0x160] ss:$8 sps:$4 sm:$0xff]  }
 0x4a6   : > { %4508 = vmatprep.subr.bf16.mxu0 %v12063_v34  ;;  %v12105_v34 = vld [vmem:[#allocation17 + $0x174] ss:$8 sps:$4 sm:$0xff]  }
 0x4a9   : > { %4509 = vmatpush1.bf16.msra.mxu0 %v12061_v37  ;;  %v12103_v37 = vld [vmem:[#allocation17 + $0x170] ss:$8 sps:$4 sm:$0xff]  }
 0x4aa   : > { %4510 = vmatprep.subr.bf16.mxu0 %v12066_v40  ;;  %v12108_v40 = vld [vmem:[#allocation17 + $0x184] ss:$8 sps:$4 sm:$0xff]  }
 0x4ad   : > { %4511 = vmatpush1.bf16.msra.mxu0 %v12064_v17  ;;  %v12106_v17 = vld [vmem:[#allocation17 + $0x180] ss:$8 sps:$4 sm:$0xff]  }
 0x4ae   : > { %4512 = vmatprep.subr.bf16.mxu0 %v12069_v18  ;;  %v12111_v18 = vld [vmem:[#allocation17 + $0x194] ss:$8 sps:$4 sm:$0xff]  }
 0x4b1   : > { %4513 = vmatpush1.bf16.msra.mxu0 %v12067_v19  ;;  %v12109_v19 = vld [vmem:[#allocation17 + $0x190] ss:$8 sps:$4 sm:$0xff]  }
 0x4b2   : > { %4514 = vmatprep.subr.bf16.mxu0 %v12072_v20  ;;  %v12114_v20 = vld [vmem:[#allocation17 + $0x1a4] ss:$8 sps:$4 sm:$0xff]  }
 0x4b5   : > { %4515 = vmatpush1.bf16.msra.mxu0 %v12070_v21  ;;  %v12112_v21 = vld [vmem:[#allocation17 + $0x1a0] ss:$8 sps:$4 sm:$0xff]  }
 0x4b6   : > { %4516 = vmatprep.subr.bf16.mxu0 %v12075_v22  ;;  %v12117_v22 = vld [vmem:[#allocation17 + $0x1b4] ss:$8 sps:$4 sm:$0xff]  }
 0x4b9   : > { %4517 = vmatpush1.bf16.msra.mxu0 %v12073_v23  ;;  %v12115_v23 = vld [vmem:[#allocation17 + $0x1b0] ss:$8 sps:$4 sm:$0xff]  }
 0x4ba   : > { %4518 = vmatprep.subr.bf16.mxu0 %v12078_v24  ;;  %v12120_v24 = vld [vmem:[#allocation17 + $0x1c4] ss:$8 sps:$4 sm:$0xff]  }
 0x4bd   : > { %4519 = vmatpush1.bf16.msra.mxu0 %v12076_v26  ;;  %v12118_v26 = vld [vmem:[#allocation17 + $0x1c0] ss:$8 sps:$4 sm:$0xff]  }
 0x4be   : > { %4520 = vmatprep.subr.bf16.mxu0 %v12081_v27  ;;  %v12123_v27 = vld [vmem:[#allocation17 + $0x1d4] ss:$8 sps:$4 sm:$0xff]  }
 0x4c1   : > { %4521 = vmatpush1.bf16.msra.mxu0 %v12079_v30  ;;  %v12121_v30 = vld [vmem:[#allocation17 + $0x1d0] ss:$8 sps:$4 sm:$0xff]  }
 0x4c2   : > { %4531 = vmatprep.subr.bf16.mxu0 %v12084_v31  ;;  %v2469_v31 = vrot.slane %v13565_v56, %v13470_v25  ;;  %v4163_v56 = vrot.slane %v4158_v55, %v13441_v47 }
 0x557   : > { %v3915_v57 = vpop.f32.mrb[8].mxu0 }
 0x558   : > { %v11408_v62 = vadd.f32 %v3915_v57, %v2461_v58  ;;  %v13574_v3 = vpop.f32.mrb[32].mxu1  ;;  %v3917_v63 = vpop.f32.mrb[9].mxu0  ;;  %v4167_v58 = vrot.slane %v4158_v55, %v13448_v50 }
 0x559   : > { %v11409_v0 = vadd.f32 %v3917_v63, %v2465_v60  ;;  %v4081_v42 = vpop.f32.mrb[33].mxu1  ;;  %v3919_v2 = vpop.f32.mrb[10].mxu0  ;;  %v11410_v39 = vadd.f32 %v13574_v3, %v2469_v31 }
 0x55a   : > { %v4086_v35 = vmax.f32 %v11408_v62, 0.0  ;;  %v11411_v38 = vadd.f32 %v4081_v42, %v2473_v61  ;;  %v4083_v41 = vpop.f32.mrb[34].mxu1  ;;  %v3920_v1 = vpop.f32.mrb[11].mxu0 }
 0x55b   : > { %v4087_v7 = vmax.f32 %v11409_v0, 0.0  ;;  %v4084_v9 = vpop.f32.mrb[35].mxu1  ;;  %v4088_v45 = vmax.f32 %v11410_v39, 0.0  ;;  %v10805_v1 = vld [vmem:[%s14403_s7] ss:$0 sm:$0xff] }
 0x55c   : > { %v4089_v36 = vmax.f32 %v11411_v38, 0.0  ;;  %v4090_v46 = vpack.c.bf16 %v4086_v35, %v4086_v35  ;;  %v13055_v38 = vmov 3  }
 0x55d   : > { %v4091_v15 = vpack.c.bf16 %v4087_v7, %v4087_v7  ;;  %v4092_v44 = vpack.c.bf16 %v4088_v45, %v4088_v45  ;;  %11637 = vset.pattern.permute.xlu1 %v13055_v38 }
 0x55e   : > { %v4093_v29 = vpack.c.bf16 %v4089_v36, %v4089_v36 }
 0x55f   : > { %4522 = vmatprep.mubr.bf16.mxu0 %v4091_v15 }
 0x560   : > { %4523 = vmatmul.mubr.bf16.vlgmr.msra.gmra.mrb[12].mxu0 %v4090_v46  ;;  %v13056_v46 = vmov 4  }
 0x561   : > { %4532 = vmatpush1.bf16.msra.mxu0 %v12082_v4  ;;  %4563 = vmatprep.mubr.bf16.mxu0 %v4093_v29  ;;  %v13058_v29 = vmov 6  }
 0x562   : > { %4533 = vmatprep.subr.bf16.mxu0 %v12087_v5  ;;  %v13057_v5 = vmov 1  }
 0x565   : > { %4534 = vmatpush1.bf16.msra.mxu0 %v12085_v6  ;;  %v13059_v6 = vmov 7  }
 0x566   : > { %4535 = vmatprep.subr.bf16.mxu0 %v12090_v28  ;;  %v13060_v28 = vmov 2  }
 0x569   : > { %4536 = vmatpush1.bf16.msra.mxu0 %v12088_v51  ;;  %v13061_v51 = vmov 8  }
 0x56a   : > { %4537 = vmatprep.subr.bf16.mxu0 %v12093_v59  ;;  %v13062_v59 = vmov 5  }
 0x56d   : > { %4538 = vmatpush1.bf16.msra.mxu0 %v12091_v52 }
 0x56e   : > { %4539 = vmatprep.subr.bf16.mxu0 %v12096_v8 }
 0x571   : > { %4540 = vmatpush1.bf16.msra.mxu0 %v12094_v11 }
 0x572   : > { %4541 = vmatprep.subr.bf16.mxu0 %v12099_v12 }
 0x575   : > { %4542 = vmatpush1.bf16.msra.mxu0 %v12097_v49  ;;  %v4751_v49 = vld [vmem:[%s14404_s10] sm:$0x3f] }
 0x576   : > { %4543 = vmatprep.subr.bf16.mxu0 %v12102_v13  ;;  %v4769_v13 = vrot.slane %v4751_v49, %v13448_v50 }
 0x579   : > { %4544 = vmatpush1.bf16.msra.mxu0 %v12100_v14  ;;  %v4760_v14 = vrot.slane %v4751_v49, %v13441_v47 }
 0x57a   : > { %4545 = vmatprep.subr.bf16.mxu0 %v12105_v34 }
 0x57d   : > { %4546 = vmatpush1.bf16.msra.mxu0 %v12103_v37 }
 0x57e   : > { %4547 = vmatprep.subr.bf16.mxu0 %v12108_v40 }
 0x581   : > { %4548 = vmatpush1.bf16.msra.mxu0 %v12106_v17 }
 0x582   : > { %4549 = vmatprep.subr.bf16.mxu0 %v12111_v18 }
 0x585   : > { %4550 = vmatpush1.bf16.msra.mxu0 %v12109_v19  ;;  %v4779_v19 = vrot.slane %v4751_v49, %v13470_v25 }
 0x586   : > { %4551 = vmatprep.subr.bf16.mxu0 %v12114_v20 }
 0x589   : > { %4552 = vmatpush1.bf16.msra.mxu0 %v12112_v21 }
 0x58a   : > { %4553 = vmatprep.subr.bf16.mxu0 %v12117_v22 }
 0x58d   : > { %4554 = vmatpush1.bf16.msra.mxu0 %v12115_v23 }
 0x58e   : > { %4555 = vmatprep.subr.bf16.mxu0 %v12120_v24 }
 0x591   : > { %4556 = vmatpush1.bf16.msra.mxu0 %v12118_v26 }
 0x592   : > { %4557 = vmatprep.subr.bf16.mxu0 %v12123_v27 }
 0x595   : > { %4558 = vmatpush1.bf16.msra.mxu0 %v12121_v30 }
 0x596   : > { %4559 = vmatprep.subr.bf16.mxu0 %v12126_v32 }
 0x599   : > { %4560 = vmatpush1.bf16.msra.mxu0 %v12124_v33 }
 0x59a   : > { %4561 = vmatprep.subr.bf16.mxu0 %v12129_v43 }
 0x59d   : > { %4562 = vmatpush1.bf16.msra.mxu0 %v12127_v48 }
 0x5a0   : > { %4564 = vmatmul.mubr.bf16.vlgmr.msra.gmra.mrb[12].mxu0 %v4092_v44 }
 0x673   : > { %v4565_v60 = vpop.f32.mrb[12].mxu0 }
 0x674   : > { %v11412_v61 = vadd.f32 %v4565_v60, %v4163_v56  ;;  %v4567_v57 = vpop.f32.mrb[13].mxu0 }
 0x675   : > { %v11413_v62 = vadd.f32 %v4567_v57, %v4167_v58  ;;  %v4569_v3 = vpop.f32.mrb[14].mxu0 }
 0x676   : > { %v4572_v63 = vmax.f32 %v11412_v61, 0.0  ;;  %v4570_v0 = vpop.f32.mrb[15].mxu0 }
 0x677   : > { %v4573_v42 = vmax.f32 %v11413_v62, 0.0 }
 0x678   : > { %v4574_v35 = vpack.c.bf16 %v4572_v63, %v4572_v63 }
 0x679   : > { %v4575_v2 = vpack.c.bf16 %v4573_v42, %v4573_v42 }
 0x67b   : > { %4743 = vmatprep.mubr.bf16.mxu1 %v4575_v2 }
 0x67c   : > { %4744 = vmatmul.mubr.bf16.vlgmr.msra.gmra.mrb[36].mxu1 %v4574_v35 }
 0x74f   : > { %v11299_v41 = vpop.f32.mrb[36].mxu1 }
 0x750   : > { %v11300_v7 = vpop.f32.mrb[37].mxu1 }
 0x751   : > { %v11301_v9 = vadd.f32 %v11300_v7, %v11299_v41  ;;  %v11302_v36 = vpop.f32.mrb[38].mxu1 }
 0x752   : > { %v11303_v15 = vpop.f32.mrb[39].mxu1 }
 0x753   : > { %v4746_v4 = vadd.f32 %v11301_v9, %v10805_v1 }
 0x755   : > { %4786 = vperm.xlu1 %11637, %v4746_v4   ;;  %4754 = vperm.xlu0 %11635, %v4746_v4  }
 0x759   : > { %11638 = vset.pattern.permute.xlu1 %v13056_v46  ;;  %11636 = vset.pattern.permute.xlu0 %v13057_v5 }
 0x75a   : > { %4791 = vperm.xlu1 %11638, %v4746_v4   ;;  %4763 = vperm.xlu0 %11636, %v4746_v4  }
 0x75e   : > { %11639 = vset.pattern.permute.xlu1 %v13058_v29  ;;  %11640 = vset.pattern.permute.xlu0 %v13059_v6 }
 0x75f   : > { %4806 = vperm.xlu1 %11639, %v4746_v4   ;;  %4811 = vperm.xlu0 %11640, %v4746_v4  }
 0x763   : > { %11641 = vset.pattern.permute.xlu1 %v13060_v28  ;;  %11643 = vset.pattern.permute.xlu0 %v13061_v51 }
 0x764   : > { %4773 = vperm.xlu1 %11641, %v4746_v4   ;;  %4817 = vperm.xlu0 %11643, %v4746_v4  }
 0x768   : > { %11642 = vset.pattern.permute.xlu1 %v13062_v59 }
 0x769   : > { %4797 = vperm.xlu1 %11642, %v4746_v4  }
 0x7d4   : > { %v4787_v52 = vpop.permute.xlu1 %4786  ;;  %v4755_v8 = vpop.permute.xlu0 %4754 }
 0x7d5   : > { %v4761_v20 = vmul.f32 %v4760_v14, %v4755_v8  ;;  %v4789_v50 = vmul.f32 %v4787_v52, %v4760_v14 }
 0x7d9   : > { %v4792_v11 = vpop.permute.xlu1 %4791  ;;  %v4764_v12 = vpop.permute.xlu0 %4763 }
 0x7da   : > { %v4770_v40 = vmul.f32 %v4769_v13, %v4764_v12  ;;  %v4794_v30 = vmul.f32 %v4792_v11, %v4769_v13 }
 0x7dc   : > { %v4771_v23 = vadd.f32 %v4770_v40, %v4761_v20  ;;  %v4795_v43 = vadd.f32 %v4794_v30, %v4789_v50 }
 0x7de   : > { %v4807_v34 = vpop.permute.xlu1 %4806  ;;  %v4812_v37 = vpop.permute.xlu0 %4811 }
 0x7df   : > { %v4809_v17 = vmul.f32 %v4807_v34, %v4760_v14  ;;  %v4814_v18 = vmul.f32 %v4812_v37, %v4769_v13 }
 0x7e1   : > { %v4815_v24 = vadd.f32 %v4814_v18, %v4809_v17 }
 0x7e3   : > { %v4774_v21 = vpop.permute.xlu1 %4773  ;;  %v4818_v22 = vpop.permute.xlu0 %4817 }
 0x7e4   : > { %v4780_v26 = vmul.f32 %v4779_v19, %v4774_v21  ;;  %v4820_v27 = vmul.f32 %v4818_v22, %v4779_v19 }
 0x7e6   : > { %v4781_v31 = vadd.f32 %v4780_v26, %v4771_v23  ;;  %v4821_v32 = vadd.f32 %v4820_v27, %v4815_v24 }
 0x7e8   : > { %v4782_v47 = vsub.f32 %v4781_v31, %v4760_v14  ;;  %v4822_v33 = vsub.f32 %v4821_v32, %v4779_v19  ;;  %v4798_v39 = vpop.permute.xlu1 %4797 }
 0x7e9   : > { %v4800_v48 = vmul.f32 %v4798_v39, %v4779_v19 }
 0x7ea   : > { %4784 = vst.msk [vmem:[#allocation3] sm:$0x3] %vm4783_vm8, %v4782_v47  ;;  %4824 = vst.msk [vmem:[#allocation3 + $0x4] sm:$0x3] %vm4783_vm8, %v4822_v33 }
 0x7eb   : > { %v4801_v25 = vadd.f32 %v4800_v48, %v4795_v43 }
 0x7ed   : > { %v4802_v45 = vsub.f32 %v4801_v25, %v4769_v13 }
 0x7ef   : > { %4804 = vst.msk [vmem:[#allocation3 + $0x2] sm:$0x3] %vm4783_vm8, %v4802_v45 }
 0x7f0 PF: > { %p10822_p7 = scmp.ne.s32.totalorder %s12999_s22, 1 }
 0x7f1   : > { %s14405_s18 = sld [smem:[#allocation32_spill]] (!%p10822_p7)  ;;  %vm5032_vm9 = vcmask (!%p10822_p7), 1042432   ;;  %v4829_v10 = vld [vmem:[%s13087_s5] sm:$0xff] (!%p10822_p7)   ;;  %vm5025_vm10 = vcmask (!%p10822_p7), 48128   ;;  %v4831_v16 = vld [vmem:[%s13087_s5 + $0x8] sm:$0xff] (!%p10822_p7)   ;;  %v13063_v57 = vmov (!%p10822_p7), 0   ;;  %v4852_v35 = vlaneseq (!%p10822_p7) }
 0x7f2   : > { %4828 = sbr.rel (%p10822_p7) target bundleno = 2322 (0x912), region = 184  ;;  %v4835_v54 = vunpack.c.l.bf16 (!%p10822_p7), %v4829_v10  ;;  %v4836_v55 = vunpack.c.h.bf16 (!%p10822_p7), %v4829_v10  ;;  %v4837_v56 = vunpack.c.l.bf16 (!%p10822_p7), %v4831_v16  ;;  %v4838_v58 = vunpack.c.h.bf16 (!%p10822_p7), %v4831_v16  ;;  %11368 = vmatprep.mubr.msk.bf16.mxu0 (!%p10822_p7), %vm5025_vm10, %v4829_v10  ;;  %12158 = vset.pattern.permute.xlu1 (!%p10822_p7), %v13063_v57  ;;  %v10823_v38 = vld.sshfl [vmem:[#allocation3] sm:$0x11 pattern:$0x75316420] (!%p10822_p7)  ;;  %s14406_s26 = sld [smem:[#allocation33_spill]] (!%p10822_p7) }
 0x7f3   : > { %12146 = vset.pattern.permute.xlu0 (!%p10822_p7), %v13063_v57  ;;  %v13064_v3 = vmov (!%p10822_p7), 1   ;;  %v13065_v63 = vmov (!%p10822_p7), 2   ;;  %vm5099_vm11 = vcmask (!%p10822_p7), 516096   ;;  %v13066_v0 = vmov (!%p10822_p7), 0.0   ;;  %s14407_s15 = sld [smem:[#allocation34_spill]] (!%p10822_p7)  ;;  %s14408_s28 = sld [smem:[#allocation35_spill]] (!%p10822_p7) }
 0x7f4   : > { %v12147_v61 = vpack.i.bf16 (!%p10822_p7), %v4836_v55, %v4835_v54  ;;  %v12159_v62 = vpack.i.bf16 (!%p10822_p7), %v4838_v58, %v4837_v56  ;;  %5100 = vst.msk [vmem:[#allocation6] sm:$0x1] (!%p10822_p7), %vm5099_vm11, %v13066_v0  ;;  %5101 = vst.msk [vmem:[#allocation7] sm:$0x1] (!%p10822_p7), %vm5099_vm11, %v13066_v0  ;;  %v13067_v42 = vmov (!%p10822_p7), 1966171168   ;;  %v4848_v36 = vcombine.high (!%p10822_p7), %v10823_v38, %v10823_v38 }
 0x7f5   : > { %v4850_v2 = vunpack.c.l.s4 (!%p10822_p7), %v13067_v42  ;;  %v4853_v1 = vshrl.u32 (!%p10822_p7), %v4852_v35, 7  ;;  %v10825_v5 = vld.sshfl [vmem:[#allocation3 + $0x4] sm:$0x11 pattern:$0x75316420] (!%p10822_p7)  ;;  %vm5103_vm12 = vcmask (!%p10822_p7), 523264  }
 0x7f6   : > { %12160 = vperm.xlu1 (!%p10822_p7), %12158, %v12159_v62   ;;  %12148 = vperm.xlu0 (!%p10822_p7), %12146, %v12147_v61   ;;  %v10824_v7 = vld.sshfl [vmem:[#allocation3 + $0x2] sm:$0x11 pattern:$0x75316420] (!%p10822_p7)  ;;  %v4966_v59 = vcombine.high (!%p10822_p7), %v10825_v5, %v10825_v5 }
 0x7f7   : > { %v4833_v44 = vld [vmem:[%s14405_s18] sm:$0x3f] (!%p10822_p7)  ;;  %v4851_v41 = vunpack.c.0.s8 (!%p10822_p7), %v4850_v2  ;;  %v4907_v4 = vcombine.high (!%p10822_p7), %v10824_v7, %v10824_v7  ;;  %v4885_v6 = vsub.s32 (!%p10822_p7), 0, %v4853_v1 }
 0x7f8   : > { %v4834_v53 = vpack.c.bf16 (!%p10822_p7), %v4833_v44, %v4833_v44 }
 0x7f9   : > { %v4854_v15 = vsub.s32 %v4851_v41, %v4853_v1 }
 0x7fa   : > { %11477 = vmatprep.subr.msk.bf16.mxu0 %vm5032_vm9, %v4834_v53  ;;  %v5034_v60 = vsel %vm5032_vm9, %v4834_v53, 0  ;;  %12164 = vset.pattern.permute.xlu1 %v13064_v3 }
 0x7fb   : > { %11367 = vmatpush3.bf16.msra.mxu0 %v5034_v60  ;;  %12152 = vset.pattern.permute.xlu0 %v13064_v3  ;;  %v4862_v29 = vrot.slane %v4848_v36, %v4854_v15  ;;  %v4921_v28 = vrot.slane %v4907_v4, %v4854_v15  ;;  %v4855_v52 = vrot.slane %v10823_v38, %v4854_v15 }
 0x7fc   : > { %12166 = vperm.xlu1 %12164, %v12159_v62   ;;  %12154 = vperm.xlu0 %12152, %v12147_v61   ;;  %v4914_v8 = vrot.slane %v10824_v7, %v4854_v15  ;;  %v4973_v34 = vrot.slane %v10825_v5, %v4854_v15  ;;  %v4980_v37 = vrot.slane %v4966_v59, %v4854_v15 }
 0x7fd   : > { %v4890_v11 = vrot.slane %v4862_v29, %v4885_v6  ;;  %v4945_v12 = vrot.slane %v4921_v28, %v4885_v6  ;;  %v4886_v40 = vrot.slane %v4855_v52, %v4885_v6 }
 0x7fe   : > { %11369 = vmatmul.mubr.msk.bf16.vlgmr.msra.gmra.mrb[0].mxu0 %vm5025_vm10, %v4831_v16  ;;  %v4941_v19 = vrot.slane %v4914_v8, %v4885_v6  ;;  %v5004_v30 = vrot.slane %v4980_v37, %v4885_v6  ;;  %v5000_v32 = vrot.slane %v4973_v34, %v4885_v6 }
 0x800   : > { %12170 = vset.pattern.permute.xlu1 %v13065_v63  ;;  %12176 = vset.pattern.permute.xlu0 %v13065_v63  ;;  %v10830_v63 = vld [vmem:[%s14406_s26] ss:$0 sm:$0xff] }
 0x801   : > { %12172 = vperm.xlu1 %12170, %v12147_v61   ;;  %4990 = vperm.xlu0 %12176, %v4837_v56  }
 0x805   : > { %4994 = vperm.xlu1 %12170, %v4838_v58  }
 0x875   : > { %v12161_v9 = vpop.permute.xlu1 %12160  ;;  %v12149_v46 = vpop.permute.xlu0 %12148 }
 0x876   : > { %v12162_v13 = vunpack.i.l.bf16 %v12161_v9  ;;  %v12150_v17 = vunpack.i.l.bf16 %v12149_v46  ;;  %v12163_v21 = vunpack.i.h.bf16 %v12161_v9  ;;  %v12151_v23 = vunpack.i.h.bf16 %v12149_v46 }
 0x878   : > { %v4895_v26 = vmul.f32 %v12162_v13, %v4890_v11  ;;  %v4893_v31 = vmul.f32 %v12150_v17, %v4886_v40  ;;  %v4896_v39 = vmul.f32 %v12163_v21, %v4890_v11  ;;  %v4894_v48 = vmul.f32 %v12151_v23, %v4886_v40 }
 0x87b   : > { %v12167_v51 = vpop.permute.xlu1 %12166  ;;  %v12155_v49 = vpop.permute.xlu0 %12154 }
 0x87c   : > { %v12168_v14 = vunpack.i.l.bf16 %v12167_v51  ;;  %v12156_v20 = vunpack.i.l.bf16 %v12155_v49  ;;  %v12169_v22 = vunpack.i.h.bf16 %v12167_v51  ;;  %v12157_v24 = vunpack.i.h.bf16 %v12155_v49 }
 0x87e   : > { %v4950_v27 = vmul.f32 %v12168_v14, %v4945_v12  ;;  %v4948_v47 = vmul.f32 %v12156_v20, %v4941_v19  ;;  %v4951_v43 = vmul.f32 %v12169_v22, %v4945_v12  ;;  %v4949_v45 = vmul.f32 %v12157_v24, %v4941_v19 }
 0x880   : > { %v12173_v18 = vpop.permute.xlu1 %12172  ;;  %v4991_v33 = vpop.permute.xlu0 %4990  ;;  %v4954_v16 = vadd.f32 %v4950_v27, %v4895_v26  ;;  %v4952_v54 = vadd.f32 %v4948_v47, %v4893_v31  ;;  %v4955_v56 = vadd.f32 %v4951_v43, %v4896_v39  ;;  %v4953_v60 = vadd.f32 %v4949_v45, %v4894_v48 }
 0x881   : > { %v12174_v50 = vunpack.i.l.bf16 %v12173_v18  ;;  %v12175_v25 = vunpack.i.h.bf16 %v12173_v18  ;;  %v5009_v10 = vmul.f32 %v5004_v30, %v4991_v33 }
 0x883   : > { %v5007_v53 = vmul.f32 %v12174_v50, %v5000_v32  ;;  %v5008_v58 = vmul.f32 %v12175_v25, %v5000_v32  ;;  %v5013_v61 = vadd.f32 %v5009_v10, %v4954_v16  ;;  %v5120_v50 = vld [vmem:[#allocation7] sm:$0x1] }
 0x884   : > { %v4995_v44 = vpop.permute.xlu1 %4994 }
 0x885   : > { %v5010_v55 = vmul.f32 %v5004_v30, %v4995_v44  ;;  %v5011_v62 = vadd.f32 %v5007_v53, %v4952_v54  ;;  %v5012_v38 = vadd.f32 %v5008_v58, %v4953_v60  ;;  %v5102_v30 = vld [vmem:[#allocation6] sm:$0x1]  ;;  %v5150_v54 = vld [vmem:[%s14407_s15] sm:$0x1] }
 0x886   : > { %v5155_v58 = vld [vmem:[%s14408_s28] sm:$0x1] }
 0x887   : > { %v5014_v42 = vadd.f32 %v5010_v55, %v4955_v56 }
 0x8d1   : > { %v11370_v57 = vpop.f32.mrb[0].mxu0 }
 0x8d2   : > { %v5079_v3 = vadd.f32 %v11370_v57, %v5013_v61  ;;  %v5070_v0 = vpop.f32.mrb[1].mxu0 }
 0x8d3   : > { %v5071_v2 = vadd.f32 %v5070_v0, %v5011_v62  ;;  %v11371_v35 = vpop.f32.mrb[2].mxu0 }
 0x8d4   : > { %v5082_v41 = vadd.f32 %v11371_v35, %v5014_v42  ;;  %v5073_v1 = vpop.f32.mrb[3].mxu0  ;;  %v5094_v7 = vadd.f32 %v10830_v63, %v5079_v3 }
 0x8d5   : > { %v5092_v9 = vadd.f32 %v10830_v63, %v5071_v2  ;;  %v5074_v36 = vadd.f32 %v5073_v1, %v5012_v38 }
 0x8d6   : > { %v5095_v4 = vadd.f32 %v10830_v63, %v5082_v41  ;;  %v5123_v5 = vmul.f32 %v5094_v7, %v5094_v7  ;;  %v5107_v59 = vsel %vm5103_vm12, %v5094_v7, 0.0 }
 0x8d7   : > { %v5121_v15 = vmul.f32 %v5092_v9, %v5092_v9  ;;  %v5093_v46 = vadd.f32 %v10830_v63, %v5074_v36  ;;  %v5104_v29 = vsel %vm5103_vm12, %v5092_v9, 0.0 }
 0x8d8   : > { %v5124_v8 = vmul.f32 %v5095_v4, %v5095_v4  ;;  %v5128_v13 = vsel %vm5103_vm12, %v5123_v5, 0.0  ;;  %v5109_v14 = vsel %vm5103_vm12, %v5095_v4, 0.0 }
 0x8d9   : > { %v5105_v6 = vsel %vm5103_vm12, %v5093_v46, 0.0  ;;  %v5122_v28 = vmul.f32 %v5093_v46, %v5093_v46  ;;  %v5125_v52 = vsel %vm5103_vm12, %v5121_v15, 0.0 }
 0x8da   : > { %v5106_v51 = vadd.f32 %v5105_v6, %v5104_v29  ;;  %v5130_v40 = vsel %vm5103_vm12, %v5124_v8, 0.0 }
 0x8db   : > { %v5126_v11 = vsel %vm5103_vm12, %v5122_v28, 0.0 }
 0x8dc   : > { %v5108_v12 = vadd.f32 %v5107_v59, %v5106_v51  ;;  %v5127_v49 = vadd.f32 %v5126_v11, %v5125_v52 }
 0x8de   : > { %v5110_v34 = vadd.f32 %v5109_v14, %v5108_v12  ;;  %v5129_v37 = vadd.f32 %v5128_v13, %v5127_v49 }
 0x8e0   : > { %v5111_v17 = vrot.slane %v5110_v34, 4  ;;  %v5131_v18 = vadd.f32 %v5130_v40, %v5129_v37 }
 0x8e2   : > { %v5112_v19 = vadd.f32 %v5111_v17, %v5110_v34  ;;  %v5132_v20 = vrot.slane %v5131_v18, 4 }
 0x8e4   : > { %v5113_v21 = vrot.slane %v5112_v19, 2  ;;  %v5133_v22 = vadd.f32 %v5132_v20, %v5131_v18 }
 0x8e6   : > { %v5114_v23 = vadd.f32 %v5113_v21, %v5112_v19  ;;  %v5134_v24 = vrot.slane %v5133_v22, 2 }
 0x8e8   : > { %v5115_v26 = vrot.slane %v5114_v23, 1  ;;  %v5135_v27 = vadd.f32 %v5134_v24, %v5133_v22 }
 0x8ea   : > { %v5116_v31 = vadd.f32 %v5115_v26, %v5114_v23  ;;  %v5136_v32 = vrot.slane %v5135_v27, 1 }
 0x8ec   : > { %v5117_v47 = vadd.f32 %v5116_v31, %v5102_v30  ;;  %v5137_v33 = vadd.f32 %v5136_v32, %v5135_v27 }
 0x8ee   : > { %5119 = vst.msk [vmem:[#allocation6] sm:$0x1] %vm5099_vm11, %v5117_v47  ;;  %v5138_v39 = vadd.f32 %v5137_v33, %v5120_v50 }
 0x8f0   : > { %5139 = vst.msk [vmem:[#allocation7] sm:$0x1] %vm5099_vm11, %v5138_v39 }
 0x8f5   : > { %v5143_v43 = vld [vmem:[#allocation6] sm:$0x1] }
 0x8f6   : > { %v5144_v48 = vmul.f32 0.03125, %v5143_v43 }
 0x8f7   : > { %v5145_v25 = vld [vmem:[#allocation7] sm:$0x1] }
 0x8f8   : > { %v5146_v45 = vmul.f32 0.03125, %v5145_v25  ;;  %v5147_v44 = vmul.f32 %v5144_v48, %v5144_v48 }
 0x8fa   : > { %v5148_v10 = vsub.f32 %v5146_v45, %v5147_v44 }
 0x8fc   : > { %v5149_v16 = vmax.f32 %v5148_v10, 0.0 }
 0x8fe   : > { %v5151_v53 = vadd.f32 1e-05, %v5149_v16 }
 0x900   : > { %12181 = vrsqrt.f32 %v5151_v53 }
 0x90a   : > { %v12182_v55 = vpop.eup %12181 }
 0x90b   : > { %v5153_v56 = vmul.f32 %v12182_v55, %v5150_v54 }
 0x90d   : > { %5154 = vst.msk [vmem:[#allocation6] sm:$0x1] %vm5099_vm11, %v5153_v56  ;;  %v5156_v60 = vmul.f32 %v5153_v56, %v5144_v48 }
 0x90f   : > { %v5157_v61 = vsub.f32 %v5155_v58, %v5156_v60 }
 0x911   : > { %5158 = vst.msk [vmem:[#allocation7] sm:$0x1] %vm5099_vm11, %v5157_v61 }
 0x912 PF: > { %p10831_p3 = scmp.ne.s32.totalorder %s12999_s22, 2 }
 0x913   : > { %s14409_s0 = sld [smem:[#allocation32_spill]] (!%p10831_p3)  ;;  %vm5366_vm13 = vcmask (!%p10831_p3), 1042432   ;;  %v5163_v62 = vld [vmem:[%s13087_s5] sm:$0xff] (!%p10831_p3)   ;;  %vm5359_vm14 = vcmask (!%p10831_p3), 48128   ;;  %v5165_v3 = vld [vmem:[%s13087_s5 + $0x8] sm:$0xff] (!%p10831_p3)   ;;  %v13068_v1 = vmov (!%p10831_p3), 0   ;;  %v5186_v28 = vlaneseq (!%p10831_p3) }
 0x914   : > { %5162 = sbr.rel (%p10831_p3) target bundleno = 2837 (0xb15), region = 196  ;;  %v5169_v0 = vunpack.c.l.bf16 (!%p10831_p3), %v5163_v62  ;;  %v5170_v42 = vunpack.c.h.bf16 (!%p10831_p3), %v5163_v62  ;;  %v5171_v2 = vunpack.c.l.bf16 (!%p10831_p3), %v5165_v3  ;;  %v5172_v35 = vunpack.c.h.bf16 (!%p10831_p3), %v5165_v3  ;;  %11374 = vmatprep.mubr.msk.bf16.mxu0 (!%p10831_p3), %vm5359_vm14, %v5163_v62  ;;  %12183 = vset.pattern.permute.xlu0 (!%p10831_p3), %v13068_v1  ;;  %s14410_s12 = sld [smem:[#allocation36_spill]] (!%p10831_p3)  ;;  %v10832_v52 = vld.sshfl [vmem:[#allocation3] sm:$0x11 pattern:$0x75316420] (!%p10831_p3) }
 0x915   : > { %12195 = vset.pattern.permute.xlu1 (!%p10831_p3), %v13068_v1  ;;  %v13069_v9 = vmov (!%p10831_p3), 1   ;;  %v13070_v36 = vmov (!%p10831_p3), 2   ;;  %v13071_v29 = vmov (!%p10831_p3), 1966171168   ;;  %v5187_v59 = vshrl.u32 (!%p10831_p3), %v5186_v28, 7  ;;  %s14411_s19 = sld [smem:[#allocation33_spill]] (!%p10831_p3) }
 0x916   : > { %v12184_v41 = vpack.i.bf16 (!%p10831_p3), %v5170_v42, %v5169_v0  ;;  %v12196_v7 = vpack.i.bf16 (!%p10831_p3), %v5172_v35, %v5171_v2  ;;  %v5184_v6 = vunpack.c.l.s4 (!%p10831_p3), %v13071_v29  ;;  %v10833_v11 = vld.sshfl [vmem:[#allocation3 + $0x2] sm:$0x11 pattern:$0x75316420] (!%p10831_p3)  ;;  %v5182_v13 = vcombine.high (!%p10831_p3), %v10832_v52, %v10832_v52  ;;  %v10840_v28 = vld [vmem:[#allocation6] ss:$0 sm:$0xff] (!%p10831_p3) }
 0x917   : > { %v5241_v14 = vcombine.high (!%p10831_p3), %v10833_v11, %v10833_v11  ;;  %v10834_v34 = vld.sshfl [vmem:[#allocation3 + $0x4] sm:$0x11 pattern:$0x75316420] (!%p10831_p3)  ;;  %v5219_v40 = vsub.s32 (!%p10831_p3), 0, %v5187_v59  ;;  %s14412_s16 = sld [smem:[#allocation37_spill]] (!%p10831_p3) }
 0x918   : > { %12185 = vperm.xlu0 (!%p10831_p3), %12183, %v12184_v41   ;;  %12197 = vperm.xlu1 (!%p10831_p3), %12195, %v12196_v7   ;;  %v5185_v51 = vunpack.c.0.s8 (!%p10831_p3), %v5184_v6  ;;  %v5300_v21 = vcombine.high (!%p10831_p3), %v10834_v34, %v10834_v34  ;;  %vm5497_vm15 = vcmask (!%p10831_p3), 523264   ;;  %s14413_s1 = sld [smem:[#allocation38_spill]] (!%p10831_p3)  ;;  %s14414_s3 = sld [smem:[#allocation39_spill]] (!%p10831_p3) }
 0x919   : > { %v5167_v57 = vld [vmem:[%s14409_s0] sm:$0x3f] (!%p10831_p3) }
 0x91a   : > { %v5168_v63 = vpack.c.bf16 (!%p10831_p3), %v5167_v57, %v5167_v57  ;;  %v12221_v15 = vld [vmem:[%s14410_s12] sm:$0xff] (!%p10831_p3)   ;;  %v12222_v4 = vld [vmem:[%s14410_s12 + $0x8] sm:$0xff] (!%p10831_p3)   ;;  %v12223_v46 = vld [vmem:[%s14410_s12 + $0x10] sm:$0xff] (!%p10831_p3)   ;;  %v5188_v49 = vsub.s32 (!%p10831_p3), %v5185_v51, %v5187_v59 }
 0x91b   : > { %11378 = vmatprep.subr.bf16.mxu1 %v12221_v15  ;;  %v12224_v5 = vld [vmem:[%s14410_s12 + $0x18] sm:$0xff]  }
 0x91c   : > { %11478 = vmatprep.subr.msk.bf16.mxu0 %vm5366_vm13, %v5168_v63  ;;  %v5368_v38 = vsel %vm5366_vm13, %v5168_v63, 0  ;;  %12189 = vset.pattern.permute.xlu0 %v13069_v9  ;;  %v5189_v37 = vrot.slane %v10832_v52, %v5188_v49  ;;  %v5196_v17 = vrot.slane %v5182_v13, %v5188_v49  ;;  %v5255_v19 = vrot.slane %v5241_v14, %v5188_v49 }
 0x91d   : > { %11373 = vmatpush3.bf16.msra.mxu0 %v5368_v38  ;;  %12201 = vset.pattern.permute.xlu1 %v13069_v9  ;;  %v5248_v22 = vrot.slane %v10833_v11, %v5188_v49  ;;  %v5314_v31 = vrot.slane %v5300_v21, %v5188_v49  ;;  %v5307_v39 = vrot.slane %v10834_v34, %v5188_v49  ;;  %v10841_v49 = vld [vmem:[#allocation7] ss:$0 sm:$0xff] }
 0x91e   : > { %12191 = vperm.xlu0 %12189, %v12184_v41   ;;  %12203 = vperm.xlu1 %12201, %v12196_v7   ;;  %v5220_v23 = vrot.slane %v5189_v37, %v5219_v40  ;;  %v5224_v24 = vrot.slane %v5196_v17, %v5219_v40  ;;  %v5279_v27 = vrot.slane %v5255_v19, %v5219_v40 }
 0x91f   : > { %11379 = vmatpush3.bf16.msra.mxu1 %v12221_v15  ;;  %v5275_v50 = vrot.slane %v5248_v22, %v5219_v40  ;;  %v5338_v53 = vrot.slane %v5314_v31, %v5219_v40  ;;  %v5334_v58 = vrot.slane %v5307_v39, %v5219_v40 }
 0x920   : > { %11375 = vmatmul.mubr.msk.bf16.vlgmr.msra.gmra.mrb[0].mxu0 %vm5359_vm14, %v5165_v3  ;;  %11380 = vmatprep.subr.bf16.mxu1 %v12222_v4 }
 0x922   : > { %12213 = vset.pattern.permute.xlu0 %v13070_v36  ;;  %12207 = vset.pattern.permute.xlu1 %v13070_v36 }
 0x923   : > { %12215 = vperm.xlu0 %12213, %v12196_v7   ;;  %12209 = vperm.xlu1 %12207, %v12184_v41  }
 0x924   : > { %11381 = vmatpush3.bf16.msra.mxu1 %v12222_v4  ;;  %v10839_v4 = vld [vmem:[%s14411_s19] ss:$0 sm:$0xff] }
 0x925   : > { %11382 = vmatprep.subr.bf16.mxu1 %v12223_v46 }
 0x928   : > { %11383 = vmatpush3.bf16.msra.mxu1 %v12223_v46 }
 0x929   : > { %11384 = vmatprep.subr.bf16.mxu1 %v12224_v5 }
 0x92c   : > { %11385 = vmatpush3.bf16.msra.mxu1 %v12224_v5 }
 0x997   : > { %v12186_v8 = vpop.permute.xlu0 %12185  ;;  %v12198_v12 = vpop.permute.xlu1 %12197 }
 0x998   : > { %v12199_v26 = vunpack.i.l.bf16 %v12198_v12  ;;  %v12187_v32 = vunpack.i.l.bf16 %v12186_v8  ;;  %v12200_v43 = vunpack.i.h.bf16 %v12198_v12  ;;  %v12188_v45 = vunpack.i.h.bf16 %v12186_v8 }
 0x99a   : > { %v5229_v10 = vmul.f32 %v12199_v26, %v5224_v24  ;;  %v5227_v55 = vmul.f32 %v12187_v32, %v5220_v23  ;;  %v5230_v61 = vmul.f32 %v12200_v43, %v5224_v24  ;;  %v5228_v3 = vmul.f32 %v12188_v45, %v5220_v23 }
 0x99d   : > { %v12192_v18 = vpop.permute.xlu0 %12191  ;;  %v12204_v20 = vpop.permute.xlu1 %12203 }
 0x99e   : > { %v12205_v30 = vunpack.i.l.bf16 %v12204_v20  ;;  %v12193_v47 = vunpack.i.l.bf16 %v12192_v18  ;;  %v12206_v48 = vunpack.i.h.bf16 %v12204_v20  ;;  %v12194_v44 = vunpack.i.h.bf16 %v12192_v18 }
 0x9a0   : > { %v5284_v16 = vmul.f32 %v12205_v30, %v5279_v27  ;;  %v5282_v56 = vmul.f32 %v12193_v47, %v5275_v50  ;;  %v5285_v57 = vmul.f32 %v12206_v48, %v5279_v27  ;;  %v5283_v63 = vmul.f32 %v12194_v44, %v5275_v50  ;;  %v10842_v47 = vld [vmem:[%s14412_s16] ss:$0 sm:$0xff] }
 0x9a1   : > { %v13072_v50 = vmov 0.0  }
 0x9a2   : > { %v12216_v33 = vpop.permute.xlu0 %12215  ;;  %v12210_v25 = vpop.permute.xlu1 %12209  ;;  %v5288_v2 = vadd.f32 %v5284_v16, %v5229_v10  ;;  %v5286_v38 = vadd.f32 %v5282_v56, %v5227_v55  ;;  %v5289_v1 = vadd.f32 %v5285_v57, %v5230_v61  ;;  %v5287_v9 = vadd.f32 %v5283_v63, %v5228_v3  ;;  %5556 = vst [vmem:[#allocation8] sm:$0x1] %v13072_v50 }
 0x9a3   : > { %v12217_v54 = vunpack.i.l.bf16 %v12216_v33  ;;  %v12211_v60 = vunpack.i.l.bf16 %v12210_v25  ;;  %v12218_v62 = vunpack.i.h.bf16 %v12216_v33  ;;  %v12212_v0 = vunpack.i.h.bf16 %v12210_v25  ;;  %5557 = vst [vmem:[#allocation9] sm:$0x1] %v13072_v50 }
 0x9a5   : > { %v5343_v42 = vmul.f32 %v12217_v54, %v5338_v53  ;;  %v5341_v35 = vmul.f32 %v12211_v60, %v5334_v58  ;;  %v5344_v41 = vmul.f32 %v12218_v62, %v5338_v53  ;;  %v5342_v7 = vmul.f32 %v12212_v0, %v5334_v58 }
 0x9a7   : > { %v5347_v36 = vadd.f32 %v5343_v42, %v5288_v2  ;;  %v5345_v46 = vadd.f32 %v5341_v35, %v5286_v38  ;;  %v5348_v6 = vadd.f32 %v5344_v41, %v5289_v1  ;;  %v5346_v52 = vadd.f32 %v5342_v7, %v5287_v9 }
 0x9a9   : > { %v5558_v7 = vld [vmem:[#allocation8] sm:$0x1] }
 0x9f3   : > { %v11376_v15 = vpop.f32.mrb[0].mxu0 }
 0x9f4   : > { %v5413_v5 = vadd.f32 %v11376_v15, %v5347_v36  ;;  %v5404_v29 = vpop.f32.mrb[1].mxu0  ;;  %v5570_v15 = vld [vmem:[#allocation9] sm:$0x1] }
 0x9f5   : > { %v5405_v51 = vadd.f32 %v5404_v29, %v5345_v46  ;;  %v11377_v59 = vpop.f32.mrb[2].mxu0 }
 0x9f6   : > { %v5428_v8 = vadd.f32 %v10839_v4, %v5413_v5  ;;  %v5416_v11 = vadd.f32 %v11377_v59, %v5348_v6  ;;  %v5407_v12 = vpop.f32.mrb[3].mxu0 }
 0x9f7   : > { %v5426_v13 = vadd.f32 %v10839_v4, %v5405_v51  ;;  %v5408_v14 = vadd.f32 %v5407_v12, %v5346_v52  ;;  %v5596_v12 = vld [vmem:[%s14413_s1] sm:$0x1] }
 0x9f8   : > { %v5439_v34 = vmul.f32 %v10840_v28, %v5428_v8  ;;  %v5429_v37 = vadd.f32 %v10839_v4, %v5416_v11 }
 0x9f9   : > { %v5437_v40 = vmul.f32 %v10840_v28, %v5426_v13  ;;  %v5427_v17 = vadd.f32 %v10839_v4, %v5408_v14  ;;  %v5601_v14 = vld [vmem:[%s14414_s3] sm:$0x1] }
 0x9fa   : > { %v5450_v18 = vadd.f32 %v10841_v49, %v5439_v34  ;;  %v5440_v19 = vmul.f32 %v10840_v28, %v5429_v37 }
 0x9fb   : > { %v5438_v20 = vmul.f32 %v10840_v28, %v5427_v17  ;;  %v5448_v21 = vadd.f32 %v10841_v49, %v5437_v40 }
 0x9fc   : > { %v5451_v22 = vadd.f32 %v10841_v49, %v5440_v19  ;;  %v5454_v24 = vmax.f32 %v5450_v18, 0.0 }
 0x9fd   : > { %v5449_v23 = vadd.f32 %v10841_v49, %v5438_v20  ;;  %v5452_v27 = vmax.f32 %v5448_v21, 0.0 }
 0x9fe   : > { %v5455_v26 = vmax.f32 %v5451_v22, 0.0 }
 0x9ff   : > { %v5453_v30 = vmax.f32 %v5449_v23, 0.0 }
 0xa00   : > { %v5457_v31 = vpack.c.bf16 %v5455_v26, %v5454_v24 }
 0xa01   : > { %v5456_v32 = vpack.c.bf16 %v5453_v30, %v5452_v27 }
 0xa03   : > { %11386 = vmatprep.mubr.msk.bf16.mxu1 %vm5497_vm15, %v5456_v32 }
 0xa04   : > { %11387 = vmatmul.mubr.msk.bf16.vlgmr.msra.gmra.mrb[0].mxu1 %vm5497_vm15, %v5457_v31 }
 0xad7   : > { %v11388_v33 = vpop.f32.mrb[0].mxu1 }
 0xad8   : > { %v5538_v39 = vpop.f32.mrb[1].mxu1  ;;  %v5547_v45 = vadd.f32 %v11388_v33, %v10842_v47 }
 0xad9   : > { %v5539_v43 = vadd.f32 %v10842_v47, %v5538_v39  ;;  %v11389_v48 = vpop.f32.mrb[2].mxu1 }
 0xada   : > { %v5541_v25 = vpop.f32.mrb[3].mxu1  ;;  %v5550_v16 = vadd.f32 %v11389_v48, %v10842_v47  ;;  %v5573_v55 = vmul.f32 %v5547_v45, %v5547_v45 }
 0xadb   : > { %v5542_v44 = vadd.f32 %v10842_v47, %v5541_v25  ;;  %v5571_v10 = vmul.f32 %v5539_v43, %v5539_v43 }
 0xadc   : > { %v5574_v60 = vmul.f32 %v5550_v16, %v5550_v16 }
 0xadd   : > { %v5559_v53 = vadd.f32 %v5542_v44, %v5539_v43  ;;  %v5572_v54 = vmul.f32 %v5542_v44, %v5542_v44 }
 0xadf   : > { %v5560_v56 = vadd.f32 %v5559_v53, %v5547_v45  ;;  %v5575_v58 = vadd.f32 %v5572_v54, %v5571_v10 }
 0xae1   : > { %v5561_v61 = vadd.f32 %v5560_v56, %v5550_v16  ;;  %v5576_v57 = vadd.f32 %v5575_v58, %v5573_v55 }
 0xae3   : > { %v5562_v62 = vrot.slane %v5561_v61, 4  ;;  %v5577_v3 = vadd.f32 %v5576_v57, %v5574_v60 }
 0xae5   : > { %v5563_v63 = vadd.f32 %v5562_v62, %v5561_v61  ;;  %v5578_v0 = vrot.slane %v5577_v3, 4 }
 0xae7   : > { %v5564_v42 = vrot.slane %v5563_v63, 2  ;;  %v5579_v2 = vadd.f32 %v5578_v0, %v5577_v3 }
 0xae9   : > { %v5565_v35 = vadd.f32 %v5564_v42, %v5563_v63  ;;  %v5580_v38 = vrot.slane %v5579_v2, 2 }
 0xaeb   : > { %v5566_v41 = vrot.slane %v5565_v35, 1  ;;  %v5581_v1 = vadd.f32 %v5580_v38, %v5579_v2 }
 0xaed   : > { %v5567_v9 = vadd.f32 %v5566_v41, %v5565_v35  ;;  %v5582_v36 = vrot.slane %v5581_v1, 1 }
 0xaef   : > { %v5568_v4 = vadd.f32 %v5567_v9, %v5558_v7  ;;  %v5583_v46 = vadd.f32 %v5582_v36, %v5581_v1 }
 0xaf1   : > { %5569 = vst [vmem:[#allocation8] sm:$0x1] %v5568_v4  ;;  %v5584_v5 = vadd.f32 %v5583_v46, %v5570_v15 }
 0xaf3   : > { %5585 = vst [vmem:[#allocation9] sm:$0x1] %v5584_v5 }
 0xaf8   : > { %v5589_v29 = vld [vmem:[#allocation8] sm:$0x1] }
 0xaf9   : > { %v5590_v6 = vmul.f32 0.03125, %v5589_v29 }
 0xafa   : > { %v5591_v28 = vld [vmem:[#allocation9] sm:$0x1] }
 0xafb   : > { %v5592_v51 = vmul.f32 0.03125, %v5591_v28  ;;  %v5593_v59 = vmul.f32 %v5590_v6, %v5590_v6 }
 0xafd   : > { %v5594_v52 = vsub.f32 %v5592_v51, %v5593_v59 }
 0xaff   : > { %v5595_v8 = vmax.f32 %v5594_v52, 0.0 }
 0xb01   : > { %v5597_v11 = vadd.f32 1e-05, %v5595_v8 }
 0xb03   : > { %12227 = vrsqrt.f32 %v5597_v11 }
 0xb0d   : > { %v12228_v49 = vpop.eup %12227 }
 0xb0e   : > { %v5599_v13 = vmul.f32 %v12228_v49, %v5596_v12 }
 0xb10   : > { %5600 = vst [vmem:[#allocation8] sm:$0x1] %v5599_v13  ;;  %v5602_v34 = vmul.f32 %v5599_v13, %v5590_v6 }
 0xb12   : > { %v5603_v37 = vsub.f32 %v5601_v14, %v5602_v34 }
 0xb14   : > { %5604 = vst [vmem:[#allocation9] sm:$0x1] %v5603_v37 }
 0xb15 PF: > { %p10849_p9 = scmp.ne.s32.totalorder %s12999_s22, 3 }
 0xb17   : > { %5608 = sbr.rel (%p10849_p9) target bundleno = 4608 (0x1200), region = 208 }
 0xb1e   : > { %s14415_s2 = sld [smem:[#allocation32_spill]]  ;;  %vm5819_vm0 = vcmask 1042432   ;;  %v5616_v17 = vld [vmem:[%s13087_s5] sm:$0xff]   ;;  %vm5812_vm1 = vcmask 48128   ;;  %v5618_v18 = vld [vmem:[%s13087_s5 + $0x8] sm:$0xff]   ;;  %v14354_v27 = vmov 0   ;;  %v5639_v9 = vlaneseq }
 0xb1f   : > { %v5622_v20 = vunpack.c.l.bf16 %v5616_v17  ;;  %v5623_v21 = vunpack.c.h.bf16 %v5616_v17  ;;  %v5624_v22 = vunpack.c.l.bf16 %v5618_v18  ;;  %v5625_v23 = vunpack.c.h.bf16 %v5618_v18  ;;  %11392 = vmatprep.mubr.msk.bf16.mxu1 %vm5812_vm1, %v5616_v17  ;;  %12229 = vset.pattern.permute.xlu0 %v14354_v27  ;;  %s14416_s22 = sld [smem:[#allocation36_spill]]  ;;  %v13641_v43 = vld [vmem:[#allocation18] sm:$0xff]  ;;  %v6036_v44 = vld [vmem:[#allocation18 + $0x10] sm:$0xff]  ;;  %s14418_s7 = sld [smem:[#allocation33_spill]] }
 0xb20   : > { %12241 = vset.pattern.permute.xlu1 %v14354_v27  ;;  %6598 = vmatprep.mubr.bf16.mxu0 %v14354_v27  ;;  %v13074_v31 = vmov 1   ;;  %v13075_v32 = vmov 2   ;;  %v13643_v48 = vld [vmem:[#allocation18 + $0x20] sm:$0xff]  ;;  %v6040_v10 = vld [vmem:[#allocation18 + $0x30] sm:$0xff]  ;;  %v13076_v1 = vmov 1966171168  }
 0xb21   : > { %v12230_v26 = vpack.i.bf16 %v5623_v21, %v5622_v20  ;;  %v12242_v30 = vpack.i.bf16 %v5625_v23, %v5624_v22  ;;  %v10869_v25 = vcombine.low %v13641_v43, %v13643_v48  ;;  %v10870_v45 = vcombine.high %v13641_v43, %v13643_v48  ;;  %v6044_v54 = vld [vmem:[#allocation18 + $0x50] sm:$0xff]  ;;  %v10851_v5 = vld.sshfl [vmem:[#allocation3 + $0x2] sm:$0x11 pattern:$0x75316420]  ;;  %v6074_v48 = vld [vmem:[#allocation18 + $0x140] sm:$0xff] }
 0xb22   : > { %v10874_v16 = vcombine.high %v6036_v44, %v6040_v10  ;;  %v10873_v53 = vcombine.low %v6036_v44, %v6040_v10  ;;  %v6048_v55 = vld [vmem:[#allocation18 + $0x70] sm:$0xff]  ;;  %v5637_v7 = vunpack.c.l.s4 %v13076_v1  ;;  %v13649_v15 = vshrl.u32 %v5639_v9, 7  ;;  %v10852_v59 = vld.sshfl [vmem:[#allocation3 + $0x4] sm:$0x11 pattern:$0x75316420] }
 0xb23   : > { %12231 = vperm.xlu0 %12229, %v12230_v26   ;;  %12243 = vperm.xlu1 %12241, %v12242_v30   ;;  %v10882_v56 = vcombine.high %v6044_v54, %v6048_v55  ;;  %v10881_v58 = vcombine.low %v6044_v54, %v6048_v55  ;;  %v6052_v60 = vld [vmem:[#allocation18 + $0x90] sm:$0xff]  ;;  %v5694_v51 = vcombine.high %v10851_v5, %v10851_v5  ;;  %vm5950_vm2 = vcmask 523264   ;;  %s14419_s10 = sld [smem:[#allocation37_spill]]  ;;  %s14420_s18 = sld [smem:[#allocation40_spill]] }
 0xb24   : > { %v5620_v40 = vld [vmem:[%s14415_s2] sm:$0x3f]  ;;  %6566 = vmatprep.subr.bf16.mxu0 %v10874_v16  ;;  %v6056_v61 = vld [vmem:[#allocation18 + $0xb0] sm:$0xff]  ;;  %v5638_v36 = vunpack.c.0.s8 %v5637_v7  ;;  %v13656_v8 = vsub.s32 0, %v13649_v15  ;;  %v5753_v14 = vcombine.high %v10852_v59, %v10852_v59  ;;  %vm7178_vm3 = vcmask 1041409   ;;  %s14448_s26 = sld [smem:[#allocation41_spill]] }
 0xb25   : > { %v5621_v19 = vpack.c.bf16 %v5620_v40, %v5620_v40  ;;  %v12267_v50 = vld [vmem:[%s14416_s22] sm:$0xff]   ;;  %v12268_v47 = vld [vmem:[%s14416_s22 + $0x8] sm:$0xff]   ;;  %v12269_v33 = vld [vmem:[%s14416_s22 + $0x10] sm:$0xff]   ;;  %6567 = vmatpush1.bf16.msra.mxu0 %v10873_v53  ;;  %v10890_v57 = vcombine.high %v6052_v60, %v6056_v61  ;;  %v10889_v62 = vcombine.low %v6052_v60, %v6056_v61  ;;  %vm7180_vm4 = vcmask 1043459   ;;  %s14449_s15 = sld [smem:[#allocation42_spill]]  ;;  %s14459_s28 = sld [smem:[#allocation43_spill]] }
 0xb26   : > { %v12270_v39 = vld [vmem:[%s14416_s22 + $0x18] sm:$0xff]   ;;  %6568 = vmatprep.subr.bf16.mxu0 %v10882_v56  ;;  %v6060_v3 = vld [vmem:[#allocation18 + $0xd0] sm:$0xff]  ;;  %v13652_v6 = vsub.s32 %v5638_v36, %v13649_v15  ;;  %14417 = vst [vmem:[#allocation47_spill] sm:$0xff] %v13656_v8  ;;  %v10857_v7 = vld [vmem:[%s14418_s7] ss:$0 sm:$0xff]  ;;  %vm7182_vm5 = vcmask 1045509  }
 0xb27   : > { %11479 = vmatprep.subr.msk.bf16.mxu1 %vm5819_vm0, %v5621_v19  ;;  %v5821_v24 = vsel %vm5819_vm0, %v5621_v19, 0  ;;  %12235 = vset.pattern.permute.xlu0 %v13074_v31  ;;  %v6064_v63 = vld [vmem:[#allocation18 + $0xf0] sm:$0xff]  ;;  %vm7184_vm6 = vcmask 1047559   ;;  %s14460_s0 = sld [smem:[#allocation44_spill]]  ;;  %vm10241_vm0 = vcmask 9216  }
 0xb28   : > { %11391 = vmatpush3.bf16.msra.mxu1 %v5821_v24  ;;  %12247 = vset.pattern.permute.xlu1 %v13074_v31  ;;  %v10898_v0 = vcombine.high %v6060_v3, %v6064_v63  ;;  %v10897_v42 = vcombine.low %v6060_v3, %v6064_v63  ;;  %v6068_v2 = vld [vmem:[#allocation18 + $0x110] sm:$0xff]  ;;  %v5708_v49 = vrot.slane %v5694_v51, %v13652_v6 }
 0xb29   : > { %12237 = vperm.xlu0 %12235, %v12230_v26   ;;  %12249 = vperm.xlu1 %12247, %v12242_v30   ;;  %v6072_v35 = vld [vmem:[#allocation18 + $0x130] sm:$0xff]  ;;  %v5701_v34 = vrot.slane %v10851_v5, %v13652_v6  ;;  %v5767_v20 = vrot.slane %v5753_v14, %v13652_v6  ;;  %v10858_v5 = vld [vmem:[#allocation6] ss:$0 sm:$0xff] }
 0xb2a   : > { %11396 = vmatprep.subr.bf16.mxu1 %v12267_v50  ;;  %6569 = vmatpush1.bf16.msra.mxu0 %v10881_v58  ;;  %v10906_v38 = vcombine.high %v6068_v2, %v6072_v35  ;;  %v10905_v41 = vcombine.low %v6068_v2, %v6072_v35  ;;  %v10850_v4 = vld.sshfl [vmem:[#allocation3] sm:$0x11 pattern:$0x75316420] }
 0xb2b   : > { %11393 = vmatmul.mubr.msk.bf16.vlgmr.msra.gmra.mrb[0].mxu1 %vm5812_vm1, %v5618_v18  ;;  %6570 = vmatprep.subr.bf16.mxu0 %v10890_v57  ;;  %v5635_v28 = vcombine.high %v10850_v4, %v10850_v4  ;;  %v5642_v52 = vrot.slane %v10850_v4, %v13652_v6  ;;  %v5732_v18 = vrot.slane %v5708_v49, %v13656_v8 }
 0xb2c   : > { %11397 = vmatpush3.bf16.msra.mxu1 %v12267_v50  ;;  %v5728_v22 = vrot.slane %v5701_v34, %v13656_v8 }
 0xb2d   : > { %12259 = vset.pattern.permute.xlu0 %v13075_v32  ;;  %12253 = vset.pattern.permute.xlu1 %v13075_v32  ;;  %v5649_v11 = vrot.slane %v5635_v28, %v13652_v6  ;;  %v5673_v37 = vrot.slane %v5642_v52, %v13656_v8 }
 0xb2e   : > { %12261 = vperm.xlu0 %12259, %v12242_v30   ;;  %12255 = vperm.xlu1 %12253, %v12230_v26   ;;  %v5760_v26 = vrot.slane %v10852_v59, %v13652_v6 }
 0xb2f   : > { %11398 = vmatprep.subr.bf16.mxu1 %v12268_v47  ;;  %6571 = vmatpush1.bf16.msra.mxu0 %v10889_v62  ;;  %v5677_v40 = vrot.slane %v5649_v11, %v13656_v8 }
 0xb30   : > { %11399 = vmatpush3.bf16.msra.mxu1 %v12268_v47  ;;  %6572 = vmatprep.subr.bf16.mxu0 %v10898_v0  ;;  %v5787_v53 = vrot.slane %v5760_v26, %v13656_v8 }
 0xb31   : > { %11400 = vmatprep.subr.bf16.mxu1 %v12269_v33 }
 0xb33   : > { %6573 = vmatpush1.bf16.msra.mxu0 %v10897_v42 }
 0xb34   : > { %11401 = vmatpush3.bf16.msra.mxu1 %v12269_v33  ;;  %6574 = vmatprep.subr.bf16.mxu0 %v10906_v38 }
 0xb35   : > { %11402 = vmatprep.subr.bf16.mxu1 %v12270_v39 }
 0xb37   : > { %6575 = vmatpush1.bf16.msra.mxu0 %v10905_v41 }
 0xb38   : > { %11403 = vmatpush3.bf16.msra.mxu1 %v12270_v39 }
 0xb39   : > { %6460 = vmatprep.subr.bf16.mxu1 %v10870_v45  ;;  %v5791_v45 = vrot.slane %v5767_v20, %v13656_v8 }
 0xba2   : > { %v12232_v46 = vpop.permute.xlu0 %12231  ;;  %v12244_v29 = vpop.permute.xlu1 %12243 }
 0xba3   : > { %v12245_v17 = vunpack.i.l.bf16 %v12244_v29  ;;  %v12233_v21 = vunpack.i.l.bf16 %v12232_v46  ;;  %v12246_v30 = vunpack.i.h.bf16 %v12244_v29  ;;  %v12234_v50 = vunpack.i.h.bf16 %v12232_v46 }
 0xba5   : > { %v5682_v33 = vmul.f32 %v12245_v17, %v5677_v40  ;;  %v5680_v10 = vmul.f32 %v12233_v21, %v5673_v37  ;;  %v5683_v55 = vmul.f32 %v12246_v30, %v5677_v40  ;;  %v5681_v60 = vmul.f32 %v12234_v50, %v5673_v37 }
 0xba8   : > { %v12238_v12 = vpop.permute.xlu0 %12237  ;;  %v12250_v13 = vpop.permute.xlu1 %12249 }
 0xba9   : > { %v12251_v19 = vunpack.i.l.bf16 %v12250_v13  ;;  %v12239_v23 = vunpack.i.l.bf16 %v12238_v12  ;;  %v12252_v31 = vunpack.i.h.bf16 %v12250_v13  ;;  %v12240_v47 = vunpack.i.h.bf16 %v12238_v12  ;;  %v10859_v12 = vld [vmem:[#allocation7] ss:$0 sm:$0xff] }
 0xbab   : > { %v5737_v39 = vmul.f32 %v12251_v19, %v5732_v18  ;;  %v5735_v16 = vmul.f32 %v12239_v23, %v5728_v22  ;;  %v5738_v56 = vmul.f32 %v12252_v31, %v5732_v18  ;;  %v5736_v61 = vmul.f32 %v12240_v47, %v5728_v22  ;;  %v6042_v31 = vld [vmem:[#allocation18 + $0x40] sm:$0xff] }
 0xbad   : > { %v12262_v24 = vpop.permute.xlu0 %12261  ;;  %v12256_v32 = vpop.permute.xlu1 %12255  ;;  %v5741_v3 = vadd.f32 %v5737_v39, %v5682_v33  ;;  %v5739_v0 = vadd.f32 %v5735_v16, %v5680_v10  ;;  %v5742_v2 = vadd.f32 %v5738_v56, %v5683_v55  ;;  %v5740_v38 = vadd.f32 %v5736_v61, %v5681_v60  ;;  %v6050_v39 = vld [vmem:[#allocation18 + $0x80] sm:$0xff] }
 0xbae   : > { %v12263_v44 = vunpack.i.l.bf16 %v12262_v24  ;;  %v12257_v54 = vunpack.i.l.bf16 %v12256_v32  ;;  %v12264_v58 = vunpack.i.h.bf16 %v12262_v24  ;;  %v12258_v57 = vunpack.i.h.bf16 %v12256_v32  ;;  %v6046_v32 = vld [vmem:[#allocation18 + $0x60] sm:$0xff] }
 0xbaf   : > { %v10878_v33 = vcombine.high %v6042_v31, %v6046_v32  ;;  %v6058_v16 = vld [vmem:[#allocation18 + $0xc0] sm:$0xff] }
 0xbb0   : > { %v5796_v62 = vmul.f32 %v12263_v44, %v5791_v45  ;;  %v5794_v63 = vmul.f32 %v12257_v54, %v5787_v53  ;;  %v5797_v42 = vmul.f32 %v12264_v58, %v5791_v45  ;;  %v5795_v35 = vmul.f32 %v12258_v57, %v5787_v53  ;;  %v6054_v45 = vld [vmem:[#allocation18 + $0xa0] sm:$0xff] }
 0xbb1   : > { %v10877_v44 = vcombine.low %v6042_v31, %v6046_v32  ;;  %v10886_v10 = vcombine.high %v6050_v39, %v6054_v45  ;;  %v6062_v53 = vld [vmem:[#allocation18 + $0xe0] sm:$0xff]  ;;  %v10885_v54 = vcombine.low %v6050_v39, %v6054_v45 }
 0xbb2   : > { %v5800_v41 = vadd.f32 %v5796_v62, %v5741_v3  ;;  %v5798_v9 = vadd.f32 %v5794_v63, %v5739_v0  ;;  %v5801_v46 = vadd.f32 %v5797_v42, %v5742_v2  ;;  %v5799_v51 = vadd.f32 %v5795_v35, %v5740_v38  ;;  %v6066_v56 = vld [vmem:[#allocation18 + $0x100] sm:$0xff]  ;;  %v6076_v62 = vld [vmem:[#allocation18 + $0x150] sm:$0xff] }
 0xbb3   : > { %v10894_v55 = vcombine.high %v6058_v16, %v6062_v53  ;;  %v6070_v58 = vld [vmem:[#allocation18 + $0x120] sm:$0xff]  ;;  %v10893_v60 = vcombine.low %v6058_v16, %v6062_v53  ;;  %v6080_v3 = vld [vmem:[#allocation18 + $0x170] sm:$0xff] }
 0xbb4   : > { %v10902_v61 = vcombine.high %v6066_v56, %v6070_v58  ;;  %v10901_v43 = vcombine.low %v6066_v56, %v6070_v58  ;;  %v10914_v0 = vcombine.high %v6076_v62, %v6080_v3  ;;  %v10913_v42 = vcombine.low %v6076_v62, %v6080_v3  ;;  %v6082_v2 = vld [vmem:[#allocation18 + $0x180] sm:$0xff]  ;;  %v6051_v58 = vld [vmem:[#allocation18 + $0x88] sm:$0xff] }
 0xbb5   : > { %v6086_v35 = vld [vmem:[#allocation18 + $0x1a0] sm:$0xff]  ;;  %v6067_v3 = vld [vmem:[#allocation18 + $0x108] sm:$0xff] }
 0xbb6   : > { %6576 = vmatprep.subr.bf16.mxu0 %v10914_v0  ;;  %v10918_v38 = vcombine.high %v6082_v2, %v6086_v35 }
 0xbb7   : > { %6577 = vmatpush1.bf16.msra.mxu0 %v10913_v42 }
 0xbfe   : > { %v11394_v1 = vpop.f32.mrb[0].mxu1 }
 0xbff   : > { %v5866_v36 = vadd.f32 %v11394_v1, %v5800_v41  ;;  %v5857_v4 = vpop.f32.mrb[1].mxu1  ;;  %v6084_v41 = vld [vmem:[#allocation18 + $0x190] sm:$0xff] }
 0xc00   : > { %v5858_v29 = vadd.f32 %v5857_v4, %v5798_v9  ;;  %v11395_v28 = vpop.f32.mrb[2].mxu1  ;;  %v6088_v1 = vld [vmem:[#allocation18 + $0x1b0] sm:$0xff]  ;;  %v6090_v4 = vld [vmem:[#allocation18 + $0x1c0] sm:$0xff] }
 0xc01   : > { %v5881_v59 = vadd.f32 %v10857_v7, %v5866_v36  ;;  %v5869_v52 = vadd.f32 %v11395_v28, %v5801_v46  ;;  %v5860_v11 = vpop.f32.mrb[3].mxu1  ;;  %v10922_v9 = vcombine.high %v6084_v41, %v6088_v1  ;;  %v10921_v36 = vcombine.low %v6084_v41, %v6088_v1  ;;  %v6094_v46 = vld [vmem:[#allocation18 + $0x1e0] sm:$0xff]  ;;  %v6096_v28 = vld [vmem:[#allocation18 + $0x1f0] sm:$0xff]  ;;  %v6083_v1 = vld [vmem:[#allocation18 + $0x188] sm:$0xff] }
 0xc02   : > { %v5879_v49 = vadd.f32 %v10857_v7, %v5858_v29  ;;  %v5861_v13 = vadd.f32 %v5860_v11, %v5799_v51  ;;  %v6092_v29 = vld [vmem:[#allocation18 + $0x1d0] sm:$0xff]  ;;  %v10925_v51 = vcombine.low %v6090_v4, %v6094_v46  ;;  %v6035_v11 = vld [vmem:[#allocation18 + $0x8] sm:$0xff] }
 0xc03   : > { %v5892_v14 = vmul.f32 %v10858_v5, %v5881_v59  ;;  %v5882_v34 = vadd.f32 %v10857_v7, %v5869_v52  ;;  %6578 = vmatprep.subr.bf16.mxu0 %v10922_v9  ;;  %v10930_v59 = vcombine.high %v6092_v29, %v6096_v28  ;;  %v10929_v52 = vcombine.low %v6092_v29, %v6096_v28  ;;  %v6037_v28 = vld [vmem:[#allocation18 + $0x18] sm:$0xff] }
 0xc04   : > { %v5890_v37 = vmul.f32 %v10858_v5, %v5879_v49  ;;  %v5880_v40 = vadd.f32 %v10857_v7, %v5861_v13  ;;  %v10917_v7 = vcombine.low %v6082_v2, %v6086_v35  ;;  %6579 = vmatpush1.bf16.msra.mxu0 %v10921_v36  ;;  %v6075_v2 = vld [vmem:[#allocation18 + $0x148] sm:$0xff] }
 0xc05   : > { %v5903_v17 = vadd.f32 %v10859_v12, %v5892_v14  ;;  %v5893_v18 = vmul.f32 %v10858_v5, %v5882_v34  ;;  %6580 = vmatprep.subr.bf16.mxu0 %v10930_v59  ;;  %v10860_v14 = vld [vmem:[%s14419_s10] ss:$0 sm:$0xff]  ;;  %v6079_v35 = vld [vmem:[#allocation18 + $0x168] sm:$0xff] }
 0xc06   : > { %v5901_v19 = vadd.f32 %v10859_v12, %v5890_v37  ;;  %v5891_v20 = vmul.f32 %v10858_v5, %v5880_v40  ;;  %v10926_v5 = vcombine.high %v6090_v4, %v6094_v46  ;;  %v10867_v37 = vld [vmem:[#allocation8] ss:$0 sm:$0xff]  ;;  %v10912_v41 = vcombine.high %v6075_v2, %v6079_v35  ;;  %v6091_v4 = vld [vmem:[#allocation18 + $0x1c8] sm:$0xff] }
 0xc07   : > { %v5904_v21 = vadd.f32 %v10859_v12, %v5893_v18  ;;  %v5907_v23 = vmax.f32 %v5903_v17, 0.0  ;;  %v10868_v18 = vld [vmem:[#allocation9] ss:$0 sm:$0xff]  ;;  %v10911_v9 = vcombine.low %v6075_v2, %v6079_v35  ;;  %v6095_v46 = vld [vmem:[#allocation18 + $0x1e8] sm:$0xff]  ;;  %v13700_v35 = vsub.s32 1, %v13649_v15 }
 0xc08   : > { %v5902_v22 = vadd.f32 %v10859_v12, %v5891_v20  ;;  %v5905_v26 = vmax.f32 %v5901_v19, 0.0  ;;  %v6039_v12 = vld [vmem:[#allocation18 + $0x28] sm:$0xff]  ;;  %6581 = vmatpush1.bf16.msra.mxu0 %v10929_v52  ;;  %v10928_v29 = vcombine.high %v6091_v4, %v6095_v46  ;;  %v10927_v59 = vcombine.low %v6091_v4, %v6095_v46  ;;  %v12289_v4 = vld [vmem:[#allocation20 + $0x60] ss:$16 sps:$4 sm:$0xff]  }
 0xc09   : > { %v5908_v24 = vmax.f32 %v5904_v21, 0.0  ;;  %v10872_v49 = vcombine.high %v6035_v11, %v6039_v12  ;;  %v10871_v13 = vcombine.low %v6035_v11, %v6039_v12  ;;  %v6045_v11 = vld [vmem:[#allocation18 + $0x58] sm:$0xff]  ;;  %v13697_v2 = vld [vmem:[%s14420_s18] sm:$0xff]  ;;  %14422 = vst [vmem:[#allocation49_spill] sm:$0xff] %v13700_v35 }
 0xc0a   : > { %v5906_v30 = vmax.f32 %v5902_v22, 0.0  ;;  %v6049_v12 = vld [vmem:[#allocation18 + $0x78] sm:$0xff] }
 0xc0b   : > { %v5910_v50 = vpack.c.bf16 %v5908_v24, %v5907_v23  ;;  %v12292_v46 = vld [vmem:[#allocation20 + $0x68] ss:$16 sps:$4 sm:$0xff]  }
 0xc0c   : > { %v5909_v47 = vpack.c.bf16 %v5906_v30, %v5905_v26 }
 0xc0e   : > { %11404 = vmatprep.mubr.msk.bf16.mxu1 %vm5950_vm2, %v5909_v47 }
 0xc0f   : > { %11405 = vmatmul.mubr.msk.bf16.vlgmr.msra.gmra.mrb[4].mxu1 %vm5950_vm2, %v5910_v50 }
 0xc10   : > { %6461 = vmatpush1.bf16.msra.mxu1 %v10869_v25  ;;  %6492 = vmatprep.mubr.bf16.mxu1 %v14354_v27  ;;  %v6078_v25 = vld [vmem:[#allocation18 + $0x160] sm:$0xff] }
 0xc11   : > { %6462 = vmatprep.subr.bf16.mxu1 %v10878_v33  ;;  %v10910_v57 = vcombine.high %v6074_v48, %v6078_v25  ;;  %v10909_v63 = vcombine.low %v6074_v48, %v6078_v25  ;;  %v6059_v48 = vld [vmem:[#allocation18 + $0xc8] sm:$0xff] }
 0xc12   : > { %v6063_v25 = vld [vmem:[#allocation18 + $0xe8] sm:$0xff] }
 0xc13   : > { %v10896_v62 = vcombine.high %v6059_v48, %v6063_v25  ;;  %v10895_v0 = vcombine.low %v6059_v48, %v6063_v25  ;;  %v12282_v48 = vld [vmem:[#allocation20 + $0x2c] ss:$16 sps:$4 sm:$0xff]   ;;  %v12277_v25 = vld [vmem:[#allocation20 + $0x20] ss:$16 sps:$4 sm:$0xff]  }
 0xc14   : > { %6463 = vmatpush1.bf16.msra.mxu1 %v10877_v44  ;;  %v6043_v44 = vld [vmem:[#allocation18 + $0x48] sm:$0xff] }
 0xc15   : > { %6464 = vmatprep.subr.bf16.mxu1 %v10886_v10  ;;  %v6047_v10 = vld [vmem:[#allocation18 + $0x68] sm:$0xff] }
 0xc16   : > { %v10880_v56 = vcombine.high %v6043_v44, %v6047_v10 }
 0xc18   : > { %6465 = vmatpush1.bf16.msra.mxu1 %v10885_v54 }
 0xc19   : > { %6466 = vmatprep.subr.bf16.mxu1 %v10894_v55 }
 0xc1c   : > { %6467 = vmatpush1.bf16.msra.mxu1 %v10893_v60  ;;  %v6055_v60 = vld [vmem:[#allocation18 + $0xa8] sm:$0xff] }
 0xc1d   : > { %6468 = vmatprep.subr.bf16.mxu1 %v10902_v61  ;;  %v10879_v61 = vcombine.low %v6043_v44, %v6047_v10  ;;  %v6097_v44 = vld [vmem:[#allocation18 + $0x1f8] sm:$0xff] }
 0xc20   : > { %6469 = vmatpush1.bf16.msra.mxu1 %v10901_v43  ;;  %v10888_v43 = vcombine.high %v6051_v58, %v6055_v60 }
 0xc21   : > { %6470 = vmatprep.subr.bf16.mxu1 %v10910_v57  ;;  %v10887_v57 = vcombine.low %v6051_v58, %v6055_v60  ;;  %v12276_v58 = vld [vmem:[#allocation20 + $0xc] ss:$16 sps:$4 sm:$0xff]   ;;  %v12271_v60 = vld [vmem:[#allocation20] ss:$16 sps:$4 sm:$0xff]  }
 0xc24   : > { %6471 = vmatpush1.bf16.msra.mxu1 %v10909_v63  ;;  %v6071_v63 = vld [vmem:[#allocation18 + $0x128] sm:$0xff] }
 0xc25   : > { %6472 = vmatprep.subr.bf16.mxu1 %v10918_v38  ;;  %v10904_v42 = vcombine.high %v6067_v3, %v6071_v63  ;;  %v10903_v38 = vcombine.low %v6067_v3, %v6071_v63  ;;  %v13077_v3 = vmov 1983009808  }
 0xc26   : > { %v7108_v63 = vunpack.c.l.s4 %v13077_v3 }
 0xc28   : > { %6473 = vmatpush1.bf16.msra.mxu1 %v10917_v7  ;;  %v6087_v7 = vld [vmem:[#allocation18 + $0x1a8] sm:$0xff] }
 0xc29   : > { %6474 = vmatprep.subr.bf16.mxu1 %v10926_v5  ;;  %v10920_v36 = vcombine.high %v6083_v1, %v6087_v7  ;;  %v10919_v5 = vcombine.low %v6083_v1, %v6087_v7  ;;  %v12294_v1 = vld [vmem:[#allocation20 + $0x6c] ss:$16 sps:$4 sm:$0xff]   ;;  %v13707_v7 = vrot.slane %v13697_v2, %v13656_v8 }
 0xc2c   : > { %6475 = vmatpush1.bf16.msra.mxu1 %v10925_v51  ;;  %v6041_v51 = vld [vmem:[#allocation18 + $0x38] sm:$0xff] }
 0xc2d   : > { %6513 = vmatprep.subr.bf16.mxu1 %v10872_v49  ;;  %v10876_v52 = vcombine.high %v6037_v28, %v6041_v51  ;;  %v10875_v49 = vcombine.low %v6037_v28, %v6041_v51 }
 0xce2   : > { %v11406_v34 = vpop.f32.mrb[4].mxu1 }
 0xce3   : > { %v6000_v40 = vadd.f32 %v11406_v34, %v10860_v14  ;;  %v5991_v17 = vpop.f32.mrb[5].mxu1  ;;  %v6057_v34 = vld [vmem:[#allocation18 + $0xb8] sm:$0xff] }
 0xce4   : > { %v5992_v19 = vadd.f32 %v10860_v14, %v5991_v17  ;;  %v11407_v20 = vpop.f32.mrb[6].mxu1  ;;  %v6061_v17 = vld [vmem:[#allocation18 + $0xd8] sm:$0xff] }
 0xce5   : > { %v6015_v21 = vmul.f32 %v10867_v37, %v6000_v40  ;;  %v6003_v22 = vadd.f32 %v11407_v20, %v10860_v14  ;;  %v5994_v23 = vpop.f32.mrb[7].mxu1 }
 0xce6   : > { %v6013_v24 = vmul.f32 %v10867_v37, %v5992_v19  ;;  %v5995_v26 = vadd.f32 %v10860_v14, %v5994_v23  ;;  %v6053_v14 = vld [vmem:[#allocation18 + $0x98] sm:$0xff] }
 0xce7   : > { %v6026_v30 = vadd.f32 %v10868_v18, %v6015_v21  ;;  %v6016_v31 = vmul.f32 %v10867_v37, %v6003_v22  ;;  %v10892_v40 = vcombine.high %v6053_v14, %v6057_v34  ;;  %v10891_v19 = vcombine.low %v6053_v14, %v6057_v34  ;;  %v6069_v21 = vld [vmem:[#allocation18 + $0x118] sm:$0xff]  ;;  %v12295_v34 = vld [vmem:[#allocation20 + $0x80] ss:$16 sps:$4 sm:$0xff]  }
 0xce8   : > { %v6024_v32 = vadd.f32 %v10868_v18, %v6013_v24  ;;  %v6014_v50 = vmul.f32 %v10867_v37, %v5995_v26  ;;  %v10883_v37 = vcombine.low %v6045_v11, %v6049_v12  ;;  %v6073_v22 = vld [vmem:[#allocation18 + $0x138] sm:$0xff] }
 0xce9   : > { %v6027_v47 = vadd.f32 %v10868_v18, %v6016_v31  ;;  %v6030_v39 = vmax.f32 %v6026_v30, 0.0  ;;  %v10908_v24 = vcombine.high %v6069_v21, %v6073_v22  ;;  %v6077_v26 = vld [vmem:[#allocation18 + $0x158] sm:$0xff]  ;;  %v10907_v31 = vcombine.low %v6069_v21, %v6073_v22 }
 0xcea   : > { %v6025_v33 = vadd.f32 %v10868_v18, %v6014_v50  ;;  %v6028_v16 = vmax.f32 %v6024_v32, 0.0  ;;  %v6065_v18 = vld [vmem:[#allocation18 + $0xf8] sm:$0xff]  ;;  %v13734_v21 = vsub.s32 3, %v13649_v15 }
 0xceb   : > { %v6031_v45 = vmax.f32 %v6027_v47, 0.0  ;;  %v10900_v20 = vcombine.high %v6061_v17, %v6065_v18  ;;  %v10899_v23 = vcombine.low %v6061_v17, %v6065_v18  ;;  %v6081_v30 = vld [vmem:[#allocation18 + $0x178] sm:$0xff] }
 0xcec   : > { %v6029_v53 = vmax.f32 %v6025_v33, 0.0  ;;  %v10916_v32 = vcombine.high %v6077_v26, %v6081_v30  ;;  %v6085_v50 = vld [vmem:[#allocation18 + $0x198] sm:$0xff]  ;;  %v10915_v33 = vcombine.low %v6077_v26, %v6081_v30  ;;  %14425 = vst [vmem:[#allocation52_spill] sm:$0xff] %v13734_v21 }
 0xced   : > { %v13675_v54 = vpack.c.bf16 %v6031_v45, %v6030_v39  ;;  %v6089_v47 = vld [vmem:[#allocation18 + $0x1b8] sm:$0xff] }
 0xcee   : > { %v13677_v55 = vpack.c.bf16 %v6029_v53, %v6028_v16  ;;  %v10924_v39 = vcombine.high %v6085_v50, %v6089_v47  ;;  %v6093_v45 = vld [vmem:[#allocation18 + $0x1d8] sm:$0xff]  ;;  %v10923_v10 = vcombine.low %v6085_v50, %v6089_v47 }
 0xcef   : > { %v10932_v16 = vcombine.high %v6093_v45, %v6097_v44  ;;  %v10931_v53 = vcombine.low %v6093_v45, %v6097_v44  ;;  %v12306_v45 = vld [vmem:[#allocation20 + $0xac] ss:$16 sps:$4 sm:$0xff]  }
 0xcf0   : > { %6493 = vmatmul.mubr.bf16.vlgmr.msra.gmra.mrb[8].mxu1 %v13677_v55  ;;  %6599 = vmatmul.mubr.bf16.vlgmr.msra.gmra.mrb[0].mxu0 %v13677_v55 }
 0xcf1   : > { %6514 = vmatpush1.bf16.msra.mxu1 %v10871_v13  ;;  %6502 = vmatprep.mubr.bf16.mxu1 %v14354_v27  ;;  %v10884_v13 = vcombine.high %v6045_v11, %v6049_v12 }
 0xcf2   : > { %6515 = vmatprep.subr.bf16.mxu1 %v10880_v56  ;;  %6608 = vmatprep.mubr.bf16.mxu0 %v14354_v27  ;;  %v12273_v56 = vld [vmem:[#allocation20 + $0x4] ss:$16 sps:$4 sm:$0xff]  }
 0xcf3   : > { %9248 = vmatprep.subr.bf16.mxu0 %v12273_v56  ;;  %v12301_v56 = vld [vmem:[#allocation20 + $0xa0] ss:$16 sps:$4 sm:$0xff]  }
 0xcf4   : > { %9249 = vmatpush1.bf16.msra.mxu0 %v12271_v60 }
 0xcf5   : > { %6516 = vmatpush1.bf16.msra.mxu1 %v10879_v61  ;;  %v12274_v61 = vld [vmem:[#allocation20 + $0x8] ss:$16 sps:$4 sm:$0xff]  }
 0xcf6   : > { %6517 = vmatprep.subr.bf16.mxu1 %v10888_v43  ;;  %v12279_v43 = vld [vmem:[#allocation20 + $0x24] ss:$16 sps:$4 sm:$0xff]  }
 0xcf7   : > { %9250 = vmatprep.subr.bf16.mxu0 %v12279_v43 }
 0xcf8   : > { %6503 = vmatmul.mubr.bf16.gmra.mrb[12].mxu1 %v13675_v54  ;;  %6609 = vmatmul.mubr.bf16.gmra.mrb[4].mxu0 %v13675_v54 }
 0xcf9   : > { %6518 = vmatpush1.bf16.msra.mxu1 %v10887_v57  ;;  %6545 = vmatprep.mubr.bf16.mxu1 %v14354_v27  ;;  %v12280_v57 = vld [vmem:[#allocation20 + $0x28] ss:$16 sps:$4 sm:$0xff]  }
 0xcfa   : > { %6519 = vmatprep.subr.bf16.mxu1 %v10896_v62  ;;  %9251 = vmatpush1.bf16.msra.mxu0 %v12277_v25  ;;  %v12288_v62 = vld [vmem:[#allocation20 + $0x4c] ss:$16 sps:$4 sm:$0xff]  }
 0xcfd   : > { %6520 = vmatpush1.bf16.msra.mxu1 %v10895_v0  ;;  %v12283_v0 = vld [vmem:[#allocation20 + $0x40] ss:$16 sps:$4 sm:$0xff]  }
 0xcfe   : > { %6521 = vmatprep.subr.bf16.mxu1 %v10904_v42  ;;  %v12286_v42 = vld [vmem:[#allocation20 + $0x48] ss:$16 sps:$4 sm:$0xff]  }
 0xd01   : > { %6522 = vmatpush1.bf16.msra.mxu1 %v10903_v38  ;;  %v13703_v38 = vsub.s32 5, %v13649_v15 }
 0xd02   : > { %6523 = vmatprep.subr.bf16.mxu1 %v10912_v41  ;;  %v12291_v41 = vld [vmem:[#allocation20 + $0x64] ss:$16 sps:$4 sm:$0xff]  }
 0xd03   : > { %14423 = vst [vmem:[#allocation50_spill] sm:$0xff] %v13703_v38 }
 0xd05   : > { %6524 = vmatpush1.bf16.msra.mxu1 %v10911_v9 }
 0xd06   : > { %6525 = vmatprep.subr.bf16.mxu1 %v10920_v36  ;;  %v7109_v36 = vunpack.c.0.s8 %v7108_v63 }
 0xd08   : > { %v13724_v14 = vsub.s32 %v7109_v36, %v13649_v15  ;;  %v12309_v36 = vld [vmem:[#allocation20 + $0xc4] ss:$16 sps:$4 sm:$0xff]  }
 0xd09   : > { %6526 = vmatpush1.bf16.msra.mxu1 %v10919_v5  ;;  %v13715_v5 = vrot.slane %v13697_v2, %v13700_v35 }
 0xd0a   : > { %6527 = vmatprep.subr.bf16.mxu1 %v10928_v29  ;;  %v13719_v29 = vrot.slane %v13697_v2, %v13703_v38 }
 0xd0d   : > { %6528 = vmatpush1.bf16.msra.mxu1 %v10927_v59  ;;  %v12297_v59 = vld [vmem:[#allocation20 + $0x84] ss:$16 sps:$4 sm:$0xff]  }
 0xd0e   : > { %6619 = vmatprep.subr.bf16.mxu1 %v10876_v52  ;;  %v12300_v52 = vld [vmem:[#allocation20 + $0x8c] ss:$16 sps:$4 sm:$0xff]  }
 0xd10   : > { %6546 = vmatmul.mubr.bf16.vlgmr.msra.gmra.mrb[16].mxu1 %v13677_v55 }
 0xd11   : > { %6620 = vmatpush1.bf16.msra.mxu1 %v10875_v49  ;;  %6555 = vmatprep.mubr.bf16.mxu1 %v14354_v27 }
 0xd12   : > { %6621 = vmatprep.subr.bf16.mxu1 %v10884_v13 }
 0xd15   : > { %6622 = vmatpush1.bf16.msra.mxu1 %v10883_v37  ;;  %v12298_v37 = vld [vmem:[#allocation20 + $0x88] ss:$16 sps:$4 sm:$0xff]  }
 0xd16   : > { %6623 = vmatprep.subr.bf16.mxu1 %v10892_v40 }
 0xd18   : > { %6556 = vmatmul.mubr.bf16.gmra.mrb[20].mxu1 %v13675_v54 }
 0xd19   : > { %6624 = vmatpush1.bf16.msra.mxu1 %v10891_v19  ;;  %6651 = vmatprep.mubr.bf16.mxu1 %v14354_v27 }
 0xd1a   : > { %6625 = vmatprep.subr.bf16.mxu1 %v10900_v20  ;;  %v13731_v20 = vsub.s32 2, %v13649_v15 }
 0xd1c   : > { %14424 = vst [vmem:[#allocation51_spill] sm:$0xff] %v13731_v20 }
 0xd1d   : > { %6626 = vmatpush1.bf16.msra.mxu1 %v10899_v23 }
 0xd1e   : > { %6627 = vmatprep.subr.bf16.mxu1 %v10908_v24 }
 0xd21   : > { %6628 = vmatpush1.bf16.msra.mxu1 %v10907_v31 }
 0xd22   : > { %6629 = vmatprep.subr.bf16.mxu1 %v10916_v32 }
 0xd25   : > { %6630 = vmatpush1.bf16.msra.mxu1 %v10915_v33 }
 0xd26   : > { %6631 = vmatprep.subr.bf16.mxu1 %v10924_v39  ;;  %v12303_v39 = vld [vmem:[#allocation20 + $0xa4] ss:$16 sps:$4 sm:$0xff]  }
 0xd29   : > { %6632 = vmatpush1.bf16.msra.mxu1 %v10923_v10 }
 0xd2a   : > { %6633 = vmatprep.subr.bf16.mxu1 %v10932_v16 }
 0xd2d   : > { %6634 = vmatpush1.bf16.msra.mxu1 %v10931_v53 }
 0xd2e   : > { %9412 = vmatprep.subr.bf16.mxu1 %v12276_v58  ;;  %v12304_v58 = vld [vmem:[#allocation20 + $0xa8] ss:$16 sps:$4 sm:$0xff]  }
 0xd30   : > { %6652 = vmatmul.mubr.bf16.vlgmr.msra.gmra.mrb[24].mxu1 %v13677_v55  ;;  %v12285_v55 = vld [vmem:[#allocation20 + $0x44] ss:$16 sps:$4 sm:$0xff]  }
 0xd31   : > { %6661 = vmatprep.mubr.bf16.mxu1 %v14354_v27  ;;  %9413 = vmatpush1.bf16.msra.mxu1 %v12274_v61 }
 0xd32   : > { %9414 = vmatprep.subr.bf16.mxu1 %v12282_v48  ;;  %9252 = vmatprep.subr.bf16.mxu0 %v12285_v55 }
 0xd33   : > { %9253 = vmatpush1.bf16.msra.mxu0 %v12283_v0 }
 0xd34   : > { %9254 = vmatprep.subr.bf16.mxu0 %v12291_v41 }
 0xd35   : > { %9415 = vmatpush1.bf16.msra.mxu1 %v12280_v57 }
 0xd36   : > { %9416 = vmatprep.subr.bf16.mxu1 %v12288_v62 }
 0xd37   : > { %9255 = vmatpush1.bf16.msra.mxu0 %v12289_v4 }
 0xd38   : > { %6662 = vmatmul.mubr.bf16.gmra.mrb[28].mxu1 %v13675_v54  ;;  %v13694_v54 = vsub.s32 4, %v13649_v15  ;;  %9256 = vmatprep.subr.bf16.mxu0 %v12297_v59 }
 0xd39   : > { %9417 = vmatpush1.bf16.msra.mxu1 %v12286_v42 }
 0xd3a   : > { %14421 = vst [vmem:[#allocation48_spill] sm:$0xff] %v13694_v54  ;;  %v13711_v9 = vrot.slane %v13697_v2, %v13694_v54  ;;  %9418 = vmatprep.subr.bf16.mxu1 %v12294_v1 }
 0xd3b   : > { %9257 = vmatpush1.bf16.msra.mxu0 %v12295_v34 }
 0xd3c   : > { %9258 = vmatprep.subr.bf16.mxu0 %v12303_v39 }
 0xd3d   : > { %9419 = vmatpush1.bf16.msra.mxu1 %v12292_v46 }
 0xd3e   : > { %9420 = vmatprep.subr.bf16.mxu1 %v12300_v52 }
 0xd3f   : > { %9259 = vmatpush1.bf16.msra.mxu0 %v12301_v56 }
 0xd40   : > { %9260 = vmatprep.subr.bf16.mxu0 %v12309_v36 }
 0xd41   : > { %9421 = vmatpush1.bf16.msra.mxu1 %v12298_v37 }
 0xd42   : > { %9422 = vmatprep.subr.bf16.mxu1 %v12306_v45 }
 0xd45   : > { %9423 = vmatpush1.bf16.msra.mxu1 %v12304_v58 }
 0xdc3   : > { %v6494_v28 = vpop.f32.mrb[8].mxu1  ;;  %v6600_v51 = vpop.f32.mrb[0].mxu0 }
 0xdc4   : > { %v6495_v11 = vadd.f32 %v6494_v28, %v13707_v7  ;;  %v6601_v12 = vadd.f32 %v6600_v51, %v13711_v9  ;;  %v6496_v49 = vpop.f32.mrb[9].mxu1  ;;  %v6602_v13 = vpop.f32.mrb[1].mxu0 }
 0xdc5   : > { %v6497_v40 = vadd.f32 %v6496_v49, %v13715_v5  ;;  %v13728_v17 = vadd.f32 %v6602_v13, %v13719_v29  ;;  %v6498_v18 = vpop.f32.mrb[10].mxu1  ;;  %v6604_v19 = vpop.f32.mrb[2].mxu0 }
 0xdc6   : > { %v6811_v22 = vmul.f32 %v6495_v11, %v6495_v11  ;;  %v6815_v23 = vmul.f32 %v6601_v12, %v6601_v12  ;;  %v6499_v24 = vadd.f32 %v6498_v18, %v13707_v7  ;;  %v6605_v26 = vadd.f32 %v6604_v19, %v13711_v9  ;;  %v6500_v30 = vpop.f32.mrb[11].mxu1  ;;  %v6606_v31 = vpop.f32.mrb[3].mxu0 }
 0xdc7   : > { %v6812_v32 = vmul.f32 %v6497_v40, %v6497_v40  ;;  %v13740_v50 = vmul.f32 %v13728_v17, %v13728_v17  ;;  %v6501_v47 = vadd.f32 %v6500_v30, %v13715_v5  ;;  %v13744_v33 = vadd.f32 %v6606_v31, %v13719_v29 }
 0xdc8   : > { %v13746_v44 = vadd.f32 %v6499_v24, %v6495_v11  ;;  %v6819_v10 = vmul.f32 %v6499_v24, %v6499_v24  ;;  %v6977_v16 = vmax.f32 %v6495_v11, %v6499_v24  ;;  %v7201_v53 = vmin.f32 %v6495_v11, %v6499_v24  ;;  %v12307_v11 = vld [vmem:[#allocation20 + $0xc0] ss:$16 sps:$4 sm:$0xff]  }
 0xdc9   : > { %v13748_v60 = vadd.f32 %v6605_v26, %v6601_v12  ;;  %v6823_v61 = vmul.f32 %v6605_v26, %v6605_v26  ;;  %v7005_v43 = vmax.f32 %v6601_v12, %v6605_v26  ;;  %v7229_v48 = vmin.f32 %v6601_v12, %v6605_v26  ;;  %v12310_v12 = vld [vmem:[#allocation20 + $0xc8] ss:$16 sps:$4 sm:$0xff]   ;;  %9261 = vmatpush1.bf16.msra.mxu0 %v12307_v11 }
 0xdca   : > { %v13750_v25 = vadd.f32 %v6819_v10, %v6811_v22  ;;  %v6978_v57 = vrot.slane %v6977_v16, 4  ;;  %v7202_v55 = vrot.slane %v7201_v53, 4  ;;  %v13752_v62 = vadd.f32 %v6501_v47, %v6497_v40  ;;  %v12315_v10 = vld [vmem:[#allocation20 + $0xe4] ss:$16 sps:$4 sm:$0xff]  }
 0xdcb   : > { %v13754_v3 = vadd.f32 %v6823_v61, %v6815_v23  ;;  %v7006_v63 = vrot.slane %v7005_v43, 4  ;;  %v7230_v0 = vrot.slane %v7229_v48, 4  ;;  %v6820_v42 = vmul.f32 %v6501_v47, %v6501_v47  ;;  %v13756_v41 = vpop.f32.mrb[12].mxu1  ;;  %v13758_v1 = vpop.f32.mrb[4].mxu0  ;;  %v12313_v61 = vld [vmem:[#allocation20 + $0xe0] ss:$16 sps:$4 sm:$0xff]   ;;  %9262 = vmatprep.subr.bf16.mxu0 %v12315_v10 }
 0xdcc   : > { %v6979_v4 = vmax.f32 %v6977_v16, %v6978_v57  ;;  %v7203_v46 = vmin.f32 %v7201_v53, %v7202_v55  ;;  %v6984_v28 = vmax.f32 %v6497_v40, %v6501_v47  ;;  %v7208_v51 = vmin.f32 %v6497_v40, %v6501_v47  ;;  %v13760_v59 = vpop.f32.mrb[13].mxu1  ;;  %v13762_v52 = vpop.f32.mrb[5].mxu0  ;;  %v12312_v40 = vld [vmem:[#allocation20 + $0xcc] ss:$16 sps:$4 sm:$0xff]  }
 0xdcd   : > { %v7007_v49 = vmax.f32 %v7005_v43, %v7006_v63  ;;  %v7231_v13 = vmin.f32 %v7229_v48, %v7230_v0  ;;  %v13764_v34 = vadd.f32 %v6820_v42, %v6812_v32  ;;  %v13768_v37 = vadd.f32 %v13744_v33, %v13728_v17  ;;  %v13770_v18 = vpop.f32.mrb[14].mxu1  ;;  %v13772_v19 = vpop.f32.mrb[6].mxu0  ;;  %9424 = vmatprep.subr.bf16.mxu1 %v12312_v40  ;;  %v12316_v43 = vld [vmem:[#allocation20 + $0xe8] ss:$16 sps:$4 sm:$0xff]   ;;  %v12318_v48 = vld [vmem:[#allocation20 + $0xec] ss:$16 sps:$4 sm:$0xff]  }
 0xdce   : > { %v6980_v22 = vrot.slane %v6979_v4, 2  ;;  %v7204_v23 = vrot.slane %v7203_v46, 2  ;;  %v6985_v24 = vrot.slane %v6984_v28, 4  ;;  %v7209_v26 = vrot.slane %v7208_v51, 4  ;;  %v13774_v30 = vpop.f32.mrb[15].mxu1  ;;  %v13776_v31 = vpop.f32.mrb[7].mxu0  ;;  %9425 = vmatpush1.bf16.msra.mxu1 %v12310_v12  ;;  %9263 = vmatpush1.bf16.msra.mxu0 %v12313_v61 }
 0xdcf   : > { %v7008_v32 = vrot.slane %v7007_v49, 2  ;;  %v7232_v47 = vrot.slane %v7231_v13, 2  ;;  %v6824_v39 = vmul.f32 %v13744_v33, %v13744_v33  ;;  %v7012_v45 = vmax.f32 %v13728_v17, %v13744_v33  ;;  %9426 = vmatprep.subr.bf16.mxu1 %v12318_v48  ;;  %v12321_v12 = vld [vmem:[#allocation20 + $0x104] ss:$16 sps:$4 sm:$0xff]   ;;  %v12330_v48 = vld [vmem:[#allocation20 + $0x12c] ss:$16 sps:$4 sm:$0xff]  }
 0xdd0   : > { %v6981_v16 = vmax.f32 %v6979_v4, %v6980_v22  ;;  %v7205_v53 = vmin.f32 %v7203_v46, %v7204_v23  ;;  %v6986_v56 = vmax.f32 %v6984_v28, %v6985_v24  ;;  %v7210_v58 = vmin.f32 %v7208_v51, %v7209_v26  ;;  %v12319_v24 = vld [vmem:[#allocation20 + $0x100] ss:$16 sps:$4 sm:$0xff]   ;;  %v12322_v26 = vld [vmem:[#allocation20 + $0x108] ss:$16 sps:$4 sm:$0xff]   ;;  %9264 = vmatprep.subr.bf16.mxu0 %v12321_v12 }
 0xdd1   : > { %v7009_v57 = vmax.f32 %v7007_v49, %v7008_v32  ;;  %v13782_v55 = vmin.f32 %v7231_v13, %v7232_v47  ;;  %v13785_v63 = vadd.f32 %v6824_v39, %v13740_v50  ;;  %v7013_v0 = vrot.slane %v7012_v45, 4  ;;  %v12324_v49 = vld [vmem:[#allocation20 + $0x10c] ss:$16 sps:$4 sm:$0xff]  }
 0xdd2   : > { %v6982_v42 = vrot.slane %v6981_v16, 1  ;;  %v7206_v36 = vrot.slane %v7205_v53, 1  ;;  %v6987_v11 = vrot.slane %v6986_v56, 2  ;;  %v7211_v40 = vrot.slane %v7210_v58, 2  ;;  %9427 = vmatpush1.bf16.msra.mxu1 %v12316_v43  ;;  %9265 = vmatpush1.bf16.msra.mxu0 %v12319_v24  ;;  %v12327_v43 = vld [vmem:[#allocation20 + $0x124] ss:$16 sps:$4 sm:$0xff]  }
 0xdd3   : > { %v7010_v4 = vrot.slane %v7009_v57, 1  ;;  %v7014_v46 = vmax.f32 %v7012_v45, %v7013_v0  ;;  %v7236_v28 = vmin.f32 %v13728_v17, %v13744_v33  ;;  %v13790_v51 = vsub.s32 6, %v13649_v15  ;;  %9428 = vmatprep.subr.bf16.mxu1 %v12324_v49  ;;  %9266 = vmatprep.subr.bf16.mxu0 %v12327_v43  ;;  %v12336_v24 = vld [vmem:[#allocation20 + $0x14c] ss:$16 sps:$4 sm:$0xff]  }
 0xdd4   : > { %v13792_v50 = vmax.f32 %v6981_v16, %v6982_v42  ;;  %v7234_v13 = vrot.slane %v13782_v55, 1  ;;  %v6988_v22 = vmax.f32 %v6986_v56, %v6987_v11  ;;  %v7212_v23 = vmin.f32 %v7210_v58, %v7211_v40  ;;  %v12325_v42 = vld [vmem:[#allocation20 + $0x120] ss:$16 sps:$4 sm:$0xff]  }
 0xdd5   : > { %14426 = vst [vmem:[#allocation53_spill] sm:$0xff] %v13790_v51  ;;  %v13795_v32 = vmin.f32 %v7205_v53, %v7206_v36  ;;  %v13797_v47 = vmax.f32 %v7009_v57, %v7010_v4  ;;  %v7015_v39 = vrot.slane %v7014_v46, 2  ;;  %v7237_v17 = vrot.slane %v7236_v28, 4  ;;  %v12328_v36 = vld [vmem:[#allocation20 + $0x128] ss:$16 sps:$4 sm:$0xff]  }
 0xdd6   : > { %v6989_v33 = vrot.slane %v6988_v22, 1  ;;  %v7213_v45 = vrot.slane %v7212_v23, 1  ;;  %v6505_v10 = vadd.f32 %v13756_v41, %v13707_v7  ;;  %v13803_v16 = vadd.f32 %v13758_v1, %v13711_v9  ;;  %9429 = vmatpush1.bf16.msra.mxu1 %v12322_v26  ;;  %9267 = vmatpush1.bf16.msra.mxu0 %v12325_v42 }
 0xdd7   : > { %v7016_v56 = vmax.f32 %v7014_v46, %v7015_v39  ;;  %v7238_v58 = vmin.f32 %v7236_v28, %v7237_v17  ;;  %v13807_v53 = vadd.f32 %v13760_v59, %v13715_v5  ;;  %v13811_v61 = vadd.f32 %v13762_v52, %v13719_v29  ;;  %9430 = vmatprep.subr.bf16.mxu1 %v12330_v48  ;;  %v12334_v17 = vld [vmem:[#allocation20 + $0x148] ss:$16 sps:$4 sm:$0xff]  }
 0xdd8   : > { %v13813_v57 = vmax.f32 %v6988_v22, %v6989_v33  ;;  %v13815_v41 = vmin.f32 %v7212_v23, %v7213_v45  ;;  %v6679_v1 = vadd.f32 %v13746_v44, %v6505_v10  ;;  %v6827_v0 = vmul.f32 %v6505_v10, %v6505_v10  ;;  %v12333_v23 = vld [vmem:[#allocation20 + $0x144] ss:$16 sps:$4 sm:$0xff]  }
 0xdd9   : > { %v7017_v11 = vrot.slane %v7016_v56, 1  ;;  %v7239_v40 = vrot.slane %v7238_v58, 2  ;;  %v6715_v59 = vadd.f32 %v13748_v60, %v13803_v16  ;;  %v6831_v52 = vmul.f32 %v13803_v16, %v13803_v16  ;;  %9268 = vmatprep.subr.bf16.mxu0 %v12333_v23 }
 0xdda   : > { %v6844_v46 = vadd.f32 %v13750_v25, %v6827_v0  ;;  %v13829_v28 = vadd.f32 %v13752_v62, %v13807_v53  ;;  %v6828_v22 = vmul.f32 %v13807_v53, %v13807_v53  ;;  %v13837_v26 = vmin.f32 %v13782_v55, %v7234_v13  ;;  %9431 = vmatpush1.bf16.msra.mxu1 %v12328_v36  ;;  %v12342_v0 = vld [vmem:[#allocation20 + $0x16c] ss:$16 sps:$4 sm:$0xff]  }
 0xddb   : > { %v13831_v12 = vmax.f32 %v7016_v56, %v7017_v11  ;;  %v7240_v60 = vmin.f32 %v7238_v58, %v7239_v40  ;;  %v6880_v49 = vadd.f32 %v13754_v3, %v6831_v52  ;;  %v13841_v25 = vadd.f32 %v13768_v37, %v13811_v61  ;;  %v12331_v3 = vld [vmem:[#allocation20 + $0x140] ss:$16 sps:$4 sm:$0xff]   ;;  %9432 = vmatprep.subr.bf16.mxu1 %v12336_v24  ;;  %v12340_v40 = vld [vmem:[#allocation20 + $0x168] ss:$16 sps:$4 sm:$0xff]  }
 0xddc   : > { %v6832_v62 = vmul.f32 %v13811_v61, %v13811_v61  ;;  %v13847_v39 = vrot.slane %v13697_v2, %v13731_v20  ;;  %v13852_v55 = vadd.f32 %v13764_v34, %v6828_v22  ;;  %v6509_v37 = vadd.f32 %v13770_v18, %v13707_v7  ;;  %9269 = vmatpush1.bf16.msra.mxu0 %v12331_v3  ;;  %v12337_v11 = vld [vmem:[#allocation20 + $0x160] ss:$16 sps:$4 sm:$0xff]  }
 0xddd   : > { %v7241_v45 = vrot.slane %v7240_v60, 1  ;;  %v6615_v56 = vadd.f32 %v13772_v19, %v13711_v9  ;;  %v13863_v58 = vrot.slane %v13697_v2, %v13734_v21  ;;  %v13866_v43 = vsub.s32 7, %v13649_v15 }
 0xdde   : > { %v13857_v13 = vadd.f32 %v13785_v63, %v6832_v62  ;;  %v6680_v48 = vadd.f32 %v6679_v1, %v6509_v37  ;;  %v6835_v7 = vmul.f32 %v6509_v37, %v6509_v37  ;;  %v13872_v18 = vrot.slane %v13697_v2, %v13790_v51  ;;  %v12339_v63 = vld [vmem:[#allocation20 + $0x164] ss:$16 sps:$4 sm:$0xff]   ;;  %9433 = vmatpush1.bf16.msra.mxu1 %v12334_v17 }
 0xddf   : > { %14427 = vst [vmem:[#allocation54_spill] sm:$0xff] %v13866_v43  ;;  %v13868_v34 = vmin.f32 %v7240_v60, %v7241_v45  ;;  %v7033_v42 = vmax.f32 %v6505_v10, %v6509_v37  ;;  %v7257_v9 = vmin.f32 %v6505_v10, %v6509_v37  ;;  %v6716_v19 = vadd.f32 %v6715_v59, %v6615_v56  ;;  %v12343_v10 = vld [vmem:[#allocation20 + $0x180] ss:$16 sps:$4 sm:$0xff]   ;;  %v12357_v51 = vld [vmem:[#allocation20 + $0x1c4] ss:$16 sps:$4 sm:$0xff]  }
 0xde0   : > { %14428 = vst [vmem:[#allocation55_spill] sm:$0xff] %v13872_v18  ;;  %v6839_v36 = vmul.f32 %v6615_v56, %v6615_v56  ;;  %v6681_v52 = vrot.slane %v6680_v48, 4  ;;  %v6845_v60 = vadd.f32 %v6844_v46, %v6835_v7  ;;  %v7061_v1 = vmax.f32 %v13803_v16, %v6615_v56  ;;  %9270 = vmatprep.subr.bf16.mxu0 %v12339_v63  ;;  %v12345_v46 = vld [vmem:[#allocation20 + $0x184] ss:$16 sps:$4 sm:$0xff]  }
 0xde1   : > { %9434 = vmatprep.subr.bf16.mxu1 %v12342_v0  ;;  %v7034_v22 = vrot.slane %v7033_v42, 4  ;;  %v7258_v23 = vrot.slane %v7257_v9, 4  ;;  %v6717_v24 = vrot.slane %v6716_v19, 4  ;;  %9271 = vmatpush1.bf16.msra.mxu0 %v12337_v11  ;;  %v13879_v45 = vadd.f32 %v13774_v30, %v13715_v5  ;;  %v12351_v5 = vld [vmem:[#allocation20 + $0x1a4] ss:$16 sps:$4 sm:$0xff]  }
 0xde2   : > { %v6881_v62 = vadd.f32 %v6880_v49, %v6839_v36  ;;  %v6682_v59 = vadd.f32 %v6681_v52, %v6680_v48  ;;  %v6846_v3 = vrot.slane %v6845_v60, 4  ;;  %v7062_v17 = vrot.slane %v7061_v1, 4  ;;  %9435 = vmatpush1.bf16.msra.mxu1 %v12340_v40  ;;  %v12346_v49 = vld [vmem:[#allocation20 + $0x188] ss:$16 sps:$4 sm:$0xff]   ;;  %v12348_v36 = vld [vmem:[#allocation20 + $0x18c] ss:$16 sps:$4 sm:$0xff]   ;;  %9272 = vmatprep.subr.bf16.mxu0 %v12345_v46 }
 0xde3   : > { %v13881_v37 = vpop.f32.mrb[16].mxu1  ;;  %v7035_v7 = vmax.f32 %v7033_v42, %v7034_v22  ;;  %v7259_v27 = vmin.f32 %v7257_v9, %v7258_v23  ;;  %v6718_v63 = vadd.f32 %v6717_v24, %v6716_v19  ;;  %v7285_v33 = vmin.f32 %v13803_v16, %v6615_v56  ;;  %9436 = vmatprep.subr.bf16.mxu1 %v12348_v36  ;;  %v12349_v40 = vld [vmem:[#allocation20 + $0x1a0] ss:$16 sps:$4 sm:$0xff]   ;;  %v12352_v46 = vld [vmem:[#allocation20 + $0x1a8] ss:$16 sps:$4 sm:$0xff]  }
 0xde4   : > { %v6882_v0 = vrot.slane %v6881_v62, 4  ;;  %v13883_v15 = vpop.f32.mrb[17].mxu1  ;;  %v6683_v11 = vrot.slane %v6682_v59, 2  ;;  %v6847_v48 = vadd.f32 %v6846_v3, %v6845_v60  ;;  %v7063_v52 = vmax.f32 %v7061_v1, %v7062_v17  ;;  %v12354_v1 = vld [vmem:[#allocation20 + $0x1ac] ss:$16 sps:$4 sm:$0xff]  }
 0xde5   : > { %v13886_v44 = vpop.f32.mrb[18].mxu1  ;;  %v7036_v30 = vrot.slane %v7035_v7, 2  ;;  %v7260_v4 = vrot.slane %v7259_v27, 2  ;;  %v6719_v42 = vrot.slane %v6718_v63, 2  ;;  %9273 = vmatpush1.bf16.msra.mxu0 %v12343_v10  ;;  %v7286_v60 = vrot.slane %v7285_v33, 4 }
 0xde6   : > { %v6883_v9 = vadd.f32 %v6882_v0, %v6881_v62  ;;  %v13888_v19 = vpop.f32.mrb[19].mxu1  ;;  %v6684_v22 = vadd.f32 %v6683_v11, %v6682_v59  ;;  %v6848_v23 = vrot.slane %v6847_v48, 2  ;;  %v7064_v24 = vrot.slane %v7063_v52, 2  ;;  %9274 = vmatprep.subr.bf16.mxu0 %v12351_v5  ;;  %9437 = vmatpush1.bf16.msra.mxu1 %v12346_v49  ;;  %v12360_v10 = vld [vmem:[#allocation20 + $0x1cc] ss:$16 sps:$4 sm:$0xff]  }
 0xde7   : > { %v7037_v16 = vmax.f32 %v7035_v7, %v7036_v30  ;;  %v7261_v56 = vmin.f32 %v7259_v27, %v7260_v4  ;;  %v6720_v3 = vadd.f32 %v6719_v42, %v6718_v63  ;;  %v7287_v38 = vmin.f32 %v7285_v33, %v7286_v60  ;;  %9438 = vmatprep.subr.bf16.mxu1 %v12354_v1  ;;  %v12355_v5 = vld [vmem:[#allocation20 + $0x1c0] ss:$16 sps:$4 sm:$0xff]   ;;  %v12363_v49 = vld [vmem:[#allocation20 + $0x1e4] ss:$16 sps:$4 sm:$0xff]  }
 0xde8   : > { %v6884_v17 = vrot.slane %v6883_v9, 2  ;;  %v6685_v54 = vrot.slane %v6684_v22, 1  ;;  %v6849_v62 = vadd.f32 %v6848_v23, %v6847_v48  ;;  %v7065_v0 = vmax.f32 %v7063_v52, %v7064_v24  ;;  %v12361_v1 = vld [vmem:[#allocation20 + $0x1e0] ss:$16 sps:$4 sm:$0xff]  }
 0xde9   : > { %v7038_v36 = vrot.slane %v7037_v16, 1  ;;  %v7262_v59 = vrot.slane %v7261_v56, 1  ;;  %v6721_v11 = vrot.slane %v6720_v3, 1  ;;  %9275 = vmatpush1.bf16.msra.mxu0 %v12349_v40  ;;  %v7288_v27 = vrot.slane %v7287_v38, 2 }
 0xdea   : > { %v6885_v20 = vadd.f32 %v6884_v17, %v6883_v9  ;;  %v6850_v21 = vrot.slane %v6849_v62, 1  ;;  %v7066_v7 = vrot.slane %v7065_v0, 1  ;;  %v6617_v4 = vadd.f32 %v13776_v31, %v13719_v29  ;;  %9276 = vmatprep.subr.bf16.mxu0 %v12357_v51  ;;  %9439 = vmatpush1.bf16.msra.mxu1 %v12352_v46  ;;  %v12358_v9 = vld [vmem:[#allocation20 + $0x1c8] ss:$16 sps:$4 sm:$0xff]   ;;  %v12366_v51 = vld [vmem:[#allocation20 + $0x1ec] ss:$16 sps:$4 sm:$0xff]  }
 0xdeb   : > { %v13892_v63 = vpop.f32.mrb[20].mxu1  ;;  %v13894_v48 = vadd.f32 %v6685_v54, %v6684_v22  ;;  %v13896_v33 = vmax.f32 %v7037_v16, %v7038_v36  ;;  %v13898_v52 = vmin.f32 %v7261_v56, %v7262_v59  ;;  %v13904_v23 = vadd.f32 %v6721_v11, %v6720_v3  ;;  %9440 = vmatprep.subr.bf16.mxu1 %v12360_v10  ;;  %v12369_v17 = vld [vmem:[#allocation20 + $0x204] ss:$16 sps:$4 sm:$0xff]   ;;  %v12372_v11 = vld [vmem:[#allocation20 + $0x20c] ss:$16 sps:$4 sm:$0xff]  }
 0xdec   : > { %v6886_v30 = vrot.slane %v6885_v20, 1  ;;  %v13900_v42 = vpop.f32.mrb[21].mxu1  ;;  %v13902_v40 = vadd.f32 %v6850_v21, %v6849_v62  ;;  %v13906_v29 = vmin.f32 %v7287_v38, %v7288_v27  ;;  %v6689_v31 = vadd.f32 %v13829_v28, %v13879_v45 }
 0xded   : > { %v13910_v54 = vpop.f32.mrb[22].mxu1  ;;  %v13912_v22 = vmax.f32 %v7065_v0, %v7066_v7  ;;  %v6836_v24 = vmul.f32 %v13879_v45, %v13879_v45  ;;  %v7040_v21 = vmax.f32 %v13807_v53, %v13879_v45  ;;  %v7264_v60 = vmin.f32 %v13807_v53, %v13879_v45  ;;  %9277 = vmatpush1.bf16.msra.mxu0 %v12355_v5  ;;  %v12364_v53 = vld [vmem:[#allocation20 + $0x1e8] ss:$16 sps:$4 sm:$0xff]  }
 0xdee   : > { %v13920_v38 = vpop.f32.mrb[23].mxu1  ;;  %v13922_v28 = vadd.f32 %v6886_v30, %v6885_v20  ;;  %v6690_v16 = vrot.slane %v6689_v31, 4  ;;  %v6725_v56 = vadd.f32 %v13841_v25, %v6617_v4  ;;  %v6840_v3 = vmul.f32 %v6617_v4, %v6617_v4  ;;  %9278 = vmatprep.subr.bf16.mxu0 %v12363_v49  ;;  %9441 = vmatpush1.bf16.msra.mxu1 %v12358_v9 }
 0xdef   : > { %v6854_v46 = vadd.f32 %v13852_v55, %v6836_v24  ;;  %v7041_v62 = vrot.slane %v7040_v21, 4  ;;  %v7265_v0 = vrot.slane %v7264_v60, 4  ;;  %v7068_v10 = vmax.f32 %v13811_v61, %v6617_v4  ;;  %9442 = vmatprep.subr.bf16.mxu1 %v12366_v51 }
 0xdf0   : > { %v7290_v45 = vrot.slane %v13906_v29, 1  ;;  %v6691_v36 = vadd.f32 %v6690_v16, %v6689_v31  ;;  %v6726_v59 = vrot.slane %v6725_v56, 4  ;;  %v6890_v20 = vadd.f32 %v13857_v13, %v6840_v3 }
 0xdf1   : > { %v6855_v25 = vrot.slane %v6854_v46, 4  ;;  %v7042_v5 = vmax.f32 %v7040_v21, %v7041_v62  ;;  %v7266_v7 = vmin.f32 %v7264_v60, %v7265_v0  ;;  %v7069_v27 = vrot.slane %v7068_v10, 4  ;;  %9279 = vmatpush1.bf16.msra.mxu0 %v12361_v1 }
 0xdf2   : > { %v6692_v55 = vrot.slane %v6691_v36, 2  ;;  %v6727_v49 = vadd.f32 %v6726_v59, %v6725_v56  ;;  %v6891_v30 = vrot.slane %v6890_v20, 4  ;;  %v7292_v24 = vmin.f32 %v13811_v61, %v6617_v4  ;;  %9289 = vmatprep.subr.bf16.mxu0 %v12369_v17  ;;  %9443 = vmatpush1.bf16.msra.mxu1 %v12364_v53 }
 0xdf3   : > { %v6856_v9 = vadd.f32 %v6855_v25, %v6854_v46  ;;  %v7043_v8 = vrot.slane %v7042_v5, 2  ;;  %v7267_v35 = vrot.slane %v7266_v7, 2  ;;  %v7070_v31 = vmax.f32 %v7068_v10, %v7069_v27  ;;  %9453 = vmatprep.subr.bf16.mxu1 %v12372_v11 }
 0xdf4   : > { %v6693_v16 = vadd.f32 %v6692_v55, %v6691_v36  ;;  %v6728_v13 = vrot.slane %v6727_v49, 2  ;;  %v6892_v51 = vadd.f32 %v6891_v30, %v6890_v20  ;;  %v7293_v3 = vrot.slane %v7292_v24, 4 }
 0xdf5   : > { %v6857_v21 = vrot.slane %v6856_v9, 2  ;;  %v7044_v60 = vmax.f32 %v7042_v5, %v7043_v8  ;;  %v7268_v62 = vmin.f32 %v7266_v7, %v7267_v35  ;;  %v7071_v1 = vrot.slane %v7070_v31, 2 }
 0xdf6   : > { %v6694_v0 = vrot.slane %v6693_v16, 1  ;;  %v6729_v56 = vadd.f32 %v6728_v13, %v6727_v49  ;;  %v6893_v59 = vrot.slane %v6892_v51, 2  ;;  %v7294_v18 = vmin.f32 %v7292_v24, %v7293_v3  ;;  %v14436_v24 = vld [vmem:[#allocation55_spill] sm:$0xff] }
 0xdf7   : > { %v6858_v61 = vadd.f32 %v6857_v21, %v6856_v9  ;;  %v7045_v4 = vrot.slane %v7044_v60, 1  ;;  %v7269_v17 = vrot.slane %v7268_v62, 1  ;;  %v7072_v46 = vmax.f32 %v7070_v31, %v7071_v1 }
 0xdf8   : > { %v6695_v25 = vadd.f32 %v6694_v0, %v6693_v16  ;;  %v6730_v10 = vrot.slane %v6729_v56, 1  ;;  %v6894_v53 = vadd.f32 %v6893_v59, %v6892_v51  ;;  %v7295_v36 = vrot.slane %v7294_v18, 2 }
 0xdf9   : > { %v6859_v27 = vrot.slane %v6858_v61, 1  ;;  %v13930_v20 = vmax.f32 %v7044_v60, %v7045_v4  ;;  %v13932_v11 = vmin.f32 %v7268_v62, %v7269_v17  ;;  %v7073_v8 = vrot.slane %v7072_v46, 1 }
 0xdfa   : > { %v6758_v35 = vcombine.low %v13894_v48, %v6695_v25  ;;  %v13935_v5 = vadd.f32 %v6730_v10, %v6729_v56  ;;  %v6895_v7 = vrot.slane %v6894_v53, 1  ;;  %v7296_v55 = vmin.f32 %v7294_v18, %v7295_v36 }
 0xdfb   : > { %v6860_v49 = vadd.f32 %v6859_v27, %v6858_v61  ;;  %v13941_v9 = vmax.f32 %v7072_v46, %v7073_v8  ;;  %v13944_v31 = vmin.f32 %v13906_v29, %v7290_v45  ;;  %v14431_v18 = vcombine.low %v13792_v50, %v13813_v57 }
 0xdfc   : > { %v13948_v48 = vadd.f32 %v6895_v7, %v6894_v53  ;;  %v7297_v13 = vrot.slane %v7296_v55, 1  ;;  %v13961_v29 = vrot.slane %v13697_v2, %v13866_v43  ;;  %v14432_v45 = vcombine.low %v13795_v32, %v13815_v41 }
 0xdfd   : > { %14429 = vst [vmem:[#allocation56_spill] sm:$0xff] %v13941_v9  ;;  %14430 = vst [vmem:[#allocation57_spill] sm:$0xff] %v13944_v31  ;;  %v13954_v51 = vrot.slane %v14431_v18, %v13724_v14  ;;  %v6923_v3 = vcombine.low %v13902_v40, %v6860_v49  ;;  %v6548_v40 = vadd.f32 %v13881_v37, %v13847_v39 }
 0xdfe   : > { %v13967_v60 = vrot.slane %v14432_v45, %v13724_v14  ;;  %v13971_v57 = vmin.f32 %v7296_v55, %v7297_v13  ;;  %v14434_v62 = vcombine.low %v13797_v47, %v13831_v12  ;;  %v14435_v32 = vcombine.low %v13837_v26, %v13868_v34 }
 0xdff   : > { %v6550_v1 = vadd.f32 %v13883_v15, %v13863_v58  ;;  %v6552_v0 = vadd.f32 %v13886_v44, %v13847_v39  ;;  %v13992_v37 = vrot.slane %v6758_v35, %v13652_v6  ;;  %v13995_v56 = vrot.slane %v6923_v3, %v13652_v6 }
 0xe00   : > { %14433 = vst [vmem:[#allocation58_spill] sm:$0xff] %v13971_v57  ;;  %v13979_v2 = vrot.slane %v14434_v62, %v13724_v14  ;;  %v13985_v41 = vrot.slane %v14435_v32, %v13724_v14  ;;  %v6554_v12 = vadd.f32 %v13888_v19, %v13863_v58  ;;  %v6813_v26 = vmul.f32 %v6548_v40, %v6548_v40 }
 0xe01   : > { %v6696_v34 = vadd.f32 %v6552_v0, %v6548_v40  ;;  %v6821_v59 = vmul.f32 %v6552_v0, %v6552_v0  ;;  %v6991_v61 = vmax.f32 %v6548_v40, %v6552_v0  ;;  %v6814_v15 = vmul.f32 %v6550_v1, %v6550_v1 }
 0xe02   : > { %v7215_v4 = vmin.f32 %v6548_v40, %v6552_v0  ;;  %v6705_v17 = vadd.f32 %v6554_v12, %v6550_v1  ;;  %v6822_v44 = vmul.f32 %v6554_v12, %v6554_v12  ;;  %v6998_v53 = vmax.f32 %v6550_v1, %v6554_v12 }
 0xe03   : > { %v14001_v46 = vpop.f32.mrb[24].mxu1  ;;  %v6861_v25 = vadd.f32 %v6821_v59, %v6813_v26  ;;  %v6992_v10 = vrot.slane %v6991_v61, 4  ;;  %v7222_v36 = vmin.f32 %v6550_v1, %v6554_v12  ;;  %v6558_v19 = vadd.f32 %v13892_v63, %v13847_v39 }
 0xe04   : > { %v14003_v27 = vpop.f32.mrb[25].mxu1  ;;  %v7216_v8 = vrot.slane %v7215_v4, 4  ;;  %v6870_v35 = vadd.f32 %v6822_v44, %v6814_v15  ;;  %v14009_v7 = vadd.f32 %v13900_v42, %v13863_v58  ;;  %v6999_v13 = vrot.slane %v6998_v53, 4 }
 0xe05   : > { %v14011_v55 = vpop.f32.mrb[26].mxu1  ;;  %v6993_v49 = vmax.f32 %v6991_v61, %v6992_v10  ;;  %v7223_v18 = vrot.slane %v7222_v36, 4  ;;  %v6562_v3 = vadd.f32 %v13910_v54, %v13847_v39  ;;  %v6697_v62 = vadd.f32 %v6696_v34, %v6558_v19 }
 0xe06   : > { %v14015_v45 = vpop.f32.mrb[27].mxu1  ;;  %v7217_v40 = vmin.f32 %v7215_v4, %v7216_v8  ;;  %v6829_v32 = vmul.f32 %v6558_v19, %v6558_v19  ;;  %v6706_v1 = vadd.f32 %v6705_v17, %v14009_v7  ;;  %v7000_v0 = vmax.f32 %v6998_v53, %v6999_v13 }
 0xe07   : > { %v6994_v63 = vrot.slane %v6993_v49, 2  ;;  %v7224_v12 = vmin.f32 %v7222_v36, %v7223_v18  ;;  %v6830_v42 = vmul.f32 %v14009_v7, %v14009_v7  ;;  %v6698_v61 = vadd.f32 %v6697_v62, %v6562_v3 }
 0xe08   : > { %v7218_v26 = vrot.slane %v7217_v40, 2  ;;  %v6862_v59 = vadd.f32 %v6861_v25, %v6829_v32  ;;  %v6837_v15 = vmul.f32 %v6562_v3, %v6562_v3  ;;  %v7001_v10 = vrot.slane %v7000_v0, 2 }
 0xe09   : > { %v6995_v44 = vmax.f32 %v6993_v49, %v6994_v63  ;;  %v7225_v39 = vrot.slane %v7224_v12, 2  ;;  %v6871_v54 = vadd.f32 %v6870_v35, %v6830_v42  ;;  %v6699_v4 = vrot.slane %v6698_v61, 4 }
 0xe0a   : > { %v7219_v47 = vmin.f32 %v7217_v40, %v7218_v26  ;;  %v6863_v34 = vadd.f32 %v6862_v59, %v6837_v15  ;;  %v7047_v8 = vmax.f32 %v6558_v19, %v6562_v3  ;;  %v7002_v53 = vmax.f32 %v7000_v0, %v7001_v10 }
 0xe0b   : > { %v14020_v21 = vpop.f32.mrb[28].mxu1  ;;  %v6996_v17 = vrot.slane %v6995_v44, 1  ;;  %v7226_v36 = vmin.f32 %v7224_v12, %v7225_v39  ;;  %v7271_v13 = vmin.f32 %v6558_v19, %v6562_v3  ;;  %v6700_v25 = vadd.f32 %v6699_v4, %v6698_v61 }
 0xe0c   : > { %v14022_v18 = vpop.f32.mrb[29].mxu1  ;;  %v7220_v50 = vrot.slane %v7219_v47, 1  ;;  %v6864_v62 = vrot.slane %v6863_v34, 4  ;;  %v7048_v32 = vrot.slane %v7047_v8, 4  ;;  %v7003_v35 = vrot.slane %v7002_v53, 1 }
 0xe0d   : > { %v14024_v49 = vpop.f32.mrb[30].mxu1  ;;  %v6997_v63 = vmax.f32 %v6995_v44, %v6996_v17  ;;  %v7227_v40 = vrot.slane %v7226_v36, 1  ;;  %v7272_v42 = vrot.slane %v7271_v13, 4  ;;  %v6701_v15 = vrot.slane %v6700_v25, 2 }
 0xe0e   : > { %v14026_v26 = vpop.f32.mrb[31].mxu1  ;;  %v7221_v59 = vmin.f32 %v7219_v47, %v7220_v50  ;;  %v6865_v16 = vadd.f32 %v6864_v62, %v6863_v34  ;;  %v7049_v0 = vmax.f32 %v7047_v8, %v7048_v32  ;;  %v7004_v12 = vmax.f32 %v7002_v53, %v7003_v35 }
 0xe0f   : > { %v7228_v19 = vmin.f32 %v7226_v36, %v7227_v40  ;;  %v7273_v3 = vmin.f32 %v7271_v13, %v7272_v42  ;;  %v6564_v61 = vadd.f32 %v13920_v38, %v13863_v58  ;;  %v6702_v10 = vadd.f32 %v6701_v15, %v6700_v25 }
 0xe10   : > { %v6866_v39 = vrot.slane %v6865_v16, 2  ;;  %v7050_v4 = vrot.slane %v7049_v0, 2  ;;  %v6654_v44 = vadd.f32 %v14001_v46, %v14436_v24  ;;  %v7106_v17 = vcombine.low %v6997_v63, %v7004_v12 }
 0xe11   : > { %v7330_v30 = vcombine.low %v7221_v59, %v7228_v19  ;;  %v7274_v43 = vrot.slane %v7273_v3, 2  ;;  %v6707_v57 = vadd.f32 %v6706_v1, %v6564_v61  ;;  %v6703_v50 = vrot.slane %v6702_v10, 1 }
 0xe12   : > { %v6867_v47 = vadd.f32 %v6866_v39, %v6865_v16  ;;  %v7051_v34 = vmax.f32 %v7049_v0, %v7050_v4  ;;  %v6838_v8 = vmul.f32 %v6564_v61, %v6564_v61  ;;  %v14033_v53 = vrot.slane %v7106_v17, %v13724_v14 }
 0xe13   : > { %v14036_v36 = vrot.slane %v7330_v30, %v13724_v14  ;;  %v7275_v58 = vmin.f32 %v7273_v3, %v7274_v43  ;;  %v6708_v38 = vrot.slane %v6707_v57, 4  ;;  %v6704_v13 = vadd.f32 %v6703_v50, %v6702_v10 }
 0xe14   : > { %v6868_v25 = vrot.slane %v6867_v47, 1  ;;  %v7052_v62 = vrot.slane %v7051_v34, 1  ;;  %v6872_v46 = vadd.f32 %v6871_v54, %v6838_v8  ;;  %v7054_v30 = vmax.f32 %v14009_v7, %v6564_v61 }
 0xe15   : > { %v7276_v1 = vrot.slane %v7275_v58, 1  ;;  %v6709_v63 = vadd.f32 %v6708_v38, %v6707_v57  ;;  %v7278_v15 = vmin.f32 %v14009_v7, %v6564_v61  ;;  %v6817_v54 = vmul.f32 %v6654_v44, %v6654_v44 }
 0xe16   : > { %v6869_v35 = vadd.f32 %v6868_v25, %v6867_v47  ;;  %v14042_v40 = vmax.f32 %v7051_v34, %v7052_v62  ;;  %v6873_v42 = vrot.slane %v6872_v46, 4  ;;  %v7055_v12 = vrot.slane %v7054_v30, 4 }
 0xe17   : > { %v14045_v43 = vmin.f32 %v7275_v58, %v7276_v1  ;;  %v6710_v59 = vrot.slane %v6709_v63, 2  ;;  %v6656_v19 = vadd.f32 %v14003_v27, %v13961_v29  ;;  %v6658_v57 = vadd.f32 %v14011_v55, %v14436_v24 }
 0xe18   : > { %v6874_v0 = vadd.f32 %v6873_v42, %v6872_v46  ;;  %v7279_v10 = vrot.slane %v7278_v15, 4  ;;  %v6660_v39 = vadd.f32 %v14015_v45, %v13961_v29  ;;  %v14056_v4 = vadd.f32 %v14020_v21, %v14436_v24 }
 0xe19   : > { %v6711_v3 = vadd.f32 %v6710_v59, %v6709_v63  ;;  %v7056_v7 = vmax.f32 %v7054_v30, %v7055_v12  ;;  %v6818_v61 = vmul.f32 %v6656_v19, %v6656_v19  ;;  %v6732_v50 = vadd.f32 %v6658_v57, %v6654_v44 }
 0xe1a   : > { %v6875_v17 = vrot.slane %v6874_v0, 2  ;;  %v7280_v34 = vmin.f32 %v7278_v15, %v7279_v10  ;;  %v6825_v8 = vmul.f32 %v6658_v57, %v6658_v57  ;;  %v7019_v27 = vmax.f32 %v6654_v44, %v6658_v57 }
 0xe1b   : > { %v6712_v47 = vrot.slane %v6711_v3, 1  ;;  %v7057_v38 = vrot.slane %v7056_v7, 2  ;;  %v7243_v55 = vmin.f32 %v6654_v44, %v6658_v57  ;;  %v6741_v25 = vadd.f32 %v6660_v39, %v6656_v19 }
 0xe1c   : > { %v6876_v58 = vadd.f32 %v6875_v17, %v6874_v0  ;;  %v7281_v46 = vrot.slane %v7280_v34, 2  ;;  %v6897_v1 = vadd.f32 %v6825_v8, %v6817_v54  ;;  %v7020_v45 = vrot.slane %v7019_v27, 4 }
 0xe1d   : > { %v6713_v62 = vadd.f32 %v6712_v47, %v6711_v3  ;;  %v7058_v42 = vmax.f32 %v7056_v7, %v7057_v38  ;;  %v7244_v21 = vrot.slane %v7243_v55, 4  ;;  %v6826_v59 = vmul.f32 %v6660_v39, %v6660_v39 }
 0xe1e   : > { %v6877_v63 = vrot.slane %v6876_v58, 1  ;;  %v7282_v30 = vmin.f32 %v7280_v34, %v7281_v46  ;;  %v7021_v12 = vmax.f32 %v7019_v27, %v7020_v45  ;;  %v7026_v32 = vmax.f32 %v6656_v19, %v6660_v39 }
 0xe1f   : > { %v6759_v16 = vcombine.low %v6704_v13, %v6713_v62  ;;  %v7059_v15 = vrot.slane %v7058_v42, 1  ;;  %v7245_v10 = vmin.f32 %v7243_v55, %v7244_v21  ;;  %v6906_v9 = vadd.f32 %v6826_v59, %v6818_v61 }
 0xe20   : > { %v6878_v31 = vadd.f32 %v6877_v63, %v6876_v58  ;;  %v7283_v44 = vrot.slane %v7282_v30, 1  ;;  %v7022_v57 = vrot.slane %v7021_v12, 2  ;;  %v7027_v3 = vrot.slane %v7026_v32, 4 }
 0xe21   : > { %v14059_v0 = vrot.slane %v6759_v16, %v13652_v6  ;;  %v7060_v17 = vmax.f32 %v7058_v42, %v7059_v15  ;;  %v7246_v47 = vrot.slane %v7245_v10, 2  ;;  %v7250_v7 = vmin.f32 %v6656_v19, %v6660_v39 }
 0xe22   : > { %v6924_v54 = vcombine.low %v6869_v35, %v6878_v31  ;;  %v7284_v34 = vmin.f32 %v7282_v30, %v7283_v44  ;;  %v7023_v8 = vmax.f32 %v7021_v12, %v7022_v57  ;;  %v7028_v27 = vmax.f32 %v7026_v32, %v7027_v3 }
 0xe23   : > { %v6790_v13 = vcombine.low %v13992_v37, %v14059_v0  ;;  %v7140_v61 = vcombine.low %v14042_v40, %v7060_v17  ;;  %v7247_v16 = vmin.f32 %v7245_v10, %v7246_v47  ;;  %v7251_v38 = vrot.slane %v7250_v7, 4 }
 0xe24   : > { %v14064_v58 = vrot.slane %v6924_v54, %v13652_v6  ;;  %v14437_v31 = vcombine.low %v13896_v33, %v13930_v20  ;;  %v7364_v19 = vcombine.low %v14045_v43, %v7284_v34  ;;  %v7024_v39 = vrot.slane %v7023_v8, 1 }
 0xe25   : > { %v7029_v55 = vrot.slane %v7028_v27, 2  ;;  %v7154_v32 = vrot.slane %v7140_v61, %v13724_v14  ;;  %v7248_v46 = vrot.slane %v7247_v16, 1  ;;  %v7252_v45 = vmin.f32 %v7250_v7, %v7251_v38 }
 0xe26   : > { %v7147_v35 = vrot.slane %v14437_v31, %v13724_v14  ;;  %v6955_v62 = vcombine.low %v13995_v56, %v14064_v58  ;;  %v14438_v40 = vcombine.low %v13898_v52, %v13932_v11  ;;  %v14082_v33 = vrot.slane %v7364_v19, %v13724_v14 }
 0xe27   : > { %v7030_v20 = vmax.f32 %v7028_v27, %v7029_v55  ;;  %v6733_v43 = vadd.f32 %v6732_v50, %v14056_v4  ;;  %v14439_v42 = vcombine.low %v13904_v23, %v13935_v5  ;;  %v7025_v30 = vmax.f32 %v7023_v8, %v7024_v39 }
 0xe28   : > { %v14079_v63 = vrot.slane %v14438_v40, %v13724_v14  ;;  %v7155_v59 = vcombine.low %v7147_v35, %v7154_v32  ;;  %v7253_v12 = vrot.slane %v7252_v45, 2  ;;  %v6833_v15 = vmul.f32 %v14056_v4, %v14056_v4 }
 0xe29   : > { %v14089_v21 = vrot.slane %v14439_v42, %v13652_v6  ;;  %v7031_v11 = vrot.slane %v7030_v20, 1  ;;  %v6666_v10 = vadd.f32 %v14022_v18, %v13961_v29  ;;  %v7249_v50 = vmin.f32 %v7247_v16, %v7248_v46 }
 0xe2a   : > { %v7379_v52 = vcombine.low %v14079_v63, %v14082_v33  ;;  %v7254_v44 = vmin.f32 %v7252_v45, %v7253_v12  ;;  %v6668_v23 = vadd.f32 %v14024_v49, %v14436_v24  ;;  %v6670_v5 = vadd.f32 %v14026_v26, %v13961_v29 }
 0xe2b   : > { %v14101_v57 = vrot.slane %v7155_v59, 7  ;;  %v7032_v3 = vmax.f32 %v7030_v20, %v7031_v11  ;;  %v6898_v54 = vadd.f32 %v6897_v1, %v6833_v15  ;;  %v6742_v17 = vadd.f32 %v6741_v25, %v6666_v10 }
 0xe2c   : > { %v7255_v47 = vrot.slane %v7254_v44, 1  ;;  %v6834_v7 = vmul.f32 %v6666_v10, %v6666_v10  ;;  %v6734_v34 = vadd.f32 %v6733_v43, %v6668_v23  ;;  %v6841_v8 = vmul.f32 %v6668_v23, %v6668_v23 }
 0xe2d   : > { %v7123_v27 = vcombine.low %v7025_v30, %v7032_v3  ;;  %v7075_v18 = vmax.f32 %v14056_v4, %v6668_v23  ;;  %v7299_v61 = vmin.f32 %v14056_v4, %v6668_v23  ;;  %v6743_v16 = vadd.f32 %v6742_v17, %v6670_v5 }
 0xe2e   : > { %v7256_v38 = vmin.f32 %v7254_v44, %v7255_v47  ;;  %v6907_v24 = vadd.f32 %v6906_v9, %v6834_v7  ;;  %v6735_v49 = vrot.slane %v6734_v34, 4  ;;  %v6899_v31 = vadd.f32 %v6898_v54, %v6841_v8 }
 0xe2f   : > { %v14106_v29 = vrot.slane %v7123_v27, %v13724_v14  ;;  %v7076_v26 = vrot.slane %v7075_v18, 4  ;;  %v7300_v1 = vrot.slane %v7299_v61, 4  ;;  %v6744_v25 = vrot.slane %v6743_v16, 4 }
 0xe30   : > { %v7347_v35 = vcombine.low %v7249_v50, %v7256_v38  ;;  %v6736_v19 = vadd.f32 %v6735_v49, %v6734_v34  ;;  %v6900_v39 = vrot.slane %v6899_v31, 4  ;;  %v6842_v55 = vmul.f32 %v6670_v5, %v6670_v5 }
 0xe31   : > { %v7138_v4 = vcombine.low %v13979_v2, %v14106_v29  ;;  %v7077_v32 = vmax.f32 %v7075_v18, %v7076_v26  ;;  %v7301_v46 = vmin.f32 %v7299_v61, %v7300_v1  ;;  %v6745_v9 = vadd.f32 %v6744_v25, %v6743_v16 }
 0xe32   : > { %v14111_v45 = vrot.slane %v7347_v35, %v13724_v14  ;;  %v6737_v40 = vrot.slane %v6736_v19, 2  ;;  %v6901_v63 = vadd.f32 %v6900_v39, %v6899_v31  ;;  %v6908_v33 = vadd.f32 %v6907_v24, %v6842_v55 }
 0xe33   : > { %v7078_v20 = vrot.slane %v7077_v32, 2  ;;  %v7302_v43 = vrot.slane %v7301_v46, 2  ;;  %v6746_v42 = vrot.slane %v6745_v9, 2  ;;  %v7082_v59 = vmax.f32 %v6666_v10, %v6670_v5 }
 0xe34   : > { %v7362_v30 = vcombine.low %v13985_v41, %v14111_v45  ;;  %v6738_v12 = vadd.f32 %v6737_v40, %v6736_v19  ;;  %v6902_v11 = vrot.slane %v6901_v63, 2  ;;  %v6909_v15 = vrot.slane %v6908_v33, 4 }
 0xe35   : > { %v7079_v50 = vmax.f32 %v7077_v32, %v7078_v20  ;;  %v7303_v44 = vmin.f32 %v7301_v46, %v7302_v43  ;;  %v6747_v23 = vadd.f32 %v6746_v42, %v6745_v9  ;;  %v7083_v3 = vrot.slane %v7082_v59, 4 }
 0xe36   : > { %v6739_v54 = vrot.slane %v6738_v12, 1  ;;  %v6903_v17 = vadd.f32 %v6902_v11, %v6901_v63  ;;  %v6910_v47 = vadd.f32 %v6909_v15, %v6908_v33  ;;  %v7306_v7 = vmin.f32 %v6666_v10, %v6670_v5 }
 0xe37   : > { %v7399_v34 = vrot.slane %v7379_v52, 7  ;;  %v7080_v8 = vrot.slane %v7079_v50, 1  ;;  %v6748_v27 = vrot.slane %v6747_v23, 1  ;;  %v7084_v18 = vmax.f32 %v7082_v59, %v7083_v3 }
 0xe38   : > { %v6740_v61 = vadd.f32 %v6739_v54, %v6738_v12  ;;  %v6904_v16 = vrot.slane %v6903_v17, 1  ;;  %v6911_v38 = vrot.slane %v6910_v47, 2  ;;  %v7307_v24 = vrot.slane %v7306_v7, 4 }
 0xe39   : > { %v7081_v49 = vmax.f32 %v7079_v50, %v7080_v8  ;;  %v7304_v31 = vrot.slane %v7303_v44, 1  ;;  %v6749_v26 = vadd.f32 %v6748_v27, %v6747_v23  ;;  %v7085_v1 = vrot.slane %v7084_v18, 2 }
 0xe3a   : > { %v6905_v25 = vadd.f32 %v6904_v16, %v6903_v17  ;;  %v6912_v35 = vadd.f32 %v6911_v38, %v6910_v47  ;;  %v7308_v19 = vmin.f32 %v7306_v7, %v7307_v24  ;;  %v14440_v39 = vcombine.low %v13954_v51, %v14033_v53  ;;  %v14446_v16 = vld [vmem:[#allocation58_spill] sm:$0xff] }
 0xe3b   : > { %v6761_v10 = vcombine.low %v6740_v61, %v6749_v26  ;;  %v7086_v5 = vmax.f32 %v7084_v18, %v7085_v1  ;;  %v14441_v32 = vcombine.low %v13967_v60, %v14036_v36  ;;  %v7305_v11 = vmin.f32 %v7303_v44, %v7304_v31  ;;  %v14443_v44 = vld [vmem:[#allocation56_spill] sm:$0xff]  ;;  %v14445_v61 = vld [vmem:[#allocation57_spill] sm:$0xff] }
 0xe3c   : > { %v7179_v52 = vsel %vm7178_vm3, %v14101_v57, %v14440_v39  ;;  %v6913_v9 = vrot.slane %v6912_v35, 1  ;;  %v7309_v40 = vrot.slane %v7308_v19, 2  ;;  %v6798_v23 = vrot.slane %v6790_v13, %v13652_v6 }
 0xe3d   : > { %v7181_v55 = vsel %vm7180_vm4, %v14101_v57, %v7179_v52  ;;  %v7400_v46 = vsel %vm7178_vm3, %v7399_v34, %v14441_v32  ;;  %v6789_v53 = vrot.slane %v6761_v10, %v13652_v6  ;;  %v7087_v33 = vrot.slane %v7086_v5, 1 }
 0xe3e   : > { %v7183_v63 = vsel %vm7182_vm5, %v14101_v57, %v7181_v55  ;;  %v7401_v51 = vsel %vm7180_vm4, %v7399_v34, %v7400_v46  ;;  %v6914_v42 = vadd.f32 %v6913_v9, %v6912_v35  ;;  %v7310_v59 = vmin.f32 %v7308_v19, %v7309_v40 }
 0xe3f   : > { %v7185_v20 = vsel %vm7184_vm6, %v14101_v57, %v7183_v63  ;;  %v7402_v43 = vsel %vm7182_vm5, %v7399_v34, %v7401_v51  ;;  %v6791_v36 = vcombine.low %v14089_v21, %v6789_v53  ;;  %v7088_v12 = vmax.f32 %v7086_v5, %v7087_v33 }
 0xe40   : > { %v7403_v60 = vsel %vm7184_vm6, %v7399_v34, %v7402_v43  ;;  %v6926_v15 = vcombine.low %v6905_v25, %v6914_v42  ;;  %v7311_v50 = vrot.slane %v7310_v59, 1  ;;  %v14442_v54 = vcombine.low %v13922_v28, %v13948_v48 }
 0xe41   : > { %v6805_v3 = vrot.slane %v6791_v36, %v13652_v6  ;;  %v7157_v57 = vcombine.low %v7081_v49, %v7088_v12  ;;  %v14444_v7 = vcombine.low %v13912_v22, %v14443_v44  ;;  %v14447_v28 = vcombine.low %v14445_v61, %v14446_v16  ;;  %v7431_v36 = vld [vmem:[%s14449_s15] sm:$0xff]  ;;  %v14455_v61 = vld [vmem:[#allocation50_spill] sm:$0xff] }
 0xe42   : > { %v6947_v17 = vrot.slane %v14442_v54, %v13652_v6  ;;  %v6954_v47 = vrot.slane %v6926_v15, %v13652_v6  ;;  %v7312_v21 = vmin.f32 %v7310_v59, %v7311_v50  ;;  %v6963_v38 = vrot.slane %v6955_v62, %v13652_v6  ;;  %v14453_v44 = vld [vmem:[#allocation52_spill] sm:$0xff] }
 0xe43   : > { %v7164_v34 = vrot.slane %v14444_v7, %v13724_v14  ;;  %v6806_v8 = vcombine.low %v6798_v23, %v6805_v3  ;;  %v7171_v37 = vrot.slane %v7157_v57, %v13724_v14  ;;  %v7388_v48 = vrot.slane %v14447_v28, %v13724_v14  ;;  %v14450_v23 = vld [vmem:[#allocation49_spill] sm:$0xff] }
 0xe44   : > { %v6956_v0 = vcombine.low %v6947_v17, %v6954_v47  ;;  %v7381_v13 = vcombine.low %v7305_v11, %v7312_v21  ;;  %v7482_v5 = vcombine.high %v7185_v20, %v7185_v20  ;;  %v7526_v55 = vcombine.high %v7403_v60, %v7403_v60  ;;  %v14452_v47 = vld [vmem:[#allocation47_spill] sm:$0xff] }
 0xe45   : > { %v7172_v27 = vcombine.low %v7164_v34, %v7171_v37  ;;  %v7421_v18 = vmul.f32 0.03125, %v6806_v8  ;;  %v7489_v9 = vrot.slane %v7185_v20, %v13724_v14  ;;  %v7533_v41 = vrot.slane %v7403_v60, %v13724_v14  ;;  %v14454_v34 = vld [vmem:[#allocation51_spill] sm:$0xff] }
 0xe46   : > { %v6970_v22 = vrot.slane %v6956_v0, %v13652_v6  ;;  %v7395_v24 = vrot.slane %v7381_v13, %v13724_v14  ;;  %v7496_v45 = vrot.slane %v7482_v5, %v13724_v14  ;;  %v7540_v40 = vrot.slane %v7526_v55, %v13724_v14 }
 0xe47   : > { %v7188_v49 = vrot.slane %v7172_v27, 7  ;;  %v7424_v1 = vmul.f32 %v7421_v18, %v7421_v18  ;;  %v7497_v42 = vcombine.high %v7489_v9, %v7489_v9  ;;  %v7541_v59 = vcombine.high %v7533_v41, %v7533_v41 }
 0xe48   : > { %v6971_v31 = vcombine.low %v6963_v38, %v6970_v22  ;;  %v7396_v26 = vcombine.low %v7388_v48, %v7395_v24  ;;  %v7498_v60 = vcombine.high %v7496_v45, %v7496_v45  ;;  %v7542_v12 = vcombine.high %v7540_v40, %v7540_v40  ;;  %v14456_v48 = vld [vmem:[#allocation48_spill] sm:$0xff] }
 0xe49   : > { %v7189_v25 = vsel %vm7178_vm3, %v7188_v49, %v7138_v4  ;;  %v14451_v54 = vmov 0  }
 0xe4a   : > { %v7406_v35 = vrot.slane %v7396_v26, 7  ;;  %v7423_v19 = vmul.f32 0.03125, %v6971_v31  ;;  %v7190_v39 = vsel %vm7180_vm4, %v7188_v49, %v7189_v25 }
 0xe4b   : > { %v7191_v56 = vsel %vm7182_vm5, %v7188_v49, %v7190_v39 }
 0xe4c   : > { %v7425_v58 = vsub.f32 %v7423_v19, %v7424_v1  ;;  %v7192_v6 = vsel %vm7184_vm6, %v7188_v49, %v7191_v56  ;;  %v7407_v62 = vsel %vm7178_vm3, %v7406_v35, %v7362_v30  ;;  %v7427_v30 = vld [vmem:[%s14448_s26] sm:$0xff] }
 0xe4d   : > { %v7408_v52 = vsel %vm7180_vm4, %v7406_v35, %v7407_v62  ;;  %v7499_v32 = vcombine.high %v7192_v6, %v7192_v6  ;;  %v14180_v63 = vrot.slane %v7192_v6, %v13724_v14 }
 0xe4e   : > { %v7426_v2 = vmax.f32 %v7425_v58, 0.0  ;;  %v7409_v29 = vsel %vm7182_vm5, %v7406_v35, %v7408_v52 }
 0xe4f   : > { %v7410_v4 = vsel %vm7184_vm6, %v7406_v35, %v7409_v29  ;;  %v14186_v53 = vrot.slane %v7499_v32, %v13724_v14  ;;  %v7514_v11 = vcombine.high %v14180_v63, %v14180_v63 }
 0xe50   : > { %v7428_v10 = vadd.f32 1e-05, %v7426_v2  ;;  %v7543_v46 = vcombine.high %v7410_v4, %v7410_v4  ;;  %v14183_v51 = vrot.slane %v7410_v4, %v13724_v14 }
 0xe51   : > { %v7515_v50 = vcombine.high %v14186_v53, %v14186_v53 }
 0xe52   : > { %12769 = vrsqrt.f32 %v7428_v10  ;;  %v14189_v33 = vrot.slane %v7543_v46, %v13724_v14  ;;  %v7558_v15 = vcombine.high %v14183_v51, %v14183_v51 }
 0xe54   : > { %v7559_v57 = vcombine.high %v14189_v33, %v14189_v33 }
 0xe5c   : > { %v12770_v20 = vpop.eup %12769 }
 0xe5d   : > { %v14191_v43 = vmul.f32 %v12770_v20, %v7427_v30  ;;  %v12367_v20 = vld [vmem:[#allocation20 + $0x200] ss:$16 sps:$4 sm:$0xff]  }
 0xe5f   : > { %v7432_v14 = vmul.f32 %v14191_v43, %v7421_v18  ;;  %vm7434_vm7 = vcmp.ge.f32.partialorder %v14191_v43, 0.0  ;;  %v7584_v3 = vrot.slane %v14191_v43, %v14450_v23  ;;  %v7580_v21 = vrot.slane %v14191_v43, %v14452_v47 }
 0xe60   : > { %v14207_v17 = vsel %vm7434_vm7, 1, %v14451_v54  ;;  %v7592_v7 = vrot.slane %v14191_v43, %v14453_v44  ;;  %v7588_v8 = vrot.slane %v14191_v43, %v14454_v34  ;;  %v7600_v28 = vrot.slane %v14191_v43, %v14455_v61 }
 0xe61   : > { %v14215_v37 = vsub.f32 %v7431_v36, %v7432_v14  ;;  %v7447_v0 = vrot.slane %v14207_v17, %v14450_v23  ;;  %v7443_v13 = vrot.slane %v14207_v17, %v14452_v47  ;;  %v7455_v27 = vrot.slane %v14207_v17, %v14453_v44 }
 0xe62   : > { %v7451_v18 = vrot.slane %v14207_v17, %v14454_v34  ;;  %v7463_v16 = vrot.slane %v14207_v17, %v14455_v61  ;;  %v7459_v38 = vrot.slane %v14207_v17, %v14456_v48  ;;  %v7596_v10 = vrot.slane %v14191_v43, %v14456_v48 }
 0xe63   : > { %vm7473_vm8 = vcmp.eq.s32.totalorder %v7447_v0, 1  ;;  %v7633_v22 = vrot.slane %v14215_v37, %v14450_v23  ;;  %vm7472_vm9 = vcmp.eq.s32.totalorder %v7443_v13, 1  ;;  %v7629_v24 = vrot.slane %v14215_v37, %v14452_v47  ;;  %v12381_v13 = vld [vmem:[#allocation20 + $0x244] ss:$16 sps:$4 sm:$0xff]  }
 0xe64   : > { %v7569_v49 = vsel %vm7473_vm8, %v7497_v42, %v7541_v59  ;;  %v7568_v31 = vsel %vm7472_vm9, %v7489_v9, %v7533_v41  ;;  %vm7475_vm10 = vcmp.eq.s32.totalorder %v7455_v27, 1  ;;  %v7641_v26 = vrot.slane %v14215_v37, %v14453_v44  ;;  %v12370_v42 = vld [vmem:[#allocation20 + $0x208] ss:$16 sps:$4 sm:$0xff]   ;;  %v12384_v27 = vld [vmem:[#allocation20 + $0x24c] ss:$16 sps:$4 sm:$0xff]  }
 0xe65   : > { %v7618_v1 = vmul.f32 %v7584_v3, %v7569_v49  ;;  %v7617_v25 = vmul.f32 %v7580_v21, %v7568_v31  ;;  %v7571_v35 = vsel %vm7475_vm10, %v7498_v60, %v7542_v12  ;;  %vm7474_vm11 = vcmp.eq.s32.totalorder %v7451_v18, 1  ;;  %v12373_v21 = vld [vmem:[#allocation20 + $0x220] ss:$16 sps:$4 sm:$0xff]   ;;  %v12393_v49 = vld [vmem:[#allocation20 + $0x284] ss:$16 sps:$4 sm:$0xff]  }
 0xe66   : > { %v7620_v19 = vmul.f32 %v7592_v7, %v7571_v35  ;;  %v7570_v39 = vsel %vm7474_vm11, %v7496_v45, %v7540_v40  ;;  %v7637_v56 = vrot.slane %v14215_v37, %v14454_v34  ;;  %vm7477_vm12 = vcmp.eq.s32.totalorder %v7463_v16, 1  ;;  %v14457_v45 = vld [vmem:[#allocation54_spill] sm:$0xff]  ;;  %v12405_v35 = vld [vmem:[#allocation20 + $0x2c4] ss:$16 sps:$4 sm:$0xff]  }
 0xe67   : > { %v7667_v58 = vadd.f32 %v7633_v22, %v7618_v1  ;;  %v7666_v6 = vadd.f32 %v7629_v24, %v7617_v25  ;;  %v7619_v62 = vmul.f32 %v7588_v8, %v7570_v39  ;;  %v7573_v52 = vsel %vm7477_vm12, %v7514_v11, %v7558_v15  ;;  %v12375_v11 = vld [vmem:[#allocation20 + $0x224] ss:$16 sps:$4 sm:$0xff]   ;;  %v12378_v15 = vld [vmem:[#allocation20 + $0x22c] ss:$16 sps:$4 sm:$0xff]   ;;  %v12376_v7 = vld [vmem:[#allocation20 + $0x228] ss:$16 sps:$4 sm:$0xff]  }
 0xe68   : > { %v7669_v2 = vadd.f32 %v7641_v26, %v7620_v19  ;;  %v7622_v29 = vmul.f32 %v7600_v28, %v7573_v52  ;;  %v7649_v4 = vrot.slane %v14215_v37, %v14455_v61  ;;  %vm7476_vm13 = vcmp.eq.s32.totalorder %v7459_v38, 1  ;;  %v14458_v8 = vld [vmem:[#allocation53_spill] sm:$0xff]  ;;  %v12390_v28 = vld [vmem:[#allocation20 + $0x26c] ss:$16 sps:$4 sm:$0xff]  }
 0xe69   : > { %v7675_v5 = vmax.f32 %v7667_v58, 0.0  ;;  %v7674_v55 = vmax.f32 %v7666_v6, 0.0  ;;  %v14243_v32 = vadd.f32 %v7637_v56, %v7619_v62  ;;  %v7572_v41 = vsel %vm7476_vm13, %v14180_v63, %v14183_v51  ;;  %v12382_v61 = vld [vmem:[#allocation20 + $0x248] ss:$16 sps:$4 sm:$0xff]   ;;  %v12396_v31 = vld [vmem:[#allocation20 + $0x28c] ss:$16 sps:$4 sm:$0xff]  }
 0xe6a   : > { %v7677_v46 = vmax.f32 %v7669_v2, 0.0  ;;  %v14245_v9 = vadd.f32 %v7649_v4, %v7622_v29  ;;  %v7471_v30 = vrot.slane %v14207_v17, %v14457_v45  ;;  %v7621_v60 = vmul.f32 %v7596_v10, %v7572_v41  ;;  %v12388_v24 = vld [vmem:[#allocation20 + $0x268] ss:$16 sps:$4 sm:$0xff]   ;;  %v12399_v26 = vld [vmem:[#allocation20 + $0x2a4] ss:$16 sps:$4 sm:$0xff]  }
 0xe6b   : > { %v7683_v40 = vpack.c.bf16 %v7675_v5, %v7675_v5  ;;  %v7682_v59 = vpack.c.bf16 %v7674_v55, %v7674_v55  ;;  %v7645_v36 = vrot.slane %v14215_v37, %v14456_v48  ;;  %v7608_v12 = vrot.slane %v14191_v43, %v14457_v45  ;;  %v12402_v1 = vld [vmem:[#allocation20 + $0x2ac] ss:$16 sps:$4 sm:$0xff]   ;;  %v12400_v25 = vld [vmem:[#allocation20 + $0x2a8] ss:$16 sps:$4 sm:$0xff]   ;;  %v12403_v39 = vld [vmem:[#allocation20 + $0x2c0] ss:$16 sps:$4 sm:$0xff]  }
 0xe6c   : > { %vm7479_vm14 = vcmp.eq.s32.totalorder %v7471_v30, 1  ;;  %v7685_v14 = vpack.c.bf16 %v7677_v46, %v7677_v46  ;;  %v7657_v54 = vrot.slane %v14215_v37, %v14457_v45  ;;  %v7467_v0 = vrot.slane %v14207_v17, %v14458_v8  ;;  %v12387_v17 = vld [vmem:[#allocation20 + $0x264] ss:$16 sps:$4 sm:$0xff]   ;;  %v12408_v19 = vld [vmem:[#allocation20 + $0x2cc] ss:$16 sps:$4 sm:$0xff]  }
 0xe6d   : > { %9280 = vmatprep.mubr.bf16.mxu0 %v7683_v40  ;;  %9444 = vmatprep.mubr.bf16.mxu1 %v7683_v40  ;;  %v14255_v63 = vadd.f32 %v7645_v36, %v7621_v60  ;;  %v7575_v51 = vsel %vm7479_vm14, %v7515_v50, %v7559_v57  ;;  %v7604_v50 = vrot.slane %v14191_v43, %v14458_v8  ;;  %v12379_v57 = vld [vmem:[#allocation20 + $0x240] ss:$16 sps:$4 sm:$0xff]   ;;  %v12406_v56 = vld [vmem:[#allocation20 + $0x2c8] ss:$16 sps:$4 sm:$0xff]   ;;  %v12411_v58 = vld [vmem:[#allocation20 + $0x2e4] ss:$16 sps:$4 sm:$0xff]  }
 0xe6e   : > { %9281 = vmatmul.mubr.bf16.vlgmr.msra.gmra.mrb[8].mxu0 %v7682_v59  ;;  %9445 = vmatmul.mubr.bf16.vlgmr.msra.gmra.mrb[32].mxu1 %v7682_v59  ;;  %v7624_v3 = vmul.f32 %v7608_v12, %v7575_v51  ;;  %vm7478_vm15 = vcmp.eq.s32.totalorder %v7467_v0, 1  ;;  %v7653_v38 = vrot.slane %v14215_v37, %v14458_v8  ;;  %v12385_v43 = vld [vmem:[#allocation20 + $0x260] ss:$16 sps:$4 sm:$0xff]   ;;  %v12414_v6 = vld [vmem:[#allocation20 + $0x2ec] ss:$16 sps:$4 sm:$0xff]  }
 0xe6f   : > { %9290 = vmatpush1.bf16.msra.mxu0 %v12367_v20  ;;  %9454 = vmatpush1.bf16.msra.mxu1 %v12370_v42  ;;  %v7574_v16 = vsel %vm7478_vm15, %v14186_v53, %v14189_v33  ;;  %v12391_v53 = vld [vmem:[#allocation20 + $0x280] ss:$16 sps:$4 sm:$0xff]   ;;  %v12394_v33 = vld [vmem:[#allocation20 + $0x288] ss:$16 sps:$4 sm:$0xff]   ;;  %v12417_v2 = vld [vmem:[#allocation20 + $0x304] ss:$16 sps:$4 sm:$0xff]  }
 0xe70   : > { %9321 = vmatprep.mubr.bf16.mxu0 %v7685_v14  ;;  %9485 = vmatprep.mubr.bf16.mxu1 %v7685_v14  ;;  %v14264_v18 = vadd.f32 %v7657_v54, %v7624_v3  ;;  %v7623_v48 = vmul.f32 %v7604_v50, %v7574_v16  ;;  %v12397_v37 = vld [vmem:[#allocation20 + $0x2a0] ss:$16 sps:$4 sm:$0xff]   ;;  %v12412_v52 = vld [vmem:[#allocation20 + $0x2e8] ss:$16 sps:$4 sm:$0xff]   ;;  %v12420_v29 = vld [vmem:[#allocation20 + $0x30c] ss:$16 sps:$4 sm:$0xff]  }
 0xe71   : > { %9291 = vmatprep.subr.bf16.mxu0 %v12375_v11  ;;  %9455 = vmatprep.subr.bf16.mxu1 %v12378_v15  ;;  %v12409_v62 = vld [vmem:[#allocation20 + $0x2e0] ss:$16 sps:$4 sm:$0xff]   ;;  %v12418_v10 = vld [vmem:[#allocation20 + $0x308] ss:$16 sps:$4 sm:$0xff]   ;;  %v12423_v5 = vld [vmem:[#allocation20 + $0x324] ss:$16 sps:$4 sm:$0xff]  }
 0xe72   : > { %v14272_v22 = vadd.f32 %v7653_v38, %v7623_v48  ;;  %v12415_v4 = vld [vmem:[#allocation20 + $0x300] ss:$16 sps:$4 sm:$0xff]   ;;  %v12426_v55 = vld [vmem:[#allocation20 + $0x32c] ss:$16 sps:$4 sm:$0xff]   ;;  %v12424_v41 = vld [vmem:[#allocation20 + $0x328] ss:$16 sps:$4 sm:$0xff]  }
 0xe73   : > { %9292 = vmatpush1.bf16.msra.mxu0 %v12373_v21  ;;  %9456 = vmatpush1.bf16.msra.mxu1 %v12376_v7  ;;  %v12421_v46 = vld [vmem:[#allocation20 + $0x320] ss:$16 sps:$4 sm:$0xff]   ;;  %v12429_v45 = vld [vmem:[#allocation20 + $0x344] ss:$16 sps:$4 sm:$0xff]   ;;  %v12432_v30 = vld [vmem:[#allocation20 + $0x34c] ss:$16 sps:$4 sm:$0xff]  }
 0xe74   : > { %9293 = vmatprep.subr.bf16.mxu0 %v12381_v13  ;;  %9457 = vmatprep.subr.bf16.mxu1 %v12384_v27  ;;  %v12427_v40 = vld [vmem:[#allocation20 + $0x340] ss:$16 sps:$4 sm:$0xff]   ;;  %v12430_v20 = vld [vmem:[#allocation20 + $0x348] ss:$16 sps:$4 sm:$0xff]   ;;  %v12435_v42 = vld [vmem:[#allocation20 + $0x364] ss:$16 sps:$4 sm:$0xff]  }
 0xe75   : > { %v12438_v59 = vld [vmem:[#allocation20 + $0x36c] ss:$16 sps:$4 sm:$0xff]   ;;  %v12433_v60 = vld [vmem:[#allocation20 + $0x360] ss:$16 sps:$4 sm:$0xff]   ;;  %v12436_v36 = vld [vmem:[#allocation20 + $0x368] ss:$16 sps:$4 sm:$0xff]  }
 0xe76   : > { %v12441_v12 = vld [vmem:[#allocation20 + $0x384] ss:$16 sps:$4 sm:$0xff]   ;;  %v12444_v11 = vld [vmem:[#allocation20 + $0x38c] ss:$16 sps:$4 sm:$0xff]   ;;  %v12439_v15 = vld [vmem:[#allocation20 + $0x380] ss:$16 sps:$4 sm:$0xff]  }
 0xe77   : > { %9294 = vmatpush1.bf16.msra.mxu0 %v12379_v57  ;;  %9458 = vmatpush1.bf16.msra.mxu1 %v12382_v61  ;;  %v12442_v51 = vld [vmem:[#allocation20 + $0x388] ss:$16 sps:$4 sm:$0xff]   ;;  %v12447_v14 = vld [vmem:[#allocation20 + $0x3a4] ss:$16 sps:$4 sm:$0xff]   ;;  %v12450_v3 = vld [vmem:[#allocation20 + $0x3ac] ss:$16 sps:$4 sm:$0xff]  }
 0xe78   : > { %9295 = vmatprep.subr.bf16.mxu0 %v12387_v17  ;;  %9459 = vmatprep.subr.bf16.mxu1 %v12390_v28  ;;  %v12445_v54 = vld [vmem:[#allocation20 + $0x3a0] ss:$16 sps:$4 sm:$0xff]   ;;  %v12448_v21 = vld [vmem:[#allocation20 + $0x3a8] ss:$16 sps:$4 sm:$0xff]   ;;  %v12453_v7 = vld [vmem:[#allocation20 + $0x3c4] ss:$16 sps:$4 sm:$0xff]  }
 0xe79   : > { %v12456_v8 = vld [vmem:[#allocation20 + $0x3cc] ss:$16 sps:$4 sm:$0xff]   ;;  %v12451_v0 = vld [vmem:[#allocation20 + $0x3c0] ss:$16 sps:$4 sm:$0xff]   ;;  %v12454_v13 = vld [vmem:[#allocation20 + $0x3c8] ss:$16 sps:$4 sm:$0xff]  }
 0xe7a   : > { %v12459_v27 = vld [vmem:[#allocation20 + $0x3e4] ss:$16 sps:$4 sm:$0xff]   ;;  %v12462_v50 = vld [vmem:[#allocation20 + $0x3ec] ss:$16 sps:$4 sm:$0xff]   ;;  %v12457_v57 = vld [vmem:[#allocation20 + $0x3e0] ss:$16 sps:$4 sm:$0xff]  }
 0xe7b   : > { %9296 = vmatpush1.bf16.msra.mxu0 %v12385_v43  ;;  %9460 = vmatpush1.bf16.msra.mxu1 %v12388_v24  ;;  %v12460_v61 = vld [vmem:[#allocation20 + $0x3e8] ss:$16 sps:$4 sm:$0xff]   ;;  %v7676_v16 = vmax.f32 %v14243_v32, 0.0  ;;  %v12465_v17 = vld [vmem:[#allocation20 + $0x404] ss:$16 sps:$4 sm:$0xff]   ;;  %v7679_v48 = vmax.f32 %v14245_v9, 0.0 }
 0xe7c   : > { %9297 = vmatprep.subr.bf16.mxu0 %v12393_v49  ;;  %9461 = vmatprep.subr.bf16.mxu1 %v12396_v31  ;;  %v12468_v28 = vld [vmem:[#allocation20 + $0x40c] ss:$16 sps:$4 sm:$0xff]   ;;  %v12463_v38 = vld [vmem:[#allocation20 + $0x400] ss:$16 sps:$4 sm:$0xff]   ;;  %v12466_v24 = vld [vmem:[#allocation20 + $0x408] ss:$16 sps:$4 sm:$0xff]  }
 0xe7d   : > { %v7684_v43 = vpack.c.bf16 %v7676_v16, %v7676_v16  ;;  %v7687_v49 = vpack.c.bf16 %v7679_v48, %v7679_v48  ;;  %v12471_v31 = vld [vmem:[#allocation20 + $0x424] ss:$16 sps:$4 sm:$0xff]   ;;  %v12472_v32 = vld [vmem:[#allocation20 + $0x428] ss:$16 sps:$4 sm:$0xff]   ;;  %v12480_v9 = vld [vmem:[#allocation20 + $0x44c] ss:$16 sps:$4 sm:$0xff]  }
 0xe7e   : > { %v12546_v16 = vld [vmem:[#allocation20 + $0x5ac] ss:$16 sps:$4 sm:$0xff]   ;;  %v12549_v48 = vld [vmem:[#allocation20 + $0x5c4] ss:$16 sps:$4 sm:$0xff]  }
 0xe7f   : > { %9298 = vmatpush1.bf16.msra.mxu0 %v12391_v53  ;;  %9462 = vmatpush1.bf16.msra.mxu1 %v12394_v33  ;;  %v12474_v53 = vld [vmem:[#allocation20 + $0x42c] ss:$16 sps:$4 sm:$0xff]   ;;  %v12469_v33 = vld [vmem:[#allocation20 + $0x420] ss:$16 sps:$4 sm:$0xff]  }
 0xe80   : > { %9299 = vmatprep.subr.bf16.mxu0 %v12399_v26  ;;  %9463 = vmatprep.subr.bf16.mxu1 %v12402_v1  ;;  %v12477_v26 = vld [vmem:[#allocation20 + $0x444] ss:$16 sps:$4 sm:$0xff]   ;;  %v12475_v1 = vld [vmem:[#allocation20 + $0x440] ss:$16 sps:$4 sm:$0xff]  }
 0xe83   : > { %9300 = vmatpush1.bf16.msra.mxu0 %v12397_v37  ;;  %9464 = vmatpush1.bf16.msra.mxu1 %v12400_v25  ;;  %v12478_v37 = vld [vmem:[#allocation20 + $0x448] ss:$16 sps:$4 sm:$0xff]   ;;  %v12483_v25 = vld [vmem:[#allocation20 + $0x464] ss:$16 sps:$4 sm:$0xff]  }
 0xe84   : > { %9301 = vmatprep.subr.bf16.mxu0 %v12405_v35  ;;  %9465 = vmatprep.subr.bf16.mxu1 %v12408_v19  ;;  %v12486_v35 = vld [vmem:[#allocation20 + $0x46c] ss:$16 sps:$4 sm:$0xff]   ;;  %v12481_v19 = vld [vmem:[#allocation20 + $0x460] ss:$16 sps:$4 sm:$0xff]  }
 0xe87   : > { %9302 = vmatpush1.bf16.msra.mxu0 %v12403_v39  ;;  %9466 = vmatpush1.bf16.msra.mxu1 %v12406_v56  ;;  %v12484_v39 = vld [vmem:[#allocation20 + $0x468] ss:$16 sps:$4 sm:$0xff]   ;;  %v12489_v56 = vld [vmem:[#allocation20 + $0x484] ss:$16 sps:$4 sm:$0xff]  }
 0xe88   : > { %9303 = vmatprep.subr.bf16.mxu0 %v12411_v58  ;;  %9467 = vmatprep.subr.bf16.mxu1 %v12414_v6  ;;  %v12492_v58 = vld [vmem:[#allocation20 + $0x48c] ss:$16 sps:$4 sm:$0xff]   ;;  %v12487_v6 = vld [vmem:[#allocation20 + $0x480] ss:$16 sps:$4 sm:$0xff]  }
 0xe8b   : > { %9304 = vmatpush1.bf16.msra.mxu0 %v12409_v62  ;;  %9468 = vmatpush1.bf16.msra.mxu1 %v12412_v52  ;;  %v12490_v62 = vld [vmem:[#allocation20 + $0x488] ss:$16 sps:$4 sm:$0xff]   ;;  %v12495_v52 = vld [vmem:[#allocation20 + $0x4a4] ss:$16 sps:$4 sm:$0xff]  }
 0xe8c   : > { %9305 = vmatprep.subr.bf16.mxu0 %v12417_v2  ;;  %9469 = vmatprep.subr.bf16.mxu1 %v12420_v29  ;;  %v12498_v2 = vld [vmem:[#allocation20 + $0x4ac] ss:$16 sps:$4 sm:$0xff]   ;;  %v12493_v29 = vld [vmem:[#allocation20 + $0x4a0] ss:$16 sps:$4 sm:$0xff]  }
 0xe8f   : > { %9306 = vmatpush1.bf16.msra.mxu0 %v12415_v4  ;;  %9470 = vmatpush1.bf16.msra.mxu1 %v12418_v10  ;;  %v12496_v4 = vld [vmem:[#allocation20 + $0x4a8] ss:$16 sps:$4 sm:$0xff]   ;;  %v12501_v10 = vld [vmem:[#allocation20 + $0x4c4] ss:$16 sps:$4 sm:$0xff]  }
 0xe90   : > { %9307 = vmatprep.subr.bf16.mxu0 %v12423_v5  ;;  %9471 = vmatprep.subr.bf16.mxu1 %v12426_v55  ;;  %v12504_v5 = vld [vmem:[#allocation20 + $0x4cc] ss:$16 sps:$4 sm:$0xff]   ;;  %v12499_v55 = vld [vmem:[#allocation20 + $0x4c0] ss:$16 sps:$4 sm:$0xff]  }
 0xe93   : > { %9308 = vmatpush1.bf16.msra.mxu0 %v12421_v46  ;;  %9472 = vmatpush1.bf16.msra.mxu1 %v12424_v41  ;;  %v12502_v46 = vld [vmem:[#allocation20 + $0x4c8] ss:$16 sps:$4 sm:$0xff]   ;;  %v12507_v41 = vld [vmem:[#allocation20 + $0x4e4] ss:$16 sps:$4 sm:$0xff]  }
 0xe94   : > { %9309 = vmatprep.subr.bf16.mxu0 %v12429_v45  ;;  %9473 = vmatprep.subr.bf16.mxu1 %v12432_v30  ;;  %v12510_v45 = vld [vmem:[#allocation20 + $0x4ec] ss:$16 sps:$4 sm:$0xff]   ;;  %v12505_v30 = vld [vmem:[#allocation20 + $0x4e0] ss:$16 sps:$4 sm:$0xff]  }
 0xe97   : > { %9310 = vmatpush1.bf16.msra.mxu0 %v12427_v40  ;;  %9474 = vmatpush1.bf16.msra.mxu1 %v12430_v20  ;;  %v12508_v40 = vld [vmem:[#allocation20 + $0x4e8] ss:$16 sps:$4 sm:$0xff]   ;;  %v12513_v20 = vld [vmem:[#allocation20 + $0x504] ss:$16 sps:$4 sm:$0xff]  }
 0xe98   : > { %9311 = vmatprep.subr.bf16.mxu0 %v12435_v42  ;;  %9475 = vmatprep.subr.bf16.mxu1 %v12438_v59  ;;  %v12516_v42 = vld [vmem:[#allocation20 + $0x50c] ss:$16 sps:$4 sm:$0xff]   ;;  %v12511_v59 = vld [vmem:[#allocation20 + $0x500] ss:$16 sps:$4 sm:$0xff]  }
 0xe9b   : > { %9312 = vmatpush1.bf16.msra.mxu0 %v12433_v60  ;;  %9476 = vmatpush1.bf16.msra.mxu1 %v12436_v36  ;;  %v12514_v60 = vld [vmem:[#allocation20 + $0x508] ss:$16 sps:$4 sm:$0xff]   ;;  %v12519_v36 = vld [vmem:[#allocation20 + $0x524] ss:$16 sps:$4 sm:$0xff]  }
 0xe9c   : > { %9313 = vmatprep.subr.bf16.mxu0 %v12441_v12  ;;  %9477 = vmatprep.subr.bf16.mxu1 %v12444_v11  ;;  %v12522_v12 = vld [vmem:[#allocation20 + $0x52c] ss:$16 sps:$4 sm:$0xff]   ;;  %v12517_v11 = vld [vmem:[#allocation20 + $0x520] ss:$16 sps:$4 sm:$0xff]  }
 0xe9f   : > { %9314 = vmatpush1.bf16.msra.mxu0 %v12439_v15  ;;  %9478 = vmatpush1.bf16.msra.mxu1 %v12442_v51  ;;  %v12520_v15 = vld [vmem:[#allocation20 + $0x528] ss:$16 sps:$4 sm:$0xff]   ;;  %v12525_v51 = vld [vmem:[#allocation20 + $0x544] ss:$16 sps:$4 sm:$0xff]  }
 0xea0   : > { %9315 = vmatprep.subr.bf16.mxu0 %v12447_v14  ;;  %9479 = vmatprep.subr.bf16.mxu1 %v12450_v3  ;;  %v12528_v14 = vld [vmem:[#allocation20 + $0x54c] ss:$16 sps:$4 sm:$0xff]   ;;  %v12523_v3 = vld [vmem:[#allocation20 + $0x540] ss:$16 sps:$4 sm:$0xff]  }
 0xea3   : > { %9316 = vmatpush1.bf16.msra.mxu0 %v12445_v54  ;;  %9480 = vmatpush1.bf16.msra.mxu1 %v12448_v21  ;;  %v12526_v54 = vld [vmem:[#allocation20 + $0x548] ss:$16 sps:$4 sm:$0xff]   ;;  %v12531_v21 = vld [vmem:[#allocation20 + $0x564] ss:$16 sps:$4 sm:$0xff]  }
 0xea4   : > { %9317 = vmatprep.subr.bf16.mxu0 %v12453_v7  ;;  %9481 = vmatprep.subr.bf16.mxu1 %v12456_v8  ;;  %v12534_v7 = vld [vmem:[#allocation20 + $0x56c] ss:$16 sps:$4 sm:$0xff]   ;;  %v12529_v8 = vld [vmem:[#allocation20 + $0x560] ss:$16 sps:$4 sm:$0xff]  }
 0xea7   : > { %9318 = vmatpush1.bf16.msra.mxu0 %v12451_v0  ;;  %9482 = vmatpush1.bf16.msra.mxu1 %v12454_v13  ;;  %v12532_v0 = vld [vmem:[#allocation20 + $0x568] ss:$16 sps:$4 sm:$0xff]   ;;  %v12537_v13 = vld [vmem:[#allocation20 + $0x584] ss:$16 sps:$4 sm:$0xff]  }
 0xea8   : > { %9319 = vmatprep.subr.bf16.mxu0 %v12459_v27  ;;  %9483 = vmatprep.subr.bf16.mxu1 %v12462_v50  ;;  %v12540_v27 = vld [vmem:[#allocation20 + $0x58c] ss:$16 sps:$4 sm:$0xff]   ;;  %v12535_v50 = vld [vmem:[#allocation20 + $0x580] ss:$16 sps:$4 sm:$0xff]  }
 0xeab   : > { %9320 = vmatpush1.bf16.msra.mxu0 %v12457_v57  ;;  %9484 = vmatpush1.bf16.msra.mxu1 %v12460_v61  ;;  %v12538_v57 = vld [vmem:[#allocation20 + $0x588] ss:$16 sps:$4 sm:$0xff]   ;;  %v12543_v61 = vld [vmem:[#allocation20 + $0x5a4] ss:$16 sps:$4 sm:$0xff]  }
 0xeac   : > { %9330 = vmatprep.subr.bf16.mxu0 %v12465_v17  ;;  %9494 = vmatprep.subr.bf16.mxu1 %v12468_v28  ;;  %v12541_v17 = vld [vmem:[#allocation20 + $0x5a0] ss:$16 sps:$4 sm:$0xff]   ;;  %v12544_v28 = vld [vmem:[#allocation20 + $0x5a8] ss:$16 sps:$4 sm:$0xff]  }
 0xeae   : > { %9322 = vmatmul.mubr.bf16.vlgmr.msra.gmra.mrb[8].mxu0 %v7684_v43  ;;  %9486 = vmatmul.mubr.bf16.vlgmr.msra.gmra.mrb[32].mxu1 %v7684_v43  ;;  %v12547_v43 = vld [vmem:[#allocation20 + $0x5c0] ss:$16 sps:$4 sm:$0xff]  }
 0xeaf   : > { %9331 = vmatpush1.bf16.msra.mxu0 %v12463_v38  ;;  %9362 = vmatprep.mubr.bf16.mxu0 %v7687_v49  ;;  %v12552_v38 = vld [vmem:[#allocation20 + $0x5cc] ss:$16 sps:$4 sm:$0xff]  }
 0xeb0   : > { %9495 = vmatpush1.bf16.msra.mxu1 %v12466_v24  ;;  %9526 = vmatprep.mubr.bf16.mxu1 %v7687_v49  ;;  %v12550_v24 = vld [vmem:[#allocation20 + $0x5c8] ss:$16 sps:$4 sm:$0xff]   ;;  %v12555_v49 = vld [vmem:[#allocation20 + $0x5e4] ss:$16 sps:$4 sm:$0xff]  }
 0xeb1   : > { %9332 = vmatprep.subr.bf16.mxu0 %v12471_v31  ;;  %9496 = vmatprep.subr.bf16.mxu1 %v12474_v53  ;;  %v12558_v31 = vld [vmem:[#allocation20 + $0x5ec] ss:$16 sps:$4 sm:$0xff]   ;;  %v12553_v53 = vld [vmem:[#allocation20 + $0x5e0] ss:$16 sps:$4 sm:$0xff]  }
 0xeb3   : > { %9333 = vmatpush1.bf16.msra.mxu0 %v12469_v33  ;;  %v12556_v33 = vld [vmem:[#allocation20 + $0x5e8] ss:$16 sps:$4 sm:$0xff]  }
 0xeb4   : > { %9497 = vmatpush1.bf16.msra.mxu1 %v12472_v32  ;;  %9334 = vmatprep.subr.bf16.mxu0 %v12477_v26  ;;  %v7678_v32 = vmax.f32 %v14255_v63, 0.0  ;;  %v12561_v26 = vld [vmem:[#allocation20 + $0x604] ss:$16 sps:$4 sm:$0xff]   ;;  %v12568_v63 = vld [vmem:[#allocation20 + $0x628] ss:$16 sps:$4 sm:$0xff]  }
 0xeb5   : > { %9498 = vmatprep.subr.bf16.mxu1 %v12480_v9  ;;  %v12564_v9 = vld [vmem:[#allocation20 + $0x60c] ss:$16 sps:$4 sm:$0xff]  }
 0xeb7   : > { %9335 = vmatpush1.bf16.msra.mxu0 %v12475_v1  ;;  %v7681_v1 = vmax.f32 %v14264_v18, 0.0  ;;  %v12576_v18 = vld [vmem:[#allocation20 + $0x64c] ss:$16 sps:$4 sm:$0xff]  }
 0xeb8   : > { %9499 = vmatpush1.bf16.msra.mxu1 %v12478_v37  ;;  %9336 = vmatprep.subr.bf16.mxu0 %v12483_v25  ;;  %v12559_v37 = vld [vmem:[#allocation20 + $0x600] ss:$16 sps:$4 sm:$0xff]   ;;  %v7686_v25 = vpack.c.bf16 %v7678_v32, %v7678_v32  ;;  %v12640_v32 = vld [vmem:[#allocation20 + $0x7a8] ss:$16 sps:$4 sm:$0xff]  }
 0xeb9   : > { %9500 = vmatprep.subr.bf16.mxu1 %v12486_v35  ;;  %v12562_v35 = vld [vmem:[#allocation20 + $0x608] ss:$16 sps:$4 sm:$0xff]  }
 0xebb   : > { %9337 = vmatpush1.bf16.msra.mxu0 %v12481_v19  ;;  %v12567_v19 = vld [vmem:[#allocation20 + $0x624] ss:$16 sps:$4 sm:$0xff]  }
 0xebc   : > { %9501 = vmatpush1.bf16.msra.mxu1 %v12484_v39  ;;  %9338 = vmatprep.subr.bf16.mxu0 %v12489_v56  ;;  %v7689_v39 = vpack.c.bf16 %v7681_v1, %v7681_v1  ;;  %v12570_v56 = vld [vmem:[#allocation20 + $0x62c] ss:$16 sps:$4 sm:$0xff]   ;;  %v12643_v1 = vld [vmem:[#allocation20 + $0x7c0] ss:$16 sps:$4 sm:$0xff]  }
 0xebd   : > { %9502 = vmatprep.subr.bf16.mxu1 %v12492_v58  ;;  %v12565_v58 = vld [vmem:[#allocation20 + $0x620] ss:$16 sps:$4 sm:$0xff]  }
 0xebf   : > { %9339 = vmatpush1.bf16.msra.mxu0 %v12487_v6  ;;  %v12573_v6 = vld [vmem:[#allocation20 + $0x644] ss:$16 sps:$4 sm:$0xff]  }
 0xec0   : > { %9503 = vmatpush1.bf16.msra.mxu1 %v12490_v62  ;;  %9340 = vmatprep.subr.bf16.mxu0 %v12495_v52  ;;  %v12571_v62 = vld [vmem:[#allocation20 + $0x640] ss:$16 sps:$4 sm:$0xff]   ;;  %v12574_v52 = vld [vmem:[#allocation20 + $0x648] ss:$16 sps:$4 sm:$0xff]  }
 0xec1   : > { %9504 = vmatprep.subr.bf16.mxu1 %v12498_v2  ;;  %v12579_v2 = vld [vmem:[#allocation20 + $0x664] ss:$16 sps:$4 sm:$0xff]  }
 0xec3   : > { %9341 = vmatpush1.bf16.msra.mxu0 %v12493_v29  ;;  %v12582_v29 = vld [vmem:[#allocation20 + $0x66c] ss:$16 sps:$4 sm:$0xff]  }
 0xec4   : > { %9505 = vmatpush1.bf16.msra.mxu1 %v12496_v4  ;;  %9342 = vmatprep.subr.bf16.mxu0 %v12501_v10  ;;  %v12577_v4 = vld [vmem:[#allocation20 + $0x660] ss:$16 sps:$4 sm:$0xff]   ;;  %v12580_v10 = vld [vmem:[#allocation20 + $0x668] ss:$16 sps:$4 sm:$0xff]  }
 0xec5   : > { %9506 = vmatprep.subr.bf16.mxu1 %v12504_v5  ;;  %v12585_v5 = vld [vmem:[#allocation20 + $0x684] ss:$16 sps:$4 sm:$0xff]  }
 0xec7   : > { %9343 = vmatpush1.bf16.msra.mxu0 %v12499_v55  ;;  %v12588_v55 = vld [vmem:[#allocation20 + $0x68c] ss:$16 sps:$4 sm:$0xff]  }
 0xec8   : > { %9507 = vmatpush1.bf16.msra.mxu1 %v12502_v46  ;;  %9344 = vmatprep.subr.bf16.mxu0 %v12507_v41  ;;  %v12583_v46 = vld [vmem:[#allocation20 + $0x680] ss:$16 sps:$4 sm:$0xff]   ;;  %v12586_v41 = vld [vmem:[#allocation20 + $0x688] ss:$16 sps:$4 sm:$0xff]  }
 0xec9   : > { %9508 = vmatprep.subr.bf16.mxu1 %v12510_v45  ;;  %v12591_v45 = vld [vmem:[#allocation20 + $0x6a4] ss:$16 sps:$4 sm:$0xff]  }
 0xecb   : > { %9345 = vmatpush1.bf16.msra.mxu0 %v12505_v30  ;;  %v12594_v30 = vld [vmem:[#allocation20 + $0x6ac] ss:$16 sps:$4 sm:$0xff]  }
 0xecc   : > { %9509 = vmatpush1.bf16.msra.mxu1 %v12508_v40  ;;  %9346 = vmatprep.subr.bf16.mxu0 %v12513_v20  ;;  %v12589_v40 = vld [vmem:[#allocation20 + $0x6a0] ss:$16 sps:$4 sm:$0xff]   ;;  %v12592_v20 = vld [vmem:[#allocation20 + $0x6a8] ss:$16 sps:$4 sm:$0xff]  }
 0xecd   : > { %9510 = vmatprep.subr.bf16.mxu1 %v12516_v42  ;;  %v12597_v42 = vld [vmem:[#allocation20 + $0x6c4] ss:$16 sps:$4 sm:$0xff]  }
 0xecf   : > { %9347 = vmatpush1.bf16.msra.mxu0 %v12511_v59  ;;  %v12600_v59 = vld [vmem:[#allocation20 + $0x6cc] ss:$16 sps:$4 sm:$0xff]  }
 0xed0   : > { %9511 = vmatpush1.bf16.msra.mxu1 %v12514_v60  ;;  %9348 = vmatprep.subr.bf16.mxu0 %v12519_v36  ;;  %v12595_v60 = vld [vmem:[#allocation20 + $0x6c0] ss:$16 sps:$4 sm:$0xff]   ;;  %v12598_v36 = vld [vmem:[#allocation20 + $0x6c8] ss:$16 sps:$4 sm:$0xff]  }
 0xed1   : > { %9512 = vmatprep.subr.bf16.mxu1 %v12522_v12  ;;  %v12603_v12 = vld [vmem:[#allocation20 + $0x6e4] ss:$16 sps:$4 sm:$0xff]  }
 0xed3   : > { %9349 = vmatpush1.bf16.msra.mxu0 %v12517_v11  ;;  %v12606_v11 = vld [vmem:[#allocation20 + $0x6ec] ss:$16 sps:$4 sm:$0xff]  }
 0xed4   : > { %9513 = vmatpush1.bf16.msra.mxu1 %v12520_v15  ;;  %9350 = vmatprep.subr.bf16.mxu0 %v12525_v51  ;;  %v12601_v15 = vld [vmem:[#allocation20 + $0x6e0] ss:$16 sps:$4 sm:$0xff]   ;;  %v12604_v51 = vld [vmem:[#allocation20 + $0x6e8] ss:$16 sps:$4 sm:$0xff]  }
 0xed5   : > { %9514 = vmatprep.subr.bf16.mxu1 %v12528_v14  ;;  %v12609_v14 = vld [vmem:[#allocation20 + $0x704] ss:$16 sps:$4 sm:$0xff]  }
 0xed7   : > { %9351 = vmatpush1.bf16.msra.mxu0 %v12523_v3  ;;  %v12612_v3 = vld [vmem:[#allocation20 + $0x70c] ss:$16 sps:$4 sm:$0xff]  }
 0xed8   : > { %9515 = vmatpush1.bf16.msra.mxu1 %v12526_v54  ;;  %9352 = vmatprep.subr.bf16.mxu0 %v12531_v21  ;;  %v12607_v54 = vld [vmem:[#allocation20 + $0x700] ss:$16 sps:$4 sm:$0xff]   ;;  %v12610_v21 = vld [vmem:[#allocation20 + $0x708] ss:$16 sps:$4 sm:$0xff]  }
 0xed9   : > { %9516 = vmatprep.subr.bf16.mxu1 %v12534_v7  ;;  %v12615_v7 = vld [vmem:[#allocation20 + $0x724] ss:$16 sps:$4 sm:$0xff]  }
 0xedb   : > { %9353 = vmatpush1.bf16.msra.mxu0 %v12529_v8  ;;  %v12618_v8 = vld [vmem:[#allocation20 + $0x72c] ss:$16 sps:$4 sm:$0xff]  }
 0xedc   : > { %9517 = vmatpush1.bf16.msra.mxu1 %v12532_v0  ;;  %9354 = vmatprep.subr.bf16.mxu0 %v12537_v13  ;;  %v12613_v0 = vld [vmem:[#allocation20 + $0x720] ss:$16 sps:$4 sm:$0xff]   ;;  %v12616_v13 = vld [vmem:[#allocation20 + $0x728] ss:$16 sps:$4 sm:$0xff]  }
 0xedd   : > { %9518 = vmatprep.subr.bf16.mxu1 %v12540_v27  ;;  %v12621_v27 = vld [vmem:[#allocation20 + $0x744] ss:$16 sps:$4 sm:$0xff]  }
 0xedf   : > { %9355 = vmatpush1.bf16.msra.mxu0 %v12535_v50  ;;  %v12624_v50 = vld [vmem:[#allocation20 + $0x74c] ss:$16 sps:$4 sm:$0xff]  }
 0xee0   : > { %9519 = vmatpush1.bf16.msra.mxu1 %v12538_v57  ;;  %9356 = vmatprep.subr.bf16.mxu0 %v12543_v61  ;;  %v12619_v57 = vld [vmem:[#allocation20 + $0x740] ss:$16 sps:$4 sm:$0xff]   ;;  %v12622_v61 = vld [vmem:[#allocation20 + $0x748] ss:$16 sps:$4 sm:$0xff]  }
 0xee1   : > { %9520 = vmatprep.subr.bf16.mxu1 %v12546_v16  ;;  %v12627_v16 = vld [vmem:[#allocation20 + $0x764] ss:$16 sps:$4 sm:$0xff]  }
 0xee3   : > { %9357 = vmatpush1.bf16.msra.mxu0 %v12541_v17  ;;  %v12630_v17 = vld [vmem:[#allocation20 + $0x76c] ss:$16 sps:$4 sm:$0xff]  }
 0xee4   : > { %9521 = vmatpush1.bf16.msra.mxu1 %v12544_v28  ;;  %9358 = vmatprep.subr.bf16.mxu0 %v12549_v48  ;;  %v12625_v28 = vld [vmem:[#allocation20 + $0x760] ss:$16 sps:$4 sm:$0xff]   ;;  %v12628_v48 = vld [vmem:[#allocation20 + $0x768] ss:$16 sps:$4 sm:$0xff]  }
 0xee5   : > { %9522 = vmatprep.subr.bf16.mxu1 %v12552_v38  ;;  %v12633_v38 = vld [vmem:[#allocation20 + $0x784] ss:$16 sps:$4 sm:$0xff]  }
 0xee7   : > { %9359 = vmatpush1.bf16.msra.mxu0 %v12547_v43  ;;  %v12636_v43 = vld [vmem:[#allocation20 + $0x78c] ss:$16 sps:$4 sm:$0xff]  }
 0xee8   : > { %9523 = vmatpush1.bf16.msra.mxu1 %v12550_v24  ;;  %9360 = vmatprep.subr.bf16.mxu0 %v12555_v49  ;;  %v12631_v24 = vld [vmem:[#allocation20 + $0x780] ss:$16 sps:$4 sm:$0xff]   ;;  %v12634_v49 = vld [vmem:[#allocation20 + $0x788] ss:$16 sps:$4 sm:$0xff]  }
 0xee9   : > { %9524 = vmatprep.subr.bf16.mxu1 %v12558_v31  ;;  %v12639_v31 = vld [vmem:[#allocation20 + $0x7a4] ss:$16 sps:$4 sm:$0xff]  }
 0xeeb   : > { %9361 = vmatpush1.bf16.msra.mxu0 %v12553_v53  ;;  %v12642_v53 = vld [vmem:[#allocation20 + $0x7ac] ss:$16 sps:$4 sm:$0xff]  }
 0xeec   : > { %9525 = vmatpush1.bf16.msra.mxu1 %v12556_v33  ;;  %9371 = vmatprep.subr.bf16.mxu0 %v12561_v26  ;;  %v12637_v33 = vld [vmem:[#allocation20 + $0x7a0] ss:$16 sps:$4 sm:$0xff]   ;;  %v12645_v26 = vld [vmem:[#allocation20 + $0x7c4] ss:$16 sps:$4 sm:$0xff]  }
 0xeed   : > { %9535 = vmatprep.subr.bf16.mxu1 %v12564_v9  ;;  %v12648_v9 = vld [vmem:[#allocation20 + $0x7cc] ss:$16 sps:$4 sm:$0xff]  }
 0xeee   : > { %9363 = vmatmul.mubr.bf16.vlgmr.msra.gmra.mrb[8].mxu0 %v7686_v25 }
 0xeef   : > { %9527 = vmatmul.mubr.bf16.vlgmr.msra.gmra.mrb[32].mxu1 %v7686_v25  ;;  %9372 = vmatpush1.bf16.msra.mxu0 %v12559_v37  ;;  %v12646_v37 = vld [vmem:[#allocation20 + $0x7c8] ss:$16 sps:$4 sm:$0xff]   ;;  %v12651_v25 = vld [vmem:[#allocation20 + $0x7e4] ss:$16 sps:$4 sm:$0xff]  }
 0xef0   : > { %9403 = vmatprep.mubr.bf16.mxu0 %v7689_v39  ;;  %9536 = vmatpush1.bf16.msra.mxu1 %v12562_v35  ;;  %v12654_v35 = vld [vmem:[#allocation20 + $0x7ec] ss:$16 sps:$4 sm:$0xff]  }
 0xef1   : > { %9567 = vmatprep.mubr.bf16.mxu1 %v7689_v39  ;;  %9373 = vmatprep.subr.bf16.mxu0 %v12567_v19  ;;  %v12649_v19 = vld [vmem:[#allocation20 + $0x7e0] ss:$16 sps:$4 sm:$0xff]   ;;  %v12652_v39 = vld [vmem:[#allocation20 + $0x7e8] ss:$16 sps:$4 sm:$0xff]  }
 0xef2   : > { %9537 = vmatprep.subr.bf16.mxu1 %v12570_v56  ;;  %v7680_v56 = vmax.f32 %v14272_v22, 0.0  ;;  %v12664_v22 = vld [vmem:[#allocation21 + $0x30] ss:$8 sps:$4 sm:$0xff]  }
 0xef3   : > { %9374 = vmatpush1.bf16.msra.mxu0 %v12565_v58  ;;  %v12657_v58 = vld [vmem:[#allocation21 + $0x4] ss:$8 sps:$4 sm:$0xff]  }
 0xef4   : > { %9538 = vmatpush1.bf16.msra.mxu1 %v12568_v63  ;;  %9375 = vmatprep.subr.bf16.mxu0 %v12573_v6  ;;  %v12655_v63 = vld [vmem:[#allocation21] ss:$8 sps:$4 sm:$0xff]   ;;  %v7688_v6 = vpack.c.bf16 %v7680_v56, %v7680_v56 }
 0xef5   : > { %9539 = vmatprep.subr.bf16.mxu1 %v12576_v18  ;;  %v12660_v18 = vld [vmem:[#allocation21 + $0x14] ss:$8 sps:$4 sm:$0xff]  }
 0xef7   : > { %9376 = vmatpush1.bf16.msra.mxu0 %v12571_v62  ;;  %v12658_v62 = vld [vmem:[#allocation21 + $0x10] ss:$8 sps:$4 sm:$0xff]  }
 0xef8   : > { %9540 = vmatpush1.bf16.msra.mxu1 %v12574_v52  ;;  %9377 = vmatprep.subr.bf16.mxu0 %v12579_v2  ;;  %v12663_v52 = vld [vmem:[#allocation21 + $0x24] ss:$8 sps:$4 sm:$0xff]   ;;  %v12661_v2 = vld [vmem:[#allocation21 + $0x20] ss:$8 sps:$4 sm:$0xff]  }
 0xef9   : > { %9541 = vmatprep.subr.bf16.mxu1 %v12582_v29  ;;  %v12666_v29 = vld [vmem:[#allocation21 + $0x34] ss:$8 sps:$4 sm:$0xff]  }
 0xefb   : > { %9378 = vmatpush1.bf16.msra.mxu0 %v12577_v4  ;;  %v12669_v4 = vld [vmem:[#allocation21 + $0x44] ss:$8 sps:$4 sm:$0xff]  }
 0xefc   : > { %9542 = vmatpush1.bf16.msra.mxu1 %v12580_v10  ;;  %9379 = vmatprep.subr.bf16.mxu0 %v12585_v5  ;;  %v12667_v10 = vld [vmem:[#allocation21 + $0x40] ss:$8 sps:$4 sm:$0xff]   ;;  %v12672_v5 = vld [vmem:[#allocation21 + $0x54] ss:$8 sps:$4 sm:$0xff]  }
 0xefd   : > { %9543 = vmatprep.subr.bf16.mxu1 %v12588_v55  ;;  %v12670_v55 = vld [vmem:[#allocation21 + $0x50] ss:$8 sps:$4 sm:$0xff]  }
 0xeff   : > { %9380 = vmatpush1.bf16.msra.mxu0 %v12583_v46  ;;  %v12675_v46 = vld [vmem:[#allocation21 + $0x64] ss:$8 sps:$4 sm:$0xff]  }
 0xf00   : > { %9544 = vmatpush1.bf16.msra.mxu1 %v12586_v41  ;;  %9381 = vmatprep.subr.bf16.mxu0 %v12591_v45  ;;  %v12673_v41 = vld [vmem:[#allocation21 + $0x60] ss:$8 sps:$4 sm:$0xff]   ;;  %v12678_v45 = vld [vmem:[#allocation21 + $0x74] ss:$8 sps:$4 sm:$0xff]  }
 0xf01   : > { %9545 = vmatprep.subr.bf16.mxu1 %v12594_v30  ;;  %v12676_v30 = vld [vmem:[#allocation21 + $0x70] ss:$8 sps:$4 sm:$0xff]  }
 0xf03   : > { %9382 = vmatpush1.bf16.msra.mxu0 %v12589_v40  ;;  %v12681_v40 = vld [vmem:[#allocation21 + $0x84] ss:$8 sps:$4 sm:$0xff]  }
 0xf04   : > { %9546 = vmatpush1.bf16.msra.mxu1 %v12592_v20  ;;  %9383 = vmatprep.subr.bf16.mxu0 %v12597_v42  ;;  %v12679_v20 = vld [vmem:[#allocation21 + $0x80] ss:$8 sps:$4 sm:$0xff]   ;;  %v12684_v42 = vld [vmem:[#allocation21 + $0x94] ss:$8 sps:$4 sm:$0xff]  }
 0xf05   : > { %9547 = vmatprep.subr.bf16.mxu1 %v12600_v59  ;;  %v12682_v59 = vld [vmem:[#allocation21 + $0x90] ss:$8 sps:$4 sm:$0xff]  }
 0xf07   : > { %9384 = vmatpush1.bf16.msra.mxu0 %v12595_v60  ;;  %v12687_v60 = vld [vmem:[#allocation21 + $0xa4] ss:$8 sps:$4 sm:$0xff]  }
 0xf08   : > { %9548 = vmatpush1.bf16.msra.mxu1 %v12598_v36  ;;  %9385 = vmatprep.subr.bf16.mxu0 %v12603_v12  ;;  %v12685_v36 = vld [vmem:[#allocation21 + $0xa0] ss:$8 sps:$4 sm:$0xff]   ;;  %v12690_v12 = vld [vmem:[#allocation21 + $0xb4] ss:$8 sps:$4 sm:$0xff]  }
 0xf09   : > { %9549 = vmatprep.subr.bf16.mxu1 %v12606_v11  ;;  %v12688_v11 = vld [vmem:[#allocation21 + $0xb0] ss:$8 sps:$4 sm:$0xff]  }
 0xf0b   : > { %9386 = vmatpush1.bf16.msra.mxu0 %v12601_v15  ;;  %v12693_v15 = vld [vmem:[#allocation21 + $0xc4] ss:$8 sps:$4 sm:$0xff]  }
 0xf0c   : > { %9550 = vmatpush1.bf16.msra.mxu1 %v12604_v51  ;;  %9387 = vmatprep.subr.bf16.mxu0 %v12609_v14  ;;  %v12691_v51 = vld [vmem:[#allocation21 + $0xc0] ss:$8 sps:$4 sm:$0xff]   ;;  %v12696_v14 = vld [vmem:[#allocation21 + $0xd4] ss:$8 sps:$4 sm:$0xff]  }
 0xf0d   : > { %9551 = vmatprep.subr.bf16.mxu1 %v12612_v3  ;;  %v12694_v3 = vld [vmem:[#allocation21 + $0xd0] ss:$8 sps:$4 sm:$0xff]  }
 0xf0f   : > { %9388 = vmatpush1.bf16.msra.mxu0 %v12607_v54  ;;  %v12697_v54 = vld [vmem:[#allocation21 + $0xe0] ss:$8 sps:$4 sm:$0xff]  }
 0xf10   : > { %9552 = vmatpush1.bf16.msra.mxu1 %v12610_v21  ;;  %9389 = vmatprep.subr.bf16.mxu0 %v12615_v7  ;;  %v12699_v21 = vld [vmem:[#allocation21 + $0xe4] ss:$8 sps:$4 sm:$0xff]   ;;  %v12702_v7 = vld [vmem:[#allocation21 + $0xf4] ss:$8 sps:$4 sm:$0xff]  }
 0xf11   : > { %9553 = vmatprep.subr.bf16.mxu1 %v12618_v8  ;;  %v12700_v8 = vld [vmem:[#allocation21 + $0xf0] ss:$8 sps:$4 sm:$0xff]  }
 0xf13   : > { %9390 = vmatpush1.bf16.msra.mxu0 %v12613_v0  ;;  %v12705_v0 = vld [vmem:[#allocation21 + $0x104] ss:$8 sps:$4 sm:$0xff]  }
 0xf14   : > { %9554 = vmatpush1.bf16.msra.mxu1 %v12616_v13  ;;  %9391 = vmatprep.subr.bf16.mxu0 %v12621_v27  ;;  %v12751_v13 = vld [vmem:[%s13232_s30 + $0x40] sm:$0xff]  }
 0xf15   : > { %9555 = vmatprep.subr.bf16.mxu1 %v12624_v50  ;;  %v12752_v27 = vld [vmem:[%s13232_s30] sm:$0xff]   ;;  %v12753_v50 = vld [vmem:[%s13232_s30 + $0x48] sm:$0xff]  }
 0xf17   : > { %9392 = vmatpush1.bf16.msra.mxu0 %v12619_v57  ;;  %v12754_v57 = vld [vmem:[%s13232_s30 + $0x8] sm:$0xff]  }
 0xf18   : > { %9556 = vmatpush1.bf16.msra.mxu1 %v12622_v61  ;;  %9393 = vmatprep.subr.bf16.mxu0 %v12627_v16  ;;  %v12755_v61 = vld [vmem:[%s13232_s30 + $0x50] sm:$0xff]  }
 0xf19   : > { %9557 = vmatprep.subr.bf16.mxu1 %v12630_v17  ;;  %v12756_v16 = vld [vmem:[%s13232_s30 + $0x10] sm:$0xff]   ;;  %v12757_v17 = vld [vmem:[%s13232_s30 + $0x58] sm:$0xff]  }
 0xf1b   : > { %9394 = vmatpush1.bf16.msra.mxu0 %v12625_v28  ;;  %v12758_v28 = vld [vmem:[%s13232_s30 + $0x18] sm:$0xff]  }
 0xf1c   : > { %9558 = vmatpush1.bf16.msra.mxu1 %v12628_v48  ;;  %9395 = vmatprep.subr.bf16.mxu0 %v12633_v38  ;;  %v12759_v48 = vld [vmem:[%s13232_s30 + $0x60] sm:$0xff]  }
 0xf1d   : > { %9559 = vmatprep.subr.bf16.mxu1 %v12636_v43  ;;  %v12760_v38 = vld [vmem:[%s13232_s30 + $0x20] sm:$0xff]   ;;  %v12761_v43 = vld [vmem:[%s13232_s30 + $0x68] sm:$0xff]  }
 0xf1f   : > { %9396 = vmatpush1.bf16.msra.mxu0 %v12631_v24  ;;  %v12762_v24 = vld [vmem:[%s13232_s30 + $0x28] sm:$0xff]  }
 0xf20   : > { %9560 = vmatpush1.bf16.msra.mxu1 %v12634_v49  ;;  %9397 = vmatprep.subr.bf16.mxu0 %v12639_v31  ;;  %v14292_v49 = vld [vmem:[%s14459_s28] sm:$0xf] }
 0xf21   : > { %9561 = vmatprep.subr.bf16.mxu1 %v12642_v53  ;;  %v7951_v31 = vrot.slane %v14292_v49, %v14452_v47  ;;  %v7955_v53 = vrot.slane %v14292_v49, %v14450_v23 }
 0xf23   : > { %9398 = vmatpush1.bf16.msra.mxu0 %v12637_v33  ;;  %v7963_v33 = vrot.slane %v14292_v49, %v14453_v44 }
 0xf24   : > { %9562 = vmatpush1.bf16.msra.mxu1 %v12640_v32  ;;  %9399 = vmatprep.subr.bf16.mxu0 %v12645_v26 }
 0xf25   : > { %9563 = vmatprep.subr.bf16.mxu1 %v12648_v9 }
 0xf27   : > { %9400 = vmatpush1.bf16.msra.mxu0 %v12643_v1 }
 0xf28   : > { %9564 = vmatpush1.bf16.msra.mxu1 %v12646_v37  ;;  %9401 = vmatprep.subr.bf16.mxu0 %v12651_v25 }
 0xf29   : > { %9565 = vmatprep.subr.bf16.mxu1 %v12654_v35 }
 0xf2b   : > { %9402 = vmatpush1.bf16.msra.mxu0 %v12649_v19 }
 0xf2c   : > { %9566 = vmatpush1.bf16.msra.mxu1 %v12652_v39  ;;  %9980 = vmatprep.subr.bf16.mxu0 %v12657_v58 }
 0xf2d   : > { %11326 = vmatprep.subr.bf16.mxu1 %v12751_v13  ;;  %v12747_v13 = vld [vmem:[#allocation21 + $0x1e4] ss:$8 sps:$4 sm:$0xff]  }
 0xf2e   : > { %9404 = vmatmul.mubr.bf16.vlgmr.msra.gmra.mrb[8].mxu0 %v7688_v6 }
 0xf2f   : > { %9568 = vmatmul.mubr.bf16.vlgmr.msra.gmra.mrb[32].mxu1 %v7688_v6  ;;  %9981 = vmatpush1.bf16.msra.mxu0 %v12655_v63 }
 0xf30   : > { %9982 = vmatprep.subr.bf16.mxu0 %v12660_v18  ;;  %11327 = vmatpush3.bf16.msra.mxu1 %v12752_v27  ;;  %v12745_v27 = vld [vmem:[#allocation21 + $0x1e0] ss:$8 sps:$4 sm:$0xff]  }
 0xf31   : > { %11328 = vmatprep.subr.bf16.mxu1 %v12753_v50 }
 0xf33   : > { %9983 = vmatpush1.bf16.msra.mxu0 %v12658_v62 }
 0xf34   : > { %9984 = vmatprep.subr.bf16.mxu0 %v12663_v52  ;;  %11329 = vmatpush3.bf16.msra.mxu1 %v12754_v57  ;;  %v12703_v52 = vld [vmem:[#allocation21 + $0x100] ss:$8 sps:$4 sm:$0xff]   ;;  %v12750_v57 = vld [vmem:[#allocation21 + $0x1f4] ss:$8 sps:$4 sm:$0xff]  }
 0xf35   : > { %11330 = vmatprep.subr.bf16.mxu1 %v12755_v61  ;;  %v12748_v61 = vld [vmem:[#allocation21 + $0x1f0] ss:$8 sps:$4 sm:$0xff]  }
 0xf37   : > { %9985 = vmatpush1.bf16.msra.mxu0 %v12661_v2 }
 0xf38   : > { %9986 = vmatprep.subr.bf16.mxu0 %v12666_v29  ;;  %11331 = vmatpush3.bf16.msra.mxu1 %v12756_v16  ;;  %v12708_v29 = vld [vmem:[#allocation21 + $0x114] ss:$8 sps:$4 sm:$0xff]  }
 0xf39   : > { %11332 = vmatprep.subr.bf16.mxu1 %v12757_v17 }
 0xf3b   : > { %9987 = vmatpush1.bf16.msra.mxu0 %v12664_v22  ;;  %v12706_v22 = vld [vmem:[#allocation21 + $0x110] ss:$8 sps:$4 sm:$0xff]  }
 0xf3c   : > { %9988 = vmatprep.subr.bf16.mxu0 %v12669_v4  ;;  %11333 = vmatpush3.bf16.msra.mxu1 %v12758_v28  ;;  %v12711_v4 = vld [vmem:[#allocation21 + $0x124] ss:$8 sps:$4 sm:$0xff]   ;;  %v12764_v28 = vld [vmem:[%s13232_s30 + $0x30] sm:$0xff]  }
 0xf3d   : > { %11334 = vmatprep.subr.bf16.mxu1 %v12759_v48  ;;  %v12765_v48 = vld [vmem:[%s13232_s30 + $0x78] sm:$0xff]  }
 0xf3f   : > { %9989 = vmatpush1.bf16.msra.mxu0 %v12667_v10  ;;  %v12709_v10 = vld [vmem:[#allocation21 + $0x120] ss:$8 sps:$4 sm:$0xff]  }
 0xf40   : > { %9990 = vmatprep.subr.bf16.mxu0 %v12672_v5  ;;  %11335 = vmatpush3.bf16.msra.mxu1 %v12760_v38  ;;  %v12714_v5 = vld [vmem:[#allocation21 + $0x134] ss:$8 sps:$4 sm:$0xff]  }
 0xf41   : > { %11336 = vmatprep.subr.bf16.mxu1 %v12761_v43  ;;  %v12766_v38 = vld [vmem:[%s13232_s30 + $0x38] sm:$0xff]   ;;  %v9648_v43 = vld [vmem:[%s13227_s27] sm:$0x3] }
 0xf43   : > { %9991 = vmatpush1.bf16.msra.mxu0 %v12670_v55  ;;  %v12712_v55 = vld [vmem:[#allocation21 + $0x130] ss:$8 sps:$4 sm:$0xff]  }
 0xf44   : > { %9992 = vmatprep.subr.bf16.mxu0 %v12675_v46  ;;  %11337 = vmatpush3.bf16.msra.mxu1 %v12762_v24  ;;  %v12717_v46 = vld [vmem:[#allocation21 + $0x144] ss:$8 sps:$4 sm:$0xff]   ;;  %v9653_v24 = vrot.slane %v9648_v43, %v14452_v47 }
 0xf47   : > { %9993 = vmatpush1.bf16.msra.mxu0 %v12673_v41  ;;  %v12715_v41 = vld [vmem:[#allocation21 + $0x140] ss:$8 sps:$4 sm:$0xff]  }
 0xf48   : > { %9994 = vmatprep.subr.bf16.mxu0 %v12678_v45  ;;  %v12720_v45 = vld [vmem:[#allocation21 + $0x154] ss:$8 sps:$4 sm:$0xff]  }
 0xf4b   : > { %9995 = vmatpush1.bf16.msra.mxu0 %v12676_v30  ;;  %v12718_v30 = vld [vmem:[#allocation21 + $0x150] ss:$8 sps:$4 sm:$0xff]  }
 0xf4c   : > { %9996 = vmatprep.subr.bf16.mxu0 %v12681_v40  ;;  %v12723_v40 = vld [vmem:[#allocation21 + $0x164] ss:$8 sps:$4 sm:$0xff]  }
 0xf4f   : > { %9997 = vmatpush1.bf16.msra.mxu0 %v12679_v20  ;;  %v12721_v20 = vld [vmem:[#allocation21 + $0x160] ss:$8 sps:$4 sm:$0xff]  }
 0xf50   : > { %9998 = vmatprep.subr.bf16.mxu0 %v12684_v42  ;;  %v12726_v42 = vld [vmem:[#allocation21 + $0x174] ss:$8 sps:$4 sm:$0xff]  }
 0xf53   : > { %9999 = vmatpush1.bf16.msra.mxu0 %v12682_v59  ;;  %v12724_v59 = vld [vmem:[#allocation21 + $0x170] ss:$8 sps:$4 sm:$0xff]  }
 0xf54   : > { %10000 = vmatprep.subr.bf16.mxu0 %v12687_v60  ;;  %v12729_v60 = vld [vmem:[#allocation21 + $0x184] ss:$8 sps:$4 sm:$0xff]  }
 0xf57   : > { %10001 = vmatpush1.bf16.msra.mxu0 %v12685_v36  ;;  %v12727_v36 = vld [vmem:[#allocation21 + $0x180] ss:$8 sps:$4 sm:$0xff]  }
 0xf58   : > { %10002 = vmatprep.subr.bf16.mxu0 %v12690_v12  ;;  %v12732_v12 = vld [vmem:[#allocation21 + $0x194] ss:$8 sps:$4 sm:$0xff]  }
 0xf5b   : > { %10003 = vmatpush1.bf16.msra.mxu0 %v12688_v11  ;;  %v12730_v11 = vld [vmem:[#allocation21 + $0x190] ss:$8 sps:$4 sm:$0xff]  }
 0xf5c   : > { %10004 = vmatprep.subr.bf16.mxu0 %v12693_v15  ;;  %v12735_v15 = vld [vmem:[#allocation21 + $0x1a4] ss:$8 sps:$4 sm:$0xff]  }
 0xf5f   : > { %10005 = vmatpush1.bf16.msra.mxu0 %v12691_v51  ;;  %v12733_v51 = vld [vmem:[#allocation21 + $0x1a0] ss:$8 sps:$4 sm:$0xff]  }
 0xf60   : > { %10006 = vmatprep.subr.bf16.mxu0 %v12696_v14  ;;  %v12738_v14 = vld [vmem:[#allocation21 + $0x1b4] ss:$8 sps:$4 sm:$0xff]  }
 0xf63   : > { %10007 = vmatpush1.bf16.msra.mxu0 %v12694_v3  ;;  %v12736_v3 = vld [vmem:[#allocation21 + $0x1b0] ss:$8 sps:$4 sm:$0xff]  }
 0xf64   : > { %10008 = vmatprep.subr.bf16.mxu0 %v12699_v21  ;;  %v12739_v21 = vld [vmem:[#allocation21 + $0x1c0] ss:$8 sps:$4 sm:$0xff]  }
 0xf67   : > { %10009 = vmatpush1.bf16.msra.mxu0 %v12697_v54  ;;  %v12741_v54 = vld [vmem:[#allocation21 + $0x1c4] ss:$8 sps:$4 sm:$0xff]  }
 0xf68   : > { %10010 = vmatprep.subr.bf16.mxu0 %v12702_v7  ;;  %v12744_v7 = vld [vmem:[#allocation21 + $0x1d4] ss:$8 sps:$4 sm:$0xff]  }
 0xf6b   : > { %10011 = vmatpush1.bf16.msra.mxu0 %v12700_v8  ;;  %v12742_v8 = vld [vmem:[#allocation21 + $0x1d0] ss:$8 sps:$4 sm:$0xff]  }
 0xf6c   : > { %10021 = vmatprep.subr.bf16.mxu0 %v12705_v0  ;;  %v7959_v0 = vrot.slane %v14292_v49, %v14454_v34  ;;  %v12763_v34 = vld [vmem:[%s13232_s30 + $0x70] sm:$0xff]   ;;  %v9657_v49 = vrot.slane %v9648_v43, %v14450_v23 }
 0xf6d   : > { %11338 = vmatprep.subr.bf16.mxu1 %v12763_v34 }
 0xf6e   : > { %11339 = vmatpush3.bf16.msra.mxu1 %v12764_v28 }
 0xf6f   : > { %11340 = vmatprep.subr.bf16.mxu1 %v12765_v48 }
 0xf72   : > { %11341 = vmatpush3.bf16.msra.mxu1 %v12766_v38 }
0x1001   : > { %v9405_v32 = vpop.f32.mrb[8].mxu0 }
0x1002   : > { %v11442_v26 = vadd.f32 %v9405_v32, %v7951_v31  ;;  %v14300_v9 = vpop.f32.mrb[32].mxu1  ;;  %v9407_v1 = vpop.f32.mrb[9].mxu0 }
0x1003   : > { %v11443_v37 = vadd.f32 %v9407_v1, %v7955_v53  ;;  %v9571_v25 = vpop.f32.mrb[33].mxu1  ;;  %v9409_v35 = vpop.f32.mrb[10].mxu0  ;;  %v11444_v50 = vadd.f32 %v14300_v9, %v7959_v0 }
0x1004   : > { %v9576_v19 = vmax.f32 %v11442_v26, 0.0  ;;  %v11445_v39 = vadd.f32 %v9571_v25, %v7963_v33  ;;  %v9573_v56 = vpop.f32.mrb[34].mxu1  ;;  %v9410_v58 = vpop.f32.mrb[11].mxu0 }
0x1005   : > { %v9577_v63 = vmax.f32 %v11443_v37, 0.0  ;;  %v9574_v6 = vpop.f32.mrb[35].mxu1  ;;  %v9578_v16 = vmax.f32 %v11444_v50, 0.0 }
0x1006   : > { %v9579_v18 = vmax.f32 %v11445_v39, 0.0  ;;  %v9580_v2 = vpack.c.bf16 %v9576_v19, %v9576_v19  ;;  %v11253_v39 = vld [vmem:[%s14460_s0] ss:$0 sm:$0xff] }
0x1007   : > { %v9581_v62 = vpack.c.bf16 %v9577_v63, %v9577_v63  ;;  %v9582_v17 = vpack.c.bf16 %v9578_v16, %v9578_v16 }
0x1008   : > { %v9583_v44 = vpack.c.bf16 %v9579_v18, %v9579_v18 }
0x1009   : > { %10012 = vmatprep.mubr.bf16.mxu0 %v9581_v62 }
0x100a   : > { %10013 = vmatmul.mubr.bf16.vlgmr.msra.gmra.mrb[12].mxu0 %v9580_v2 }
0x100b   : > { %10022 = vmatpush1.bf16.msra.mxu0 %v12703_v52  ;;  %10053 = vmatprep.mubr.bf16.mxu0 %v9583_v44 }
0x100c   : > { %10023 = vmatprep.subr.bf16.mxu0 %v12708_v29 }
0x100f   : > { %10024 = vmatpush1.bf16.msra.mxu0 %v12706_v22 }
0x1010   : > { %10025 = vmatprep.subr.bf16.mxu0 %v12711_v4 }
0x1013   : > { %10026 = vmatpush1.bf16.msra.mxu0 %v12709_v10 }
0x1014   : > { %10027 = vmatprep.subr.bf16.mxu0 %v12714_v5 }
0x1017   : > { %10028 = vmatpush1.bf16.msra.mxu0 %v12712_v55 }
0x1018   : > { %10029 = vmatprep.subr.bf16.mxu0 %v12717_v46 }
0x101b   : > { %10030 = vmatpush1.bf16.msra.mxu0 %v12715_v41 }
0x101c   : > { %10031 = vmatprep.subr.bf16.mxu0 %v12720_v45 }
0x101f   : > { %10032 = vmatpush1.bf16.msra.mxu0 %v12718_v30 }
0x1020   : > { %10033 = vmatprep.subr.bf16.mxu0 %v12723_v40 }
0x1023   : > { %10034 = vmatpush1.bf16.msra.mxu0 %v12721_v20 }
0x1024   : > { %10035 = vmatprep.subr.bf16.mxu0 %v12726_v42 }
0x1027   : > { %10036 = vmatpush1.bf16.msra.mxu0 %v12724_v59 }
0x1028   : > { %10037 = vmatprep.subr.bf16.mxu0 %v12729_v60 }
0x102b   : > { %10038 = vmatpush1.bf16.msra.mxu0 %v12727_v36 }
0x102c   : > { %10039 = vmatprep.subr.bf16.mxu0 %v12732_v12 }
0x102f   : > { %10040 = vmatpush1.bf16.msra.mxu0 %v12730_v11 }
0x1030   : > { %10041 = vmatprep.subr.bf16.mxu0 %v12735_v15 }
0x1033   : > { %10042 = vmatpush1.bf16.msra.mxu0 %v12733_v51 }
0x1034   : > { %10043 = vmatprep.subr.bf16.mxu0 %v12738_v14 }
0x1037   : > { %10044 = vmatpush1.bf16.msra.mxu0 %v12736_v3 }
0x1038   : > { %10045 = vmatprep.subr.bf16.mxu0 %v12741_v54 }
0x103b   : > { %10046 = vmatpush1.bf16.msra.mxu0 %v12739_v21 }
0x103c   : > { %10047 = vmatprep.subr.bf16.mxu0 %v12744_v7 }
0x103f   : > { %10048 = vmatpush1.bf16.msra.mxu0 %v12742_v8 }
0x1040   : > { %10049 = vmatprep.subr.bf16.mxu0 %v12747_v13 }
0x1043   : > { %10050 = vmatpush1.bf16.msra.mxu0 %v12745_v27 }
0x1044   : > { %10051 = vmatprep.subr.bf16.mxu0 %v12750_v57 }
0x1047   : > { %10052 = vmatpush1.bf16.msra.mxu0 %v12748_v61 }
0x104a   : > { %10054 = vmatmul.mubr.bf16.vlgmr.msra.gmra.mrb[12].mxu0 %v9582_v17 }
0x111d   : > { %v10055_v31 = vpop.f32.mrb[12].mxu0 }
0x111e   : > { %v11446_v53 = vadd.f32 %v10055_v31, %v9653_v24  ;;  %v10057_v33 = vpop.f32.mrb[13].mxu0 }
0x111f   : > { %v11447_v32 = vadd.f32 %v10057_v33, %v9657_v49  ;;  %v10059_v26 = vpop.f32.mrb[14].mxu0 }
0x1120   : > { %v10062_v9 = vmax.f32 %v11446_v53, 0.0  ;;  %v10060_v1 = vpop.f32.mrb[15].mxu0 }
0x1121   : > { %v10063_v37 = vmax.f32 %v11447_v32, 0.0 }
0x1122   : > { %v10064_v35 = vpack.c.bf16 %v10062_v9, %v10062_v9 }
0x1123   : > { %v10065_v25 = vpack.c.bf16 %v10063_v37, %v10063_v37 }
0x1125   : > { %10233 = vmatprep.mubr.bf16.mxu1 %v10065_v25 }
0x1126   : > { %10234 = vmatmul.mubr.bf16.vlgmr.msra.gmra.mrb[36].mxu1 %v10064_v35 }
0x11f9   : > { %v11342_v19 = vpop.f32.mrb[36].mxu1 }
0x11fa   : > { %v11343_v56 = vpop.f32.mrb[37].mxu1 }
0x11fb   : > { %v11344_v58 = vadd.f32 %v11343_v56, %v11342_v19  ;;  %v11345_v63 = vpop.f32.mrb[38].mxu1 }
0x11fc   : > { %v11346_v47 = vpop.f32.mrb[39].mxu1 }
0x11fd   : > { %v10236_v23 = vadd.f32 %v11344_v58, %v11253_v39 }
0x11ff   : > { %10242 = vst.msk [vmem:[#allocation23] sm:$0x3] %vm10241_vm0, %v10236_v23 }
0x1200 PF: > { %s14461_s12 = sld [smem:[#allocation46_spill]]  ;;  %s13078_s1 = smov [#allocation23]  }
0x1201   : > { %s10250_s3 = sshll.u32 %s13078_s1, 4  ;;  %s10251_s3 = int_to_ptr.vmem [resolvable:$true] %s10250_s3 }
0x1202   : > { %s12939_s2 = scalar_lea.vmem %s10251_s3, 32  ;;  %p12946_p0 = scmp.lt.s32.totalorder %s10251_s3, %s10251_s3 }
0x1203   : > { %p12940_p11 = scmp.ne.s32.totalorder %s10251_s3, %s12939_s2  ;;  %p12947_p1 = scmp.lt.s32.totalorder %s12939_s2, %s12939_s2 }
0x1205   : > { %p12948_p4 = por %p12947_p1, %p12946_p0 }
0x1206   : > { %s14462_s19 = sadd.s32 4294967295, %s14461_s12  }
0x1207   : > { %p14315_p10 = scmp.eq.s32.totalorder %s14462_s19, 3 }
0x1209   : > { %p12941_p12 = pnand %p12940_p11, %p14315_p10 }
0x120b   : > { %p12942_p13 = pneg %p12941_p12 }
0x120d   : > { %p12949_p6 = pnand %p12948_p4, %p12942_p13 }
0x120f   : > { %12952 = shalt.err (!%p12949_p6)
}
0x1210   : > { %s14464_s22 = sld [smem:[#allocation45_spill]] }
0x1216   : > { %s14465_s7 = smov %s14464_s22  ;;  %s12953_s10 = scalar_lea.hbm %s14464_s22, 32 }
0x1217   : > { %p12954_p8 = scmp.ne.s32.totalorder %s14465_s7, %s12953_s10  ;;  %p12959_p7 = scmp.lt.u32.totalorder %s12953_s10, %s14465_s7 }
0x1219   : > { %p12955_p2 = pnand %p12954_p8, %p14315_p10 }
0x121b   : > { %p12956_p5 = pneg %p12955_p2 }
0x121d   : > { %p12961_p3 = pnand %p12959_p7, %p12956_p5 }
0x121f   : > { %12964 = shalt.err (!%p12961_p3)
}
0x1220   : > { %11505 = dma.vmem_to_hbm [thread:$0]  (%p14315_p10), %s10251_s3, 32, %s14465_s7, [#allocation14]  }
0x1221   : > { %12994 = dma.done.wait (%p14315_p10), [#allocation14], 32  }
0x1222   : > { %12996 = vsyncadd (%p14315_p10), [#allocation14], 4294967264 }
0x1223 PF: > { %s14466_s18 = sld [smem:[#allocation46_spill]]  ;;  %s14467_s22 = smov %s13003_s23 }
0x1224   : > { %s14468_s23 = smov %s14470_s11 }
0x1229   : > { %s78_s26 = sadd.s32 1, %s14466_s18  }
0x122a   : > { %p75_p9 = scmp.ge.s32.totalorder %s78_s26, 6  }
0x122c   :  { %77 = sbr.rel (!%p75_p9) target bundleno = 60 (0x3c), region = 287 }
0x1233   :  { %10263 = vsyncpa [#allocation13], 1 }
0x1234   :  { %10265 = vsyncpa [#allocation13 + $0x1], 1 }
0x1235   :  { %10266 = vsyncpa [#allocation16], 1 }
0x1236   :  { %10267 = vsyncpa [#allocation19], 1 }
0x1237   :  { %10268 = vsyncpa [#allocation22], 1 }
0x1238   :  { %10269 = vsyncpa [#allocation14], 1 }
0x1239   :  { %10271 = vsyncpa [#allocation14 + $0x1], 1 }

</bundles_post_ra>
